<compile_context>
chip_gen: v7x
topology: tpu7x:2x2x1
jax: 0.10.0
libtpu: 0.0.40
codegen_flags: <defaults>
</compile_context>

<pallas_src>
import functools
import math

import jax
import jax.numpy as jnp
from jax.experimental import pallas as pl
from jax.experimental.pallas import tpu as pltpu

LANE = 128
_VMEM_LIMIT = 48 * 1024 * 1024          # fits v5e/v6e/v7x scoped VMEM


def _round_up(v, m):
    return (v + m - 1) // m * m


# ------------------------------------------------------------------ shared epilogue

def _finalize(acc, *, mask, count, cp, groups, norm, act, res, eps=1e-5):
    """f32 epilogue: per-sample InstanceNorm (optionally row-masked / phase-grouped),
    residual add, activation.  acc: (rows, groups*cp) f32."""
    if norm:
        sel = acc if mask is None else acc * mask
        s = jnp.sum(sel, axis=0, keepdims=True)
        if groups > 1:
            tot = s[:, 0:cp]
            for g in range(1, groups):
                tot = tot + s[:, g * cp:(g + 1) * cp]
            s = tot
        mean = s * (1.0 / count)
        if groups > 1:
            mean = jnp.concatenate([mean] * groups, axis=1)
        cen = acc - mean
        sq = cen * cen
        if mask is not None:
            sq = sq * mask
        s2 = jnp.sum(sq, axis=0, keepdims=True)
        if groups > 1:
            tot = s2[:, 0:cp]
            for g in range(1, groups):
                tot = tot + s2[:, g * cp:(g + 1) * cp]
            s2 = tot
        var = s2 * (1.0 / count)
        if groups > 1:
            var = jnp.concatenate([var] * groups, axis=1)
        y = cen * jax.lax.rsqrt(var + eps)
    else:
        y = acc
    if res is not None:
        y = y + res
    if act == "relu":
        y = jnp.maximum(y, 0.0)
    elif act == "tanh":
        y = jnp.tanh(y)
    return y


# ------------------------------------------------------ kernel A: tap conv (no im2col)

def _tap_conv_kernel(x_ref, w_ref, b_ref, m_ref, *rest, offs, lout, cp, groups,
                     count, norm, act, residual):
    """One padded sample as a flattened 'strip'; conv = sum of shifted matmuls.

    x_ref : (1, Lx, Cin)        bf16
    w_ref : (T, Cin, groups*cp) bf16  (per-tap weights, Cout zero-padded to cp)
    b_ref : (1, groups*cp)      f32
    m_ref : (lout, 1)           f32 valid-row mask (junk columns of the strip = 0)
    rest  : [res_ref (1, lout, cp) bf16], o_ref (1, lout, groups*cp) bf16
    """
    if residual:
        res_ref, o_ref = rest
        res = res_ref[0].astype(jnp.float32)
    else:
        (o_ref,) = rest
        res = None

    acc = jnp.dot(x_ref[0, pl.ds(offs[0], lout), :], w_ref[0],
                  preferred_element_type=jnp.float32)
    for t in range(1, len(offs)):
        acc = acc + jnp.dot(x_ref[0, pl.ds(offs[t], lout), :], w_ref[t],
                            preferred_element_type=jnp.float32)
    acc = acc + b_ref[...]

    y = _finalize(acc, mask=m_ref[...], count=count, cp=cp, groups=groups,
                  norm=norm, act=act, res=res)
    o_ref[0] = y.astype(o_ref.dtype)


def _tap_conv(x_strip, w_taps, bias, mask, res_strip, *, offs, lout, cp, groups,
              count, norm, act, flops, bytes_accessed):
    n, lx, cin = x_strip.shape
    ctot = groups * cp
    args = [x_strip, w_taps, bias, mask]
    in_specs = [
        pl.BlockSpec((1, lx, cin), lambda i: (i, 0, 0)),
        pl.BlockSpec(w_taps.shape, lambda i: (0, 0, 0)),
        pl.BlockSpec((1, ctot), lambda i: (0, 0)),
        pl.BlockSpec((lout, 1), lambda i: (0, 0)),
    ]
    if res_strip is not None:
        args.append(res_strip)
        in_specs.append(pl.BlockSpec((1, lout, ctot), lambda i: (i, 0, 0)))
    kernel = functools.partial(_tap_conv_kernel, offs=offs, lout=lout, cp=cp,
                               groups=groups, count=count, norm=norm, act=act,
                               residual=res_strip is not None)
    return pl.pallas_call(
        kernel,
        out_shape=jax.ShapeDtypeStruct((n, lout, ctot), jnp.bfloat16),
        grid=(n,),
        in_specs=in_specs,
        out_specs=pl.BlockSpec((1, lout, ctot), lambda i: (i, 0, 0)),
        compiler_params=pltpu.CompilerParams(
            dimension_semantics=("parallel",),
            vmem_limit_bytes=_VMEM_LIMIT),
        cost_estimate=pl.CostEstimate(flops=int(flops), transcendentals=0,
                                      bytes_accessed=int(bytes_accessed)),
    )(*args)


# ------------------------------------------------ kernel B: im2col matmul conv (7x7 / stride-2)

def _im2col_conv_kernel(x_ref, w_ref, b_ref, o_ref, acc_ref, *, m, norm, act):
    """grid = (sample, K-chunk); f32 accumulator resident across the K axis."""
    k = pl.program_id(1)

    @pl.when(k == 0)
    def _():
        acc_ref[...] = jnp.zeros_like(acc_ref)

    acc_ref[...] += jnp.dot(x_ref[0], w_ref[...], preferred_element_type=jnp.float32)

    @pl.when(k == pl.num_programs(1) - 1)
    def _():
        acc = acc_ref[...] + b_ref[...]
        y = _finalize(acc, mask=None, count=float(m), cp=acc.shape[1], groups=1,
                      norm=norm, act=act, res=None)
        o_ref[0] = y.astype(o_ref.dtype)


def _im2col_conv(patches, w_flat, bias, *, norm, act, tk=128):
    n, m, kpad = patches.shape
    cp = w_flat.shape[-1]
    nk = kpad // tk
    flops = 2 * n * m * kpad * cp
    trans = n * m * cp if act == "tanh" else 0
    bytes_ = patches.size * 2 + w_flat.size * 2 + n * m * cp * 2 + bias.size * 4
    return pl.pallas_call(
        functools.partial(_im2col_conv_kernel, m=m, norm=norm, act=act),
        out_shape=jax.ShapeDtypeStruct((n, m, cp), jnp.bfloat16),
        grid=(n, nk),
        in_specs=[
            pl.BlockSpec((1, m, tk), lambda i, k: (i, 0, k)),
            pl.BlockSpec((tk, cp), lambda i, k: (k, 0)),
            pl.BlockSpec((1, cp), lambda i, k: (0, 0)),
        ],
        out_specs=pl.BlockSpec((1, m, cp), lambda i, k: (i, 0, 0)),
        scratch_shapes=[pltpu.VMEM((m, cp), jnp.float32)],
        compiler_params=pltpu.CompilerParams(
            dimension_semantics=("parallel", "arbitrary"),
            vmem_limit_bytes=_VMEM_LIMIT),
        cost_estimate=pl.CostEstimate(flops=int(flops), transcendentals=int(trans),
                                      bytes_accessed=int(bytes_)),
    )(patches, w_flat, bias)


# --------------------------------------------------------------------- layer wrappers

def conv_im2col_layer(x, w, b, *, k, stride, pad, pad_mode, norm, act):
    """Conv2d(k, stride, pad) -> [IN] -> [ReLU|Tanh]; used for 7x7 and stride-2 convs."""
    n, h, wd, cin = x.shape
    cout = w.shape[-1]
    xp = jnp.pad(x, ((0, 0), (pad, pad), (pad, pad), (0, 0)), mode=pad_mode) if pad else x
    ho = (h + 2 * pad - k) // stride + 1
    wo = (wd + 2 * pad - k) // stride + 1
    cols = []
    for dy in range(k):
        for dx in range(k):
            cols.append(xp[:, dy:dy + stride * (ho - 1) + 1:stride,
                            dx:dx + stride * (wo - 1) + 1:stride, :])
    kdim = k * k * cin
    kpad = _round_up(kdim, LANE)
    cp = _round_up(cout, LANE)
    patches = jnp.concatenate(cols, axis=-1).reshape(n, ho * wo, kdim)
    patches = jnp.pad(patches, ((0, 0), (0, 0), (0, kpad - kdim))).astype(jnp.bfloat16)
    w_flat = jnp.pad(w.reshape(kdim, cout),
                     ((0, kpad - kdim), (0, cp - cout))).astype(jnp.bfloat16)
    bias = jnp.pad(b, (0, cp - cout)).reshape(1, cp).astype(jnp.float32)
    out = _im2col_conv(patches, w_flat, bias, norm=norm, act=act)
    return out.reshape(n, ho, wo, cp)[:, :, :, :cout]


def conv3x3_layer(x, w, b, *, pad_mode, norm, act, residual=None):
    """3x3 stride-1 conv via in-kernel tap accumulation (no im2col). NHWC bf16."""
    n, h, wd, cin = x.shape
    cout = w.shape[-1]
    cp = _round_up(cout, LANE)
    hp, wp = h + 2, wd + 2
    xp = jnp.pad(x, ((0, 0), (1, 1), (1, 1), (0, 0)), mode=pad_mode)
    lout = h * wp
    lx = _round_up(lout + 2 * wp + 2, 8)
    x_strip = jnp.pad(xp.reshape(n, hp * wp, cin),
                      ((0, 0), (0, lx - hp * wp), (0, 0))).astype(jnp.bfloat16)
    offs = tuple(dy * wp + dx for dy in range(3) for dx in range(3))
    w_taps = jnp.pad(w.reshape(9, cin, cout),
                     ((0, 0), (0, 0), (0, cp - cout))).astype(jnp.bfloat16)
    bias = jnp.pad(b, (0, cp - cout)).reshape(1, cp).astype(jnp.float32)
    mask = ((jnp.arange(lout, dtype=jnp.int32) % wp) < wd
            ).astype(jnp.float32).reshape(lout, 1)
    res_strip = None
    if residual is not None:
        rpad = jnp.pad(residual, ((0, 0), (0, 0), (0, wp - wd), (0, cp - cout)))
        res_strip = rpad.reshape(n, lout, cp).astype(jnp.bfloat16)
    flops = 2 * n * lout * 9 * cin * cp
    bytes_ = (x_strip.size * 2 + w_taps.size * 2 + n * lout * cp * 2
              + (res_strip.size * 2 if res_strip is not None else 0))
    out = _tap_conv(x_strip, w_taps, bias, mask, res_strip, offs=offs, lout=lout,
                    cp=cp, groups=1, count=float(h * wd), norm=norm, act=act,
                    flops=flops, bytes_accessed=bytes_)
    return out.reshape(n, h, wp, cp)[:, :, :wd, :cout]


def up_layer(x, we, b, *, norm=True, act="relu"):
    """ConvTranspose2d(3, s=2, p=1, op=1) -> IN -> ReLU as a 4-phase 2x2 conv.

    `we` is the equivalent-conv weight (3,3,Cin,Cout); the 4 output-parity phases
    are computed as 4*Cout channel groups and interleaved afterwards (pure layout)."""
    n, h, wd, cin = x.shape
    cout = we.shape[-1]
    cp = _round_up(cout, LANE)
    z = jnp.zeros((cin, cout), we.dtype)
    # tap (ty,tx) x phase (py,px): phases 0..3 = (0,0),(0,1),(1,0),(1,1)
    w2 = jnp.stack([
        jnp.stack([we[1, 1], we[1, 0], we[0, 1], we[0, 0]], axis=1),   # tap (0,0)
        jnp.stack([z,        we[1, 2], z,        we[0, 2]], axis=1),   # tap (0,1)
        jnp.stack([z,        z,        we[2, 1], we[2, 0]], axis=1),   # tap (1,0)
        jnp.stack([z,        z,        z,        we[2, 2]], axis=1),   # tap (1,1)
    ], axis=0)                                                         # (4,cin,4,cout)
    w_taps = jnp.pad(w2, ((0, 0), (0, 0), (0, 0), (0, cp - cout))
                     ).reshape(4, cin, 4 * cp).astype(jnp.bfloat16)
    bias = jnp.tile(jnp.pad(b, (0, cp - cout)), 4).reshape(1, 4 * cp).astype(jnp.float32)

    hp, wp = h + 1, wd + 1
    xp = jnp.pad(x, ((0, 0), (0, 1), (0, 1), (0, 0)))     # zero pad bottom/right
    lout = h * wp
    lx = _round_up(lout + wp + 1, 8)
    x_strip = jnp.pad(xp.reshape(n, hp * wp, cin),
                      ((0, 0), (0, lx - hp * wp), (0, 0))).astype(jnp.bfloat16)
    offs = (0, 1, wp, wp + 1)
    mask = ((jnp.arange(lout, dtype=jnp.int32) % wp) < wd
            ).astype(jnp.float32).reshape(lout, 1)
    flops = 2 * n * lout * 4 * cin * 4 * cp
    bytes_ = x_strip.size * 2 + w_taps.size * 2 + n * lout * 4 * cp * 2
    out = _tap_conv(x_strip, w_taps, bias, mask, None, offs=offs, lout=lout,
                    cp=cp, groups=4, count=float(4 * h * wd), norm=norm, act=act,
                    flops=flops, bytes_accessed=bytes_)
    out = out.reshape(n, h, wp, 4, cp)[:, :, :wd, :, :cout]      # (n,h,w,4,cout)
    out = out.reshape(n, h, wd, 2, 2, cout).transpose(0, 1, 3, 2, 4, 5)
    return out.reshape(n, 2 * h, 2 * wd, cout)


# --------------------------------------------------------------------------- params

def _conv_params(key, cin, cout, k):
    kw, kb = jax.random.split(key)
    bound = 1.0 / math.sqrt(cin * k * k)
    w = jax.random.uniform(kw, (k, k, cin, cout), jnp.float32, -bound, bound)
    b = jax.random.uniform(kb, (cout,), jnp.float32, -bound, bound)
    return w, b


def init_global_generator(key, opt):
    ngf, n_scale, n_blocks = opt["ngf"], opt["n_scale"], opt["n_res_block"]
    keys = iter(jax.random.split(key, 2 + 2 * n_scale + 2 * n_blocks + 2))
    params = {"head": _conv_params(next(keys), opt["input_dim"], ngf, 7),
              "down": [], "res": [], "up": []}
    for i in range(n_scale):
        mult = 2 ** i
        params["down"].append(_conv_params(next(keys), ngf * mult, ngf * mult * 2, 3))
    mult = 2 ** n_scale
    for _ in range(n_blocks):
        params["res"].append((_conv_params(next(keys), ngf * mult, ngf * mult, 3),
                              _conv_params(next(keys), ngf * mult, ngf * mult, 3)))
    for i in range(n_scale):
        mult = 2 ** (n_scale - i)
        params["up"].append(_conv_params(next(keys), ngf * mult, ngf * mult // 2, 3))
    params["tail"] = _conv_params(next(keys), ngf, opt["output_dim"], 7)
    return params


# --------------------------------------------------------------------------- forward

def global_generator_forward(params, x_nchw, opt):
    refl = "reflect" if opt["padding_type"] == "reflect" else "constant"
    x = jnp.transpose(x_nchw, (0, 2, 3, 1)).astype(jnp.bfloat16)   # NCHW -> NHWC

    # ReflectionPad2d(3) + Conv7x7 + IN + ReLU
    w, b = params["head"]
    x = conv_im2col_layer(x, w, b, k=7, stride=1, pad=3, pad_mode="reflect",
                          norm=True, act="relu")

    # downsampling: Conv3x3 stride2 pad1 (zero pad) + IN + ReLU
    for w, b in params["down"]:
        x = conv_im2col_layer(x, w, b, k=3, stride=2, pad=1, pad_mode="constant",
                              norm=True, act="relu")

    # ResnetBlocks: [pad, conv, IN, ReLU, pad, conv, IN] + identity
    for (w1, b1), (w2, b2) in params["res"]:
        y = conv3x3_layer(x, w1, b1, pad_mode=refl, norm=True, act="relu")
        x = conv3x3_layer(y, w2, b2, pad_mode=refl, norm=True, act="none", residual=x)

    # upsampling: ConvTranspose2d(3, s2, p1, op1) + IN + ReLU
    for w, b in params["up"]:
        x = up_layer(x, w, b, norm=True, act="relu")

    # ReflectionPad2d(3) + Conv7x7 + Tanh
    w, b = params["tail"]
    x = conv_im2col_layer(x, w, b, k=7, stride=1, pad=3, pad_mode="reflect",
                          norm=False, act="tanh")

    return jnp.transpose(x.astype(jnp.float32), (0, 3, 1, 2))     # NHWC -> NCHW


# --------------------------------------------------------------------------- main

if __name__ == "__main__":
    opt = dict(
        input_dim=3, output_dim=3, ngf=8, n_scale=2, n_res_block=2,
        max_channel=512,                  # read by the module but unused in construction
        norm_layer="instance", padding_type="reflect", image_size=16,
    )
    key = jax.random.PRNGKey(0)
    pkey, xkey = jax.random.split(key)
    params = init_global_generator(pkey, opt)
    x = jax.random.normal(
        xkey, (2, opt["input_dim"], opt["image_size"], opt["image_size"]), jnp.float32)

    fwd = jax.jit(functools.partial(global_generator_forward, opt=opt))
    out = jax.block_until_ready(fwd(params, x))

    assert out.shape == (2, opt["output_dim"], opt["image_size"], opt["image_size"])
    assert bool(jnp.all(jnp.isfinite(out)))
    print("KERNEL_OK")
</pallas_src>

<mosaic_0001>
module attributes {stable_mosaic.version = 11 : i64} {
  func.func @_im2col_conv_kernel(%arg0: i32, %arg1: i32, %arg2: memref<1x256x128xbf16, #tpu.memory_space<vmem>>, %arg3: memref<128x128xbf16, #tpu.memory_space<vmem>>, %arg4: memref<1x128xf32, #tpu.memory_space<vmem>>, %arg5: memref<1x256x128xbf16, #tpu.memory_space<vmem>>, %arg6: memref<256x128xf32, #tpu.memory_space<vmem>>) attributes {dimension_semantics = [#tpu.dimension_semantics<parallel>, #tpu.dimension_semantics<arbitrary>], iteration_bounds = array<i64: 2, 2>, scalar_prefetch = 0 : i64, scratch_operands = 1 : i64, tpu.core_type = #tpu.core_type<tc>, window_params = [{transform_indices = @transform_0, window_bounds = array<i64: 1, 256, 128>}, {transform_indices = @transform_1, window_bounds = array<i64: 128, 128>}, {pipeline_mode = #tpu.pipeline_mode<synchronous>, transform_indices = @transform_2, window_bounds = array<i64: 1, 128>}, {transform_indices = @transform_3, window_bounds = array<i64: 1, 256, 128>}]} {
    %c0_i32 = arith.constant 0 : i32
    %0 = arith.cmpi eq, %arg1, %c0_i32 : i32
    %1 = arith.extui %0 : i1 to i32
    %c0_i32_0 = arith.constant 0 : i32
    %2 = arith.cmpi ne, %1, %c0_i32_0 : i32
    scf.if %2 {
      %cst_10 = arith.constant 0.000000e+00 : f32
      %13 = vector.broadcast %cst_10 : f32 to vector<256x128xf32>
      %c0_11 = arith.constant 0 : index
      %c0_12 = arith.constant 0 : index
      %14 = vector.load %arg6[%c0_11, %c0_12] : memref<256x128xf32, #tpu.memory_space<vmem>>, vector<256x128xf32>
      tpu.vector_store %arg6[%c0_11, %c0_12], %13 {strides = array<i32>} : memref<256x128xf32, #tpu.memory_space<vmem>>, vector<256x128xf32>,
    } else {
    }
    %c0 = arith.constant 0 : index
    %c0_1 = arith.constant 0 : index
    %3 = vector.load %arg6[%c0, %c0_1] : memref<256x128xf32, #tpu.memory_space<vmem>>, vector<256x128xf32>
    %c0_2 = arith.constant 0 : index
    %c0_3 = arith.constant 0 : index
    %c0_4 = arith.constant 0 : index
    %4 = vector.load %arg2[%c0_2, %c0_3, %c0_4] : memref<1x256x128xbf16, #tpu.memory_space<vmem>>, vector<1x256x128xbf16>
    %5 = vector.shape_cast %4 : vector<1x256x128xbf16> to vector<256x128xbf16>
    %c0_5 = arith.constant 0 : index
    %c0_6 = arith.constant 0 : index
    %6 = vector.load %arg3[%c0_5, %c0_6] : memref<128x128xbf16, #tpu.memory_space<vmem>>, vector<128x128xbf16>
    %cst = arith.constant dense<0.000000e+00> : vector<256x128xf32>
    %7 = tpu.matmul %5, %6, %cst {dimension_numbers = #tpu.dot_dimension_numbers<[1], [0], [0], [1], [0, 0, 1, 1], [], []>} : vector<256x128xbf16>, vector<128x128xbf16>, vector<256x128xf32> -> vector<256x128xf32>
    %8 = arith.addf %3, %7 : vector<256x128xf32>
    %c0_7 = arith.constant 0 : index
    %c0_8 = arith.constant 0 : index
    %9 = vector.load %arg6[%c0_7, %c0_8] : memref<256x128xf32, #tpu.memory_space<vmem>>, vector<256x128xf32>
    tpu.vector_store %arg6[%c0_7, %c0_8], %8 {strides = array<i32>} : memref<256x128xf32, #tpu.memory_space<vmem>>, vector<256x128xf32>,
    %c1_i32 = arith.constant 1 : i32
    %10 = arith.cmpi eq, %arg1, %c1_i32 : i32
    %11 = arith.extui %10 : i1 to i32
    %c0_i32_9 = arith.constant 0 : i32
    %12 = arith.cmpi ne, %11, %c0_i32_9 : i32
    scf.if %12 {
      %c0_10 = arith.constant 0 : index
      %c0_11 = arith.constant 0 : index
      %13 = vector.load %arg6[%c0_10, %c0_11] : memref<256x128xf32, #tpu.memory_space<vmem>>, vector<256x128xf32>
      %c0_12 = arith.constant 0 : index
      %c0_13 = arith.constant 0 : index
      %14 = vector.load %arg4[%c0_12, %c0_13] : memref<1x128xf32, #tpu.memory_space<vmem>>, vector<1x128xf32>
      %15 = vector.broadcast %14 : vector<1x128xf32> to vector<256x128xf32>
      %16 = arith.addf %13, %15 : vector<256x128xf32>
      %cst_14 = arith.constant dense<0.000000e+00> : vector<128xf32>
      %17 = vector.multi_reduction <add>, %16, %cst_14 [0] : vector<256x128xf32> to vector<128xf32>
      %18 = vector.shape_cast %17 : vector<128xf32> to vector<1x128xf32>
      %cst_15 = arith.constant 3.906250e-03 : f32
      %19 = vector.broadcast %cst_15 : f32 to vector<1x128xf32>
      %20 = arith.mulf %18, %19 : vector<1x128xf32>
      %21 = vector.broadcast %20 : vector<1x128xf32> to vector<256x128xf32>
      %22 = arith.subf %16, %21 : vector<256x128xf32>
      %23 = arith.mulf %22, %22 : vector<256x128xf32>
      %cst_16 = arith.constant dense<0.000000e+00> : vector<128xf32>
      %24 = vector.multi_reduction <add>, %23, %cst_16 [0] : vector<256x128xf32> to vector<128xf32>
      %25 = vector.shape_cast %24 : vector<128xf32> to vector<1x128xf32>
      %cst_17 = arith.constant 3.906250e-03 : f32
      %26 = vector.broadcast %cst_17 : f32 to vector<1x128xf32>
      %27 = arith.mulf %25, %26 : vector<1x128xf32>
      %cst_18 = arith.constant 9.99999974E-6 : f32
      %28 = vector.broadcast %cst_18 : f32 to vector<1x128xf32>
      %29 = arith.addf %27, %28 : vector<1x128xf32>
      %30 = math.rsqrt %29 : vector<1x128xf32>
      %31 = vector.broadcast %30 : vector<1x128xf32> to vector<256x128xf32>
      %32 = arith.mulf %22, %31 : vector<256x128xf32>
      %cst_19 = arith.constant 0.000000e+00 : f32
      %33 = vector.broadcast %cst_19 : f32 to vector<256x128xf32>
      %34 = arith.maximumf %32, %33 : vector<256x128xf32>
      %35 = arith.truncf %34 : vector<256x128xf32> to vector<256x128xbf16>
      %c0_20 = arith.constant 0 : index
      %c0_21 = arith.constant 0 : index
      %c0_22 = arith.constant 0 : index
      %36 = vector.load %arg5[%c0_20, %c0_21, %c0_22] : memref<1x256x128xbf16, #tpu.memory_space<vmem>>, vector<1x256x128xbf16>
      %37 = vector.shape_cast %36 : vector<1x256x128xbf16> to vector<256x128xbf16>
      %38 = vector.shape_cast %35 : vector<256x128xbf16> to vector<1x256x128xbf16>
      tpu.vector_store %arg5[%c0_20, %c0_21, %c0_22], %38 {strides = array<i32>} : memref<1x256x128xbf16, #tpu.memory_space<vmem>>, vector<1x256x128xbf16>,
    } else {
    }
    return
  }
  func.func @transform_0(%arg0: i32, %arg1: i32) -> (i32, i32, i32) {
    %c0_i32 = arith.constant 0 : i32
    %c0_i32_0 = arith.constant 0 : i32
    return %arg0, %c0_i32, %arg1 : i32, i32, i32
  }
  func.func @transform_1(%arg0: i32, %arg1: i32) -> (i32, i32) {
    %c0_i32 = arith.constant 0 : i32
    %c0_i32_0 = arith.constant 0 : i32
    return %arg1, %c0_i32 : i32, i32
  }
  func.func @transform_2(%arg0: i32, %arg1: i32) -> (i32, i32) {
    %c0_i32 = arith.constant 0 : i32
    %c0_i32_0 = arith.constant 0 : i32
    %c0_i32_1 = arith.constant 0 : i32
    return %c0_i32, %c0_i32_0 : i32, i32
  }
  func.func @transform_3(%arg0: i32, %arg1: i32) -> (i32, i32, i32) {
    %c0_i32 = arith.constant 0 : i32
    %c0_i32_0 = arith.constant 0 : i32
    %c0_i32_1 = arith.constant 0 : i32
    return %arg0, %c0_i32, %c0_i32_0 : i32, i32, i32
  }
}

module attributes {stable_mosaic.version = 11 : i64} {
  func.func @_im2col_conv_kernel(%arg0: i32, %arg1: i32, %arg2: memref<1x64x128xbf16, #tpu.memory_space<vmem>>, %arg3: memref<128x128xbf16, #tpu.memory_space<vmem>>, %arg4: memref<1x128xf32, #tpu.memory_space<vmem>>, %arg5: memref<1x64x128xbf16, #tpu.memory_space<vmem>>, %arg6: memref<64x128xf32, #tpu.memory_space<vmem>>) attributes {dimension_semantics = [#tpu.dimension_semantics<parallel>, #tpu.dimension_semantics<arbitrary>], iteration_bounds = array<i64: 2, 1>, scalar_prefetch = 0 : i64, scratch_operands = 1 : i64, tpu.core_type = #tpu.core_type<tc>, window_params = [{transform_indices = @transform_0, window_bounds = array<i64: 1, 64, 128>}, {transform_indices = @transform_1, window_bounds = array<i64: 128, 128>}, {pipeline_mode = #tpu.pipeline_mode<synchronous>, transform_indices = @transform_2, window_bounds = array<i64: 1, 128>}, {transform_indices = @transform_3, window_bounds = array<i64: 1, 64, 128>}]} {
    %c0_i32 = arith.constant 0 : i32
    %0 = arith.cmpi eq, %arg1, %c0_i32 : i32
    %1 = arith.extui %0 : i1 to i32
    %c0_i32_0 = arith.constant 0 : i32
    %2 = arith.cmpi ne, %1, %c0_i32_0 : i32
    scf.if %2 {
      %cst_11 = arith.constant 0.000000e+00 : f32
      %13 = vector.broadcast %cst_11 : f32 to vector<64x128xf32>
      %c0_12 = arith.constant 0 : index
      %c0_13 = arith.constant 0 : index
      %14 = vector.load %arg6[%c0_12, %c0_13] : memref<64x128xf32, #tpu.memory_space<vmem>>, vector<64x128xf32>
      tpu.vector_store %arg6[%c0_12, %c0_13], %13 {strides = array<i32>} : memref<64x128xf32, #tpu.memory_space<vmem>>, vector<64x128xf32>,
    } else {
    }
    %c0 = arith.constant 0 : index
    %c0_1 = arith.constant 0 : index
    %3 = vector.load %arg6[%c0, %c0_1] : memref<64x128xf32, #tpu.memory_space<vmem>>, vector<64x128xf32>
    %c0_2 = arith.constant 0 : index
    %c0_3 = arith.constant 0 : index
    %c0_4 = arith.constant 0 : index
    %4 = vector.load %arg2[%c0_2, %c0_3, %c0_4] : memref<1x64x128xbf16, #tpu.memory_space<vmem>>, vector<1x64x128xbf16>
    %5 = vector.shape_cast %4 : vector<1x64x128xbf16> to vector<64x128xbf16>
    %c0_5 = arith.constant 0 : index
    %c0_6 = arith.constant 0 : index
    %6 = vector.load %arg3[%c0_5, %c0_6] : memref<128x128xbf16, #tpu.memory_space<vmem>>, vector<128x128xbf16>
    %cst = arith.constant dense<0.000000e+00> : vector<64x128xf32>
    %7 = tpu.matmul %5, %6, %cst {dimension_numbers = #tpu.dot_dimension_numbers<[1], [0], [0], [1], [0, 0, 1, 1], [], []>} : vector<64x128xbf16>, vector<128x128xbf16>, vector<64x128xf32> -> vector<64x128xf32>
    %8 = arith.addf %3, %7 : vector<64x128xf32>
    %c0_7 = arith.constant 0 : index
    %c0_8 = arith.constant 0 : index
    %9 = vector.load %arg6[%c0_7, %c0_8] : memref<64x128xf32, #tpu.memory_space<vmem>>, vector<64x128xf32>
    tpu.vector_store %arg6[%c0_7, %c0_8], %8 {strides = array<i32>} : memref<64x128xf32, #tpu.memory_space<vmem>>, vector<64x128xf32>,
    %c0_i32_9 = arith.constant 0 : i32
    %10 = arith.cmpi eq, %arg1, %c0_i32_9 : i32
    %11 = arith.extui %10 : i1 to i32
    %c0_i32_10 = arith.constant 0 : i32
    %12 = arith.cmpi ne, %11, %c0_i32_10 : i32
    scf.if %12 {
      %c0_11 = arith.constant 0 : index
      %c0_12 = arith.constant 0 : index
      %13 = vector.load %arg6[%c0_11, %c0_12] : memref<64x128xf32, #tpu.memory_space<vmem>>, vector<64x128xf32>
      %c0_13 = arith.constant 0 : index
      %c0_14 = arith.constant 0 : index
      %14 = vector.load %arg4[%c0_13, %c0_14] : memref<1x128xf32, #tpu.memory_space<vmem>>, vector<1x128xf32>
      %15 = vector.broadcast %14 : vector<1x128xf32> to vector<64x128xf32>
      %16 = arith.addf %13, %15 : vector<64x128xf32>
      %cst_15 = arith.constant dense<0.000000e+00> : vector<128xf32>
      %17 = vector.multi_reduction <add>, %16, %cst_15 [0] : vector<64x128xf32> to vector<128xf32>
      %18 = vector.shape_cast %17 : vector<128xf32> to vector<1x128xf32>
      %cst_16 = arith.constant 1.562500e-02 : f32
      %19 = vector.broadcast %cst_16 : f32 to vector<1x128xf32>
      %20 = arith.mulf %18, %19 : vector<1x128xf32>
      %21 = vector.broadcast %20 : vector<1x128xf32> to vector<64x128xf32>
      %22 = arith.subf %16, %21 : vector<64x128xf32>
      %23 = arith.mulf %22, %22 : vector<64x128xf32>
      %cst_17 = arith.constant dense<0.000000e+00> : vector<128xf32>
      %24 = vector.multi_reduction <add>, %23, %cst_17 [0] : vector<64x128xf32> to vector<128xf32>
      %25 = vector.shape_cast %24 : vector<128xf32> to vector<1x128xf32>
      %cst_18 = arith.constant 1.562500e-02 : f32
      %26 = vector.broadcast %cst_18 : f32 to vector<1x128xf32>
      %27 = arith.mulf %25, %26 : vector<1x128xf32>
      %cst_19 = arith.constant 9.99999974E-6 : f32
      %28 = vector.broadcast %cst_19 : f32 to vector<1x128xf32>
      %29 = arith.addf %27, %28 : vector<1x128xf32>
      %30 = math.rsqrt %29 : vector<1x128xf32>
      %31 = vector.broadcast %30 : vector<1x128xf32> to vector<64x128xf32>
      %32 = arith.mulf %22, %31 : vector<64x128xf32>
      %cst_20 = arith.constant 0.000000e+00 : f32
      %33 = vector.broadcast %cst_20 : f32 to vector<64x128xf32>
      %34 = arith.maximumf %32, %33 : vector<64x128xf32>
      %35 = arith.truncf %34 : vector<64x128xf32> to vector<64x128xbf16>
      %c0_21 = arith.constant 0 : index
      %c0_22 = arith.constant 0 : index
      %c0_23 = arith.constant 0 : index
      %36 = vector.load %arg5[%c0_21, %c0_22, %c0_23] : memref<1x64x128xbf16, #tpu.memory_space<vmem>>, vector<1x64x128xbf16>
      %37 = vector.shape_cast %36 : vector<1x64x128xbf16> to vector<64x128xbf16>
      %38 = vector.shape_cast %35 : vector<64x128xbf16> to vector<1x64x128xbf16>
      tpu.vector_store %arg5[%c0_21, %c0_22, %c0_23], %38 {strides = array<i32>} : memref<1x64x128xbf16, #tpu.memory_space<vmem>>, vector<1x64x128xbf16>,
    } else {
    }
    return
  }
  func.func @transform_0(%arg0: i32, %arg1: i32) -> (i32, i32, i32) {
    %c0_i32 = arith.constant 0 : i32
    %c0_i32_0 = arith.constant 0 : i32
    return %arg0, %c0_i32, %arg1 : i32, i32, i32
  }
  func.func @transform_1(%arg0: i32, %arg1: i32) -> (i32, i32) {
    %c0_i32 = arith.constant 0 : i32
    %c0_i32_0 = arith.constant 0 : i32
    return %arg1, %c0_i32 : i32, i32
  }
  func.func @transform_2(%arg0: i32, %arg1: i32) -> (i32, i32) {
    %c0_i32 = arith.constant 0 : i32
    %c0_i32_0 = arith.constant 0 : i32
    %c0_i32_1 = arith.constant 0 : i32
    return %c0_i32, %c0_i32_0 : i32, i32
  }
  func.func @transform_3(%arg0: i32, %arg1: i32) -> (i32, i32, i32) {
    %c0_i32 = arith.constant 0 : i32
    %c0_i32_0 = arith.constant 0 : i32
    %c0_i32_1 = arith.constant 0 : i32
    return %arg0, %c0_i32, %c0_i32_0 : i32, i32, i32
  }
}

module attributes {stable_mosaic.version = 11 : i64} {
  func.func @_im2col_conv_kernel(%arg0: i32, %arg1: i32, %arg2: memref<1x16x128xbf16, #tpu.memory_space<vmem>>, %arg3: memref<128x128xbf16, #tpu.memory_space<vmem>>, %arg4: memref<1x128xf32, #tpu.memory_space<vmem>>, %arg5: memref<1x16x128xbf16, #tpu.memory_space<vmem>>, %arg6: memref<16x128xf32, #tpu.memory_space<vmem>>) attributes {dimension_semantics = [#tpu.dimension_semantics<parallel>, #tpu.dimension_semantics<arbitrary>], iteration_bounds = array<i64: 2, 2>, scalar_prefetch = 0 : i64, scratch_operands = 1 : i64, tpu.core_type = #tpu.core_type<tc>, window_params = [{transform_indices = @transform_0, window_bounds = array<i64: 1, 16, 128>}, {transform_indices = @transform_1, window_bounds = array<i64: 128, 128>}, {pipeline_mode = #tpu.pipeline_mode<synchronous>, transform_indices = @transform_2, window_bounds = array<i64: 1, 128>}, {transform_indices = @transform_3, window_bounds = array<i64: 1, 16, 128>}]} {
    %c0_i32 = arith.constant 0 : i32
    %0 = arith.cmpi eq, %arg1, %c0_i32 : i32
    %1 = arith.extui %0 : i1 to i32
    %c0_i32_0 = arith.constant 0 : i32
    %2 = arith.cmpi ne, %1, %c0_i32_0 : i32
    scf.if %2 {
      %cst_10 = arith.constant 0.000000e+00 : f32
      %13 = vector.broadcast %cst_10 : f32 to vector<16x128xf32>
      %c0_11 = arith.constant 0 : index
      %c0_12 = arith.constant 0 : index
      %14 = vector.load %arg6[%c0_11, %c0_12] : memref<16x128xf32, #tpu.memory_space<vmem>>, vector<16x128xf32>
      tpu.vector_store %arg6[%c0_11, %c0_12], %13 {strides = array<i32>} : memref<16x128xf32, #tpu.memory_space<vmem>>, vector<16x128xf32>,
    } else {
    }
    %c0 = arith.constant 0 : index
    %c0_1 = arith.constant 0 : index
    %3 = vector.load %arg6[%c0, %c0_1] : memref<16x128xf32, #tpu.memory_space<vmem>>, vector<16x128xf32>
    %c0_2 = arith.constant 0 : index
    %c0_3 = arith.constant 0 : index
    %c0_4 = arith.constant 0 : index
    %4 = vector.load %arg2[%c0_2, %c0_3, %c0_4] : memref<1x16x128xbf16, #tpu.memory_space<vmem>>, vector<1x16x128xbf16>
    %5 = vector.shape_cast %4 : vector<1x16x128xbf16> to vector<16x128xbf16>
    %c0_5 = arith.constant 0 : index
    %c0_6 = arith.constant 0 : index
    %6 = vector.load %arg3[%c0_5, %c0_6] : memref<128x128xbf16, #tpu.memory_space<vmem>>, vector<128x128xbf16>
    %cst = arith.constant dense<0.000000e+00> : vector<16x128xf32>
    %7 = tpu.matmul %5, %6, %cst {dimension_numbers = #tpu.dot_dimension_numbers<[1], [0], [0], [1], [0, 0, 1, 1], [], []>} : vector<16x128xbf16>, vector<128x128xbf16>, vector<16x128xf32> -> vector<16x128xf32>
    %8 = arith.addf %3, %7 : vector<16x128xf32>
    %c0_7 = arith.constant 0 : index
    %c0_8 = arith.constant 0 : index
    %9 = vector.load %arg6[%c0_7, %c0_8] : memref<16x128xf32, #tpu.memory_space<vmem>>, vector<16x128xf32>
    tpu.vector_store %arg6[%c0_7, %c0_8], %8 {strides = array<i32>} : memref<16x128xf32, #tpu.memory_space<vmem>>, vector<16x128xf32>,
    %c1_i32 = arith.constant 1 : i32
    %10 = arith.cmpi eq, %arg1, %c1_i32 : i32
    %11 = arith.extui %10 : i1 to i32
    %c0_i32_9 = arith.constant 0 : i32
    %12 = arith.cmpi ne, %11, %c0_i32_9 : i32
    scf.if %12 {
      %c0_10 = arith.constant 0 : index
      %c0_11 = arith.constant 0 : index
      %13 = vector.load %arg6[%c0_10, %c0_11] : memref<16x128xf32, #tpu.memory_space<vmem>>, vector<16x128xf32>
      %c0_12 = arith.constant 0 : index
      %c0_13 = arith.constant 0 : index
      %14 = vector.load %arg4[%c0_12, %c0_13] : memref<1x128xf32, #tpu.memory_space<vmem>>, vector<1x128xf32>
      %15 = vector.broadcast %14 : vector<1x128xf32> to vector<16x128xf32>
      %16 = arith.addf %13, %15 : vector<16x128xf32>
      %cst_14 = arith.constant dense<0.000000e+00> : vector<128xf32>
      %17 = vector.multi_reduction <add>, %16, %cst_14 [0] : vector<16x128xf32> to vector<128xf32>
      %18 = vector.shape_cast %17 : vector<128xf32> to vector<1x128xf32>
      %cst_15 = arith.constant 6.250000e-02 : f32
      %19 = vector.broadcast %cst_15 : f32 to vector<1x128xf32>
      %20 = arith.mulf %18, %19 : vector<1x128xf32>
      %21 = vector.broadcast %20 : vector<1x128xf32> to vector<16x128xf32>
      %22 = arith.subf %16, %21 : vector<16x128xf32>
      %23 = arith.mulf %22, %22 : vector<16x128xf32>
      %cst_16 = arith.constant dense<0.000000e+00> : vector<128xf32>
      %24 = vector.multi_reduction <add>, %23, %cst_16 [0] : vector<16x128xf32> to vector<128xf32>
      %25 = vector.shape_cast %24 : vector<128xf32> to vector<1x128xf32>
      %cst_17 = arith.constant 6.250000e-02 : f32
      %26 = vector.broadcast %cst_17 : f32 to vector<1x128xf32>
      %27 = arith.mulf %25, %26 : vector<1x128xf32>
      %cst_18 = arith.constant 9.99999974E-6 : f32
      %28 = vector.broadcast %cst_18 : f32 to vector<1x128xf32>
      %29 = arith.addf %27, %28 : vector<1x128xf32>
      %30 = math.rsqrt %29 : vector<1x128xf32>
      %31 = vector.broadcast %30 : vector<1x128xf32> to vector<16x128xf32>
      %32 = arith.mulf %22, %31 : vector<16x128xf32>
      %cst_19 = arith.constant 0.000000e+00 : f32
      %33 = vector.broadcast %cst_19 : f32 to vector<16x128xf32>
      %34 = arith.maximumf %32, %33 : vector<16x128xf32>
      %35 = arith.truncf %34 : vector<16x128xf32> to vector<16x128xbf16>
      %c0_20 = arith.constant 0 : index
      %c0_21 = arith.constant 0 : index
      %c0_22 = arith.constant 0 : index
      %36 = vector.load %arg5[%c0_20, %c0_21, %c0_22] : memref<1x16x128xbf16, #tpu.memory_space<vmem>>, vector<1x16x128xbf16>
      %37 = vector.shape_cast %36 : vector<1x16x128xbf16> to vector<16x128xbf16>
      %38 = vector.shape_cast %35 : vector<16x128xbf16> to vector<1x16x128xbf16>
      tpu.vector_store %arg5[%c0_20, %c0_21, %c0_22], %38 {strides = array<i32>} : memref<1x16x128xbf16, #tpu.memory_space<vmem>>, vector<1x16x128xbf16>,
    } else {
    }
    return
  }
  func.func @transform_0(%arg0: i32, %arg1: i32) -> (i32, i32, i32) {
    %c0_i32 = arith.constant 0 : i32
    %c0_i32_0 = arith.constant 0 : i32
    return %arg0, %c0_i32, %arg1 : i32, i32, i32
  }
  func.func @transform_1(%arg0: i32, %arg1: i32) -> (i32, i32) {
    %c0_i32 = arith.constant 0 : i32
    %c0_i32_0 = arith.constant 0 : i32
    return %arg1, %c0_i32 : i32, i32
  }
  func.func @transform_2(%arg0: i32, %arg1: i32) -> (i32, i32) {
    %c0_i32 = arith.constant 0 : i32
    %c0_i32_0 = arith.constant 0 : i32
    %c0_i32_1 = arith.constant 0 : i32
    return %c0_i32, %c0_i32_0 : i32, i32
  }
  func.func @transform_3(%arg0: i32, %arg1: i32) -> (i32, i32, i32) {
    %c0_i32 = arith.constant 0 : i32
    %c0_i32_0 = arith.constant 0 : i32
    %c0_i32_1 = arith.constant 0 : i32
    return %arg0, %c0_i32, %c0_i32_0 : i32, i32, i32
  }
}

module attributes {stable_mosaic.version = 11 : i64} {
  func.func @_tap_conv_kernel(%arg0: i32, %arg1: memref<1x40x32xbf16, #tpu.memory_space<vmem>>, %arg2: memref<9x32x128xbf16, #tpu.memory_space<vmem>>, %arg3: memref<1x128xf32, #tpu.memory_space<vmem>>, %arg4: memref<24x1xf32, #tpu.memory_space<vmem>>, %arg5: memref<1x24x128xbf16, #tpu.memory_space<vmem>>) attributes {dimension_semantics = [#tpu.dimension_semantics<parallel>], iteration_bounds = array<i64: 2>, scalar_prefetch = 0 : i64, scratch_operands = 0 : i64, tpu.core_type = #tpu.core_type<tc>, window_params = [{transform_indices = @transform_0, window_bounds = array<i64: 1, 40, 32>}, {pipeline_mode = #tpu.pipeline_mode<synchronous>, transform_indices = @transform_1, window_bounds = array<i64: 9, 32, 128>}, {pipeline_mode = #tpu.pipeline_mode<synchronous>, transform_indices = @transform_2, window_bounds = array<i64: 1, 128>}, {pipeline_mode = #tpu.pipeline_mode<synchronous>, transform_indices = @transform_3, window_bounds = array<i64: 24, 1>}, {transform_indices = @transform_4, window_bounds = array<i64: 1, 24, 128>}]} {
    %c0 = arith.constant 0 : index
    %c0_0 = arith.constant 0 : index
    %c0_1 = arith.constant 0 : index
    %0 = vector.load %arg1[%c0, %c0_0, %c0_1] : memref<1x40x32xbf16, #tpu.memory_space<vmem>>, vector<1x24x32xbf16>
    %1 = vector.shape_cast %0 : vector<1x24x32xbf16> to vector<24x32xbf16>
    %c0_2 = arith.constant 0 : index
    %c0_3 = arith.constant 0 : index
    %c0_4 = arith.constant 0 : index
    %2 = vector.load %arg2[%c0_2, %c0_3, %c0_4] : memref<9x32x128xbf16, #tpu.memory_space<vmem>>, vector<1x32x128xbf16>
    %3 = vector.shape_cast %2 : vector<1x32x128xbf16> to vector<32x128xbf16>
    %cst = arith.constant dense<0.000000e+00> : vector<24x128xf32>
    %4 = tpu.matmul %1, %3, %cst {dimension_numbers = #tpu.dot_dimension_numbers<[1], [0], [0], [1], [0, 0, 1, 1], [], []>} : vector<24x32xbf16>, vector<32x128xbf16>, vector<24x128xf32> -> vector<24x128xf32>
    %c0_5 = arith.constant 0 : index
    %c1 = arith.constant 1 : index
    %c0_6 = arith.constant 0 : index
    %5 = vector.load %arg1[%c0_5, %c1, %c0_6] : memref<1x40x32xbf16, #tpu.memory_space<vmem>>, vector<1x24x32xbf16>
    %6 = vector.shape_cast %5 : vector<1x24x32xbf16> to vector<24x32xbf16>
    %c1_7 = arith.constant 1 : index
    %c0_8 = arith.constant 0 : index
    %c0_9 = arith.constant 0 : index
    %7 = vector.load %arg2[%c1_7, %c0_8, %c0_9] : memref<9x32x128xbf16, #tpu.memory_space<vmem>>, vector<1x32x128xbf16>
    %8 = vector.shape_cast %7 : vector<1x32x128xbf16> to vector<32x128xbf16>
    %cst_10 = arith.constant dense<0.000000e+00> : vector<24x128xf32>
    %9 = tpu.matmul %6, %8, %cst_10 {dimension_numbers = #tpu.dot_dimension_numbers<[1], [0], [0], [1], [0, 0, 1, 1], [], []>} : vector<24x32xbf16>, vector<32x128xbf16>, vector<24x128xf32> -> vector<24x128xf32>
    %10 = arith.addf %4, %9 : vector<24x128xf32>
    %c0_11 = arith.constant 0 : index
    %c2 = arith.constant 2 : index
    %c0_12 = arith.constant 0 : index
    %11 = vector.load %arg1[%c0_11, %c2, %c0_12] : memref<1x40x32xbf16, #tpu.memory_space<vmem>>, vector<1x24x32xbf16>
    %12 = vector.shape_cast %11 : vector<1x24x32xbf16> to vector<24x32xbf16>
    %c2_13 = arith.constant 2 : index
    %c0_14 = arith.constant 0 : index
    %c0_15 = arith.constant 0 : index
    %13 = vector.load %arg2[%c2_13, %c0_14, %c0_15] : memref<9x32x128xbf16, #tpu.memory_space<vmem>>, vector<1x32x128xbf16>
    %14 = vector.shape_cast %13 : vector<1x32x128xbf16> to vector<32x128xbf16>
    %cst_16 = arith.constant dense<0.000000e+00> : vector<24x128xf32>
    %15 = tpu.matmul %12, %14, %cst_16 {dimension_numbers = #tpu.dot_dimension_numbers<[1], [0], [0], [1], [0, 0, 1, 1], [], []>} : vector<24x32xbf16>, vector<32x128xbf16>, vector<24x128xf32> -> vector<24x128xf32>
    %16 = arith.addf %10, %15 : vector<24x128xf32>
    %c0_17 = arith.constant 0 : index
    %c6 = arith.constant 6 : index
    %c0_18 = arith.constant 0 : index
    %17 = vector.load %arg1[%c0_17, %c6, %c0_18] : memref<1x40x32xbf16, #tpu.memory_space<vmem>>, vector<1x24x32xbf16>
    %18 = vector.shape_cast %17 : vector<1x24x32xbf16> to vector<24x32xbf16>
    %c3 = arith.constant 3 : index
    %c0_19 = arith.constant 0 : index
    %c0_20 = arith.constant 0 : index
    %19 = vector.load %arg2[%c3, %c0_19, %c0_20] : memref<9x32x128xbf16, #tpu.memory_space<vmem>>, vector<1x32x128xbf16>
    %20 = vector.shape_cast %19 : vector<1x32x128xbf16> to vector<32x128xbf16>
    %cst_21 = arith.constant dense<0.000000e+00> : vector<24x128xf32>
    %21 = tpu.matmul %18, %20, %cst_21 {dimension_numbers = #tpu.dot_dimension_numbers<[1], [0], [0], [1], [0, 0, 1, 1], [], []>} : vector<24x32xbf16>, vector<32x128xbf16>, vector<24x128xf32> -> vector<24x128xf32>
    %22 = arith.addf %16, %21 : vector<24x128xf32>
    %c0_22 = arith.constant 0 : index
    %c7 = arith.constant 7 : index
    %c0_23 = arith.constant 0 : index
    %23 = vector.load %arg1[%c0_22, %c7, %c0_23] : memref<1x40x32xbf16, #tpu.memory_space<vmem>>, vector<1x24x32xbf16>
    %24 = vector.shape_cast %23 : vector<1x24x32xbf16> to vector<24x32xbf16>
    %c4 = arith.constant 4 : index
    %c0_24 = arith.constant 0 : index
    %c0_25 = arith.constant 0 : index
    %25 = vector.load %arg2[%c4, %c0_24, %c0_25] : memref<9x32x128xbf16, #tpu.memory_space<vmem>>, vector<1x32x128xbf16>
    %26 = vector.shape_cast %25 : vector<1x32x128xbf16> to vector<32x128xbf16>
    %cst_26 = arith.constant dense<0.000000e+00> : vector<24x128xf32>
    %27 = tpu.matmul %24, %26, %cst_26 {dimension_numbers = #tpu.dot_dimension_numbers<[1], [0], [0], [1], [0, 0, 1, 1], [], []>} : vector<24x32xbf16>, vector<32x128xbf16>, vector<24x128xf32> -> vector<24x128xf32>
    %28 = arith.addf %22, %27 : vector<24x128xf32>
    %c0_27 = arith.constant 0 : index
    %c8 = arith.constant 8 : index
    %c0_28 = arith.constant 0 : index
    %29 = vector.load %arg1[%c0_27, %c8, %c0_28] : memref<1x40x32xbf16, #tpu.memory_space<vmem>>, vector<1x24x32xbf16>
    %30 = vector.shape_cast %29 : vector<1x24x32xbf16> to vector<24x32xbf16>
    %c5 = arith.constant 5 : index
    %c0_29 = arith.constant 0 : index
    %c0_30 = arith.constant 0 : index
    %31 = vector.load %arg2[%c5, %c0_29, %c0_30] : memref<9x32x128xbf16, #tpu.memory_space<vmem>>, vector<1x32x128xbf16>
    %32 = vector.shape_cast %31 : vector<1x32x128xbf16> to vector<32x128xbf16>
    %cst_31 = arith.constant dense<0.000000e+00> : vector<24x128xf32>
    %33 = tpu.matmul %30, %32, %cst_31 {dimension_numbers = #tpu.dot_dimension_numbers<[1], [0], [0], [1], [0, 0, 1, 1], [], []>} : vector<24x32xbf16>, vector<32x128xbf16>, vector<24x128xf32> -> vector<24x128xf32>
    %34 = arith.addf %28, %33 : vector<24x128xf32>
    %c0_32 = arith.constant 0 : index
    %c12 = arith.constant 12 : index
    %c0_33 = arith.constant 0 : index
    %35 = vector.load %arg1[%c0_32, %c12, %c0_33] : memref<1x40x32xbf16, #tpu.memory_space<vmem>>, vector<1x24x32xbf16>
    %36 = vector.shape_cast %35 : vector<1x24x32xbf16> to vector<24x32xbf16>
    %c6_34 = arith.constant 6 : index
    %c0_35 = arith.constant 0 : index
    %c0_36 = arith.constant 0 : index
    %37 = vector.load %arg2[%c6_34, %c0_35, %c0_36] : memref<9x32x128xbf16, #tpu.memory_space<vmem>>, vector<1x32x128xbf16>
    %38 = vector.shape_cast %37 : vector<1x32x128xbf16> to vector<32x128xbf16>
    %cst_37 = arith.constant dense<0.000000e+00> : vector<24x128xf32>
    %39 = tpu.matmul %36, %38, %cst_37 {dimension_numbers = #tpu.dot_dimension_numbers<[1], [0], [0], [1], [0, 0, 1, 1], [], []>} : vector<24x32xbf16>, vector<32x128xbf16>, vector<24x128xf32> -> vector<24x128xf32>
    %40 = arith.addf %34, %39 : vector<24x128xf32>
    %c0_38 = arith.constant 0 : index
    %c13 = arith.constant 13 : index
    %c0_39 = arith.constant 0 : index
    %41 = vector.load %arg1[%c0_38, %c13, %c0_39] : memref<1x40x32xbf16, #tpu.memory_space<vmem>>, vector<1x24x32xbf16>
    %42 = vector.shape_cast %41 : vector<1x24x32xbf16> to vector<24x32xbf16>
    %c7_40 = arith.constant 7 : index
    %c0_41 = arith.constant 0 : index
    %c0_42 = arith.constant 0 : index
    %43 = vector.load %arg2[%c7_40, %c0_41, %c0_42] : memref<9x32x128xbf16, #tpu.memory_space<vmem>>, vector<1x32x128xbf16>
    %44 = vector.shape_cast %43 : vector<1x32x128xbf16> to vector<32x128xbf16>
    %cst_43 = arith.constant dense<0.000000e+00> : vector<24x128xf32>
    %45 = tpu.matmul %42, %44, %cst_43 {dimension_numbers = #tpu.dot_dimension_numbers<[1], [0], [0], [1], [0, 0, 1, 1], [], []>} : vector<24x32xbf16>, vector<32x128xbf16>, vector<24x128xf32> -> vector<24x128xf32>
    %46 = arith.addf %40, %45 : vector<24x128xf32>
    %c0_44 = arith.constant 0 : index
    %c14 = arith.constant 14 : index
    %c0_45 = arith.constant 0 : index
    %47 = vector.load %arg1[%c0_44, %c14, %c0_45] : memref<1x40x32xbf16, #tpu.memory_space<vmem>>, vector<1x24x32xbf16>
    %48 = vector.shape_cast %47 : vector<1x24x32xbf16> to vector<24x32xbf16>
    %c8_46 = arith.constant 8 : index
    %c0_47 = arith.constant 0 : index
    %c0_48 = arith.constant 0 : index
    %49 = vector.load %arg2[%c8_46, %c0_47, %c0_48] : memref<9x32x128xbf16, #tpu.memory_space<vmem>>, vector<1x32x128xbf16>
    %50 = vector.shape_cast %49 : vector<1x32x128xbf16> to vector<32x128xbf16>
    %cst_49 = arith.constant dense<0.000000e+00> : vector<24x128xf32>
    %51 = tpu.matmul %48, %50, %cst_49 {dimension_numbers = #tpu.dot_dimension_numbers<[1], [0], [0], [1], [0, 0, 1, 1], [], []>} : vector<24x32xbf16>, vector<32x128xbf16>, vector<24x128xf32> -> vector<24x128xf32>
    %52 = arith.addf %46, %51 : vector<24x128xf32>
    %c0_50 = arith.constant 0 : index
    %c0_51 = arith.constant 0 : index
    %53 = vector.load %arg3[%c0_50, %c0_51] : memref<1x128xf32, #tpu.memory_space<vmem>>, vector<1x128xf32>
    %54 = vector.broadcast %53 : vector<1x128xf32> to vector<24x128xf32>
    %55 = arith.addf %52, %54 : vector<24x128xf32>
    %c0_52 = arith.constant 0 : index
    %c0_53 = arith.constant 0 : index
    %56 = vector.load %arg4[%c0_52, %c0_53] : memref<24x1xf32, #tpu.memory_space<vmem>>, vector<24x1xf32>
    %57 = vector.broadcast %56 : vector<24x1xf32> to vector<24x128xf32>
    %58 = arith.mulf %55, %57 : vector<24x128xf32>
    %cst_54 = arith.constant dense<0.000000e+00> : vector<128xf32>
    %59 = vector.multi_reduction <add>, %58, %cst_54 [0] : vector<24x128xf32> to vector<128xf32>
    %60 = vector.shape_cast %59 : vector<128xf32> to vector<1x128xf32>
    %cst_55 = arith.constant 6.250000e-02 : f32
    %61 = vector.broadcast %cst_55 : f32 to vector<1x128xf32>
    %62 = arith.mulf %60, %61 : vector<1x128xf32>
    %63 = vector.broadcast %62 : vector<1x128xf32> to vector<24x128xf32>
    %64 = arith.subf %55, %63 : vector<24x128xf32>
    %65 = arith.mulf %64, %64 : vector<24x128xf32>
    %66 = vector.broadcast %56 : vector<24x1xf32> to vector<24x128xf32>
    %67 = arith.mulf %65, %66 : vector<24x128xf32>
    %cst_56 = arith.constant dense<0.000000e+00> : vector<128xf32>
    %68 = vector.multi_reduction <add>, %67, %cst_56 [0] : vector<24x128xf32> to vector<128xf32>
    %69 = vector.shape_cast %68 : vector<128xf32> to vector<1x128xf32>
    %cst_57 = arith.constant 6.250000e-02 : f32
    %70 = vector.broadcast %cst_57 : f32 to vector<1x128xf32>
    %71 = arith.mulf %69, %70 : vector<1x128xf32>
    %cst_58 = arith.constant 9.99999974E-6 : f32
    %72 = vector.broadcast %cst_58 : f32 to vector<1x128xf32>
    %73 = arith.addf %71, %72 : vector<1x128xf32>
    %74 = math.rsqrt %73 : vector<1x128xf32>
    %75 = vector.broadcast %74 : vector<1x128xf32> to vector<24x128xf32>
    %76 = arith.mulf %64, %75 : vector<24x128xf32>
    %cst_59 = arith.constant 0.000000e+00 : f32
    %77 = vector.broadcast %cst_59 : f32 to vector<24x128xf32>
    %78 = arith.maximumf %76, %77 : vector<24x128xf32>
    %79 = arith.truncf %78 : vector<24x128xf32> to vector<24x128xbf16>
    %c0_60 = arith.constant 0 : index
    %c0_61 = arith.constant 0 : index
    %c0_62 = arith.constant 0 : index
    %80 = vector.load %arg5[%c0_60, %c0_61, %c0_62] : memref<1x24x128xbf16, #tpu.memory_space<vmem>>, vector<1x24x128xbf16>
    %81 = vector.shape_cast %80 : vector<1x24x128xbf16> to vector<24x128xbf16>
    %82 = vector.shape_cast %79 : vector<24x128xbf16> to vector<1x24x128xbf16>
    tpu.vector_store %arg5[%c0_60, %c0_61, %c0_62], %82 {strides = array<i32>} : memref<1x24x128xbf16, #tpu.memory_space<vmem>>, vector<1x24x128xbf16>,
    return
  }
  func.func @transform_0(%arg0: i32) -> (i32, i32, i32) {
    %c0_i32 = arith.constant 0 : i32
    %c0_i32_0 = arith.constant 0 : i32
    %c0_i32_1 = arith.constant 0 : i32
    return %arg0, %c0_i32, %c0_i32_0 : i32, i32, i32
  }
  func.func @transform_1(%arg0: i32) -> (i32, i32, i32) {
    %c0_i32 = arith.constant 0 : i32
    %c0_i32_0 = arith.constant 0 : i32
    %c0_i32_1 = arith.constant 0 : i32
    %c0_i32_2 = arith.constant 0 : i32
    return %c0_i32, %c0_i32_0, %c0_i32_1 : i32, i32, i32
  }
  func.func @transform_2(%arg0: i32) -> (i32, i32) {
    %c0_i32 = arith.constant 0 : i32
    %c0_i32_0 = arith.constant 0 : i32
    %c0_i32_1 = arith.constant 0 : i32
    return %c0_i32, %c0_i32_0 : i32, i32
  }
  func.func @transform_3(%arg0: i32) -> (i32, i32) {
    %c0_i32 = arith.constant 0 : i32
    %c0_i32_0 = arith.constant 0 : i32
    %c0_i32_1 = arith.constant 0 : i32
    return %c0_i32, %c0_i32_0 : i32, i32
  }
  func.func @transform_4(%arg0: i32) -> (i32, i32, i32) {
    %c0_i32 = arith.constant 0 : i32
    %c0_i32_0 = arith.constant 0 : i32
    %c0_i32_1 = arith.constant 0 : i32
    return %arg0, %c0_i32, %c0_i32_0 : i32, i32, i32
  }
}

module attributes {stable_mosaic.version = 11 : i64} {
  func.func @_tap_conv_kernel(%arg0: i32, %arg1: memref<1x40x32xbf16, #tpu.memory_space<vmem>>, %arg2: memref<9x32x128xbf16, #tpu.memory_space<vmem>>, %arg3: memref<1x128xf32, #tpu.memory_space<vmem>>, %arg4: memref<24x1xf32, #tpu.memory_space<vmem>>, %arg5: memref<1x24x128xbf16, #tpu.memory_space<vmem>>, %arg6: memref<1x24x128xbf16, #tpu.memory_space<vmem>>) attributes {dimension_semantics = [#tpu.dimension_semantics<parallel>], iteration_bounds = array<i64: 2>, scalar_prefetch = 0 : i64, scratch_operands = 0 : i64, tpu.core_type = #tpu.core_type<tc>, window_params = [{transform_indices = @transform_0, window_bounds = array<i64: 1, 40, 32>}, {pipeline_mode = #tpu.pipeline_mode<synchronous>, transform_indices = @transform_1, window_bounds = array<i64: 9, 32, 128>}, {pipeline_mode = #tpu.pipeline_mode<synchronous>, transform_indices = @transform_2, window_bounds = array<i64: 1, 128>}, {pipeline_mode = #tpu.pipeline_mode<synchronous>, transform_indices = @transform_3, window_bounds = array<i64: 24, 1>}, {transform_indices = @transform_4, window_bounds = array<i64: 1, 24, 128>}, {transform_indices = @transform_5, window_bounds = array<i64: 1, 24, 128>}]} {
    %c0 = arith.constant 0 : index
    %c0_0 = arith.constant 0 : index
    %c0_1 = arith.constant 0 : index
    %0 = vector.load %arg5[%c0, %c0_0, %c0_1] : memref<1x24x128xbf16, #tpu.memory_space<vmem>>, vector<1x24x128xbf16>
    %1 = vector.shape_cast %0 : vector<1x24x128xbf16> to vector<24x128xbf16>
    %2 = arith.extf %1 : vector<24x128xbf16> to vector<24x128xf32>
    %c0_2 = arith.constant 0 : index
    %c0_3 = arith.constant 0 : index
    %c0_4 = arith.constant 0 : index
    %3 = vector.load %arg1[%c0_2, %c0_3, %c0_4] : memref<1x40x32xbf16, #tpu.memory_space<vmem>>, vector<1x24x32xbf16>
    %4 = vector.shape_cast %3 : vector<1x24x32xbf16> to vector<24x32xbf16>
    %c0_5 = arith.constant 0 : index
    %c0_6 = arith.constant 0 : index
    %c0_7 = arith.constant 0 : index
    %5 = vector.load %arg2[%c0_5, %c0_6, %c0_7] : memref<9x32x128xbf16, #tpu.memory_space<vmem>>, vector<1x32x128xbf16>
    %6 = vector.shape_cast %5 : vector<1x32x128xbf16> to vector<32x128xbf16>
    %cst = arith.constant dense<0.000000e+00> : vector<24x128xf32>
    %7 = tpu.matmul %4, %6, %cst {dimension_numbers = #tpu.dot_dimension_numbers<[1], [0], [0], [1], [0, 0, 1, 1], [], []>} : vector<24x32xbf16>, vector<32x128xbf16>, vector<24x128xf32> -> vector<24x128xf32>
    %c0_8 = arith.constant 0 : index
    %c1 = arith.constant 1 : index
    %c0_9 = arith.constant 0 : index
    %8 = vector.load %arg1[%c0_8, %c1, %c0_9] : memref<1x40x32xbf16, #tpu.memory_space<vmem>>, vector<1x24x32xbf16>
    %9 = vector.shape_cast %8 : vector<1x24x32xbf16> to vector<24x32xbf16>
    %c1_10 = arith.constant 1 : index
    %c0_11 = arith.constant 0 : index
    %c0_12 = arith.constant 0 : index
    %10 = vector.load %arg2[%c1_10, %c0_11, %c0_12] : memref<9x32x128xbf16, #tpu.memory_space<vmem>>, vector<1x32x128xbf16>
    %11 = vector.shape_cast %10 : vector<1x32x128xbf16> to vector<32x128xbf16>
    %cst_13 = arith.constant dense<0.000000e+00> : vector<24x128xf32>
    %12 = tpu.matmul %9, %11, %cst_13 {dimension_numbers = #tpu.dot_dimension_numbers<[1], [0], [0], [1], [0, 0, 1, 1], [], []>} : vector<24x32xbf16>, vector<32x128xbf16>, vector<24x128xf32> -> vector<24x128xf32>
    %13 = arith.addf %7, %12 : vector<24x128xf32>
    %c0_14 = arith.constant 0 : index
    %c2 = arith.constant 2 : index
    %c0_15 = arith.constant 0 : index
    %14 = vector.load %arg1[%c0_14, %c2, %c0_15] : memref<1x40x32xbf16, #tpu.memory_space<vmem>>, vector<1x24x32xbf16>
    %15 = vector.shape_cast %14 : vector<1x24x32xbf16> to vector<24x32xbf16>
    %c2_16 = arith.constant 2 : index
    %c0_17 = arith.constant 0 : index
    %c0_18 = arith.constant 0 : index
    %16 = vector.load %arg2[%c2_16, %c0_17, %c0_18] : memref<9x32x128xbf16, #tpu.memory_space<vmem>>, vector<1x32x128xbf16>
    %17 = vector.shape_cast %16 : vector<1x32x128xbf16> to vector<32x128xbf16>
    %cst_19 = arith.constant dense<0.000000e+00> : vector<24x128xf32>
    %18 = tpu.matmul %15, %17, %cst_19 {dimension_numbers = #tpu.dot_dimension_numbers<[1], [0], [0], [1], [0, 0, 1, 1], [], []>} : vector<24x32xbf16>, vector<32x128xbf16>, vector<24x128xf32> -> vector<24x128xf32>
    %19 = arith.addf %13, %18 : vector<24x128xf32>
    %c0_20 = arith.constant 0 : index
    %c6 = arith.constant 6 : index
    %c0_21 = arith.constant 0 : index
    %20 = vector.load %arg1[%c0_20, %c6, %c0_21] : memref<1x40x32xbf16, #tpu.memory_space<vmem>>, vector<1x24x32xbf16>
    %21 = vector.shape_cast %20 : vector<1x24x32xbf16> to vector<24x32xbf16>
    %c3 = arith.constant 3 : index
    %c0_22 = arith.constant 0 : index
    %c0_23 = arith.constant 0 : index
    %22 = vector.load %arg2[%c3, %c0_22, %c0_23] : memref<9x32x128xbf16, #tpu.memory_space<vmem>>, vector<1x32x128xbf16>
    %23 = vector.shape_cast %22 : vector<1x32x128xbf16> to vector<32x128xbf16>
    %cst_24 = arith.constant dense<0.000000e+00> : vector<24x128xf32>
    %24 = tpu.matmul %21, %23, %cst_24 {dimension_numbers = #tpu.dot_dimension_numbers<[1], [0], [0], [1], [0, 0, 1, 1], [], []>} : vector<24x32xbf16>, vector<32x128xbf16>, vector<24x128xf32> -> vector<24x128xf32>
    %25 = arith.addf %19, %24 : vector<24x128xf32>
    %c0_25 = arith.constant 0 : index
    %c7 = arith.constant 7 : index
    %c0_26 = arith.constant 0 : index
    %26 = vector.load %arg1[%c0_25, %c7, %c0_26] : memref<1x40x32xbf16, #tpu.memory_space<vmem>>, vector<1x24x32xbf16>
    %27 = vector.shape_cast %26 : vector<1x24x32xbf16> to vector<24x32xbf16>
    %c4 = arith.constant 4 : index
    %c0_27 = arith.constant 0 : index
    %c0_28 = arith.constant 0 : index
    %28 = vector.load %arg2[%c4, %c0_27, %c0_28] : memref<9x32x128xbf16, #tpu.memory_space<vmem>>, vector<1x32x128xbf16>
    %29 = vector.shape_cast %28 : vector<1x32x128xbf16> to vector<32x128xbf16>
    %cst_29 = arith.constant dense<0.000000e+00> : vector<24x128xf32>
    %30 = tpu.matmul %27, %29, %cst_29 {dimension_numbers = #tpu.dot_dimension_numbers<[1], [0], [0], [1], [0, 0, 1, 1], [], []>} : vector<24x32xbf16>, vector<32x128xbf16>, vector<24x128xf32> -> vector<24x128xf32>
    %31 = arith.addf %25, %30 : vector<24x128xf32>
    %c0_30 = arith.constant 0 : index
    %c8 = arith.constant 8 : index
    %c0_31 = arith.constant 0 : index
    %32 = vector.load %arg1[%c0_30, %c8, %c0_31] : memref<1x40x32xbf16, #tpu.memory_space<vmem>>, vector<1x24x32xbf16>
    %33 = vector.shape_cast %32 : vector<1x24x32xbf16> to vector<24x32xbf16>
    %c5 = arith.constant 5 : index
    %c0_32 = arith.constant 0 : index
    %c0_33 = arith.constant 0 : index
    %34 = vector.load %arg2[%c5, %c0_32, %c0_33] : memref<9x32x128xbf16, #tpu.memory_space<vmem>>, vector<1x32x128xbf16>
    %35 = vector.shape_cast %34 : vector<1x32x128xbf16> to vector<32x128xbf16>
    %cst_34 = arith.constant dense<0.000000e+00> : vector<24x128xf32>
    %36 = tpu.matmul %33, %35, %cst_34 {dimension_numbers = #tpu.dot_dimension_numbers<[1], [0], [0], [1], [0, 0, 1, 1], [], []>} : vector<24x32xbf16>, vector<32x128xbf16>, vector<24x128xf32> -> vector<24x128xf32>
    %37 = arith.addf %31, %36 : vector<24x128xf32>
    %c0_35 = arith.constant 0 : index
    %c12 = arith.constant 12 : index
    %c0_36 = arith.constant 0 : index
    %38 = vector.load %arg1[%c0_35, %c12, %c0_36] : memref<1x40x32xbf16, #tpu.memory_space<vmem>>, vector<1x24x32xbf16>
    %39 = vector.shape_cast %38 : vector<1x24x32xbf16> to vector<24x32xbf16>
    %c6_37 = arith.constant 6 : index
    %c0_38 = arith.constant 0 : index
    %c0_39 = arith.constant 0 : index
    %40 = vector.load %arg2[%c6_37, %c0_38, %c0_39] : memref<9x32x128xbf16, #tpu.memory_space<vmem>>, vector<1x32x128xbf16>
    %41 = vector.shape_cast %40 : vector<1x32x128xbf16> to vector<32x128xbf16>
    %cst_40 = arith.constant dense<0.000000e+00> : vector<24x128xf32>
    %42 = tpu.matmul %39, %41, %cst_40 {dimension_numbers = #tpu.dot_dimension_numbers<[1], [0], [0], [1], [0, 0, 1, 1], [], []>} : vector<24x32xbf16>, vector<32x128xbf16>, vector<24x128xf32> -> vector<24x128xf32>
    %43 = arith.addf %37, %42 : vector<24x128xf32>
    %c0_41 = arith.constant 0 : index
    %c13 = arith.constant 13 : index
    %c0_42 = arith.constant 0 : index
    %44 = vector.load %arg1[%c0_41, %c13, %c0_42] : memref<1x40x32xbf16, #tpu.memory_space<vmem>>, vector<1x24x32xbf16>
    %45 = vector.shape_cast %44 : vector<1x24x32xbf16> to vector<24x32xbf16>
    %c7_43 = arith.constant 7 : index
    %c0_44 = arith.constant 0 : index
    %c0_45 = arith.constant 0 : index
    %46 = vector.load %arg2[%c7_43, %c0_44, %c0_45] : memref<9x32x128xbf16, #tpu.memory_space<vmem>>, vector<1x32x128xbf16>
    %47 = vector.shape_cast %46 : vector<1x32x128xbf16> to vector<32x128xbf16>
    %cst_46 = arith.constant dense<0.000000e+00> : vector<24x128xf32>
    %48 = tpu.matmul %45, %47, %cst_46 {dimension_numbers = #tpu.dot_dimension_numbers<[1], [0], [0], [1], [0, 0, 1, 1], [], []>} : vector<24x32xbf16>, vector<32x128xbf16>, vector<24x128xf32> -> vector<24x128xf32>
    %49 = arith.addf %43, %48 : vector<24x128xf32>
    %c0_47 = arith.constant 0 : index
    %c14 = arith.constant 14 : index
    %c0_48 = arith.constant 0 : index
    %50 = vector.load %arg1[%c0_47, %c14, %c0_48] : memref<1x40x32xbf16, #tpu.memory_space<vmem>>, vector<1x24x32xbf16>
    %51 = vector.shape_cast %50 : vector<1x24x32xbf16> to vector<24x32xbf16>
    %c8_49 = arith.constant 8 : index
    %c0_50 = arith.constant 0 : index
    %c0_51 = arith.constant 0 : index
    %52 = vector.load %arg2[%c8_49, %c0_50, %c0_51] : memref<9x32x128xbf16, #tpu.memory_space<vmem>>, vector<1x32x128xbf16>
    %53 = vector.shape_cast %52 : vector<1x32x128xbf16> to vector<32x128xbf16>
    %cst_52 = arith.constant dense<0.000000e+00> : vector<24x128xf32>
    %54 = tpu.matmul %51, %53, %cst_52 {dimension_numbers = #tpu.dot_dimension_numbers<[1], [0], [0], [1], [0, 0, 1, 1], [], []>} : vector<24x32xbf16>, vector<32x128xbf16>, vector<24x128xf32> -> vector<24x128xf32>
    %55 = arith.addf %49, %54 : vector<24x128xf32>
    %c0_53 = arith.constant 0 : index
    %c0_54 = arith.constant 0 : index
    %56 = vector.load %arg3[%c0_53, %c0_54] : memref<1x128xf32, #tpu.memory_space<vmem>>, vector<1x128xf32>
    %57 = vector.broadcast %56 : vector<1x128xf32> to vector<24x128xf32>
    %58 = arith.addf %55, %57 : vector<24x128xf32>
    %c0_55 = arith.constant 0 : index
    %c0_56 = arith.constant 0 : index
    %59 = vector.load %arg4[%c0_55, %c0_56] : memref<24x1xf32, #tpu.memory_space<vmem>>, vector<24x1xf32>
    %60 = vector.broadcast %59 : vector<24x1xf32> to vector<24x128xf32>
    %61 = arith.mulf %58, %60 : vector<24x128xf32>
    %cst_57 = arith.constant dense<0.000000e+00> : vector<128xf32>
    %62 = vector.multi_reduction <add>, %61, %cst_57 [0] : vector<24x128xf32> to vector<128xf32>
    %63 = vector.shape_cast %62 : vector<128xf32> to vector<1x128xf32>
    %cst_58 = arith.constant 6.250000e-02 : f32
    %64 = vector.broadcast %cst_58 : f32 to vector<1x128xf32>
    %65 = arith.mulf %63, %64 : vector<1x128xf32>
    %66 = vector.broadcast %65 : vector<1x128xf32> to vector<24x128xf32>
    %67 = arith.subf %58, %66 : vector<24x128xf32>
    %68 = arith.mulf %67, %67 : vector<24x128xf32>
    %69 = vector.broadcast %59 : vector<24x1xf32> to vector<24x128xf32>
    %70 = arith.mulf %68, %69 : vector<24x128xf32>
    %cst_59 = arith.constant dense<0.000000e+00> : vector<128xf32>
    %71 = vector.multi_reduction <add>, %70, %cst_59 [0] : vector<24x128xf32> to vector<128xf32>
    %72 = vector.shape_cast %71 : vector<128xf32> to vector<1x128xf32>
    %cst_60 = arith.constant 6.250000e-02 : f32
    %73 = vector.broadcast %cst_60 : f32 to vector<1x128xf32>
    %74 = arith.mulf %72, %73 : vector<1x128xf32>
    %cst_61 = arith.constant 9.99999974E-6 : f32
    %75 = vector.broadcast %cst_61 : f32 to vector<1x128xf32>
    %76 = arith.addf %74, %75 : vector<1x128xf32>
    %77 = math.rsqrt %76 : vector<1x128xf32>
    %78 = vector.broadcast %77 : vector<1x128xf32> to vector<24x128xf32>
    %79 = arith.mulf %67, %78 : vector<24x128xf32>
    %80 = arith.addf %79, %2 : vector<24x128xf32>
    %81 = arith.truncf %80 : vector<24x128xf32> to vector<24x128xbf16>
    %c0_62 = arith.constant 0 : index
    %c0_63 = arith.constant 0 : index
    %c0_64 = arith.constant 0 : index
    %82 = vector.load %arg6[%c0_62, %c0_63, %c0_64] : memref<1x24x128xbf16, #tpu.memory_space<vmem>>, vector<1x24x128xbf16>
    %83 = vector.shape_cast %82 : vector<1x24x128xbf16> to vector<24x128xbf16>
    %84 = vector.shape_cast %81 : vector<24x128xbf16> to vector<1x24x128xbf16>
    tpu.vector_store %arg6[%c0_62, %c0_63, %c0_64], %84 {strides = array<i32>} : memref<1x24x128xbf16, #tpu.memory_space<vmem>>, vector<1x24x128xbf16>,
    return
  }
  func.func @transform_0(%arg0: i32) -> (i32, i32, i32) {
    %c0_i32 = arith.constant 0 : i32
    %c0_i32_0 = arith.constant 0 : i32
    %c0_i32_1 = arith.constant 0 : i32
    return %arg0, %c0_i32, %c0_i32_0 : i32, i32, i32
  }
  func.func @transform_1(%arg0: i32) -> (i32, i32, i32) {
    %c0_i32 = arith.constant 0 : i32
    %c0_i32_0 = arith.constant 0 : i32
    %c0_i32_1 = arith.constant 0 : i32
    %c0_i32_2 = arith.constant 0 : i32
    return %c0_i32, %c0_i32_0, %c0_i32_1 : i32, i32, i32
  }
  func.func @transform_2(%arg0: i32) -> (i32, i32) {
    %c0_i32 = arith.constant 0 : i32
    %c0_i32_0 = arith.constant 0 : i32
    %c0_i32_1 = arith.constant 0 : i32
    return %c0_i32, %c0_i32_0 : i32, i32
  }
  func.func @transform_3(%arg0: i32) -> (i32, i32) {
    %c0_i32 = arith.constant 0 : i32
    %c0_i32_0 = arith.constant 0 : i32
    %c0_i32_1 = arith.constant 0 : i32
    return %c0_i32, %c0_i32_0 : i32, i32
  }
  func.func @transform_4(%arg0: i32) -> (i32, i32, i32) {
    %c0_i32 = arith.constant 0 : i32
    %c0_i32_0 = arith.constant 0 : i32
    %c0_i32_1 = arith.constant 0 : i32
    return %arg0, %c0_i32, %c0_i32_0 : i32, i32, i32
  }
  func.func @transform_5(%arg0: i32) -> (i32, i32, i32) {
    %c0_i32 = arith.constant 0 : i32
    %c0_i32_0 = arith.constant 0 : i32
    %c0_i32_1 = arith.constant 0 : i32
    return %arg0, %c0_i32, %c0_i32_0 : i32, i32, i32
  }
}

module attributes {stable_mosaic.version = 11 : i64} {
  func.func @_tap_conv_kernel(%arg0: i32, %arg1: memref<1x32x32xbf16, #tpu.memory_space<vmem>>, %arg2: memref<4x32x512xbf16, #tpu.memory_space<vmem>>, %arg3: memref<1x512xf32, #tpu.memory_space<vmem>>, %arg4: memref<20x1xf32, #tpu.memory_space<vmem>>, %arg5: memref<1x20x512xbf16, #tpu.memory_space<vmem>>) attributes {dimension_semantics = [#tpu.dimension_semantics<parallel>], iteration_bounds = array<i64: 2>, scalar_prefetch = 0 : i64, scratch_operands = 0 : i64, tpu.core_type = #tpu.core_type<tc>, window_params = [{transform_indices = @transform_0, window_bounds = array<i64: 1, 32, 32>}, {pipeline_mode = #tpu.pipeline_mode<synchronous>, transform_indices = @transform_1, window_bounds = array<i64: 4, 32, 512>}, {pipeline_mode = #tpu.pipeline_mode<synchronous>, transform_indices = @transform_2, window_bounds = array<i64: 1, 512>}, {pipeline_mode = #tpu.pipeline_mode<synchronous>, transform_indices = @transform_3, window_bounds = array<i64: 20, 1>}, {transform_indices = @transform_4, window_bounds = array<i64: 1, 20, 512>}]} {
    %c0 = arith.constant 0 : index
    %c0_0 = arith.constant 0 : index
    %c0_1 = arith.constant 0 : index
    %0 = vector.load %arg1[%c0, %c0_0, %c0_1] : memref<1x32x32xbf16, #tpu.memory_space<vmem>>, vector<1x20x32xbf16>
    %1 = vector.shape_cast %0 : vector<1x20x32xbf16> to vector<20x32xbf16>
    %c0_2 = arith.constant 0 : index
    %c0_3 = arith.constant 0 : index
    %c0_4 = arith.constant 0 : index
    %2 = vector.load %arg2[%c0_2, %c0_3, %c0_4] : memref<4x32x512xbf16, #tpu.memory_space<vmem>>, vector<1x32x512xbf16>
    %3 = vector.shape_cast %2 : vector<1x32x512xbf16> to vector<32x512xbf16>
    %cst = arith.constant dense<0.000000e+00> : vector<20x512xf32>
    %4 = tpu.matmul %1, %3, %cst {dimension_numbers = #tpu.dot_dimension_numbers<[1], [0], [0], [1], [0, 0, 1, 1], [], []>} : vector<20x32xbf16>, vector<32x512xbf16>, vector<20x512xf32> -> vector<20x512xf32>
    %c0_5 = arith.constant 0 : index
    %c1 = arith.constant 1 : index
    %c0_6 = arith.constant 0 : index
    %5 = vector.load %arg1[%c0_5, %c1, %c0_6] : memref<1x32x32xbf16, #tpu.memory_space<vmem>>, vector<1x20x32xbf16>
    %6 = vector.shape_cast %5 : vector<1x20x32xbf16> to vector<20x32xbf16>
    %c1_7 = arith.constant 1 : index
    %c0_8 = arith.constant 0 : index
    %c0_9 = arith.constant 0 : index
    %7 = vector.load %arg2[%c1_7, %c0_8, %c0_9] : memref<4x32x512xbf16, #tpu.memory_space<vmem>>, vector<1x32x512xbf16>
    %8 = vector.shape_cast %7 : vector<1x32x512xbf16> to vector<32x512xbf16>
    %cst_10 = arith.constant dense<0.000000e+00> : vector<20x512xf32>
    %9 = tpu.matmul %6, %8, %cst_10 {dimension_numbers = #tpu.dot_dimension_numbers<[1], [0], [0], [1], [0, 0, 1, 1], [], []>} : vector<20x32xbf16>, vector<32x512xbf16>, vector<20x512xf32> -> vector<20x512xf32>
    %10 = arith.addf %4, %9 : vector<20x512xf32>
    %c0_11 = arith.constant 0 : index
    %c5 = arith.constant 5 : index
    %c0_12 = arith.constant 0 : index
    %11 = vector.load %arg1[%c0_11, %c5, %c0_12] : memref<1x32x32xbf16, #tpu.memory_space<vmem>>, vector<1x20x32xbf16>
    %12 = vector.shape_cast %11 : vector<1x20x32xbf16> to vector<20x32xbf16>
    %c2 = arith.constant 2 : index
    %c0_13 = arith.constant 0 : index
    %c0_14 = arith.constant 0 : index
    %13 = vector.load %arg2[%c2, %c0_13, %c0_14] : memref<4x32x512xbf16, #tpu.memory_space<vmem>>, vector<1x32x512xbf16>
    %14 = vector.shape_cast %13 : vector<1x32x512xbf16> to vector<32x512xbf16>
    %cst_15 = arith.constant dense<0.000000e+00> : vector<20x512xf32>
    %15 = tpu.matmul %12, %14, %cst_15 {dimension_numbers = #tpu.dot_dimension_numbers<[1], [0], [0], [1], [0, 0, 1, 1], [], []>} : vector<20x32xbf16>, vector<32x512xbf16>, vector<20x512xf32> -> vector<20x512xf32>
    %16 = arith.addf %10, %15 : vector<20x512xf32>
    %c0_16 = arith.constant 0 : index
    %c6 = arith.constant 6 : index
    %c0_17 = arith.constant 0 : index
    %17 = vector.load %arg1[%c0_16, %c6, %c0_17] : memref<1x32x32xbf16, #tpu.memory_space<vmem>>, vector<1x20x32xbf16>
    %18 = vector.shape_cast %17 : vector<1x20x32xbf16> to vector<20x32xbf16>
    %c3 = arith.constant 3 : index
    %c0_18 = arith.constant 0 : index
    %c0_19 = arith.constant 0 : index
    %19 = vector.load %arg2[%c3, %c0_18, %c0_19] : memref<4x32x512xbf16, #tpu.memory_space<vmem>>, vector<1x32x512xbf16>
    %20 = vector.shape_cast %19 : vector<1x32x512xbf16> to vector<32x512xbf16>
    %cst_20 = arith.constant dense<0.000000e+00> : vector<20x512xf32>
    %21 = tpu.matmul %18, %20, %cst_20 {dimension_numbers = #tpu.dot_dimension_numbers<[1], [0], [0], [1], [0, 0, 1, 1], [], []>} : vector<20x32xbf16>, vector<32x512xbf16>, vector<20x512xf32> -> vector<20x512xf32>
    %22 = arith.addf %16, %21 : vector<20x512xf32>
    %c0_21 = arith.constant 0 : index
    %c0_22 = arith.constant 0 : index
    %23 = vector.load %arg3[%c0_21, %c0_22] : memref<1x512xf32, #tpu.memory_space<vmem>>, vector<1x512xf32>
    %24 = vector.broadcast %23 : vector<1x512xf32> to vector<20x512xf32>
    %25 = arith.addf %22, %24 : vector<20x512xf32>
    %c0_23 = arith.constant 0 : index
    %c0_24 = arith.constant 0 : index
    %26 = vector.load %arg4[%c0_23, %c0_24] : memref<20x1xf32, #tpu.memory_space<vmem>>, vector<20x1xf32>
    %27 = vector.broadcast %26 : vector<20x1xf32> to vector<20x512xf32>
    %28 = arith.mulf %25, %27 : vector<20x512xf32>
    %cst_25 = arith.constant dense<0.000000e+00> : vector<512xf32>
    %29 = vector.multi_reduction <add>, %28, %cst_25 [0] : vector<20x512xf32> to vector<512xf32>
    %30 = vector.shape_cast %29 : vector<512xf32> to vector<1x512xf32>
    %31 = vector.extract_strided_slice %30 {offsets = [0, 0], sizes = [1, 128], strides = [1, 1]} : vector<1x512xf32> to vector<1x128xf32>
    %32 = vector.extract_strided_slice %30 {offsets = [0, 128], sizes = [1, 128], strides = [1, 1]} : vector<1x512xf32> to vector<1x128xf32>
    %33 = arith.addf %31, %32 : vector<1x128xf32>
    %34 = vector.extract_strided_slice %30 {offsets = [0, 256], sizes = [1, 128], strides = [1, 1]} : vector<1x512xf32> to vector<1x128xf32>
    %35 = arith.addf %33, %34 : vector<1x128xf32>
    %36 = vector.extract_strided_slice %30 {offsets = [0, 384], sizes = [1, 128], strides = [1, 1]} : vector<1x512xf32> to vector<1x128xf32>
    %37 = arith.addf %35, %36 : vector<1x128xf32>
    %cst_26 = arith.constant 1.562500e-02 : f32
    %38 = vector.broadcast %cst_26 : f32 to vector<1x128xf32>
    %39 = arith.mulf %37, %38 : vector<1x128xf32>
    %40 = tpu.concatenate %39, %39, %39, %39 in 1 : vector<1x128xf32>, vector<1x128xf32>, vector<1x128xf32>, vector<1x128xf32> -> vector<1x512xf32>
    %41 = vector.broadcast %40 : vector<1x512xf32> to vector<20x512xf32>
    %42 = arith.subf %25, %41 : vector<20x512xf32>
    %43 = arith.mulf %42, %42 : vector<20x512xf32>
    %44 = vector.broadcast %26 : vector<20x1xf32> to vector<20x512xf32>
    %45 = arith.mulf %43, %44 : vector<20x512xf32>
    %cst_27 = arith.constant dense<0.000000e+00> : vector<512xf32>
    %46 = vector.multi_reduction <add>, %45, %cst_27 [0] : vector<20x512xf32> to vector<512xf32>
    %47 = vector.shape_cast %46 : vector<512xf32> to vector<1x512xf32>
    %48 = vector.extract_strided_slice %47 {offsets = [0, 0], sizes = [1, 128], strides = [1, 1]} : vector<1x512xf32> to vector<1x128xf32>
    %49 = vector.extract_strided_slice %47 {offsets = [0, 128], sizes = [1, 128], strides = [1, 1]} : vector<1x512xf32> to vector<1x128xf32>
    %50 = arith.addf %48, %49 : vector<1x128xf32>
    %51 = vector.extract_strided_slice %47 {offsets = [0, 256], sizes = [1, 128], strides = [1, 1]} : vector<1x512xf32> to vector<1x128xf32>
    %52 = arith.addf %50, %51 : vector<1x128xf32>
    %53 = vector.extract_strided_slice %47 {offsets = [0, 384], sizes = [1, 128], strides = [1, 1]} : vector<1x512xf32> to vector<1x128xf32>
    %54 = arith.addf %52, %53 : vector<1x128xf32>
    %cst_28 = arith.constant 1.562500e-02 : f32
    %55 = vector.broadcast %cst_28 : f32 to vector<1x128xf32>
    %56 = arith.mulf %54, %55 : vector<1x128xf32>
    %57 = tpu.concatenate %56, %56, %56, %56 in 1 : vector<1x128xf32>, vector<1x128xf32>, vector<1x128xf32>, vector<1x128xf32> -> vector<1x512xf32>
    %cst_29 = arith.constant 9.99999974E-6 : f32
    %58 = vector.broadcast %cst_29 : f32 to vector<1x512xf32>
    %59 = arith.addf %57, %58 : vector<1x512xf32>
    %60 = math.rsqrt %59 : vector<1x512xf32>
    %61 = vector.broadcast %60 : vector<1x512xf32> to vector<20x512xf32>
    %62 = arith.mulf %42, %61 : vector<20x512xf32>
    %cst_30 = arith.constant 0.000000e+00 : f32
    %63 = vector.broadcast %cst_30 : f32 to vector<20x512xf32>
    %64 = arith.maximumf %62, %63 : vector<20x512xf32>
    %65 = arith.truncf %64 : vector<20x512xf32> to vector<20x512xbf16>
    %c0_31 = arith.constant 0 : index
    %c0_32 = arith.constant 0 : index
    %c0_33 = arith.constant 0 : index
    %66 = vector.load %arg5[%c0_31, %c0_32, %c0_33] : memref<1x20x512xbf16, #tpu.memory_space<vmem>>, vector<1x20x512xbf16>
    %67 = vector.shape_cast %66 : vector<1x20x512xbf16> to vector<20x512xbf16>
    %68 = vector.shape_cast %65 : vector<20x512xbf16> to vector<1x20x512xbf16>
    tpu.vector_store %arg5[%c0_31, %c0_32, %c0_33], %68 {strides = array<i32>} : memref<1x20x512xbf16, #tpu.memory_space<vmem>>, vector<1x20x512xbf16>,
    return
  }
  func.func @transform_0(%arg0: i32) -> (i32, i32, i32) {
    %c0_i32 = arith.constant 0 : i32
    %c0_i32_0 = arith.constant 0 : i32
    %c0_i32_1 = arith.constant 0 : i32
    return %arg0, %c0_i32, %c0_i32_0 : i32, i32, i32
  }
  func.func @transform_1(%arg0: i32) -> (i32, i32, i32) {
    %c0_i32 = arith.constant 0 : i32
    %c0_i32_0 = arith.constant 0 : i32
    %c0_i32_1 = arith.constant 0 : i32
    %c0_i32_2 = arith.constant 0 : i32
    return %c0_i32, %c0_i32_0, %c0_i32_1 : i32, i32, i32
  }
  func.func @transform_2(%arg0: i32) -> (i32, i32) {
    %c0_i32 = arith.constant 0 : i32
    %c0_i32_0 = arith.constant 0 : i32
    %c0_i32_1 = arith.constant 0 : i32
    return %c0_i32, %c0_i32_0 : i32, i32
  }
  func.func @transform_3(%arg0: i32) -> (i32, i32) {
    %c0_i32 = arith.constant 0 : i32
    %c0_i32_0 = arith.constant 0 : i32
    %c0_i32_1 = arith.constant 0 : i32
    return %c0_i32, %c0_i32_0 : i32, i32
  }
  func.func @transform_4(%arg0: i32) -> (i32, i32, i32) {
    %c0_i32 = arith.constant 0 : i32
    %c0_i32_0 = arith.constant 0 : i32
    %c0_i32_1 = arith.constant 0 : i32
    return %arg0, %c0_i32, %c0_i32_0 : i32, i32, i32
  }
}

module attributes {stable_mosaic.version = 11 : i64} {
  func.func @_tap_conv_kernel(%arg0: i32, %arg1: memref<1x88x16xbf16, #tpu.memory_space<vmem>>, %arg2: memref<4x16x512xbf16, #tpu.memory_space<vmem>>, %arg3: memref<1x512xf32, #tpu.memory_space<vmem>>, %arg4: memref<72x1xf32, #tpu.memory_space<vmem>>, %arg5: memref<1x72x512xbf16, #tpu.memory_space<vmem>>) attributes {dimension_semantics = [#tpu.dimension_semantics<parallel>], iteration_bounds = array<i64: 2>, scalar_prefetch = 0 : i64, scratch_operands = 0 : i64, tpu.core_type = #tpu.core_type<tc>, window_params = [{transform_indices = @transform_0, window_bounds = array<i64: 1, 88, 16>}, {pipeline_mode = #tpu.pipeline_mode<synchronous>, transform_indices = @transform_1, window_bounds = array<i64: 4, 16, 512>}, {pipeline_mode = #tpu.pipeline_mode<synchronous>, transform_indices = @transform_2, window_bounds = array<i64: 1, 512>}, {pipeline_mode = #tpu.pipeline_mode<synchronous>, transform_indices = @transform_3, window_bounds = array<i64: 72, 1>}, {transform_indices = @transform_4, window_bounds = array<i64: 1, 72, 512>}]} {
    %c0 = arith.constant 0 : index
    %c0_0 = arith.constant 0 : index
    %c0_1 = arith.constant 0 : index
    %0 = vector.load %arg1[%c0, %c0_0, %c0_1] : memref<1x88x16xbf16, #tpu.memory_space<vmem>>, vector<1x72x16xbf16>
    %1 = vector.shape_cast %0 : vector<1x72x16xbf16> to vector<72x16xbf16>
    %c0_2 = arith.constant 0 : index
    %c0_3 = arith.constant 0 : index
    %c0_4 = arith.constant 0 : index
    %2 = vector.load %arg2[%c0_2, %c0_3, %c0_4] : memref<4x16x512xbf16, #tpu.memory_space<vmem>>, vector<1x16x512xbf16>
    %3 = vector.shape_cast %2 : vector<1x16x512xbf16> to vector<16x512xbf16>
    %cst = arith.constant dense<0.000000e+00> : vector<72x512xf32>
    %4 = tpu.matmul %1, %3, %cst {dimension_numbers = #tpu.dot_dimension_numbers<[1], [0], [0], [1], [0, 0, 1, 1], [], []>} : vector<72x16xbf16>, vector<16x512xbf16>, vector<72x512xf32> -> vector<72x512xf32>
    %c0_5 = arith.constant 0 : index
    %c1 = arith.constant 1 : index
    %c0_6 = arith.constant 0 : index
    %5 = vector.load %arg1[%c0_5, %c1, %c0_6] : memref<1x88x16xbf16, #tpu.memory_space<vmem>>, vector<1x72x16xbf16>
    %6 = vector.shape_cast %5 : vector<1x72x16xbf16> to vector<72x16xbf16>
    %c1_7 = arith.constant 1 : index
    %c0_8 = arith.constant 0 : index
    %c0_9 = arith.constant 0 : index
    %7 = vector.load %arg2[%c1_7, %c0_8, %c0_9] : memref<4x16x512xbf16, #tpu.memory_space<vmem>>, vector<1x16x512xbf16>
    %8 = vector.shape_cast %7 : vector<1x16x512xbf16> to vector<16x512xbf16>
    %cst_10 = arith.constant dense<0.000000e+00> : vector<72x512xf32>
    %9 = tpu.matmul %6, %8, %cst_10 {dimension_numbers = #tpu.dot_dimension_numbers<[1], [0], [0], [1], [0, 0, 1, 1], [], []>} : vector<72x16xbf16>, vector<16x512xbf16>, vector<72x512xf32> -> vector<72x512xf32>
    %10 = arith.addf %4, %9 : vector<72x512xf32>
    %c0_11 = arith.constant 0 : index
    %c9 = arith.constant 9 : index
    %c0_12 = arith.constant 0 : index
    %11 = vector.load %arg1[%c0_11, %c9, %c0_12] : memref<1x88x16xbf16, #tpu.memory_space<vmem>>, vector<1x72x16xbf16>
    %12 = vector.shape_cast %11 : vector<1x72x16xbf16> to vector<72x16xbf16>
    %c2 = arith.constant 2 : index
    %c0_13 = arith.constant 0 : index
    %c0_14 = arith.constant 0 : index
    %13 = vector.load %arg2[%c2, %c0_13, %c0_14] : memref<4x16x512xbf16, #tpu.memory_space<vmem>>, vector<1x16x512xbf16>
    %14 = vector.shape_cast %13 : vector<1x16x512xbf16> to vector<16x512xbf16>
    %cst_15 = arith.constant dense<0.000000e+00> : vector<72x512xf32>
    %15 = tpu.matmul %12, %14, %cst_15 {dimension_numbers = #tpu.dot_dimension_numbers<[1], [0], [0], [1], [0, 0, 1, 1], [], []>} : vector<72x16xbf16>, vector<16x512xbf16>, vector<72x512xf32> -> vector<72x512xf32>
    %16 = arith.addf %10, %15 : vector<72x512xf32>
    %c0_16 = arith.constant 0 : index
    %c10 = arith.constant 10 : index
    %c0_17 = arith.constant 0 : index
    %17 = vector.load %arg1[%c0_16, %c10, %c0_17] : memref<1x88x16xbf16, #tpu.memory_space<vmem>>, vector<1x72x16xbf16>
    %18 = vector.shape_cast %17 : vector<1x72x16xbf16> to vector<72x16xbf16>
    %c3 = arith.constant 3 : index
    %c0_18 = arith.constant 0 : index
    %c0_19 = arith.constant 0 : index
    %19 = vector.load %arg2[%c3, %c0_18, %c0_19] : memref<4x16x512xbf16, #tpu.memory_space<vmem>>, vector<1x16x512xbf16>
    %20 = vector.shape_cast %19 : vector<1x16x512xbf16> to vector<16x512xbf16>
    %cst_20 = arith.constant dense<0.000000e+00> : vector<72x512xf32>
    %21 = tpu.matmul %18, %20, %cst_20 {dimension_numbers = #tpu.dot_dimension_numbers<[1], [0], [0], [1], [0, 0, 1, 1], [], []>} : vector<72x16xbf16>, vector<16x512xbf16>, vector<72x512xf32> -> vector<72x512xf32>
    %22 = arith.addf %16, %21 : vector<72x512xf32>
    %c0_21 = arith.constant 0 : index
    %c0_22 = arith.constant 0 : index
    %23 = vector.load %arg3[%c0_21, %c0_22] : memref<1x512xf32, #tpu.memory_space<vmem>>, vector<1x512xf32>
    %24 = vector.broadcast %23 : vector<1x512xf32> to vector<72x512xf32>
    %25 = arith.addf %22, %24 : vector<72x512xf32>
    %c0_23 = arith.constant 0 : index
    %c0_24 = arith.constant 0 : index
    %26 = vector.load %arg4[%c0_23, %c0_24] : memref<72x1xf32, #tpu.memory_space<vmem>>, vector<72x1xf32>
    %27 = vector.broadcast %26 : vector<72x1xf32> to vector<72x512xf32>
    %28 = arith.mulf %25, %27 : vector<72x512xf32>
    %cst_25 = arith.constant dense<0.000000e+00> : vector<512xf32>
    %29 = vector.multi_reduction <add>, %28, %cst_25 [0] : vector<72x512xf32> to vector<512xf32>
    %30 = vector.shape_cast %29 : vector<512xf32> to vector<1x512xf32>
    %31 = vector.extract_strided_slice %30 {offsets = [0, 0], sizes = [1, 128], strides = [1, 1]} : vector<1x512xf32> to vector<1x128xf32>
    %32 = vector.extract_strided_slice %30 {offsets = [0, 128], sizes = [1, 128], strides = [1, 1]} : vector<1x512xf32> to vector<1x128xf32>
    %33 = arith.addf %31, %32 : vector<1x128xf32>
    %34 = vector.extract_strided_slice %30 {offsets = [0, 256], sizes = [1, 128], strides = [1, 1]} : vector<1x512xf32> to vector<1x128xf32>
    %35 = arith.addf %33, %34 : vector<1x128xf32>
    %36 = vector.extract_strided_slice %30 {offsets = [0, 384], sizes = [1, 128], strides = [1, 1]} : vector<1x512xf32> to vector<1x128xf32>
    %37 = arith.addf %35, %36 : vector<1x128xf32>
    %cst_26 = arith.constant 3.906250e-03 : f32
    %38 = vector.broadcast %cst_26 : f32 to vector<1x128xf32>
    %39 = arith.mulf %37, %38 : vector<1x128xf32>
    %40 = tpu.concatenate %39, %39, %39, %39 in 1 : vector<1x128xf32>, vector<1x128xf32>, vector<1x128xf32>, vector<1x128xf32> -> vector<1x512xf32>
    %41 = vector.broadcast %40 : vector<1x512xf32> to vector<72x512xf32>
    %42 = arith.subf %25, %41 : vector<72x512xf32>
    %43 = arith.mulf %42, %42 : vector<72x512xf32>
    %44 = vector.broadcast %26 : vector<72x1xf32> to vector<72x512xf32>
    %45 = arith.mulf %43, %44 : vector<72x512xf32>
    %cst_27 = arith.constant dense<0.000000e+00> : vector<512xf32>
    %46 = vector.multi_reduction <add>, %45, %cst_27 [0] : vector<72x512xf32> to vector<512xf32>
    %47 = vector.shape_cast %46 : vector<512xf32> to vector<1x512xf32>
    %48 = vector.extract_strided_slice %47 {offsets = [0, 0], sizes = [1, 128], strides = [1, 1]} : vector<1x512xf32> to vector<1x128xf32>
    %49 = vector.extract_strided_slice %47 {offsets = [0, 128], sizes = [1, 128], strides = [1, 1]} : vector<1x512xf32> to vector<1x128xf32>
    %50 = arith.addf %48, %49 : vector<1x128xf32>
    %51 = vector.extract_strided_slice %47 {offsets = [0, 256], sizes = [1, 128], strides = [1, 1]} : vector<1x512xf32> to vector<1x128xf32>
    %52 = arith.addf %50, %51 : vector<1x128xf32>
    %53 = vector.extract_strided_slice %47 {offsets = [0, 384], sizes = [1, 128], strides = [1, 1]} : vector<1x512xf32> to vector<1x128xf32>
    %54 = arith.addf %52, %53 : vector<1x128xf32>
    %cst_28 = arith.constant 3.906250e-03 : f32
    %55 = vector.broadcast %cst_28 : f32 to vector<1x128xf32>
    %56 = arith.mulf %54, %55 : vector<1x128xf32>
    %57 = tpu.concatenate %56, %56, %56, %56 in 1 : vector<1x128xf32>, vector<1x128xf32>, vector<1x128xf32>, vector<1x128xf32> -> vector<1x512xf32>
    %cst_29 = arith.constant 9.99999974E-6 : f32
    %58 = vector.broadcast %cst_29 : f32 to vector<1x512xf32>
    %59 = arith.addf %57, %58 : vector<1x512xf32>
    %60 = math.rsqrt %59 : vector<1x512xf32>
    %61 = vector.broadcast %60 : vector<1x512xf32> to vector<72x512xf32>
    %62 = arith.mulf %42, %61 : vector<72x512xf32>
    %cst_30 = arith.constant 0.000000e+00 : f32
    %63 = vector.broadcast %cst_30 : f32 to vector<72x512xf32>
    %64 = arith.maximumf %62, %63 : vector<72x512xf32>
    %65 = arith.truncf %64 : vector<72x512xf32> to vector<72x512xbf16>
    %c0_31 = arith.constant 0 : index
    %c0_32 = arith.constant 0 : index
    %c0_33 = arith.constant 0 : index
    %66 = vector.load %arg5[%c0_31, %c0_32, %c0_33] : memref<1x72x512xbf16, #tpu.memory_space<vmem>>, vector<1x72x512xbf16>
    %67 = vector.shape_cast %66 : vector<1x72x512xbf16> to vector<72x512xbf16>
    %68 = vector.shape_cast %65 : vector<72x512xbf16> to vector<1x72x512xbf16>
    tpu.vector_store %arg5[%c0_31, %c0_32, %c0_33], %68 {strides = array<i32>} : memref<1x72x512xbf16, #tpu.memory_space<vmem>>, vector<1x72x512xbf16>,
    return
  }
  func.func @transform_0(%arg0: i32) -> (i32, i32, i32) {
    %c0_i32 = arith.constant 0 : i32
    %c0_i32_0 = arith.constant 0 : i32
    %c0_i32_1 = arith.constant 0 : i32
    return %arg0, %c0_i32, %c0_i32_0 : i32, i32, i32
  }
  func.func @transform_1(%arg0: i32) -> (i32, i32, i32) {
    %c0_i32 = arith.constant 0 : i32
    %c0_i32_0 = arith.constant 0 : i32
    %c0_i32_1 = arith.constant 0 : i32
    %c0_i32_2 = arith.constant 0 : i32
    return %c0_i32, %c0_i32_0, %c0_i32_1 : i32, i32, i32
  }
  func.func @transform_2(%arg0: i32) -> (i32, i32) {
    %c0_i32 = arith.constant 0 : i32
    %c0_i32_0 = arith.constant 0 : i32
    %c0_i32_1 = arith.constant 0 : i32
    return %c0_i32, %c0_i32_0 : i32, i32
  }
  func.func @transform_3(%arg0: i32) -> (i32, i32) {
    %c0_i32 = arith.constant 0 : i32
    %c0_i32_0 = arith.constant 0 : i32
    %c0_i32_1 = arith.constant 0 : i32
    return %c0_i32, %c0_i32_0 : i32, i32
  }
  func.func @transform_4(%arg0: i32) -> (i32, i32, i32) {
    %c0_i32 = arith.constant 0 : i32
    %c0_i32_0 = arith.constant 0 : i32
    %c0_i32_1 = arith.constant 0 : i32
    return %arg0, %c0_i32, %c0_i32_0 : i32, i32, i32
  }
}

module attributes {stable_mosaic.version = 11 : i64} {
  func.func @_im2col_conv_kernel(%arg0: i32, %arg1: i32, %arg2: memref<1x256x128xbf16, #tpu.memory_space<vmem>>, %arg3: memref<128x128xbf16, #tpu.memory_space<vmem>>, %arg4: memref<1x128xf32, #tpu.memory_space<vmem>>, %arg5: memref<1x256x128xbf16, #tpu.memory_space<vmem>>, %arg6: memref<256x128xf32, #tpu.memory_space<vmem>>) attributes {dimension_semantics = [#tpu.dimension_semantics<parallel>, #tpu.dimension_semantics<arbitrary>], iteration_bounds = array<i64: 2, 4>, scalar_prefetch = 0 : i64, scratch_operands = 1 : i64, tpu.core_type = #tpu.core_type<tc>, window_params = [{transform_indices = @transform_0, window_bounds = array<i64: 1, 256, 128>}, {transform_indices = @transform_1, window_bounds = array<i64: 128, 128>}, {pipeline_mode = #tpu.pipeline_mode<synchronous>, transform_indices = @transform_2, window_bounds = array<i64: 1, 128>}, {transform_indices = @transform_3, window_bounds = array<i64: 1, 256, 128>}]} {
    %c0_i32 = arith.constant 0 : i32
    %0 = arith.cmpi eq, %arg1, %c0_i32 : i32
    %1 = arith.extui %0 : i1 to i32
    %c0_i32_0 = arith.constant 0 : i32
    %2 = arith.cmpi ne, %1, %c0_i32_0 : i32
    scf.if %2 {
      %cst_10 = arith.constant 0.000000e+00 : f32
      %13 = vector.broadcast %cst_10 : f32 to vector<256x128xf32>
      %c0_11 = arith.constant 0 : index
      %c0_12 = arith.constant 0 : index
      %14 = vector.load %arg6[%c0_11, %c0_12] : memref<256x128xf32, #tpu.memory_space<vmem>>, vector<256x128xf32>
      tpu.vector_store %arg6[%c0_11, %c0_12], %13 {strides = array<i32>} : memref<256x128xf32, #tpu.memory_space<vmem>>, vector<256x128xf32>,
    } else {
    }
    %c0 = arith.constant 0 : index
    %c0_1 = arith.constant 0 : index
    %3 = vector.load %arg6[%c0, %c0_1] : memref<256x128xf32, #tpu.memory_space<vmem>>, vector<256x128xf32>
    %c0_2 = arith.constant 0 : index
    %c0_3 = arith.constant 0 : index
    %c0_4 = arith.constant 0 : index
    %4 = vector.load %arg2[%c0_2, %c0_3, %c0_4] : memref<1x256x128xbf16, #tpu.memory_space<vmem>>, vector<1x256x128xbf16>
    %5 = vector.shape_cast %4 : vector<1x256x128xbf16> to vector<256x128xbf16>
    %c0_5 = arith.constant 0 : index
    %c0_6 = arith.constant 0 : index
    %6 = vector.load %arg3[%c0_5, %c0_6] : memref<128x128xbf16, #tpu.memory_space<vmem>>, vector<128x128xbf16>
    %cst = arith.constant dense<0.000000e+00> : vector<256x128xf32>
    %7 = tpu.matmul %5, %6, %cst {dimension_numbers = #tpu.dot_dimension_numbers<[1], [0], [0], [1], [0, 0, 1, 1], [], []>} : vector<256x128xbf16>, vector<128x128xbf16>, vector<256x128xf32> -> vector<256x128xf32>
    %8 = arith.addf %3, %7 : vector<256x128xf32>
    %c0_7 = arith.constant 0 : index
    %c0_8 = arith.constant 0 : index
    %9 = vector.load %arg6[%c0_7, %c0_8] : memref<256x128xf32, #tpu.memory_space<vmem>>, vector<256x128xf32>
    tpu.vector_store %arg6[%c0_7, %c0_8], %8 {strides = array<i32>} : memref<256x128xf32, #tpu.memory_space<vmem>>, vector<256x128xf32>,
    %c3_i32 = arith.constant 3 : i32
    %10 = arith.cmpi eq, %arg1, %c3_i32 : i32
    %11 = arith.extui %10 : i1 to i32
    %c0_i32_9 = arith.constant 0 : i32
    %12 = arith.cmpi ne, %11, %c0_i32_9 : i32
    scf.if %12 {
      %c0_10 = arith.constant 0 : index
      %c0_11 = arith.constant 0 : index
      %13 = vector.load %arg6[%c0_10, %c0_11] : memref<256x128xf32, #tpu.memory_space<vmem>>, vector<256x128xf32>
      %c0_12 = arith.constant 0 : index
      %c0_13 = arith.constant 0 : index
      %14 = vector.load %arg4[%c0_12, %c0_13] : memref<1x128xf32, #tpu.memory_space<vmem>>, vector<1x128xf32>
      %15 = vector.broadcast %14 : vector<1x128xf32> to vector<256x128xf32>
      %16 = arith.addf %13, %15 : vector<256x128xf32>
      %17 = math.tanh %16 : vector<256x128xf32>
      %18 = arith.truncf %17 : vector<256x128xf32> to vector<256x128xbf16>
      %c0_14 = arith.constant 0 : index
      %c0_15 = arith.constant 0 : index
      %c0_16 = arith.constant 0 : index
      %19 = vector.load %arg5[%c0_14, %c0_15, %c0_16] : memref<1x256x128xbf16, #tpu.memory_space<vmem>>, vector<1x256x128xbf16>
      %20 = vector.shape_cast %19 : vector<1x256x128xbf16> to vector<256x128xbf16>
      %21 = vector.shape_cast %18 : vector<256x128xbf16> to vector<1x256x128xbf16>
      tpu.vector_store %arg5[%c0_14, %c0_15, %c0_16], %21 {strides = array<i32>} : memref<1x256x128xbf16, #tpu.memory_space<vmem>>, vector<1x256x128xbf16>,
    } else {
    }
    return
  }
  func.func @transform_0(%arg0: i32, %arg1: i32) -> (i32, i32, i32) {
    %c0_i32 = arith.constant 0 : i32
    %c0_i32_0 = arith.constant 0 : i32
    return %arg0, %c0_i32, %arg1 : i32, i32, i32
  }
  func.func @transform_1(%arg0: i32, %arg1: i32) -> (i32, i32) {
    %c0_i32 = arith.constant 0 : i32
    %c0_i32_0 = arith.constant 0 : i32
    return %arg1, %c0_i32 : i32, i32
  }
  func.func @transform_2(%arg0: i32, %arg1: i32) -> (i32, i32) {
    %c0_i32 = arith.constant 0 : i32
    %c0_i32_0 = arith.constant 0 : i32
    %c0_i32_1 = arith.constant 0 : i32
    return %c0_i32, %c0_i32_0 : i32, i32
  }
  func.func @transform_3(%arg0: i32, %arg1: i32) -> (i32, i32, i32) {
    %c0_i32 = arith.constant 0 : i32
    %c0_i32_0 = arith.constant 0 : i32
    %c0_i32_1 = arith.constant 0 : i32
    return %arg0, %c0_i32, %c0_i32_0 : i32, i32, i32
  }
}

</mosaic_0001>

<bundles_post_ra>
// kernel: global_generator_forward.10
= control target key start
LH: loop header
LB: loop body
LE: loop exit
PB: predicated region body
PF: predicated region fallthrough
CT: control target
= control target key end

     0   :  { %s1837_s12 = smov 0   ;;  %s1839_s13 = smov 0   ;;  %s2439_s0 = inlined_call_operand.vmem [shape: bf16[2,256,256], index: 0, kind: input, shape index: {}]   ;;  %s2440_s1 = inlined_call_operand.vmem [shape: bf16[256,128], index: 1, kind: input, shape index: {}]   ;;  %s2441_s2 = inlined_call_operand.vmem [shape: f32[1,128], index: 2, kind: input, shape index: {}]   ;;  %s2442_s3 = inlined_call_operand.vmem [shape: bf16[2,256,128], index: 3, kind: output, shape index: {}]  }
   0x1   :  { %s1841_s14 = smov 0   ;;  %s1843_s15 = smov 0  }
   0x2   :  { %s1845_s16 = smov 0   ;;  %s1847_s17 = smov 0  }
   0x3   :  { %s1849_s18 = smov 0  }
   0x4 LB: > { %s22_s19 = sadd.s32 1, %s1806_s16  ;;  %s25_s20 = sadd.s32 1, %s1810_s17  ;;  %s1814_s18 = sphi %s1849_s18, %s13_s18   ;;  %s1810_s17 = sphi %s1847_s17, %s2448_s17   ;;  %s1806_s16 = sphi %s1845_s16, %s2447_s16   ;;  %s1802_s15 = sphi %s1843_s15, %s2446_s15   ;;  %s1798_s14 = sphi %s1841_s14, %s2445_s14   ;;  %s1794_s13 = sphi %s1839_s13, %s2444_s13   ;;  %s1790_s12 = sphi %s1837_s12, %s2443_s12  }
   0x5   : > { %p23_p0 = scmp.ge.s32.totalorder %s22_s19, 2  ;;  %p41_p1 = scmp.ne.s32.totalorder %s1794_s13, %s1790_s12 }
   0x6   : > { %p42_p2 = scmp.eq.s32.totalorder %s1814_s18, 0  ;;  %s34_s24 = sadd.s32 1, %s1794_s13 }
   0x7   : > { %s2450_s19 = smov (%p23_p0, %s22_s19), 0  ;;  %s2452_s20 = smov (!%p23_p0, %s25_s20), %s1810_s17 }
   0x8   : > { %p43_p3 = por %p42_p2, %p41_p1  ;;  %p27_p4 = scmp.ge.s32.totalorder %s2452_s20, 2 }
   0x9   : > { %s30_s21 = ssub.s32 %s1806_s16, %s2450_s19  ;;  %p1390_p6 = scmp.ge.s32.totalorder %s1814_s18, 4 }
   0xa   : > { %s2454_s20 = smov (%p27_p4, %s2452_s20), 0 }
   0xb   : > { %s29_s22 = ssub.s32 %s1810_s17, %s2454_s20  ;;  %143 = sbr.rel (%p1390_p6) target bundleno = 45 (0x2d), region = 20 }
   0xc   : > { %s31_s23 = sor.u32 %s30_s21, %s29_s22 }
   0xd   : > { %p32_p5 = scmp.eq.s32.totalorder %s31_s23, 0 }
   0xf   : > { %s1888_s25 = scalar_select %p32_p5, %s1794_s13, %s34_s24  }
  0x12   : > { %146 = sbr.rel (!%p43_p3) target bundleno = 45 (0x2d), region = 24  ;;  %s148_s26 = sand.u32 (%p43_p3), 1, %s1794_s13  }
  0x13   : > { %s1392_s27 = sshll.u32 (%p43_p3), %s1810_s17, 6  ;;  %s1391_s28 = sshll.u32 (%p43_p3), %s148_s26, 7 }
  0x14   : > { %s152_s29 = sadd.s32 (%p43_p3), %s1806_s16, %s1392_s27  ;;  %s1902_s7 = scalar_lea.vmem (%p43_p3), [#allocation3], %s1391_s28 }
  0x15   : > { %s1393_s30 = sshll.u32 (%p43_p3), %s152_s29, 2 }
  0x16   : > { %s1897_s6 = scalar_lea.vmem (%p43_p3), %s2439_s0, %s1393_s30 }
  0x17   : > { %v170_v0 = vld [vmem:[%s1897_s6] sm:$0xf] (%p43_p3)  ;;  %v172_v1 = vld [vmem:[%s1897_s6 + $0x8] sm:$0xf] (%p43_p3)  ;;  %v174_v2 = vld [vmem:[%s1897_s6 + $0x10] sm:$0xf] (%p43_p3) }
  0x18   : > { %171 = vst [vmem:[%s1902_s7] sm:$0xf] (%p43_p3), %v170_v0  ;;  %173 = vst [vmem:[%s1902_s7 + $0x4] sm:$0xf] (%p43_p3), %v172_v1  ;;  %v176_v3 = vld [vmem:[%s1897_s6 + $0x18] sm:$0xf] (%p43_p3) }
  0x19   : > { %175 = vst [vmem:[%s1902_s7 + $0x8] sm:$0xf] %v174_v2  ;;  %v178_v4 = vld [vmem:[%s1897_s6 + $0x20] sm:$0xf]  ;;  %v180_v5 = vld [vmem:[%s1897_s6 + $0x28] sm:$0xf] }
  0x1a   : > { %177 = vst [vmem:[%s1902_s7 + $0xc] sm:$0xf] %v176_v3  ;;  %179 = vst [vmem:[%s1902_s7 + $0x10] sm:$0xf] %v178_v4  ;;  %v182_v6 = vld [vmem:[%s1897_s6 + $0x30] sm:$0xf] }
  0x1b   : > { %181 = vst [vmem:[%s1902_s7 + $0x14] sm:$0xf] %v180_v5  ;;  %v184_v7 = vld [vmem:[%s1897_s6 + $0x38] sm:$0xf]  ;;  %v186_v8 = vld [vmem:[%s1897_s6 + $0x40] sm:$0xf] }
  0x1c   : > { %183 = vst [vmem:[%s1902_s7 + $0x18] sm:$0xf] %v182_v6  ;;  %185 = vst [vmem:[%s1902_s7 + $0x1c] sm:$0xf] %v184_v7  ;;  %v188_v9 = vld [vmem:[%s1897_s6 + $0x48] sm:$0xf] }
  0x1d   : > { %187 = vst [vmem:[%s1902_s7 + $0x20] sm:$0xf] %v186_v8  ;;  %v190_v10 = vld [vmem:[%s1897_s6 + $0x50] sm:$0xf]  ;;  %v192_v11 = vld [vmem:[%s1897_s6 + $0x58] sm:$0xf] }
  0x1e   : > { %189 = vst [vmem:[%s1902_s7 + $0x24] sm:$0xf] %v188_v9  ;;  %191 = vst [vmem:[%s1902_s7 + $0x28] sm:$0xf] %v190_v10  ;;  %v194_v12 = vld [vmem:[%s1897_s6 + $0x60] sm:$0xf] }
  0x1f   : > { %193 = vst [vmem:[%s1902_s7 + $0x2c] sm:$0xf] %v192_v11  ;;  %v196_v13 = vld [vmem:[%s1897_s6 + $0x68] sm:$0xf]  ;;  %v198_v14 = vld [vmem:[%s1897_s6 + $0x70] sm:$0xf] }
  0x20   : > { %195 = vst [vmem:[%s1902_s7 + $0x30] sm:$0xf] %v194_v12  ;;  %197 = vst [vmem:[%s1902_s7 + $0x34] sm:$0xf] %v196_v13  ;;  %v200_v15 = vld [vmem:[%s1897_s6 + $0x78] sm:$0xf] }
  0x21   : > { %199 = vst [vmem:[%s1902_s7 + $0x38] sm:$0xf] %v198_v14  ;;  %v202_v16 = vld [vmem:[%s1897_s6 + $0x80] sm:$0xf]  ;;  %v204_v17 = vld [vmem:[%s1897_s6 + $0x88] sm:$0xf] }
  0x22   : > { %201 = vst [vmem:[%s1902_s7 + $0x3c] sm:$0xf] %v200_v15  ;;  %203 = vst [vmem:[%s1902_s7 + $0x40] sm:$0xf] %v202_v16  ;;  %v206_v18 = vld [vmem:[%s1897_s6 + $0x90] sm:$0xf] }
  0x23   : > { %205 = vst [vmem:[%s1902_s7 + $0x44] sm:$0xf] %v204_v17  ;;  %v208_v19 = vld [vmem:[%s1897_s6 + $0x98] sm:$0xf]  ;;  %v210_v20 = vld [vmem:[%s1897_s6 + $0xa0] sm:$0xf] }
  0x24   : > { %207 = vst [vmem:[%s1902_s7 + $0x48] sm:$0xf] %v206_v18  ;;  %209 = vst [vmem:[%s1902_s7 + $0x4c] sm:$0xf] %v208_v19  ;;  %v212_v21 = vld [vmem:[%s1897_s6 + $0xa8] sm:$0xf] }
  0x25   : > { %211 = vst [vmem:[%s1902_s7 + $0x50] sm:$0xf] %v210_v20  ;;  %v214_v22 = vld [vmem:[%s1897_s6 + $0xb0] sm:$0xf]  ;;  %v216_v23 = vld [vmem:[%s1897_s6 + $0xb8] sm:$0xf] }
  0x26   : > { %213 = vst [vmem:[%s1902_s7 + $0x54] sm:$0xf] %v212_v21  ;;  %215 = vst [vmem:[%s1902_s7 + $0x58] sm:$0xf] %v214_v22  ;;  %v218_v24 = vld [vmem:[%s1897_s6 + $0xc0] sm:$0xf] }
  0x27   : > { %217 = vst [vmem:[%s1902_s7 + $0x5c] sm:$0xf] %v216_v23  ;;  %v220_v25 = vld [vmem:[%s1897_s6 + $0xc8] sm:$0xf]  ;;  %v222_v26 = vld [vmem:[%s1897_s6 + $0xd0] sm:$0xf] }
  0x28   : > { %219 = vst [vmem:[%s1902_s7 + $0x60] sm:$0xf] %v218_v24  ;;  %221 = vst [vmem:[%s1902_s7 + $0x64] sm:$0xf] %v220_v25  ;;  %v224_v27 = vld [vmem:[%s1897_s6 + $0xd8] sm:$0xf] }
  0x29   : > { %223 = vst [vmem:[%s1902_s7 + $0x68] sm:$0xf] %v222_v26  ;;  %v226_v28 = vld [vmem:[%s1897_s6 + $0xe0] sm:$0xf]  ;;  %v228_v29 = vld [vmem:[%s1897_s6 + $0xe8] sm:$0xf] }
  0x2a   : > { %225 = vst [vmem:[%s1902_s7 + $0x6c] sm:$0xf] %v224_v27  ;;  %227 = vst [vmem:[%s1902_s7 + $0x70] sm:$0xf] %v226_v28  ;;  %v230_v30 = vld [vmem:[%s1897_s6 + $0xf0] sm:$0xf] }
  0x2b   : > { %229 = vst [vmem:[%s1902_s7 + $0x74] sm:$0xf] %v228_v29  ;;  %v232_v31 = vld [vmem:[%s1897_s6 + $0xf8] sm:$0xf]  ;;  %231 = vst [vmem:[%s1902_s7 + $0x78] sm:$0xf] %v230_v30 }
  0x2c   : > { %233 = vst [vmem:[%s1902_s7 + $0x7c] sm:$0xf] %v232_v31 }
  0x2d PF: > { %p1394_p7 = scmp.ge.s32.totalorder %s1814_s18, 1  ;;  %p328_p8 = scmp.lt.s32.totalorder %s1814_s18, 5 }
  0x2f   : > { %p329_p9 = pnand %p1394_p7, %p328_p8 }
  0x30   : > { %s335_s8 = sand.u32 (!%p329_p9), 1, %s1790_s12   ;;  %s1396_s9 = sshll.u32 (!%p329_p9), %s1798_s14, 4 }
  0x31   : > { %332 = sbr.rel (%p329_p9) target bundleno = 528 (0x210), region = 69  ;;  %s1395_s10 = sshll.u32 (!%p329_p9), %s335_s8, 7 }
  0x32   : > { %p364_p10 = scmp.lt.s32.totalorder (!%p329_p9), %s1396_s9, 31  ;;  %p369_p11 = scmp.lt.s32.totalorder (!%p329_p9), %s1802_s15, 1 }
  0x33   : > { %s1981_s29 = scalar_lea.vmem (!%p329_p9), [#allocation3], %s1395_s10  ;;  %p1400_p12 = scmp.ne.s32.totalorder (!%p329_p9), %s1798_s14, 0 }
  0x38   : > { %s2456_s9 = smov (!%p364_p10, %s1396_s9), 31  ;;  %s2458_s15 = smov (!%p369_p11, %s1802_s15), 1 }
  0x39   : > { %s1397_s11 = sshll.u32 %s2456_s9, 2  ;;  %s1461_s24 = sshll.u32 %s2458_s15, 7  ;;  %v1816_v32 = vmov (!%p1400_p12), 0.0  }
  0x3a   : > { %s1974_s23 = scalar_lea.vmem %s2440_s1, %s1397_s11  ;;  %s1979_s28 = scalar_lea.vmem %s2442_s3, %s1461_s24  ;;  %379 = vst [vmem:[#allocation2] sm:$0xff] (!%p1400_p12), %v1816_v32  ;;  %380 = vst [vmem:[#allocation2 + $0x8] sm:$0xff] (!%p1400_p12), %v1816_v32 }
  0x3b   : > { %378 = sbr.rel (%p1400_p12) target bundleno = 74 (0x4a), region = 77  ;;  %381 = vst [vmem:[#allocation2 + $0x10] sm:$0xff] (!%p1400_p12), %v1816_v32  ;;  %382 = vst [vmem:[#allocation2 + $0x18] sm:$0xff] (!%p1400_p12), %v1816_v32 }
  0x3c   : > { %383 = vst [vmem:[#allocation2 + $0x20] sm:$0xff] (!%p1400_p12), %v1816_v32  ;;  %384 = vst [vmem:[#allocation2 + $0x28] sm:$0xff] (!%p1400_p12), %v1816_v32 }
  0x3d   : > { %385 = vst [vmem:[#allocation2 + $0x30] sm:$0xff] (!%p1400_p12), %v1816_v32  ;;  %386 = vst [vmem:[#allocation2 + $0x38] sm:$0xff] (!%p1400_p12), %v1816_v32 }
  0x3e   : > { %387 = vst [vmem:[#allocation2 + $0x40] sm:$0xff] (!%p1400_p12), %v1816_v32  ;;  %388 = vst [vmem:[#allocation2 + $0x48] sm:$0xff] (!%p1400_p12), %v1816_v32 }
  0x3f   : > { %389 = vst [vmem:[#allocation2 + $0x50] sm:$0xff] (!%p1400_p12), %v1816_v32  ;;  %390 = vst [vmem:[#allocation2 + $0x58] sm:$0xff] (!%p1400_p12), %v1816_v32 }
  0x40   : > { %391 = vst [vmem:[#allocation2 + $0x60] sm:$0xff] (!%p1400_p12), %v1816_v32  ;;  %392 = vst [vmem:[#allocation2 + $0x68] sm:$0xff] (!%p1400_p12), %v1816_v32 }
  0x41   : > { %393 = vst [vmem:[#allocation2 + $0x70] sm:$0xff] (!%p1400_p12), %v1816_v32  ;;  %394 = vst [vmem:[#allocation2 + $0x78] sm:$0xff] (!%p1400_p12), %v1816_v32 }
  0x42   : > { %395 = vst [vmem:[#allocation2 + $0x80] sm:$0xff] %v1816_v32  ;;  %396 = vst [vmem:[#allocation2 + $0x88] sm:$0xff] %v1816_v32 }
  0x43   : > { %397 = vst [vmem:[#allocation2 + $0x90] sm:$0xff] %v1816_v32  ;;  %398 = vst [vmem:[#allocation2 + $0x98] sm:$0xff] %v1816_v32 }
  0x44   : > { %399 = vst [vmem:[#allocation2 + $0xa0] sm:$0xff] %v1816_v32  ;;  %400 = vst [vmem:[#allocation2 + $0xa8] sm:$0xff] %v1816_v32 }
  0x45   : > { %401 = vst [vmem:[#allocation2 + $0xb0] sm:$0xff] %v1816_v32  ;;  %402 = vst [vmem:[#allocation2 + $0xb8] sm:$0xff] %v1816_v32 }
  0x46   : > { %403 = vst [vmem:[#allocation2 + $0xc0] sm:$0xff] %v1816_v32  ;;  %404 = vst [vmem:[#allocation2 + $0xc8] sm:$0xff] %v1816_v32 }
  0x47   : > { %405 = vst [vmem:[#allocation2 + $0xd0] sm:$0xff] %v1816_v32  ;;  %406 = vst [vmem:[#allocation2 + $0xd8] sm:$0xff] %v1816_v32 }
  0x48   : > { %407 = vst [vmem:[#allocation2 + $0xe0] sm:$0xff] %v1816_v32  ;;  %408 = vst [vmem:[#allocation2 + $0xe8] sm:$0xff] %v1816_v32 }
  0x49   : > { %409 = vst [vmem:[#allocation2 + $0xf0] sm:$0xff] %v1816_v32  ;;  %410 = vst [vmem:[#allocation2 + $0xf8] sm:$0xff] %v1816_v32 }
  0x4a PF: > { %v1734_v33 = vld [vmem:[%s1974_s23] sm:$0xff]   ;;  %v1735_v34 = vld [vmem:[%s1974_s23 + $0x8] sm:$0xff]   ;;  %v1736_v35 = vld [vmem:[%s1974_s23 + $0x10] sm:$0xff]   ;;  %p1425_p13 = scmp.ne.s32.totalorder %s1798_s14, 1 }
  0x4b   : > { %1613 = vmatprep.subr.bf16.mxu0 %v1734_v33  ;;  %1661 = vmatprep.subr.bf16.mxu1 %v1734_v33  ;;  %v1737_v36 = vld [vmem:[%s1974_s23 + $0x18] sm:$0xff]   ;;  %v1742_v37 = vld [vmem:[%s1981_s29] sm:$0xff]   ;;  %v1739_v40 = vld [vmem:[%s1974_s23 + $0x28] sm:$0xff]  }
  0x4c   : > { %1614 = vmatpush3.bf16.msra.mxu0 %v1734_v33  ;;  %1669 = vmatpush3.bf16.msra.mxu1 %v1734_v33  ;;  %v1743_v38 = vld [vmem:[%s1981_s29 + $0x40] sm:$0xff]   ;;  %v1740_v41 = vld [vmem:[%s1974_s23 + $0x30] sm:$0xff]   ;;  %v1741_v42 = vld [vmem:[%s1974_s23 + $0x38] sm:$0xff]  }
  0x4d   : > { %1615 = vmatprep.subr.bf16.mxu0 %v1735_v34  ;;  %1662 = vmatprep.subr.bf16.mxu1 %v1735_v34  ;;  %v1738_v39 = vld [vmem:[%s1974_s23 + $0x20] sm:$0xff]   ;;  %v1744_v43 = vld [vmem:[%s1981_s29 + $0x8] sm:$0xff]   ;;  %v1746_v45 = vld [vmem:[%s1981_s29 + $0x10] sm:$0xff]  }
  0x4e   : > { %1629 = vmatprep.mubr.bf16.mxu0 %v1742_v37  ;;  %1645 = vmatprep.mubr.bf16.mxu1 %v1743_v38  ;;  %v1745_v44 = vld [vmem:[%s1981_s29 + $0x48] sm:$0xff]   ;;  %v1747_v46 = vld [vmem:[%s1981_s29 + $0x50] sm:$0xff]   ;;  %v1748_v47 = vld [vmem:[%s1981_s29 + $0x18] sm:$0xff]  }
  0x4f   : > { %v1749_v48 = vld [vmem:[%s1981_s29 + $0x58] sm:$0xff]   ;;  %v1750_v49 = vld [vmem:[%s1981_s29 + $0x20] sm:$0xff]   ;;  %v1752_v51 = vld [vmem:[%s1981_s29 + $0x28] sm:$0xff]  }
  0x50   : > { %1616 = vmatpush3.bf16.msra.mxu0 %v1735_v34  ;;  %1670 = vmatpush3.bf16.msra.mxu1 %v1735_v34  ;;  %v1751_v50 = vld [vmem:[%s1981_s29 + $0x60] sm:$0xff]   ;;  %v1753_v52 = vld [vmem:[%s1981_s29 + $0x68] sm:$0xff]   ;;  %v1754_v53 = vld [vmem:[%s1981_s29 + $0x30] sm:$0xff]  }
  0x51   : > { %1617 = vmatprep.subr.bf16.mxu0 %v1736_v35  ;;  %1663 = vmatprep.subr.bf16.mxu1 %v1736_v35  ;;  %v1755_v54 = vld [vmem:[%s1981_s29 + $0x70] sm:$0xff]   ;;  %v1756_v55 = vld [vmem:[%s1981_s29 + $0x38] sm:$0xff]   ;;  %v411_v59 = vld [vmem:[#allocation2] sm:$0xff] }
  0x52   : > { %v1757_v56 = vld [vmem:[%s1981_s29 + $0x78] sm:$0xff]   ;;  %v413_v57 = vld [vmem:[#allocation2 + $0x10] sm:$0xff]  ;;  %v427_v60 = vld [vmem:[#allocation2 + $0x80] sm:$0xff] }
  0x53   : > { %v429_v58 = vld [vmem:[#allocation2 + $0x90] sm:$0xff]  ;;  %v414_v63 = vld [vmem:[#allocation2 + $0x18] sm:$0xff]  ;;  %v412_v5 = vld [vmem:[#allocation2 + $0x8] sm:$0xff] }
  0x54   : > { %1618 = vmatpush3.bf16.msra.mxu0 %v1736_v35  ;;  %1671 = vmatpush3.bf16.msra.mxu1 %v1736_v35  ;;  %v430_v0 = vld [vmem:[#allocation2 + $0x98] sm:$0xff]  ;;  %v428_v6 = vld [vmem:[#allocation2 + $0x88] sm:$0xff]  ;;  %v417_v17 = vld [vmem:[#allocation2 + $0x30] sm:$0xff] }
  0x55   : > { %1619 = vmatprep.subr.bf16.mxu0 %v1737_v36  ;;  %1664 = vmatprep.subr.bf16.mxu1 %v1737_v36  ;;  %v433_v18 = vld [vmem:[#allocation2 + $0xb0] sm:$0xff]  ;;  %v415_v19 = vld [vmem:[#allocation2 + $0x20] sm:$0xff]  ;;  %v418_v23 = vld [vmem:[#allocation2 + $0x38] sm:$0xff] }
  0x56   : > { %v431_v20 = vld [vmem:[#allocation2 + $0xa0] sm:$0xff]  ;;  %v434_v24 = vld [vmem:[#allocation2 + $0xb8] sm:$0xff]  ;;  %v416_v29 = vld [vmem:[#allocation2 + $0x28] sm:$0xff] }
  0x57   : > { %v432_v30 = vld [vmem:[#allocation2 + $0xa8] sm:$0xff] }
  0x58   : > { %1620 = vmatpush3.bf16.msra.mxu0 %v1737_v36  ;;  %1672 = vmatpush3.bf16.msra.mxu1 %v1737_v36 }
  0x59   : > { %1621 = vmatprep.subr.bf16.mxu0 %v1738_v39  ;;  %1665 = vmatprep.subr.bf16.mxu1 %v1738_v39 }
  0x5c   : > { %1622 = vmatpush3.bf16.msra.mxu0 %v1738_v39  ;;  %1673 = vmatpush3.bf16.msra.mxu1 %v1738_v39 }
  0x5d   : > { %1623 = vmatprep.subr.bf16.mxu0 %v1739_v40  ;;  %1666 = vmatprep.subr.bf16.mxu1 %v1739_v40 }
  0x60   : > { %1624 = vmatpush3.bf16.msra.mxu0 %v1739_v40  ;;  %1674 = vmatpush3.bf16.msra.mxu1 %v1739_v40 }
  0x61   : > { %1625 = vmatprep.subr.bf16.mxu0 %v1740_v41  ;;  %1667 = vmatprep.subr.bf16.mxu1 %v1740_v41 }
  0x64   : > { %1626 = vmatpush3.bf16.msra.mxu0 %v1740_v41  ;;  %1675 = vmatpush3.bf16.msra.mxu1 %v1740_v41  ;;  %v421_v41 = vld [vmem:[#allocation2 + $0x50] sm:$0xff] }
  0x65   : > { %1627 = vmatprep.subr.bf16.mxu0 %v1741_v42  ;;  %1668 = vmatprep.subr.bf16.mxu1 %v1741_v42 }
  0x68   : > { %1628 = vmatpush3.bf16.msra.mxu0 %v1741_v42  ;;  %1676 = vmatpush3.bf16.msra.mxu1 %v1741_v42  ;;  %v437_v42 = vld [vmem:[#allocation2 + $0xd0] sm:$0xff] }
  0x6b   : > { %1630 = vmatmul.mubr.bf16.vlgmr.msra.gmra.mrb[0].mxu0 %v1744_v43  ;;  %1646 = vmatmul.mubr.bf16.vlgmr.msra.gmra.mrb[0].mxu1 %v1745_v44  ;;  %v419_v43 = vld [vmem:[#allocation2 + $0x40] sm:$0xff] }
  0x6c   : > { %1633 = vmatprep.mubr.bf16.mxu0 %v1746_v45  ;;  %1649 = vmatprep.mubr.bf16.mxu1 %v1747_v46  ;;  %v435_v44 = vld [vmem:[#allocation2 + $0xc0] sm:$0xff] }
  0x73   : > { %1634 = vmatmul.mubr.bf16.gmra.mrb[4].mxu0 %v1748_v47  ;;  %1650 = vmatmul.mubr.bf16.gmra.mrb[4].mxu1 %v1749_v48  ;;  %v422_v47 = vld [vmem:[#allocation2 + $0x58] sm:$0xff] }
  0x74   : > { %1637 = vmatprep.mubr.bf16.mxu0 %v1750_v49  ;;  %1653 = vmatprep.mubr.bf16.mxu1 %v1751_v50  ;;  %v438_v48 = vld [vmem:[#allocation2 + $0xd8] sm:$0xff] }
  0x7b   : > { %1638 = vmatmul.mubr.bf16.gmra.mrb[8].mxu0 %v1752_v51  ;;  %1654 = vmatmul.mubr.bf16.gmra.mrb[8].mxu1 %v1753_v52 }
  0x7c   : > { %1641 = vmatprep.mubr.bf16.mxu0 %v1754_v53  ;;  %1657 = vmatprep.mubr.bf16.mxu1 %v1755_v54  ;;  %v420_v53 = vld [vmem:[#allocation2 + $0x48] sm:$0xff] }
  0x7d   : > { %v436_v54 = vld [vmem:[#allocation2 + $0xc8] sm:$0xff] }
  0x83   : > { %1642 = vmatmul.mubr.bf16.gmra.mrb[12].mxu0 %v1756_v55  ;;  %1658 = vmatmul.mubr.bf16.gmra.mrb[12].mxu1 %v1757_v56 }
 0x13e   : > { %v1631_v61 = vpop.f32.mrb[0].mxu0  ;;  %v1647_v62 = vpop.f32.mrb[0].mxu1 }
 0x13f   : > { %v798_v1 = vadd.f32 %v1631_v61, %v413_v57  ;;  %v814_v2 = vadd.f32 %v1647_v62, %v429_v58  ;;  %v669_v3 = vpop.f32.mrb[1].mxu0  ;;  %v733_v4 = vpop.f32.mrb[1].mxu1 }
 0x140   : > { %v796_v7 = vadd.f32 %v669_v3, %v411_v59  ;;  %v812_v8 = vadd.f32 %v733_v4, %v427_v60  ;;  %v1632_v9 = vpop.f32.mrb[2].mxu0  ;;  %v1648_v10 = vpop.f32.mrb[2].mxu1  ;;  %v423_v3 = vld [vmem:[#allocation2 + $0x60] sm:$0xff] }
 0x141   : > { %830 = vst [vmem:[#allocation2 + $0x10] sm:$0xff] %v798_v1  ;;  %846 = vst [vmem:[#allocation2 + $0x90] sm:$0xff] %v814_v2  ;;  %v799_v11 = vadd.f32 %v1632_v9, %v414_v63  ;;  %v815_v12 = vadd.f32 %v1648_v10, %v430_v0  ;;  %v672_v13 = vpop.f32.mrb[3].mxu0  ;;  %v736_v14 = vpop.f32.mrb[3].mxu1  ;;  %v425_v1 = vld [vmem:[#allocation2 + $0x70] sm:$0xff]  ;;  %v439_v4 = vld [vmem:[#allocation2 + $0xe0] sm:$0xff] }
 0x142   : > { %828 = vst [vmem:[#allocation2] sm:$0xff] %v796_v7  ;;  %844 = vst [vmem:[#allocation2 + $0x80] sm:$0xff] %v812_v8  ;;  %v797_v15 = vadd.f32 %v672_v13, %v412_v5  ;;  %v813_v16 = vadd.f32 %v736_v14, %v428_v6  ;;  %v441_v2 = vld [vmem:[#allocation2 + $0xf0] sm:$0xff]  ;;  %v426_v7 = vld [vmem:[#allocation2 + $0x78] sm:$0xff] }
 0x143   : > { %831 = vst [vmem:[#allocation2 + $0x18] sm:$0xff] %v799_v11  ;;  %847 = vst [vmem:[#allocation2 + $0x98] sm:$0xff] %v815_v12  ;;  %v442_v8 = vld [vmem:[#allocation2 + $0xf8] sm:$0xff]  ;;  %v424_v13 = vld [vmem:[#allocation2 + $0x68] sm:$0xff] }
 0x144   : > { %829 = vst [vmem:[#allocation2 + $0x8] sm:$0xff] %v797_v15  ;;  %845 = vst [vmem:[#allocation2 + $0x88] sm:$0xff] %v813_v16  ;;  %v440_v14 = vld [vmem:[#allocation2 + $0xe8] sm:$0xff] }
 0x146   : > { %v1635_v21 = vpop.f32.mrb[4].mxu0  ;;  %v1651_v22 = vpop.f32.mrb[4].mxu1 }
 0x147   : > { %v802_v25 = vadd.f32 %v1635_v21, %v417_v17  ;;  %v818_v26 = vadd.f32 %v1651_v22, %v433_v18  ;;  %v685_v27 = vpop.f32.mrb[5].mxu0  ;;  %v749_v28 = vpop.f32.mrb[5].mxu1 }
 0x148   : > { %v800_v31 = vadd.f32 %v685_v27, %v415_v19  ;;  %v816_v32 = vadd.f32 %v749_v28, %v431_v20  ;;  %v1636_v33 = vpop.f32.mrb[6].mxu0  ;;  %v1652_v34 = vpop.f32.mrb[6].mxu1  ;;  %v2012_v27 = vld [vmem:[%s2441_s2] ss:$0 sm:$0xff] (!%p1425_p13)  ;;  %v866_v28 = vld [vmem:[#allocation2 + $0x10] sm:$0xff] (!%p1425_p13) }
 0x149   : > { %834 = vst [vmem:[#allocation2 + $0x30] sm:$0xff] %v802_v25  ;;  %850 = vst [vmem:[#allocation2 + $0xb0] sm:$0xff] %v818_v26  ;;  %v803_v35 = vadd.f32 %v1636_v33, %v418_v23  ;;  %v819_v36 = vadd.f32 %v1652_v34, %v434_v24  ;;  %v688_v37 = vpop.f32.mrb[7].mxu0  ;;  %v752_v38 = vpop.f32.mrb[7].mxu1  ;;  %v864_v25 = vld [vmem:[#allocation2] sm:$0xff] (!%p1425_p13) }
 0x14a   : > { %832 = vst [vmem:[#allocation2 + $0x20] sm:$0xff] %v800_v31  ;;  %848 = vst [vmem:[#allocation2 + $0xa0] sm:$0xff] %v816_v32  ;;  %v801_v39 = vadd.f32 %v688_v37, %v416_v29  ;;  %v817_v40 = vadd.f32 %v752_v38, %v432_v30  ;;  %v2015_v29 = vadd.f32 (!%p1425_p13), %v2012_v27, %v864_v25  ;;  %v867_v31 = vld [vmem:[#allocation2 + $0x18] sm:$0xff] (!%p1425_p13) }
 0x14b   : > { %835 = vst [vmem:[#allocation2 + $0x38] sm:$0xff] %v803_v35  ;;  %851 = vst [vmem:[#allocation2 + $0xb8] sm:$0xff] %v819_v36  ;;  %v865_v26 = vld [vmem:[#allocation2 + $0x8] sm:$0xff] (!%p1425_p13)  ;;  %v2021_v32 = vadd.f32 (!%p1425_p13), %v2012_v27, %v866_v28  ;;  %v2024_v34 = vadd.f32 (!%p1425_p13), %v2012_v27, %v867_v31 }
 0x14c   : > { %833 = vst [vmem:[#allocation2 + $0x28] sm:$0xff] %v801_v39  ;;  %849 = vst [vmem:[#allocation2 + $0xa8] sm:$0xff] %v817_v40  ;;  %v2018_v30 = vadd.f32 (!%p1425_p13), %v2012_v27, %v865_v26 }
 0x14e   : > { %v1639_v45 = vpop.f32.mrb[8].mxu0  ;;  %v1655_v46 = vpop.f32.mrb[8].mxu1  ;;  %v935_v35 = vadd.f32 (!%p1425_p13), %v2018_v30, %v2015_v29 }
 0x14f   : > { %v806_v49 = vadd.f32 %v1639_v45, %v421_v41  ;;  %v822_v50 = vadd.f32 %v1655_v46, %v437_v42  ;;  %v701_v51 = vpop.f32.mrb[9].mxu0  ;;  %v765_v52 = vpop.f32.mrb[9].mxu1 }
 0x150   : > { %v804_v55 = vadd.f32 %v701_v51, %v419_v43  ;;  %v820_v56 = vadd.f32 %v765_v52, %v435_v44  ;;  %v1640_v57 = vpop.f32.mrb[10].mxu0  ;;  %v1656_v58 = vpop.f32.mrb[10].mxu1  ;;  %v936_v38 = vadd.f32 (!%p1425_p13), %v935_v35, %v2021_v32  ;;  %v870_v39 = vld [vmem:[#allocation2 + $0x30] sm:$0xff] (!%p1425_p13) }
 0x151   : > { %838 = vst [vmem:[#allocation2 + $0x50] sm:$0xff] %v806_v49  ;;  %854 = vst [vmem:[#allocation2 + $0xd0] sm:$0xff] %v822_v50  ;;  %v807_v59 = vadd.f32 %v1640_v57, %v422_v47  ;;  %v823_v60 = vadd.f32 %v1656_v58, %v438_v48  ;;  %v704_v61 = vpop.f32.mrb[11].mxu0  ;;  %v768_v62 = vpop.f32.mrb[11].mxu1  ;;  %v868_v33 = vld [vmem:[#allocation2 + $0x20] sm:$0xff] (!%p1425_p13)  ;;  %v2037_v43 = vadd.f32 (!%p1425_p13), %v2012_v27, %v870_v39 }
 0x152   : > { %836 = vst [vmem:[#allocation2 + $0x40] sm:$0xff] %v804_v55  ;;  %852 = vst [vmem:[#allocation2 + $0xc0] sm:$0xff] %v820_v56  ;;  %v805_v63 = vadd.f32 %v704_v61, %v420_v53  ;;  %v821_v0 = vadd.f32 %v768_v62, %v436_v54  ;;  %v2029_v37 = vadd.f32 (!%p1425_p13), %v2012_v27, %v868_v33  ;;  %v871_v42 = vld [vmem:[#allocation2 + $0x38] sm:$0xff] (!%p1425_p13) }
 0x153   : > { %839 = vst [vmem:[#allocation2 + $0x58] sm:$0xff] %v807_v59  ;;  %855 = vst [vmem:[#allocation2 + $0xd8] sm:$0xff] %v823_v60  ;;  %v869_v36 = vld [vmem:[#allocation2 + $0x28] sm:$0xff] (!%p1425_p13)  ;;  %v937_v41 = vadd.f32 (!%p1425_p13), %v936_v38, %v2024_v34  ;;  %v2041_v46 = vadd.f32 (!%p1425_p13), %v2012_v27, %v871_v42  ;;  %v887_v26 = vld [vmem:[#allocation2 + $0xb8] sm:$0xff] (!%p1425_p13) }
 0x154   : > { %837 = vst [vmem:[#allocation2 + $0x48] sm:$0xff] %v805_v63  ;;  %853 = vst [vmem:[#allocation2 + $0xc8] sm:$0xff] %v821_v0  ;;  %v2033_v40 = vadd.f32 (!%p1425_p13), %v2012_v27, %v869_v36  ;;  %v2105_v35 = vadd.f32 (!%p1425_p13), %v2012_v27, %v887_v26 }
 0x155   : > { %v938_v44 = vadd.f32 (!%p1425_p13), %v937_v41, %v2029_v37 }
 0x156   : > { %v1643_v5 = vpop.f32.mrb[12].mxu0  ;;  %v1659_v6 = vpop.f32.mrb[12].mxu1  ;;  %863 = sbr.rel (%p1425_p13) target bundleno = 528 (0x210), region = 81 }
 0x157   : > { %v810_v9 = vadd.f32 %v1643_v5, %v425_v1  ;;  %v826_v10 = vadd.f32 %v1659_v6, %v441_v2  ;;  %v717_v11 = vpop.f32.mrb[13].mxu0  ;;  %v781_v12 = vpop.f32.mrb[13].mxu1  ;;  %v939_v47 = vadd.f32 (!%p1425_p13), %v938_v44, %v2033_v40  ;;  %v880_v5 = vld [vmem:[#allocation2 + $0x80] sm:$0xff] (!%p1425_p13) }
 0x158   : > { %v808_v15 = vadd.f32 %v717_v11, %v423_v3  ;;  %v824_v16 = vadd.f32 %v781_v12, %v439_v4  ;;  %v1644_v17 = vpop.f32.mrb[14].mxu0  ;;  %v1660_v18 = vpop.f32.mrb[14].mxu1  ;;  %v874_v51 = vld [vmem:[#allocation2 + $0x50] sm:$0xff] (!%p1425_p13) }
 0x159   : > { %842 = vst [vmem:[#allocation2 + $0x70] sm:$0xff] %v810_v9  ;;  %858 = vst [vmem:[#allocation2 + $0xf0] sm:$0xff] %v826_v10  ;;  %v811_v19 = vadd.f32 %v1644_v17, %v426_v7  ;;  %v827_v20 = vadd.f32 %v1660_v18, %v442_v8  ;;  %v720_v21 = vpop.f32.mrb[15].mxu0  ;;  %v784_v22 = vpop.f32.mrb[15].mxu1  ;;  %v872_v45 = vld [vmem:[#allocation2 + $0x40] sm:$0xff] (!%p1425_p13)  ;;  %v940_v50 = vadd.f32 (!%p1425_p13), %v939_v47, %v2037_v43  ;;  %v881_v8 = vld [vmem:[#allocation2 + $0x88] sm:$0xff] (!%p1425_p13) }
 0x15a   : > { %840 = vst [vmem:[#allocation2 + $0x60] sm:$0xff] %v808_v15  ;;  %856 = vst [vmem:[#allocation2 + $0xe0] sm:$0xff] %v824_v16  ;;  %v809_v23 = vadd.f32 %v720_v21, %v424_v13  ;;  %v825_v24 = vadd.f32 %v784_v22, %v440_v14  ;;  %v2045_v49 = vadd.f32 (!%p1425_p13), %v2012_v27, %v872_v45  ;;  %v875_v54 = vld [vmem:[#allocation2 + $0x58] sm:$0xff] (!%p1425_p13)  ;;  %v882_v11 = vld [vmem:[#allocation2 + $0x90] sm:$0xff] (!%p1425_p13) }
 0x15b   : > { %843 = vst [vmem:[#allocation2 + $0x78] sm:$0xff] %v811_v19  ;;  %859 = vst [vmem:[#allocation2 + $0xf8] sm:$0xff] %v827_v20  ;;  %v873_v48 = vld [vmem:[#allocation2 + $0x48] sm:$0xff] (!%p1425_p13)  ;;  %v941_v53 = vadd.f32 (!%p1425_p13), %v940_v50, %v2041_v46  ;;  %v2053_v55 = vadd.f32 (!%p1425_p13), %v2012_v27, %v874_v51  ;;  %v2057_v58 = vadd.f32 (!%p1425_p13), %v2012_v27, %v875_v54  ;;  %v883_v14 = vld [vmem:[#allocation2 + $0x98] sm:$0xff] (!%p1425_p13) }
 0x15c   : > { %841 = vst [vmem:[#allocation2 + $0x68] sm:$0xff] %v809_v23  ;;  %857 = vst [vmem:[#allocation2 + $0xe8] sm:$0xff] %v825_v24  ;;  %v2049_v52 = vadd.f32 (!%p1425_p13), %v2012_v27, %v873_v48  ;;  %v2077_v9 = vadd.f32 (!%p1425_p13), %v2012_v27, %v880_v5  ;;  %v2081_v12 = vadd.f32 (!%p1425_p13), %v2012_v27, %v881_v8  ;;  %v884_v17 = vld [vmem:[#allocation2 + $0xa0] sm:$0xff] (!%p1425_p13)  ;;  %v885_v20 = vld [vmem:[#allocation2 + $0xa8] sm:$0xff] (!%p1425_p13) }
 0x15d   : > { %v942_v56 = vadd.f32 %v941_v53, %v2045_v49  ;;  %v2085_v15 = vadd.f32 %v2012_v27, %v882_v11  ;;  %v2089_v18 = vadd.f32 %v2012_v27, %v883_v14  ;;  %v2093_v21 = vadd.f32 %v2012_v27, %v884_v17  ;;  %v886_v23 = vld [vmem:[#allocation2 + $0xb0] sm:$0xff]  ;;  %v888_v33 = vld [vmem:[#allocation2 + $0xc0] sm:$0xff]  ;;  %v889_v38 = vld [vmem:[#allocation2 + $0xc8] sm:$0xff] }
 0x15e   : > { %v2097_v24 = vadd.f32 %v2012_v27, %v885_v20  ;;  %v2101_v28 = vadd.f32 %v2012_v27, %v886_v23  ;;  %v2109_v39 = vadd.f32 %v2012_v27, %v888_v33  ;;  %v890_v42 = vld [vmem:[#allocation2 + $0xd0] sm:$0xff]  ;;  %v2113_v44 = vadd.f32 %v2012_v27, %v889_v38  ;;  %v891_v47 = vld [vmem:[#allocation2 + $0xd8] sm:$0xff] }
 0x15f   : > { %v943_v59 = vadd.f32 %v942_v56, %v2049_v52  ;;  %v2117_v48 = vadd.f32 %v2012_v27, %v890_v42  ;;  %v2121_v53 = vadd.f32 %v2012_v27, %v891_v47 }
 0x160   : > { %v878_v63 = vld [vmem:[#allocation2 + $0x70] sm:$0xff] }
 0x161   : > { %v876_v57 = vld [vmem:[#allocation2 + $0x60] sm:$0xff]  ;;  %v944_v62 = vadd.f32 %v943_v59, %v2053_v55  ;;  %v2069_v3 = vadd.f32 %v2012_v27, %v878_v63 }
 0x162   : > { %v2061_v61 = vadd.f32 %v2012_v27, %v876_v57  ;;  %v879_v2 = vld [vmem:[#allocation2 + $0x78] sm:$0xff]  ;;  %v892_v51 = vld [vmem:[#allocation2 + $0xe0] sm:$0xff] }
 0x163   : > { %v877_v60 = vld [vmem:[#allocation2 + $0x68] sm:$0xff]  ;;  %v945_v1 = vadd.f32 %v944_v62, %v2057_v58  ;;  %v2073_v6 = vadd.f32 %v2012_v27, %v879_v2  ;;  %v2125_v57 = vadd.f32 %v2012_v27, %v892_v51 }
 0x164   : > { %v2065_v0 = vadd.f32 %v2012_v27, %v877_v60  ;;  %v893_v56 = vld [vmem:[#allocation2 + $0xe8] sm:$0xff]  ;;  %v894_v60 = vld [vmem:[#allocation2 + $0xf0] sm:$0xff] }
 0x165   : > { %v946_v4 = vadd.f32 %v945_v1, %v2061_v61  ;;  %v2129_v62 = vadd.f32 %v2012_v27, %v893_v56  ;;  %v895_v1 = vld [vmem:[#allocation2 + $0xf8] sm:$0xff]  ;;  %v2133_v2 = vadd.f32 %v2012_v27, %v894_v60 }
 0x166   : > { %v2137_v5 = vadd.f32 %v2012_v27, %v895_v1 }
 0x167   : > { %v947_v7 = vadd.f32 %v946_v4, %v2065_v0 }
 0x169   : > { %v948_v10 = vadd.f32 %v947_v7, %v2069_v3 }
 0x16b   : > { %v949_v13 = vadd.f32 %v948_v10, %v2073_v6 }
 0x16d   : > { %v950_v16 = vadd.f32 %v949_v13, %v2077_v9 }
 0x16f   : > { %v951_v19 = vadd.f32 %v950_v16, %v2081_v12 }
 0x171   : > { %v952_v22 = vadd.f32 %v951_v19, %v2085_v15 }
 0x173   : > { %v953_v25 = vadd.f32 %v952_v22, %v2089_v18 }
 0x175   : > { %v954_v31 = vadd.f32 %v953_v25, %v2093_v21 }
 0x177   : > { %v955_v36 = vadd.f32 %v954_v31, %v2097_v24 }
 0x179   : > { %v956_v41 = vadd.f32 %v955_v36, %v2101_v28 }
 0x17b   : > { %v957_v45 = vadd.f32 %v956_v41, %v2105_v35 }
 0x17d   : > { %v958_v50 = vadd.f32 %v957_v45, %v2109_v39 }
 0x17f   : > { %v959_v54 = vadd.f32 %v958_v50, %v2113_v44 }
 0x181   : > { %v960_v59 = vadd.f32 %v959_v54, %v2117_v48 }
 0x183   : > { %v961_v63 = vadd.f32 %v960_v59, %v2121_v53 }
 0x185   : > { %v962_v4 = vadd.f32 %v961_v63, %v2125_v57 }
 0x187   : > { %v963_v7 = vadd.f32 %v962_v4, %v2129_v62 }
 0x189   : > { %v964_v8 = vadd.f32 %v963_v7, %v2133_v2 }
 0x18b   : > { %v965_v10 = vadd.f32 %v964_v8, %v2137_v5 }
 0x18d   : > { %v966_v11 = vrot.slane %v965_v10, 4 }
 0x18f   : > { %v967_v13 = vadd.f32 %v966_v11, %v965_v10 }
 0x191   : > { %v968_v14 = vrot.slane %v967_v13, 2 }
 0x193   : > { %v969_v16 = vadd.f32 %v968_v14, %v967_v13 }
 0x195   : > { %v970_v17 = vrot.slane %v969_v16, 1 }
 0x197   : > { %v971_v19 = vadd.f32 %v970_v17, %v969_v16 }
 0x199   : > { %v2142_v20 = vmul.f32 0.00390625, %v971_v19 }
 0x19b   : > { %v2146_v22 = vsub.f32 %v2015_v29, %v2142_v20  ;;  %v2150_v27 = vsub.f32 %v2018_v30, %v2142_v20  ;;  %v2154_v23 = vsub.f32 %v2021_v32, %v2142_v20  ;;  %v2158_v25 = vsub.f32 %v2024_v34, %v2142_v20 }
 0x19c   : > { %v2166_v29 = vsub.f32 %v2029_v37, %v2142_v20  ;;  %v2172_v32 = vsub.f32 %v2033_v40, %v2142_v20  ;;  %v2178_v36 = vsub.f32 %v2037_v43, %v2142_v20  ;;  %v2184_v41 = vsub.f32 %v2041_v46, %v2142_v20 }
 0x19d   : > { %v1005_v26 = vmul.f32 %v2146_v22, %v2146_v22  ;;  %v1006_v31 = vmul.f32 %v2150_v27, %v2150_v27  ;;  %v1007_v30 = vmul.f32 %v2154_v23, %v2154_v23  ;;  %v1008_v34 = vmul.f32 %v2158_v25, %v2158_v25 }
 0x19e   : > { %v1009_v38 = vmul.f32 %v2166_v29, %v2166_v29  ;;  %v1010_v40 = vmul.f32 %v2172_v32, %v2172_v32  ;;  %v2190_v45 = vsub.f32 %v2045_v49, %v2142_v20  ;;  %v1011_v43 = vmul.f32 %v2178_v36, %v2178_v36 }
 0x19f   : > { %v1037_v33 = vadd.f32 %v1006_v31, %v1005_v26  ;;  %v2196_v50 = vsub.f32 %v2049_v52, %v2142_v20  ;;  %v1012_v46 = vmul.f32 %v2184_v41, %v2184_v41  ;;  %v2202_v54 = vsub.f32 %v2053_v55, %v2142_v20 }
 0x1a0   : > { %v1013_v49 = vmul.f32 %v2190_v45, %v2190_v45  ;;  %v2208_v59 = vsub.f32 %v2057_v58, %v2142_v20  ;;  %v2214_v63 = vsub.f32 %v2061_v61, %v2142_v20  ;;  %v2220_v4 = vsub.f32 %v2065_v0, %v2142_v20 }
 0x1a1   : > { %v1038_v37 = vadd.f32 %v1037_v33, %v1007_v30  ;;  %v1014_v52 = vmul.f32 %v2196_v50, %v2196_v50  ;;  %v1015_v55 = vmul.f32 %v2202_v54, %v2202_v54  ;;  %v2226_v8 = vsub.f32 %v2069_v3, %v2142_v20 }
 0x1a2   : > { %v1016_v58 = vmul.f32 %v2208_v59, %v2208_v59  ;;  %v1017_v61 = vmul.f32 %v2214_v63, %v2214_v63  ;;  %v2232_v11 = vsub.f32 %v2073_v6, %v2142_v20  ;;  %v1018_v0 = vmul.f32 %v2220_v4, %v2220_v4 }
 0x1a3   : > { %v1039_v42 = vadd.f32 %v1038_v37, %v1008_v34  ;;  %v2238_v14 = vsub.f32 %v2077_v9, %v2142_v20  ;;  %v1019_v3 = vmul.f32 %v2226_v8, %v2226_v8  ;;  %v2244_v17 = vsub.f32 %v2081_v12, %v2142_v20 }
 0x1a4   : > { %v1020_v6 = vmul.f32 %v2232_v11, %v2232_v11  ;;  %v2250_v26 = vsub.f32 %v2085_v15, %v2142_v20  ;;  %v2256_v30 = vsub.f32 %v2089_v18, %v2142_v20  ;;  %v2262_v33 = vsub.f32 %v2093_v21, %v2142_v20 }
 0x1a5   : > { %v1040_v47 = vadd.f32 %v1039_v42, %v1009_v38  ;;  %v1021_v9 = vmul.f32 %v2238_v14, %v2238_v14  ;;  %v1022_v12 = vmul.f32 %v2244_v17, %v2244_v17  ;;  %v2268_v37 = vsub.f32 %v2097_v24, %v2142_v20 }
 0x1a6   : > { %v1023_v15 = vmul.f32 %v2250_v26, %v2250_v26  ;;  %v1024_v18 = vmul.f32 %v2256_v30, %v2256_v30  ;;  %v2274_v42 = vsub.f32 %v2101_v28, %v2142_v20  ;;  %v1025_v21 = vmul.f32 %v2262_v33, %v2262_v33 }
 0x1a7   : > { %v1041_v51 = vadd.f32 %v1040_v47, %v1010_v40  ;;  %v2280_v47 = vsub.f32 %v2105_v35, %v2142_v20  ;;  %v1026_v24 = vmul.f32 %v2268_v37, %v2268_v37 }
 0x1a8   : > { %v1027_v28 = vmul.f32 %v2274_v42, %v2274_v42 }
 0x1a9   : > { %v1042_v56 = vadd.f32 %v1041_v51, %v1011_v43  ;;  %v2286_v51 = vsub.f32 %v2109_v39, %v2142_v20  ;;  %v1028_v35 = vmul.f32 %v2280_v47, %v2280_v47 }
 0x1ab   : > { %v1043_v60 = vadd.f32 %v1042_v56, %v1012_v46  ;;  %v2292_v56 = vsub.f32 %v2113_v44, %v2142_v20  ;;  %v1029_v39 = vmul.f32 %v2286_v51, %v2286_v51 }
 0x1ad   : > { %v1044_v1 = vadd.f32 %v1043_v60, %v1013_v49  ;;  %v2298_v60 = vsub.f32 %v2117_v48, %v2142_v20  ;;  %v1030_v44 = vmul.f32 %v2292_v56, %v2292_v56 }
 0x1af   : > { %v1045_v7 = vadd.f32 %v1044_v1, %v1014_v52  ;;  %v2304_v1 = vsub.f32 %v2121_v53, %v2142_v20  ;;  %v1031_v48 = vmul.f32 %v2298_v60, %v2298_v60 }
 0x1b1   : > { %v1046_v10 = vadd.f32 %v1045_v7, %v1015_v55  ;;  %v2310_v7 = vsub.f32 %v2125_v57, %v2142_v20  ;;  %v1032_v53 = vmul.f32 %v2304_v1, %v2304_v1 }
 0x1b3   : > { %v1047_v13 = vadd.f32 %v1046_v10, %v1016_v58  ;;  %v2316_v10 = vsub.f32 %v2129_v62, %v2142_v20  ;;  %v1033_v57 = vmul.f32 %v2310_v7, %v2310_v7 }
 0x1b5   : > { %v1048_v16 = vadd.f32 %v1047_v13, %v1017_v61  ;;  %v2322_v13 = vsub.f32 %v2133_v2, %v2142_v20  ;;  %v1034_v62 = vmul.f32 %v2316_v10, %v2316_v10 }
 0x1b7   : > { %v1049_v19 = vadd.f32 %v1048_v16, %v1018_v0  ;;  %v2328_v16 = vsub.f32 %v2137_v5, %v2142_v20 }
 0x1b9   : > { %v1050_v31 = vadd.f32 %v1049_v19, %v1019_v3  ;;  %v1035_v19 = vmul.f32 %v2322_v13, %v2322_v13  ;;  %v1036_v2 = vmul.f32 %v2328_v16, %v2328_v16 }
 0x1bb   : > { %v1051_v34 = vadd.f32 %v1050_v31, %v1020_v6 }
 0x1bd   : > { %v1052_v38 = vadd.f32 %v1051_v34, %v1021_v9 }
 0x1bf   : > { %v1053_v40 = vadd.f32 %v1052_v38, %v1022_v12 }
 0x1c1   : > { %v1054_v43 = vadd.f32 %v1053_v40, %v1023_v15 }
 0x1c3   : > { %v1055_v46 = vadd.f32 %v1054_v43, %v1024_v18 }
 0x1c5   : > { %v1056_v49 = vadd.f32 %v1055_v46, %v1025_v21 }
 0x1c7   : > { %v1057_v52 = vadd.f32 %v1056_v49, %v1026_v24 }
 0x1c9   : > { %v1058_v55 = vadd.f32 %v1057_v52, %v1027_v28 }
 0x1cb   : > { %v1059_v58 = vadd.f32 %v1058_v55, %v1028_v35 }
 0x1cd   : > { %v1060_v61 = vadd.f32 %v1059_v58, %v1029_v39 }
 0x1cf   : > { %v1061_v0 = vadd.f32 %v1060_v61, %v1030_v44 }
 0x1d1   : > { %v1062_v3 = vadd.f32 %v1061_v0, %v1031_v48 }
 0x1d3   : > { %v1063_v6 = vadd.f32 %v1062_v3, %v1032_v53 }
 0x1d5   : > { %v1064_v9 = vadd.f32 %v1063_v6, %v1033_v57 }
 0x1d7   : > { %v1065_v31 = vadd.f32 %v1064_v9, %v1034_v62 }
 0x1d9   : > { %v1066_v12 = vadd.f32 %v1065_v31, %v1035_v19 }
 0x1db   : > { %v1067_v34 = vadd.f32 %v1066_v12, %v1036_v2 }
 0x1dd   : > { %v1068_v15 = vrot.slane %v1067_v34, 4 }
 0x1df   : > { %v1069_v38 = vadd.f32 %v1068_v15, %v1067_v34 }
 0x1e1   : > { %v1070_v18 = vrot.slane %v1069_v38, 2 }
 0x1e3   : > { %v1071_v40 = vadd.f32 %v1070_v18, %v1069_v38 }
 0x1e5   : > { %v1072_v5 = vrot.slane %v1071_v40, 1 }
 0x1e7   : > { %v1073_v20 = vadd.f32 %v1072_v5, %v1071_v40 }
 0x1e9   : > { %v1074_v21 = vmul.f32 0.00390625, %v1073_v20 }
 0x1eb   : > { %v1075_v43 = vadd.f32 1e-05, %v1074_v21 }
 0x1ed   : > { %1758 = vrsqrt.f32 %v1075_v43 }
 0x1f7   : > { %v2336_v24 = vpop.eup %1758 }
 0x1f8   : > { %v1077_v46 = vmul.f32 %v2336_v24, %v2146_v22  ;;  %v1078_v28 = vmul.f32 %v2336_v24, %v2150_v27  ;;  %v1079_v49 = vmul.f32 %v2336_v24, %v2154_v23  ;;  %v1080_v35 = vmul.f32 %v2336_v24, %v2158_v25 }
 0x1f9   : > { %v1081_v52 = vmul.f32 %v2336_v24, %v2166_v29  ;;  %v1082_v39 = vmul.f32 %v2336_v24, %v2172_v32  ;;  %v1083_v55 = vmul.f32 %v2336_v24, %v2178_v36  ;;  %v1084_v22 = vmul.f32 %v2336_v24, %v2184_v41 }
 0x1fa   : > { %v1109_v44 = vmax.f32 %v1077_v46, 0.0  ;;  %v1110_v27 = vmax.f32 %v1078_v28, 0.0  ;;  %v1111_v23 = vmax.f32 %v1079_v49, 0.0  ;;  %v1112_v58 = vmax.f32 %v1080_v35, 0.0 }
 0x1fb   : > { %v1113_v48 = vmax.f32 %v1081_v52, 0.0  ;;  %v1114_v25 = vmax.f32 %v1082_v39, 0.0  ;;  %v1115_v61 = vmax.f32 %v1083_v55, 0.0  ;;  %v1116_v29 = vmax.f32 %v1084_v22, 0.0 }
 0x1fc   : > { %v1497_v53 = vpack.c.bf16 %v1110_v27, %v1109_v44  ;;  %v1502_v32 = vpack.c.bf16 %v1112_v58, %v1111_v23  ;;  %v1085_v36 = vmul.f32 %v2336_v24, %v2190_v45  ;;  %v1086_v41 = vmul.f32 %v2336_v24, %v2196_v50 }
 0x1fd   : > { %v1507_v0 = vpack.c.bf16 %v1114_v25, %v1113_v48  ;;  %v1512_v57 = vpack.c.bf16 %v1116_v29, %v1115_v61  ;;  %v1087_v3 = vmul.f32 %v2336_v24, %v2202_v54  ;;  %v1088_v62 = vmul.f32 %v2336_v24, %v2208_v59 }
 0x1fe   : > { %1498 = vst [vmem:[%s1979_s28] sm:$0xff] %v1497_v53   ;;  %1574 = vst [vmem:[%s1979_s28 + $0x8] sm:$0xff] %v1502_v32   ;;  %v1117_v6 = vmax.f32 %v1085_v36, 0.0  ;;  %v1118_v19 = vmax.f32 %v1086_v41, 0.0  ;;  %v1089_v9 = vmul.f32 %v2336_v24, %v2214_v63  ;;  %v1090_v45 = vmul.f32 %v2336_v24, %v2220_v4 }
 0x1ff   : > { %1575 = vst [vmem:[%s1979_s28 + $0x10] sm:$0xff] %v1507_v0   ;;  %1576 = vst [vmem:[%s1979_s28 + $0x18] sm:$0xff] %v1512_v57   ;;  %v1119_v50 = vmax.f32 %v1087_v3, 0.0  ;;  %v1120_v2 = vmax.f32 %v1088_v62, 0.0  ;;  %v1091_v54 = vmul.f32 %v2336_v24, %v2226_v8  ;;  %v1092_v59 = vmul.f32 %v2336_v24, %v2232_v11 }
 0x200   : > { %v1517_v31 = vpack.c.bf16 %v1118_v19, %v1117_v6  ;;  %v1121_v12 = vmax.f32 %v1089_v9, 0.0  ;;  %v1122_v34 = vmax.f32 %v1090_v45, 0.0  ;;  %v1093_v63 = vmul.f32 %v2336_v24, %v2238_v14 }
 0x201   : > { %v1522_v15 = vpack.c.bf16 %v1120_v2, %v1119_v50  ;;  %v1123_v4 = vmax.f32 %v1091_v54, 0.0  ;;  %v1124_v38 = vmax.f32 %v1092_v59, 0.0  ;;  %v1094_v18 = vmul.f32 %v2336_v24, %v2244_v17 }
 0x202   : > { %1577 = vst [vmem:[%s1979_s28 + $0x20] sm:$0xff] %v1517_v31   ;;  %v1527_v40 = vpack.c.bf16 %v1122_v34, %v1121_v12  ;;  %v1125_v8 = vmax.f32 %v1093_v63, 0.0  ;;  %v1095_v11 = vmul.f32 %v2336_v24, %v2250_v26  ;;  %v1096_v5 = vmul.f32 %v2336_v24, %v2256_v30 }
 0x203   : > { %1578 = vst [vmem:[%s1979_s28 + $0x28] sm:$0xff] %v1522_v15   ;;  %v1532_v20 = vpack.c.bf16 %v1124_v38, %v1123_v4  ;;  %v1126_v21 = vmax.f32 %v1094_v18, 0.0  ;;  %v1097_v14 = vmul.f32 %v2336_v24, %v2262_v33  ;;  %v1098_v17 = vmul.f32 %v2336_v24, %v2268_v37 }
 0x204   : > { %1579 = vst [vmem:[%s1979_s28 + $0x30] sm:$0xff] %v1527_v40   ;;  %v1127_v43 = vmax.f32 %v1095_v11, 0.0  ;;  %v1128_v46 = vmax.f32 %v1096_v5, 0.0  ;;  %v1099_v28 = vmul.f32 %v2336_v24, %v2274_v42  ;;  %v1100_v26 = vmul.f32 %v2336_v24, %v2280_v47 }
 0x205   : > { %1580 = vst [vmem:[%s1979_s28 + $0x38] sm:$0xff] %v1532_v20   ;;  %v1537_v30 = vpack.c.bf16 %v1126_v21, %v1125_v8  ;;  %v1129_v49 = vmax.f32 %v1097_v14, 0.0  ;;  %v1130_v35 = vmax.f32 %v1098_v17, 0.0  ;;  %v1101_v33 = vmul.f32 %v2336_v24, %v2286_v51 }
 0x206   : > { %v1542_v52 = vpack.c.bf16 %v1128_v46, %v1127_v43  ;;  %v1131_v37 = vmax.f32 %v1099_v28, 0.0  ;;  %v1132_v39 = vmax.f32 %v1100_v26, 0.0  ;;  %v1102_v55 = vmul.f32 %v2336_v24, %v2292_v56 }
 0x207   : > { %1581 = vst [vmem:[%s1979_s28 + $0x40] sm:$0xff] %v1537_v30   ;;  %v1547_v42 = vpack.c.bf16 %v1130_v35, %v1129_v49  ;;  %v1133_v22 = vmax.f32 %v1101_v33, 0.0  ;;  %v1103_v47 = vmul.f32 %v2336_v24, %v2298_v60  ;;  %v1104_v44 = vmul.f32 %v2336_v24, %v2304_v1 }
 0x208   : > { %1582 = vst [vmem:[%s1979_s28 + $0x48] sm:$0xff] %v1542_v52   ;;  %v1552_v27 = vpack.c.bf16 %v1132_v39, %v1131_v37  ;;  %v1134_v51 = vmax.f32 %v1102_v55, 0.0  ;;  %v1105_v23 = vmul.f32 %v2336_v24, %v2310_v7  ;;  %v1106_v56 = vmul.f32 %v2336_v24, %v2316_v10 }
 0x209   : > { %1583 = vst [vmem:[%s1979_s28 + $0x50] sm:$0xff] %v1547_v42   ;;  %v1135_v58 = vmax.f32 %v1103_v47, 0.0  ;;  %v1136_v48 = vmax.f32 %v1104_v44, 0.0  ;;  %v1107_v60 = vmul.f32 %v2336_v24, %v2322_v13  ;;  %v1108_v1 = vmul.f32 %v2336_v24, %v2328_v16 }
 0x20a   : > { %1584 = vst [vmem:[%s1979_s28 + $0x58] sm:$0xff] %v1552_v27   ;;  %v1557_v25 = vpack.c.bf16 %v1134_v51, %v1133_v22  ;;  %v1137_v61 = vmax.f32 %v1105_v23, 0.0  ;;  %v1138_v29 = vmax.f32 %v1106_v56, 0.0 }
 0x20b   : > { %v1562_v7 = vpack.c.bf16 %v1136_v48, %v1135_v58  ;;  %v1139_v53 = vmax.f32 %v1107_v60, 0.0  ;;  %v1140_v32 = vmax.f32 %v1108_v1, 0.0 }
 0x20c   : > { %1585 = vst [vmem:[%s1979_s28 + $0x60] sm:$0xff] %v1557_v25   ;;  %v1567_v10 = vpack.c.bf16 %v1138_v29, %v1137_v61 }
 0x20d   : > { %1586 = vst [vmem:[%s1979_s28 + $0x68] sm:$0xff] %v1562_v7   ;;  %v1572_v36 = vpack.c.bf16 %v1140_v32, %v1139_v53 }
 0x20e   : > { %1587 = vst [vmem:[%s1979_s28 + $0x70] sm:$0xff] %v1567_v10  }
 0x20f   : > { %1588 = vst [vmem:[%s1979_s28 + $0x78] sm:$0xff] %v1572_v36  }
 0x210 PF: > { %s13_s18 = sadd.s32 1, %s1814_s18   ;;  %s2443_s12 = smov %s1794_s13 }
 0x211   : > { %p10_p0 = scmp.ge.s32.totalorder %s13_s18, 6   ;;  %s2444_s13 = smov %s1888_s25 }
 0x212   : > { %s2445_s14 = smov %s1806_s16  ;;  %s2446_s15 = smov %s1810_s17 }
 0x213   : > { %s2447_s16 = smov %s2450_s19  ;;  %s2448_s17 = smov %s2454_s20 }
 0x214   :  { %12 = sbr.rel (!%p10_p0) target bundleno = 4 (0x4), region = 119 }

// kernel: global_generator_forward.11
= control target key start
LH: loop header
LB: loop body
LE: loop exit
PB: predicated region body
PF: predicated region fallthrough
CT: control target
= control target key end

     0   :  { %s827_s12 = smov 0   ;;  %s829_s13 = smov 0   ;;  %s900_s0 = inlined_call_operand.vmem [shape: bf16[2,64,128], index: 0, kind: input, shape index: {}]   ;;  %s901_s1 = inlined_call_operand.vmem [shape: bf16[128,128], index: 1, kind: input, shape index: {}]   ;;  %s902_s2 = inlined_call_operand.vmem [shape: f32[1,128], index: 2, kind: input, shape index: {}]   ;;  %s903_s3 = inlined_call_operand.vmem [shape: bf16[2,64,128], index: 3, kind: output, shape index: {}]  }
   0x1   :  { %s831_s14 = smov 0  }
   0x2 LB: > { %s25_s15 = sadd.s32 1, %s801_s13  ;;  %p632_p0 = scmp.ge.s32.totalorder %s805_s14, 1  ;;  %s805_s14 = sphi %s831_s14, %s13_s14   ;;  %s801_s13 = sphi %s829_s13, %s905_s13   ;;  %s797_s12 = sphi %s827_s12, %s904_s12  }
   0x3   : > { %p27_p1 = scmp.ge.s32.totalorder %s25_s15, 2  ;;  %p165_p2 = scmp.lt.s32.totalorder %s805_s14, 3 }
   0x5   : > { %s907_s15 = smov (%p27_p1, %s25_s15), 0  ;;  %p166_p3 = pnand %p632_p0, %p165_p2 }
   0x6   : > { %v769_v0 = vld [vmem:[%s901_s1] sm:$0xff] (!%p166_p3)   ;;  %p197_p4 = scmp.lt.s32.totalorder (!%p166_p3), %s797_s12, 1  ;;  %v770_v1 = vld [vmem:[%s901_s1 + $0x8] sm:$0xff] (!%p166_p3)   ;;  %v771_v2 = vld [vmem:[%s901_s1 + $0x10] sm:$0xff] (!%p166_p3)  }
   0x7   : > { %169 = sbr.rel (%p166_p3) target bundleno = 337 (0x151), region = 32  ;;  %705 = vmatprep.subr.bf16.mxu0 (!%p166_p3), %v769_v0  ;;  %729 = vmatprep.subr.bf16.mxu1 (!%p166_p3), %v769_v0  ;;  %v772_v3 = vld [vmem:[%s901_s1 + $0x18] sm:$0xff] (!%p166_p3)   ;;  %v773_v6 = vld [vmem:[%s901_s1 + $0x20] sm:$0xff] (!%p166_p3)   ;;  %v774_v7 = vld [vmem:[%s901_s1 + $0x28] sm:$0xff] (!%p166_p3)  }
   0x8   : > { %706 = vmatpush3.bf16.msra.mxu0 (!%p166_p3), %v769_v0  ;;  %737 = vmatpush3.bf16.msra.mxu1 (!%p166_p3), %v769_v0  ;;  %v775_v8 = vld [vmem:[%s901_s1 + $0x30] sm:$0xff] (!%p166_p3)   ;;  %v776_v9 = vld [vmem:[%s901_s1 + $0x38] sm:$0xff] (!%p166_p3)   ;;  %v649_v14 = vld [vmem:[%s902_s2] ss:$0 sm:$0xff] (!%p166_p3) }
   0x9   : > { %707 = vmatprep.subr.bf16.mxu0 (!%p166_p3), %v770_v1  ;;  %730 = vmatprep.subr.bf16.mxu1 (!%p166_p3), %v770_v1 }
   0xc   : > { %708 = vmatpush3.bf16.msra.mxu0 (!%p166_p3), %v770_v1  ;;  %738 = vmatpush3.bf16.msra.mxu1 (!%p166_p3), %v770_v1 }
   0xd   : > { %709 = vmatprep.subr.bf16.mxu0 (!%p166_p3), %v771_v2  ;;  %731 = vmatprep.subr.bf16.mxu1 (!%p166_p3), %v771_v2 }
   0xe   : > { %s909_s12 = smov (!%p197_p4, %s797_s12), 1 }
   0xf   : > { %s660_s22 = sshll.u32 %s909_s12, 5 }
  0x10   : > { %s862_s25 = scalar_lea.vmem %s900_s0, %s660_s22  ;;  %710 = vmatpush3.bf16.msra.mxu0 %v771_v2  ;;  %739 = vmatpush3.bf16.msra.mxu1 %v771_v2  ;;  %s215_s17 = scalar_lea.vmem %s903_s3, %s660_s22 }
  0x11   : > { %v777_v4 = vld [vmem:[%s862_s25] sm:$0xff]   ;;  %v779_v5 = vld [vmem:[%s862_s25 + $0x10] sm:$0xff]   ;;  %711 = vmatprep.subr.bf16.mxu0 %v772_v3  ;;  %732 = vmatprep.subr.bf16.mxu1 %v772_v3  ;;  %v778_v10 = vld [vmem:[%s862_s25 + $0x8] sm:$0xff]  }
  0x12   : > { %721 = vmatprep.mubr.bf16.mxu0 %v777_v4  ;;  %725 = vmatprep.mubr.bf16.mxu1 %v779_v5  ;;  %v780_v11 = vld [vmem:[%s862_s25 + $0x18] sm:$0xff]  }
  0x14   : > { %712 = vmatpush3.bf16.msra.mxu0 %v772_v3  ;;  %740 = vmatpush3.bf16.msra.mxu1 %v772_v3 }
  0x15   : > { %713 = vmatprep.subr.bf16.mxu0 %v773_v6  ;;  %733 = vmatprep.subr.bf16.mxu1 %v773_v6 }
  0x18   : > { %714 = vmatpush3.bf16.msra.mxu0 %v773_v6  ;;  %741 = vmatpush3.bf16.msra.mxu1 %v773_v6 }
  0x19   : > { %715 = vmatprep.subr.bf16.mxu0 %v774_v7  ;;  %734 = vmatprep.subr.bf16.mxu1 %v774_v7 }
  0x1c   : > { %716 = vmatpush3.bf16.msra.mxu0 %v774_v7  ;;  %742 = vmatpush3.bf16.msra.mxu1 %v774_v7 }
  0x1d   : > { %717 = vmatprep.subr.bf16.mxu0 %v775_v8  ;;  %735 = vmatprep.subr.bf16.mxu1 %v775_v8 }
  0x20   : > { %718 = vmatpush3.bf16.msra.mxu0 %v775_v8  ;;  %743 = vmatpush3.bf16.msra.mxu1 %v775_v8 }
  0x21   : > { %719 = vmatprep.subr.bf16.mxu0 %v776_v9  ;;  %736 = vmatprep.subr.bf16.mxu1 %v776_v9 }
  0x24   : > { %720 = vmatpush3.bf16.msra.mxu0 %v776_v9  ;;  %744 = vmatpush3.bf16.msra.mxu1 %v776_v9 }
  0x27   : > { %722 = vmatmul.mubr.bf16.vlgmr.msra.gmra.mrb[0].mxu0 %v778_v10  ;;  %726 = vmatmul.mubr.bf16.vlgmr.msra.gmra.mrb[0].mxu1 %v780_v11 }
  0xfa   : > { %v723_v12 = vpop.f32.mrb[0].mxu0  ;;  %v727_v13 = vpop.f32.mrb[0].mxu1 }
  0xfb   : > { %v367_v15 = vpop.f32.mrb[1].mxu0  ;;  %v383_v16 = vpop.f32.mrb[1].mxu1  ;;  %v434_v23 = vadd.f32 %v723_v12, %v649_v14  ;;  %v438_v31 = vadd.f32 %v727_v13, %v649_v14 }
  0xfc   : > { %v724_v17 = vpop.f32.mrb[2].mxu0  ;;  %v728_v18 = vpop.f32.mrb[2].mxu1  ;;  %v432_v21 = vadd.f32 %v649_v14, %v367_v15  ;;  %v436_v27 = vadd.f32 %v649_v14, %v383_v16 }
  0xfd   : > { %v370_v19 = vpop.f32.mrb[3].mxu0  ;;  %v386_v20 = vpop.f32.mrb[3].mxu1  ;;  %v435_v25 = vadd.f32 %v724_v17, %v649_v14  ;;  %v439_v33 = vadd.f32 %v728_v18, %v649_v14 }
  0xfe   : > { %v433_v22 = vadd.f32 %v649_v14, %v370_v19  ;;  %v437_v30 = vadd.f32 %v649_v14, %v386_v20 }
 0x100   : > { %v440_v24 = vadd.f32 %v433_v22, %v432_v21 }
 0x102   : > { %v441_v26 = vadd.f32 %v440_v24, %v434_v23 }
 0x104   : > { %v442_v28 = vadd.f32 %v441_v26, %v435_v25 }
 0x106   : > { %v443_v29 = vadd.f32 %v442_v28, %v436_v27 }
 0x108   : > { %v444_v32 = vadd.f32 %v443_v29, %v437_v30 }
 0x10a   : > { %v445_v34 = vadd.f32 %v444_v32, %v438_v31 }
 0x10c   : > { %v446_v35 = vadd.f32 %v445_v34, %v439_v33 }
 0x10e   : > { %v447_v36 = vrot.slane %v446_v35, 4 }
 0x110   : > { %v448_v37 = vadd.f32 %v447_v36, %v446_v35 }
 0x112   : > { %v449_v38 = vrot.slane %v448_v37, 2 }
 0x114   : > { %v450_v39 = vadd.f32 %v449_v38, %v448_v37 }
 0x116   : > { %v451_v40 = vrot.slane %v450_v39, 1 }
 0x118   : > { %v452_v41 = vadd.f32 %v451_v40, %v450_v39 }
 0x11a   : > { %v453_v42 = vmul.f32 0.015625, %v452_v41 }
 0x11c   : > { %v454_v43 = vsub.f32 %v432_v21, %v453_v42  ;;  %v455_v44 = vsub.f32 %v433_v22, %v453_v42  ;;  %v456_v45 = vsub.f32 %v434_v23, %v453_v42  ;;  %v457_v46 = vsub.f32 %v435_v25, %v453_v42 }
 0x11d   : > { %v458_v47 = vsub.f32 %v436_v27, %v453_v42  ;;  %v459_v48 = vsub.f32 %v437_v30, %v453_v42  ;;  %v460_v49 = vsub.f32 %v438_v31, %v453_v42  ;;  %v461_v50 = vsub.f32 %v439_v33, %v453_v42 }
 0x11e   : > { %v462_v51 = vmul.f32 %v454_v43, %v454_v43  ;;  %v463_v52 = vmul.f32 %v455_v44, %v455_v44  ;;  %v464_v53 = vmul.f32 %v456_v45, %v456_v45  ;;  %v465_v55 = vmul.f32 %v457_v46, %v457_v46 }
 0x11f   : > { %v466_v57 = vmul.f32 %v458_v47, %v458_v47  ;;  %v467_v59 = vmul.f32 %v459_v48, %v459_v48  ;;  %v468_v61 = vmul.f32 %v460_v49, %v460_v49  ;;  %v469_v63 = vmul.f32 %v461_v50, %v461_v50 }
 0x120   : > { %v470_v54 = vadd.f32 %v463_v52, %v462_v51 }
 0x122   : > { %v471_v56 = vadd.f32 %v470_v54, %v464_v53 }
 0x124   : > { %v472_v58 = vadd.f32 %v471_v56, %v465_v55 }
 0x126   : > { %v473_v60 = vadd.f32 %v472_v58, %v466_v57 }
 0x128   : > { %v474_v62 = vadd.f32 %v473_v60, %v467_v59 }
 0x12a   : > { %v475_v0 = vadd.f32 %v474_v62, %v468_v61 }
 0x12c   : > { %v476_v1 = vadd.f32 %v475_v0, %v469_v63 }
 0x12e   : > { %v477_v2 = vrot.slane %v476_v1, 4 }
 0x130   : > { %v478_v3 = vadd.f32 %v477_v2, %v476_v1 }
 0x132   : > { %v479_v4 = vrot.slane %v478_v3, 2 }
 0x134   : > { %v480_v5 = vadd.f32 %v479_v4, %v478_v3 }
 0x136   : > { %v481_v6 = vrot.slane %v480_v5, 1 }
 0x138   : > { %v482_v7 = vadd.f32 %v481_v6, %v480_v5 }
 0x13a   : > { %v483_v8 = vmul.f32 0.015625, %v482_v7 }
 0x13c   : > { %v484_v9 = vadd.f32 1e-05, %v483_v8 }
 0x13e   : > { %781 = vrsqrt.f32 %v484_v9 }
 0x148   : > { %v782_v10 = vpop.eup %781 }
 0x149   : > { %v486_v11 = vmul.f32 %v782_v10, %v454_v43  ;;  %v487_v12 = vmul.f32 %v782_v10, %v455_v44  ;;  %v488_v13 = vmul.f32 %v782_v10, %v456_v45  ;;  %v489_v14 = vmul.f32 %v782_v10, %v457_v46 }
 0x14a   : > { %v490_v15 = vmul.f32 %v782_v10, %v458_v47  ;;  %v491_v16 = vmul.f32 %v782_v10, %v459_v48  ;;  %v492_v17 = vmul.f32 %v782_v10, %v460_v49  ;;  %v493_v18 = vmul.f32 %v782_v10, %v461_v50 }
 0x14b   : > { %v494_v19 = vmax.f32 %v486_v11, 0.0  ;;  %v495_v20 = vmax.f32 %v487_v12, 0.0  ;;  %v496_v21 = vmax.f32 %v488_v13, 0.0  ;;  %v497_v22 = vmax.f32 %v489_v14, 0.0 }
 0x14c   : > { %v498_v23 = vmax.f32 %v490_v15, 0.0  ;;  %v499_v24 = vmax.f32 %v491_v16, 0.0  ;;  %v500_v25 = vmax.f32 %v492_v17, 0.0  ;;  %v501_v26 = vmax.f32 %v493_v18, 0.0 }
 0x14d   : > { %v673_v27 = vpack.c.bf16 %v495_v20, %v494_v19  ;;  %v678_v28 = vpack.c.bf16 %v497_v22, %v496_v21 }
 0x14e   : > { %v683_v29 = vpack.c.bf16 %v499_v24, %v498_v23  ;;  %v688_v30 = vpack.c.bf16 %v501_v26, %v500_v25 }
 0x14f   : > { %674 = vst [vmem:[%s215_s17] sm:$0xff] %v673_v27   ;;  %690 = vst [vmem:[%s215_s17 + $0x8] sm:$0xff] %v678_v28  }
 0x150   : > { %691 = vst [vmem:[%s215_s17 + $0x10] sm:$0xff] %v683_v29   ;;  %692 = vst [vmem:[%s215_s17 + $0x18] sm:$0xff] %v688_v30  }
 0x151 PF: > { %s13_s14 = sadd.s32 1, %s805_s14   ;;  %s904_s12 = smov %s801_s13 }
 0x152   : > { %p10_p5 = scmp.ge.s32.totalorder %s13_s14, 4   ;;  %s905_s13 = smov %s907_s15 }
 0x154   :  { %12 = sbr.rel (!%p10_p5) target bundleno = 2 (0x2), region = 73 }

// kernel: global_generator_forward.12
= control target key start
LH: loop header
LB: loop body
LE: loop exit
PB: predicated region body
PF: predicated region fallthrough
CT: control target
= control target key end

     0   :  { %s732_s12 = smov 0   ;;  %s734_s13 = smov 0   ;;  %s848_s0 = inlined_call_operand.vmem [shape: bf16[2,16,256], index: 0, kind: input, shape index: {}]   ;;  %s849_s1 = inlined_call_operand.vmem [shape: bf16[256,128], index: 1, kind: input, shape index: {}]   ;;  %s850_s2 = inlined_call_operand.vmem [shape: f32[1,128], index: 2, kind: input, shape index: {}]   ;;  %s851_s3 = inlined_call_operand.vmem [shape: bf16[2,16,128], index: 3, kind: output, shape index: {}]  }
   0x1   :  { %s736_s14 = smov 0   ;;  %s738_s15 = smov 0  }
   0x2   :  { %s740_s16 = smov 0   ;;  %s742_s17 = smov 0  }
   0x3   :  { %s744_s18 = smov 0  }
   0x4 LB: > { %s22_s19 = sadd.s32 1, %s699_s16  ;;  %s25_s20 = sadd.s32 1, %s703_s17  ;;  %s707_s18 = sphi %s744_s18, %s13_s18   ;;  %s703_s17 = sphi %s742_s17, %s857_s17   ;;  %s699_s16 = sphi %s740_s16, %s856_s16   ;;  %s695_s15 = sphi %s738_s15, %s855_s15   ;;  %s691_s14 = sphi %s736_s14, %s854_s14   ;;  %s687_s13 = sphi %s734_s13, %s853_s13   ;;  %s683_s12 = sphi %s732_s12, %s852_s12  }
   0x5   : > { %p23_p0 = scmp.ge.s32.totalorder %s22_s19, 2  ;;  %p41_p1 = scmp.ne.s32.totalorder %s687_s13, %s683_s12 }
   0x6   : > { %p42_p2 = scmp.eq.s32.totalorder %s707_s18, 0  ;;  %s34_s24 = sadd.s32 1, %s687_s13 }
   0x7   : > { %s859_s19 = smov (%p23_p0, %s22_s19), 0  ;;  %s861_s20 = smov (!%p23_p0, %s25_s20), %s703_s17 }
   0x8   : > { %p43_p3 = por %p42_p2, %p41_p1  ;;  %p27_p4 = scmp.ge.s32.totalorder %s861_s20, 2 }
   0x9   : > { %s30_s21 = ssub.s32 %s699_s16, %s859_s19  ;;  %p520_p6 = scmp.ge.s32.totalorder %s707_s18, 4 }
   0xa   : > { %s863_s20 = smov (%p27_p4, %s861_s20), 0 }
   0xb   : > { %s29_s22 = ssub.s32 %s703_s17, %s863_s20  ;;  %143 = sbr.rel (%p520_p6) target bundleno = 25 (0x19), region = 20 }
   0xc   : > { %s31_s23 = sor.u32 %s30_s21, %s29_s22 }
   0xd   : > { %p32_p5 = scmp.eq.s32.totalorder %s31_s23, 0 }
   0xf   : > { %s783_s25 = scalar_select %p32_p5, %s687_s13, %s34_s24  }
  0x12   : > { %146 = sbr.rel (!%p43_p3) target bundleno = 25 (0x19), region = 24  ;;  %s148_s26 = sand.u32 (%p43_p3), 1, %s687_s13  }
  0x13   : > { %s522_s27 = sshll.u32 (%p43_p3), %s703_s17, 2  ;;  %s521_s28 = sshll.u32 (%p43_p3), %s148_s26, 3 }
  0x14   : > { %s152_s29 = sadd.s32 (%p43_p3), %s699_s16, %s522_s27  ;;  %s150_s7 = scalar_lea.vmem (%p43_p3), [#allocation3], %s521_s28 }
  0x15   : > { %s523_s30 = sshll.u32 (%p43_p3), %s152_s29, 2 }
  0x16   : > { %s154_s6 = scalar_lea.vmem (%p43_p3), %s848_s0, %s523_s30 }
  0x17   : > { %v170_v0 = vld [vmem:[%s154_s6] sm:$0xf] (%p43_p3)  ;;  %v172_v1 = vld [vmem:[%s154_s6 + $0x8] sm:$0xf] (%p43_p3) }
  0x18   : > { %171 = vst [vmem:[%s150_s7] sm:$0xf] (%p43_p3), %v170_v0  ;;  %173 = vst [vmem:[%s150_s7 + $0x4] sm:$0xf] (%p43_p3), %v172_v1 }
  0x19 PF: > { %p524_p7 = scmp.ge.s32.totalorder %s707_s18, 1  ;;  %p208_p8 = scmp.lt.s32.totalorder %s707_s18, 5 }
  0x1b   : > { %p209_p9 = pnand %p524_p7, %p208_p8 }
  0x1c   : > { %s215_s8 = sand.u32 (!%p209_p9), 1, %s683_s12   ;;  %s526_s9 = sshll.u32 (!%p209_p9), %s691_s14, 4 }
  0x1d   : > { %212 = sbr.rel (%p209_p9) target bundleno = 361 (0x169), region = 69  ;;  %s796_s10 = sshll.u32 (!%p209_p9), %s215_s8, 3 }
  0x1e   : > { %p244_p10 = scmp.lt.s32.totalorder (!%p209_p9), %s526_s9, 31  ;;  %p249_p11 = scmp.lt.s32.totalorder (!%p209_p9), %s695_s15, 1 }
  0x1f   : > { %s217_s12 = scalar_lea.vmem (!%p209_p9), [#allocation3], %s796_s10  ;;  %p530_p12 = scmp.ne.s32.totalorder (!%p209_p9), %s691_s14, 0 }
  0x24   : > { %s865_s9 = smov (!%p244_p10, %s526_s9), 31  ;;  %s867_s15 = smov (!%p249_p11, %s695_s15), 1 }
  0x25   : > { %s527_s11 = sshll.u32 %s865_s9, 2  ;;  %s546_s24 = sshll.u32 %s867_s15, 3  ;;  %v709_v2 = vmov (!%p530_p12), 0.0  }
  0x26   : > { %s803_s23 = scalar_lea.vmem %s849_s1, %s527_s11  ;;  %s808_s28 = scalar_lea.vmem %s851_s3, %s546_s24  ;;  %259 = vst [vmem:[#allocation2] sm:$0xff] (!%p530_p12), %v709_v2  ;;  %260 = vst [vmem:[#allocation2 + $0x8] sm:$0xff] (!%p530_p12), %v709_v2 }
  0x27   : > { %258 = sbr.rel (%p530_p12) target bundleno = 46 (0x2e), region = 77 }
  0x2e PF: > { %v642_v3 = vld [vmem:[%s803_s23] sm:$0xff]   ;;  %v710_v4 = vmov 0.0   ;;  %v643_v5 = vld [vmem:[%s803_s23 + $0x8] sm:$0xff]   ;;  %vm711_vm0 = vmmov 0   ;;  %v644_v6 = vld [vmem:[%s803_s23 + $0x10] sm:$0xff]   ;;  %p540_p13 = scmp.ne.s32.totalorder %s691_s14, 1 }
  0x2f   : > { %563 = vmatprep.subr.bf16.mxu0 %v710_v4  ;;  %579 = vmatprep.mubr.msk.bf16.mxu0 %vm711_vm0, %v710_v4  ;;  %v645_v7 = vld [vmem:[%s803_s23 + $0x18] sm:$0xff]   ;;  %v646_v8 = vld [vmem:[%s803_s23 + $0x20] sm:$0xff]   ;;  %v647_v9 = vld [vmem:[%s803_s23 + $0x28] sm:$0xff]  }
  0x30   : > { %564 = vmatpush3.bf16.msra.mxu0 %v642_v3  ;;  %v648_v10 = vld [vmem:[%s803_s23 + $0x30] sm:$0xff]   ;;  %v649_v11 = vld [vmem:[%s803_s23 + $0x38] sm:$0xff]   ;;  %v261_v13 = vld [vmem:[#allocation2] sm:$0xff] }
  0x31   : > { %565 = vmatprep.subr.bf16.mxu0 %v710_v4  ;;  %v650_v12 = vld [vmem:[%s217_s12] sm:$0xff]   ;;  %v262_v15 = vld [vmem:[#allocation2 + $0x8] sm:$0xff]  ;;  %v541_v23 = vld [vmem:[%s850_s2] ss:$0 sm:$0xff] (!%p540_p13) }
  0x34   : > { %566 = vmatpush3.bf16.msra.mxu0 %v643_v5 }
  0x35   : > { %567 = vmatprep.subr.bf16.mxu0 %v710_v4 }
  0x38   : > { %568 = vmatpush3.bf16.msra.mxu0 %v644_v6 }
  0x39   : > { %569 = vmatprep.subr.bf16.mxu0 %v710_v4 }
  0x3c   : > { %570 = vmatpush3.bf16.msra.mxu0 %v645_v7 }
  0x3d   : > { %571 = vmatprep.subr.bf16.mxu0 %v710_v4 }
  0x40   : > { %572 = vmatpush3.bf16.msra.mxu0 %v646_v8 }
  0x41   : > { %573 = vmatprep.subr.bf16.mxu0 %v710_v4 }
  0x44   : > { %574 = vmatpush3.bf16.msra.mxu0 %v647_v9 }
  0x45   : > { %575 = vmatprep.subr.bf16.mxu0 %v710_v4 }
  0x48   : > { %576 = vmatpush3.bf16.msra.mxu0 %v648_v10 }
  0x49   : > { %577 = vmatprep.subr.bf16.mxu0 %v710_v4 }
  0x4c   : > { %578 = vmatpush3.bf16.msra.mxu0 %v649_v11 }
  0x4f   : > { %580 = vmatmul.mubr.bf16.vlgmr.msra.gmra.mrb[0].mxu0 %v650_v12 }
 0x121   : > { %383 = sbr.rel (%p540_p13) target bundleno = 361 (0x169), region = 81 }
 0x122   : > { %v369_v14 = vpop.f32.mrb[0].mxu0 }
 0x123   : > { %v376_v16 = vadd.f32 %v369_v14, %v261_v13  ;;  %v581_v17 = vpop.f32.mrb[1].mxu0 }
 0x124   : > { %v372_v18 = vpop.f32.mrb[2].mxu0 }
 0x125   : > { %378 = vst [vmem:[#allocation2] sm:$0xff] %v376_v16  ;;  %v377_v19 = vadd.f32 %v372_v18, %v262_v15  ;;  %v582_v20 = vpop.f32.mrb[3].mxu0 }
 0x127   : > { %379 = vst [vmem:[#allocation2 + $0x8] sm:$0xff] %v377_v19 }
 0x12c   : > { %v384_v21 = vld [vmem:[#allocation2] sm:$0xff] }
 0x12d   : > { %v393_v24 = vadd.f32 %v541_v23, %v384_v21 }
 0x12e   : > { %v385_v22 = vld [vmem:[#allocation2 + $0x8] sm:$0xff] }
 0x12f   : > { %v394_v25 = vadd.f32 %v541_v23, %v385_v22 }
 0x131   : > { %v395_v26 = vadd.f32 %v394_v25, %v393_v24 }
 0x133   : > { %v396_v27 = vrot.slane %v395_v26, 4 }
 0x135   : > { %v397_v28 = vadd.f32 %v396_v27, %v395_v26 }
 0x137   : > { %v398_v29 = vrot.slane %v397_v28, 2 }
 0x139   : > { %v399_v30 = vadd.f32 %v398_v29, %v397_v28 }
 0x13b   : > { %v400_v31 = vrot.slane %v399_v30, 1 }
 0x13d   : > { %v401_v32 = vadd.f32 %v400_v31, %v399_v30 }
 0x13f   : > { %v402_v33 = vmul.f32 0.0625, %v401_v32 }
 0x141   : > { %v403_v34 = vsub.f32 %v393_v24, %v402_v33  ;;  %v404_v35 = vsub.f32 %v394_v25, %v402_v33 }
 0x143   : > { %v405_v36 = vmul.f32 %v403_v34, %v403_v34  ;;  %v406_v37 = vmul.f32 %v404_v35, %v404_v35 }
 0x145   : > { %v407_v38 = vadd.f32 %v406_v37, %v405_v36 }
 0x147   : > { %v408_v39 = vrot.slane %v407_v38, 4 }
 0x149   : > { %v409_v40 = vadd.f32 %v408_v39, %v407_v38 }
 0x14b   : > { %v410_v41 = vrot.slane %v409_v40, 2 }
 0x14d   : > { %v411_v42 = vadd.f32 %v410_v41, %v409_v40 }
 0x14f   : > { %v412_v43 = vrot.slane %v411_v42, 1 }
 0x151   : > { %v413_v44 = vadd.f32 %v412_v43, %v411_v42 }
 0x153   : > { %v414_v45 = vmul.f32 0.0625, %v413_v44 }
 0x155   : > { %v415_v46 = vadd.f32 1e-05, %v414_v45 }
 0x157   : > { %651 = vrsqrt.f32 %v415_v46 }
 0x161   : > { %v652_v47 = vpop.eup %651 }
 0x162   : > { %v417_v48 = vmul.f32 %v652_v47, %v403_v34  ;;  %v418_v49 = vmul.f32 %v652_v47, %v404_v35 }
 0x164   : > { %v419_v50 = vmax.f32 %v417_v48, 0.0  ;;  %v420_v51 = vmax.f32 %v418_v49, 0.0 }
 0x166   : > { %v552_v52 = vpack.c.bf16 %v420_v51, %v419_v50 }
 0x168   : > { %553 = vst [vmem:[%s808_s28] sm:$0xff] %v552_v52  }
 0x169 PF: > { %s13_s18 = sadd.s32 1, %s707_s18   ;;  %s852_s12 = smov %s687_s13 }
 0x16a   : > { %p10_p0 = scmp.ge.s32.totalorder %s13_s18, 6   ;;  %s853_s13 = smov %s783_s25 }
 0x16b   : > { %s854_s14 = smov %s699_s16  ;;  %s855_s15 = smov %s703_s17 }
 0x16c   : > { %s856_s16 = smov %s859_s19  ;;  %s857_s17 = smov %s863_s20 }
 0x16d   :  { %12 = sbr.rel (!%p10_p0) target bundleno = 4 (0x4), region = 119 }

// kernel: global_generator_forward.13
= control target key start
LH: loop header
LB: loop body
LE: loop exit
PB: predicated region body
PF: predicated region fallthrough
CT: control target
= control target key end

     0   :  { %s1407_s15 = smov 0   ;;  %s1570_s0 = inlined_call_operand.vmem [shape: bf16[2,40,32], index: 0, kind: input, shape index: {}]   ;;  %s1571_s1 = inlined_call_operand.vmem [shape: bf16[9,32,128], index: 1, kind: input, shape index: {}]   ;;  %s1572_s2 = inlined_call_operand.vmem [shape: f32[1,128], index: 2, kind: input, shape index: {}]   ;;  %s1573_s3 = inlined_call_operand.vmem [shape: f32[24,1], index: 3, kind: input, shape index: {}]   ;;  %s1574_s4 = inlined_call_operand.vmem [shape: bf16[2,24,128], index: 4, kind: output, shape index: {}]  }
   0x1 LB: > { %s1117_s16 = sadd.s32 4294967295, %s1379_s15   ;;  %p1121_p0 = scmp.ge.s32.totalorder %s1379_s15, 1  ;;  %s1379_s15 = sphi %s1407_s15, %s14_s15  }
   0x2   : > { %p162_p1 = scmp.lt.s32.totalorder %s1379_s15, 3 }
   0x4   : > { %p163_p2 = pnand %p1121_p0, %p162_p1 }
   0x5   : > { %v1340_v0 = vld [vmem:[%s1571_s1 + $0x10] sm:$0xff] (!%p163_p2)   ;;  %p188_p3 = scmp.lt.s32.totalorder (!%p163_p2), %s1117_s16, 1  ;;  %v1341_v1 = vld [vmem:[%s1571_s1] sm:$0xff] (!%p163_p2)   ;;  %v1342_v2 = vld [vmem:[%s1571_s1 + $0x18] sm:$0xff] (!%p163_p2)   ;;  %vm250_vm0 = vcmask (!%p163_p2), 261120   ;;  %v1381_v18 = vmov (!%p163_p2), 0  }
   0x6   : > { %166 = sbr.rel (%p163_p2) target bundleno = 343 (0x157), region = 36  ;;  %1255 = vmatprep.subr.bf16.mxu0 (!%p163_p2), %v1340_v0  ;;  %1263 = vmatprep.subr.bf16.mxu1 (!%p163_p2), %v1341_v1  ;;  %v1343_v3 = vld [vmem:[%s1571_s1 + $0x8] sm:$0xff] (!%p163_p2)   ;;  %v1433_v4 = vld [vmem:[%s1571_s1 + $0x20] sm:$0xff] (!%p163_p2)   ;;  %v1348_v5 = vld [vmem:[%s1571_s1 + $0x30] sm:$0xff] (!%p163_p2)   ;;  %vm222_vm1 = vsmask.f32 (!%p163_p2), 7424 }
   0x7   : > { %1256 = vmatpush3.bf16.msra.mxu0 (!%p163_p2), %v1340_v0  ;;  %1264 = vmatpush3.bf16.msra.mxu1 (!%p163_p2), %v1341_v1  ;;  %v1350_v13 = vld [vmem:[%s1571_s1 + $0x38] sm:$0xff] (!%p163_p2)   ;;  %vm380_vm2 = vcmask (!%p163_p2), 1046528   ;;  %v1355_v29 = vld [vmem:[%s1571_s1 + $0x50] sm:$0xff] (!%p163_p2)   ;;  %vm466_vm3 = vcmask (!%p163_p2), 1044480   ;;  %v1349_v37 = vld [vmem:[%s1571_s1 + $0x28] sm:$0xff] (!%p163_p2)   ;;  %vm730_vm6 = vcmask (!%p163_p2), 1045504  }
   0x8   : > { %1257 = vmatprep.subr.bf16.mxu0 (!%p163_p2), %v1342_v2  ;;  %1265 = vmatprep.subr.bf16.mxu1 (!%p163_p2), %v1343_v3  ;;  %vm548_vm4 = vsmask.f32 (!%p163_p2), 4352  ;;  %v1357_v43 = vld [vmem:[%s1571_s1 + $0x58] sm:$0xff] (!%p163_p2)   ;;  %v1352_v47 = vld [vmem:[%s1571_s1 + $0x40] sm:$0xff] (!%p163_p2)   ;;  %v1362_v51 = vld [vmem:[%s1571_s1 + $0x70] sm:$0xff] (!%p163_p2)  }
   0x9   : > { %1338 = vset.pattern.permute.xlu0 (!%p163_p2), %v1381_v18  ;;  %1339 = vset.pattern.permute.xlu1 (!%p163_p2), %v1381_v18  ;;  %v1356_v62 = vld [vmem:[%s1571_s1 + $0x48] sm:$0xff] (!%p163_p2)   ;;  %vm812_vm5 = vsmask.f32 (!%p163_p2), 5376 }
   0xb   : > { %1258 = vmatpush3.bf16.msra.mxu0 (!%p163_p2), %v1342_v2  ;;  %1266 = vmatpush3.bf16.msra.mxu1 (!%p163_p2), %v1343_v3  ;;  %v990_v3 = vld [vmem:[%s1573_s3] sm:$0xff] (!%p163_p2) }
   0xc   : > { %1271 = vmatprep.subr.bf16.mxu0 (!%p163_p2), %v1433_v4  ;;  %1279 = vmatprep.subr.bf16.mxu1 (!%p163_p2), %v1348_v5 }
   0xd   : > { %s1576_s16 = smov (!%p188_p3, %s1117_s16), 1  ;;  %995 = vperm.xlu0 %1338, %v990_v3  }
   0xe   : > { %s1327_s25 = smul.u32 20, %s1576_s16 }
   0xf   : > { %s1328_s17 = smul.u32 12, %s1576_s16 }
  0x10   : > { %s1438_s30 = scalar_lea.vmem %s1570_s0, %s1327_s25 }
  0x11   : > { %v199_v6 = vld [vmem:[%s1438_s30] sm:$0xf]  ;;  %v1445_v7 = vld [vmem:[%s1438_s30 + $0x4] sm:$0xf]  ;;  %v1448_v8 = vld [vmem:[%s1438_s30 + $0x8] sm:$0xf]  ;;  %s197_s20 = scalar_lea.vmem %s1574_s4, %s1328_s17 }
  0x12   : > { %v206_v9 = vld [vmem:[%s1438_s30 + $0xc] sm:$0x1]  ;;  %v1128_v10 = vcombine.low %v199_v6, %v1445_v7  ;;  %v1134_v11 = vcombine.low %v1448_v8, %v1448_v8  ;;  %v371_v14 = vld [vmem:[%s1438_s30] sm:$0xe]  ;;  %v1171_v42 = vcombine.low %v1445_v7, %v1448_v8  ;;  %v711_v53 = vld [vmem:[%s1438_s30 + $0x4] sm:$0xc] }
  0x13   : > { %v1456_v12 = vcombine.low %v1448_v8, %v206_v9  ;;  %v1143_v17 = vcombine.low %v371_v14, %v1445_v7  ;;  %v453_v22 = vld [vmem:[%s1438_s30] sm:$0x8]  ;;  %v454_v25 = vld [vmem:[%s1438_s30 + $0xc] sm:$0x7]  ;;  %v712_v54 = vld [vmem:[%s1438_s30 + $0x8] sm:$0xf] }
  0x14   : > { %v224_v15 = vshrl.u32 %v1128_v10, 16  ;;  %v226_v16 = vshll.u32 %v1128_v10, 16  ;;  %1267 = vmatprep.mubr.msk.bf16.mxu1 %vm250_vm0, %v1128_v10  ;;  %v1152_v26 = vcombine.low %v453_v22, %v1445_v7  ;;  %v1153_v28 = vcombine.low %v1448_v8, %v454_v25  ;;  %v1479_v35 = vld [vmem:[%s1438_s30 + $0xc] sm:$0xf]  ;;  %v714_v57 = vld [vmem:[%s1438_s30 + $0x10] sm:$0x3] }
  0x15   : > { %v231_v19 = vshll.u32 %v1456_v12, 16  ;;  %v235_v20 = vshrl.u32 %v1456_v12, 16  ;;  %1268 = vmatmul.mubr.msk.bf16.vlgmr.msra.gmra.mrb[0].mxu1 %vm250_vm0, %v1134_v11  ;;  %v382_v21 = vrot.slane %v1456_v12, 1  ;;  %v381_v24 = vrot.slane %v1143_v17, 1  ;;  %v713_v55 = vld [vmem:[%s1438_s30 + $0xc] sm:$0xf] }
  0x16   : > { %v228_v23 = vrot.slane %v226_v16, 1  ;;  %1280 = vmatpush3.bf16.msra.mxu1 %v1348_v5  ;;  %v467_v31 = vrot.slane %v1152_v26, 3  ;;  %v468_v34 = vrot.slane %v1153_v28, 3  ;;  %v1162_v38 = vcombine.low %v1448_v8, %v1479_v35  ;;  %v803_v59 = vld [vmem:[%s1438_s30 + $0x10] sm:$0x7]  ;;  %v1364_v6 = vld [vmem:[%s1571_s1 + $0x78] sm:$0xff]  }
  0x17   : > { %v233_v27 = vrot.slane %v231_v19, 1  ;;  %1281 = vmatprep.subr.bf16.mxu1 %v1350_v13  ;;  %v383_v33 = vsel %vm380_vm2, %v381_v24, %v382_v21  ;;  %v550_v39 = vshrl.u32 %v1152_v26, 16  ;;  %v553_v41 = vshll.u32 %v1152_v26, 16  ;;  %v991_v9 = vld [vmem:[%s1573_s3 + $0x8] sm:$0xff]  ;;  %v992_v12 = vld [vmem:[%s1573_s3 + $0x10] sm:$0xff] }
  0x18   : > { %v229_v30 = vor.u32 %v228_v23, %v224_v15  ;;  %v469_v40 = vsel %vm466_vm3, %v467_v31, %v468_v34  ;;  %v558_v45 = vshrl.u32 %v1162_v38, 16  ;;  %v561_v46 = vshll.u32 %v1162_v38, 16  ;;  %v899_v18 = vld [vmem:[%s1438_s30 + $0x4] sm:$0x8]  ;;  %1000 = vperm.xlu0 %1338, %v991_v9   ;;  %1005 = vperm.xlu1 %1339, %v992_v12   ;;  %v1369_v26 = vld [vmem:[%s1571_s1 + $0x88] sm:$0xff]  }
  0x19   : > { %v237_v32 = vor.u32 %v235_v20, %v233_v27  ;;  %1283 = vmatprep.mubr.msk.bf16.mxu1 %vm250_vm0, %v469_v40  ;;  %v552_v44 = vrot.slane %v550_v39, 3  ;;  %v555_v48 = vrot.slane %v553_v41, 4  ;;  %v1181_v58 = vcombine.low %v711_v53, %v712_v54  ;;  %v1363_v20 = vld [vmem:[%s1571_s1 + $0x68] sm:$0xff]   ;;  %v1368_v23 = vld [vmem:[%s1571_s1 + $0x80] sm:$0xff]  }
  0x1a   : > { %v234_v36 = vsel %vm222_vm1, %v229_v30, %v233_v27  ;;  %1282 = vmatpush3.bf16.msra.mxu1 %v1350_v13  ;;  %v560_v49 = vrot.slane %v558_v45, 3  ;;  %v563_v50 = vrot.slane %v561_v46, 4  ;;  %v1172_v60 = vcombine.low %v1479_v35, %v1479_v35  ;;  %v1359_v13 = vld [vmem:[%s1571_s1 + $0x60] sm:$0xff]  }
  0x1b   : > { %1259 = vmatprep.mubr.msk.bf16.mxu0 %vm250_vm0, %v234_v36  ;;  %1295 = vmatprep.subr.bf16.mxu1 %v1355_v29  ;;  %v556_v52 = vor.u32 %v555_v48, %v552_v44  ;;  %v1513_v61 = vcombine.low %v713_v55, %v803_v59  ;;  %v1182_v0 = vcombine.low %v713_v55, %v714_v57  ;;  %v814_v1 = vshrl.u32 %v1181_v58, 16 }
  0x1c   : > { %1260 = vmatmul.mubr.msk.bf16.vlgmr.msra.gmra.mrb[0].mxu0 %vm250_vm0, %v237_v32  ;;  %v564_v56 = vor.u32 %v563_v50, %v560_v49  ;;  %v817_v2 = vshll.u32 %v1181_v58, 16  ;;  %v731_v14 = vrot.slane %v1181_v58, 2  ;;  %v1200_v22 = vcombine.low %v899_v18, %v712_v54 }
  0x1d   : > { %1272 = vmatpush3.bf16.msra.mxu0 %v1433_v4  ;;  %1275 = vmatprep.mubr.msk.bf16.mxu0 %vm250_vm0, %v383_v33  ;;  %v822_v4 = vshrl.u32 %v1513_v61, 16  ;;  %v825_v5 = vshll.u32 %v1513_v61, 16  ;;  %v816_v7 = vrot.slane %v814_v1, 2  ;;  %v732_v15 = vrot.slane %v1182_v0, 2 }
  0x1e   : > { %1273 = vmatprep.subr.bf16.mxu0 %v1349_v37  ;;  %1284 = vmatmul.mubr.msk.bf16.vlgmr.msra.gmra.mrb[4].mxu1 %vm250_vm0, %v468_v34  ;;  %v565_v63 = vsel %vm548_vm4, %v556_v52, %v564_v56  ;;  %v819_v8 = vrot.slane %v817_v2, 3  ;;  %v908_v24 = vrot.slane %v1200_v22, 3  ;;  %v909_v25 = vrot.slane %v1513_v61, 3 }
  0x1f   : > { %1296 = vmatpush3.bf16.msra.mxu1 %v1355_v29  ;;  %1299 = vmatprep.mubr.msk.bf16.mxu1 %vm250_vm0, %v1171_v42  ;;  %v824_v10 = vrot.slane %v822_v4, 2  ;;  %v827_v11 = vrot.slane %v825_v5, 3 }
  0x20   : > { %1297 = vmatprep.subr.bf16.mxu1 %v1357_v43  ;;  %v820_v16 = vor.u32 %v819_v8, %v816_v7  ;;  %v910_v27 = vsel %vm466_vm3, %v908_v24, %v909_v25 }
  0x21   : > { %1274 = vmatpush3.bf16.msra.mxu0 %v1349_v37  ;;  %v828_v17 = vor.u32 %v827_v11, %v824_v10 }
  0x22   : > { %1287 = vmatprep.subr.bf16.mxu0 %v1352_v47 }
  0x23   : > { %1298 = vmatpush3.bf16.msra.mxu1 %v1357_v43  ;;  %v829_v19 = vsel %vm812_vm5, %v820_v16, %v828_v17 }
  0x24   : > { %1276 = vmatmul.mubr.msk.bf16.vlgmr.msra.gmra.mrb[4].mxu0 %vm250_vm0, %v382_v21  ;;  %1311 = vmatprep.subr.bf16.mxu1 %v1362_v51  ;;  %v733_v21 = vsel %vm730_vm6, %v731_v14, %v732_v15 }
  0x25   : > { %1288 = vmatpush3.bf16.msra.mxu0 %v1352_v47  ;;  %1291 = vmatprep.mubr.msk.bf16.mxu0 %vm250_vm0, %v565_v63 }
  0x26   : > { %1289 = vmatprep.subr.bf16.mxu0 %v1356_v62  ;;  %1300 = vmatmul.mubr.msk.bf16.vlgmr.msra.gmra.mrb[8].mxu1 %vm250_vm0, %v1172_v60 }
  0x27   : > { %1312 = vmatpush3.bf16.msra.mxu1 %v1362_v51  ;;  %1315 = vmatprep.mubr.msk.bf16.mxu1 %vm250_vm0, %v829_v19 }
  0x28   : > { %1313 = vmatprep.subr.bf16.mxu1 %v1364_v6 }
  0x29   : > { %1290 = vmatpush3.bf16.msra.mxu0 %v1356_v62 }
  0x2a   : > { %1303 = vmatprep.subr.bf16.mxu0 %v1359_v13 }
  0x2b   : > { %1314 = vmatpush3.bf16.msra.mxu1 %v1364_v6 }
  0x2c   : > { %1292 = vmatmul.mubr.msk.bf16.vlgmr.msra.gmra.mrb[8].mxu0 %vm250_vm0, %v564_v56 }
  0x2d   : > { %1304 = vmatpush3.bf16.msra.mxu0 %v1359_v13  ;;  %1307 = vmatprep.mubr.msk.bf16.mxu0 %vm250_vm0, %v733_v21  ;;  %v1205_v21 = vld [vmem:[%s1572_s2] ss:$0 sm:$0xff] }
  0x2e   : > { %1305 = vmatprep.subr.bf16.mxu0 %v1363_v20  ;;  %1316 = vmatmul.mubr.msk.bf16.vlgmr.msra.gmra.mrb[12].mxu1 %vm250_vm0, %v828_v17 }
  0x31   : > { %1306 = vmatpush3.bf16.msra.mxu0 %v1363_v20 }
  0x32   : > { %1319 = vmatprep.subr.bf16.mxu0 %v1368_v23 }
  0x34   : > { %1308 = vmatmul.mubr.msk.bf16.vlgmr.msra.gmra.mrb[12].mxu0 %vm250_vm0, %v732_v15 }
  0x35   : > { %1320 = vmatpush3.bf16.msra.mxu0 %v1368_v23  ;;  %1323 = vmatprep.mubr.msk.bf16.mxu0 %vm250_vm0, %v910_v27 }
  0x36   : > { %1321 = vmatprep.subr.bf16.mxu0 %v1369_v26 }
  0x39   : > { %1322 = vmatpush3.bf16.msra.mxu0 %v1369_v26 }
  0x3c   : > { %1324 = vmatmul.mubr.msk.bf16.vlgmr.msra.gmra.mrb[16].mxu0 %vm250_vm0, %v909_v25 }
  0x8c   : > { %v996_v18 = vpop.permute.xlu0 %995 }
  0xe8   : > { %v1269_v28 = vpop.f32.mrb[0].mxu1 }
  0xe9   : > { %v357_v29 = vpop.f32.mrb[1].mxu1 }
  0xea   : > { %v1270_v30 = vpop.f32.mrb[2].mxu1 }
  0xeb   : > { %v360_v31 = vpop.f32.mrb[3].mxu1  ;;  %v1006_v30 = vpop.permute.xlu1 %1005 }
  0xef   : > { %v1261_v32 = vpop.f32.mrb[0].mxu0 }
  0xf0   : > { %v366_v33 = vadd.f32 %v1269_v28, %v1261_v32  ;;  %v291_v34 = vpop.f32.mrb[1].mxu0 }
  0xf1   : > { %v358_v35 = vadd.f32 %v357_v29, %v291_v34  ;;  %v1262_v36 = vpop.f32.mrb[2].mxu0  ;;  %v1285_v37 = vpop.f32.mrb[4].mxu1 }
  0xf2   : > { %v294_v38 = vpop.f32.mrb[3].mxu0  ;;  %v522_v39 = vpop.f32.mrb[5].mxu1 }
  0xf3   : > { %v361_v40 = vadd.f32 %v360_v31, %v294_v38  ;;  %v1286_v41 = vpop.f32.mrb[6].mxu1  ;;  %v1001_v29 = vpop.permute.xlu0 %1000 }
  0xf4   : > { %v525_v42 = vpop.f32.mrb[7].mxu1 }
  0xf7   : > { %v1277_v43 = vpop.f32.mrb[4].mxu0 }
  0xf8   : > { %v452_v44 = vadd.f32 %v1277_v43, %v366_v33  ;;  %v436_v45 = vpop.f32.mrb[5].mxu0 }
  0xf9   : > { %v450_v46 = vadd.f32 %v436_v45, %v358_v35  ;;  %v1278_v47 = vpop.f32.mrb[6].mxu0  ;;  %v1301_v48 = vpop.f32.mrb[8].mxu1 }
  0xfa   : > { %v538_v49 = vadd.f32 %v1285_v37, %v452_v44  ;;  %v439_v50 = vpop.f32.mrb[7].mxu0  ;;  %v694_v51 = vpop.f32.mrb[9].mxu1 }
  0xfb   : > { %v451_v52 = vadd.f32 %v439_v50, %v361_v40  ;;  %v536_v53 = vadd.f32 %v522_v39, %v450_v46  ;;  %v1302_v54 = vpop.f32.mrb[10].mxu1 }
  0xfc   : > { %v697_v55 = vpop.f32.mrb[11].mxu1 }
  0xfd   : > { %v537_v56 = vadd.f32 %v525_v42, %v451_v52 }
  0xff   : > { %v1293_v57 = vpop.f32.mrb[8].mxu0 }
 0x100   : > { %v634_v58 = vadd.f32 %v1293_v57, %v538_v49  ;;  %v618_v59 = vpop.f32.mrb[9].mxu0 }
 0x101   : > { %v632_v60 = vadd.f32 %v618_v59, %v536_v53  ;;  %v1294_v61 = vpop.f32.mrb[10].mxu0  ;;  %v1317_v62 = vpop.f32.mrb[12].mxu1 }
 0x102   : > { %v710_v63 = vadd.f32 %v1301_v48, %v634_v58  ;;  %v621_v0 = vpop.f32.mrb[11].mxu0  ;;  %v882_v1 = vpop.f32.mrb[13].mxu1 }
 0x103   : > { %v633_v2 = vadd.f32 %v621_v0, %v537_v56  ;;  %v708_v3 = vadd.f32 %v694_v51, %v632_v60  ;;  %v1318_v4 = vpop.f32.mrb[14].mxu1 }
 0x104   : > { %v885_v5 = vpop.f32.mrb[15].mxu1 }
 0x105   : > { %v709_v6 = vadd.f32 %v697_v55, %v633_v2 }
 0x107   : > { %v1309_v7 = vpop.f32.mrb[12].mxu0 }
 0x108   : > { %v802_v8 = vadd.f32 %v1309_v7, %v710_v63  ;;  %v786_v9 = vpop.f32.mrb[13].mxu0 }
 0x109   : > { %v800_v10 = vadd.f32 %v786_v9, %v708_v3  ;;  %v1310_v11 = vpop.f32.mrb[14].mxu0 }
 0x10a   : > { %v898_v12 = vadd.f32 %v1317_v62, %v802_v8  ;;  %v789_v13 = vpop.f32.mrb[15].mxu0 }
 0x10b   : > { %v801_v14 = vadd.f32 %v789_v13, %v709_v6  ;;  %v896_v15 = vadd.f32 %v882_v1, %v800_v10 }
 0x10d   : > { %v897_v16 = vadd.f32 %v885_v5, %v801_v14 }
 0x10f   : > { %v1325_v17 = vpop.f32.mrb[16].mxu0 }
 0x110   : > { %v979_v19 = vadd.f32 %v1325_v17, %v898_v12  ;;  %v963_v20 = vpop.f32.mrb[17].mxu0 }
 0x111   : > { %v977_v22 = vadd.f32 %v963_v20, %v896_v15  ;;  %v1326_v23 = vpop.f32.mrb[18].mxu0 }
 0x112   : > { %v966_v24 = vpop.f32.mrb[19].mxu0  ;;  %v989_v28 = vadd.f32 %v1205_v21, %v979_v19 }
 0x113   : > { %v987_v25 = vadd.f32 %v1205_v21, %v977_v22  ;;  %v978_v26 = vadd.f32 %v966_v24, %v897_v16 }
 0x114   : > { %v1010_v33 = vmul.f32 %v1006_v30, %v989_v28 }
 0x115   : > { %v988_v27 = vadd.f32 %v1205_v21, %v978_v26  ;;  %v1008_v31 = vmul.f32 %v996_v18, %v987_v25 }
 0x117   : > { %v1009_v32 = vmul.f32 %v1001_v29, %v988_v27 }
 0x119   : > { %v1011_v34 = vadd.f32 %v1009_v32, %v1008_v31 }
 0x11b   : > { %v1012_v35 = vadd.f32 %v1011_v34, %v1010_v33 }
 0x11d   : > { %v1013_v36 = vrot.slane %v1012_v35, 4 }
 0x11f   : > { %v1014_v37 = vadd.f32 %v1013_v36, %v1012_v35 }
 0x121   : > { %v1015_v38 = vrot.slane %v1014_v37, 2 }
 0x123   : > { %v1016_v39 = vadd.f32 %v1015_v38, %v1014_v37 }
 0x125   : > { %v1017_v40 = vrot.slane %v1016_v39, 1 }
 0x127   : > { %v1018_v41 = vadd.f32 %v1017_v40, %v1016_v39 }
 0x129   : > { %v1019_v42 = vmul.f32 0.0625, %v1018_v41 }
 0x12b   : > { %v1020_v43 = vsub.f32 %v987_v25, %v1019_v42  ;;  %v1021_v44 = vsub.f32 %v988_v27, %v1019_v42  ;;  %v1022_v45 = vsub.f32 %v989_v28, %v1019_v42 }
 0x12d   : > { %v1023_v46 = vmul.f32 %v1020_v43, %v1020_v43  ;;  %v1024_v47 = vmul.f32 %v1021_v44, %v1021_v44  ;;  %v1025_v48 = vmul.f32 %v1022_v45, %v1022_v45 }
 0x12f   : > { %v1026_v49 = vmul.f32 %v1023_v46, %v996_v18  ;;  %v1027_v50 = vmul.f32 %v1024_v47, %v1001_v29  ;;  %v1028_v51 = vmul.f32 %v1025_v48, %v1006_v30 }
 0x131   : > { %v1029_v52 = vadd.f32 %v1027_v50, %v1026_v49 }
 0x133   : > { %v1030_v53 = vadd.f32 %v1029_v52, %v1028_v51 }
 0x135   : > { %v1031_v54 = vrot.slane %v1030_v53, 4 }
 0x137   : > { %v1032_v55 = vadd.f32 %v1031_v54, %v1030_v53 }
 0x139   : > { %v1033_v56 = vrot.slane %v1032_v55, 2 }
 0x13b   : > { %v1034_v57 = vadd.f32 %v1033_v56, %v1032_v55 }
 0x13d   : > { %v1035_v58 = vrot.slane %v1034_v57, 1 }
 0x13f   : > { %v1036_v59 = vadd.f32 %v1035_v58, %v1034_v57 }
 0x141   : > { %v1037_v60 = vmul.f32 0.0625, %v1036_v59 }
 0x143   : > { %v1038_v61 = vadd.f32 1e-05, %v1037_v60 }
 0x145   : > { %1371 = vrsqrt.f32 %v1038_v61 }
 0x14f   : > { %v1372_v62 = vpop.eup %1371 }
 0x150   : > { %v1040_v63 = vmul.f32 %v1372_v62, %v1020_v43  ;;  %v1041_v0 = vmul.f32 %v1372_v62, %v1021_v44  ;;  %v1042_v1 = vmul.f32 %v1372_v62, %v1022_v45 }
 0x152   : > { %v1043_v2 = vmax.f32 %v1040_v63, 0.0  ;;  %v1044_v3 = vmax.f32 %v1041_v0, 0.0  ;;  %v1045_v4 = vmax.f32 %v1042_v1, 0.0 }
 0x154   : > { %v1213_v5 = vpack.c.bf16 %v1045_v4, %v1045_v4  ;;  %v1217_v6 = vpack.c.bf16 %v1044_v3, %v1043_v2 }
 0x156   : > { %1218 = vst [vmem:[%s197_s20] sm:$0xff] %v1217_v6   ;;  %1061 = vst [vmem:[%s197_s20 + $0x8] sm:$0xf] %v1213_v5 }
 0x157 PF: > { %s14_s15 = sadd.s32 1, %s1379_s15  }
 0x158   : > { %p11_p4 = scmp.ge.s32.totalorder %s14_s15, 4  }
 0x15a   :  { %13 = sbr.rel (!%p11_p4) target bundleno = 1 (0x1), region = 74 }

// kernel: global_generator_forward.14
= control target key start
LH: loop header
LB: loop body
LE: loop exit
PB: predicated region body
PF: predicated region fallthrough
CT: control target
= control target key end

     0   :  { %s1482_s18 = smov 0   ;;  %s1648_s0 = inlined_call_operand.vmem [shape: bf16[2,40,32], index: 0, kind: input, shape index: {}]   ;;  %s1649_s1 = inlined_call_operand.vmem [shape: bf16[9,32,128], index: 1, kind: input, shape index: {}]   ;;  %s1650_s2 = inlined_call_operand.vmem [shape: f32[1,128], index: 2, kind: input, shape index: {}]   ;;  %s1651_s3 = inlined_call_operand.vmem [shape: f32[24,1], index: 3, kind: input, shape index: {}]   ;;  %s1652_s4 = inlined_call_operand.vmem [shape: bf16[2,24,128], index: 4, kind: input, shape index: {}]   ;;  %s1653_s5 = inlined_call_operand.vmem [shape: bf16[2,24,128], index: 5, kind: output, shape index: {}]  }
   0x1 LB: > { %s1182_s19 = sadd.s32 4294967295, %s1449_s18   ;;  %p1186_p0 = scmp.ge.s32.totalorder %s1449_s18, 1  ;;  %s1449_s18 = sphi %s1482_s18, %s15_s18  }
   0x2   : > { %p197_p1 = scmp.lt.s32.totalorder %s1449_s18, 3 }
   0x4   : > { %p198_p2 = pnand %p1186_p0, %p197_p1 }
   0x5   : > { %v1410_v0 = vld [vmem:[%s1649_s1 + $0x10] sm:$0xff] (!%p198_p2)   ;;  %p230_p3 = scmp.lt.s32.totalorder (!%p198_p2), %s1182_s19, 1  ;;  %v1411_v1 = vld [vmem:[%s1649_s1] sm:$0xff] (!%p198_p2)   ;;  %v1412_v2 = vld [vmem:[%s1649_s1 + $0x18] sm:$0xff] (!%p198_p2)   ;;  %vm303_vm0 = vcmask (!%p198_p2), 261120   ;;  %v1451_v18 = vmov (!%p198_p2), 0  }
   0x6   : > { %201 = sbr.rel (%p198_p2) target bundleno = 343 (0x157), region = 40  ;;  %1325 = vmatprep.subr.bf16.mxu0 (!%p198_p2), %v1410_v0  ;;  %1333 = vmatprep.subr.bf16.mxu1 (!%p198_p2), %v1411_v1  ;;  %v1413_v3 = vld [vmem:[%s1649_s1 + $0x8] sm:$0xff] (!%p198_p2)   ;;  %v1508_v4 = vld [vmem:[%s1649_s1 + $0x20] sm:$0xff] (!%p198_p2)   ;;  %v1418_v5 = vld [vmem:[%s1649_s1 + $0x30] sm:$0xff] (!%p198_p2)   ;;  %vm275_vm1 = vsmask.f32 (!%p198_p2), 7424 }
   0x7   : > { %1326 = vmatpush3.bf16.msra.mxu0 (!%p198_p2), %v1410_v0  ;;  %1334 = vmatpush3.bf16.msra.mxu1 (!%p198_p2), %v1411_v1  ;;  %v1420_v13 = vld [vmem:[%s1649_s1 + $0x38] sm:$0xff] (!%p198_p2)   ;;  %vm433_vm2 = vcmask (!%p198_p2), 1046528   ;;  %v1425_v29 = vld [vmem:[%s1649_s1 + $0x50] sm:$0xff] (!%p198_p2)   ;;  %vm519_vm3 = vcmask (!%p198_p2), 1044480   ;;  %v1419_v37 = vld [vmem:[%s1649_s1 + $0x28] sm:$0xff] (!%p198_p2)   ;;  %vm783_vm6 = vcmask (!%p198_p2), 1045504  }
   0x8   : > { %1327 = vmatprep.subr.bf16.mxu0 (!%p198_p2), %v1412_v2  ;;  %1335 = vmatprep.subr.bf16.mxu1 (!%p198_p2), %v1413_v3  ;;  %vm601_vm4 = vsmask.f32 (!%p198_p2), 4352  ;;  %v1427_v43 = vld [vmem:[%s1649_s1 + $0x58] sm:$0xff] (!%p198_p2)   ;;  %v1422_v47 = vld [vmem:[%s1649_s1 + $0x40] sm:$0xff] (!%p198_p2)   ;;  %v1432_v51 = vld [vmem:[%s1649_s1 + $0x70] sm:$0xff] (!%p198_p2)  }
   0x9   : > { %1408 = vset.pattern.permute.xlu0 (!%p198_p2), %v1451_v18  ;;  %1409 = vset.pattern.permute.xlu1 (!%p198_p2), %v1451_v18  ;;  %v1426_v62 = vld [vmem:[%s1649_s1 + $0x48] sm:$0xff] (!%p198_p2)   ;;  %vm865_vm5 = vsmask.f32 (!%p198_p2), 5376 }
   0xb   : > { %1328 = vmatpush3.bf16.msra.mxu0 (!%p198_p2), %v1412_v2  ;;  %1336 = vmatpush3.bf16.msra.mxu1 (!%p198_p2), %v1413_v3  ;;  %v1043_v3 = vld [vmem:[%s1651_s3] sm:$0xff] (!%p198_p2) }
   0xc   : > { %1341 = vmatprep.subr.bf16.mxu0 (!%p198_p2), %v1508_v4  ;;  %1349 = vmatprep.subr.bf16.mxu1 (!%p198_p2), %v1418_v5 }
   0xd   : > { %s1655_s19 = smov (!%p230_p3, %s1182_s19), 1  ;;  %1048 = vperm.xlu0 %1408, %v1043_v3  }
   0xe   : > { %s1397_s28 = smul.u32 20, %s1655_s19 }
   0xf   : > { %s1398_s22 = smul.u32 12, %s1655_s19 }
  0x10   : > { %s1513_s8 = scalar_lea.vmem %s1648_s0, %s1397_s28 }
  0x11   : > { %v252_v6 = vld [vmem:[%s1513_s8] sm:$0xf]  ;;  %v1520_v7 = vld [vmem:[%s1513_s8 + $0x4] sm:$0xf]  ;;  %v1523_v8 = vld [vmem:[%s1513_s8 + $0x8] sm:$0xf]  ;;  %s239_s25 = scalar_lea.vmem %s1652_s4, %s1398_s22  ;;  %s244_s19 = scalar_lea.vmem %s1653_s5, %s1398_s22 }
  0x12   : > { %v259_v9 = vld [vmem:[%s1513_s8 + $0xc] sm:$0x1]  ;;  %v1194_v10 = vcombine.low %v252_v6, %v1520_v7  ;;  %v1200_v11 = vcombine.low %v1523_v8, %v1523_v8  ;;  %v424_v14 = vld [vmem:[%s1513_s8] sm:$0xe]  ;;  %v1237_v42 = vcombine.low %v1520_v7, %v1523_v8  ;;  %v764_v53 = vld [vmem:[%s1513_s8 + $0x4] sm:$0xc] }
  0x13   : > { %v1531_v12 = vcombine.low %v1523_v8, %v259_v9  ;;  %v1209_v17 = vcombine.low %v424_v14, %v1520_v7  ;;  %v506_v22 = vld [vmem:[%s1513_s8] sm:$0x8]  ;;  %v507_v25 = vld [vmem:[%s1513_s8 + $0xc] sm:$0x7]  ;;  %v765_v54 = vld [vmem:[%s1513_s8 + $0x8] sm:$0xf] }
  0x14   : > { %v277_v15 = vshrl.u32 %v1194_v10, 16  ;;  %v279_v16 = vshll.u32 %v1194_v10, 16  ;;  %1337 = vmatprep.mubr.msk.bf16.mxu1 %vm303_vm0, %v1194_v10  ;;  %v1218_v26 = vcombine.low %v506_v22, %v1520_v7  ;;  %v1219_v28 = vcombine.low %v1523_v8, %v507_v25  ;;  %v1554_v35 = vld [vmem:[%s1513_s8 + $0xc] sm:$0xf]  ;;  %v767_v57 = vld [vmem:[%s1513_s8 + $0x10] sm:$0x3] }
  0x15   : > { %v284_v19 = vshll.u32 %v1531_v12, 16  ;;  %v288_v20 = vshrl.u32 %v1531_v12, 16  ;;  %1338 = vmatmul.mubr.msk.bf16.vlgmr.msra.gmra.mrb[0].mxu1 %vm303_vm0, %v1200_v11  ;;  %v435_v21 = vrot.slane %v1531_v12, 1  ;;  %v434_v24 = vrot.slane %v1209_v17, 1  ;;  %v766_v55 = vld [vmem:[%s1513_s8 + $0xc] sm:$0xf] }
  0x16   : > { %v281_v23 = vrot.slane %v279_v16, 1  ;;  %1350 = vmatpush3.bf16.msra.mxu1 %v1418_v5  ;;  %v520_v31 = vrot.slane %v1218_v26, 3  ;;  %v521_v34 = vrot.slane %v1219_v28, 3  ;;  %v1228_v38 = vcombine.low %v1523_v8, %v1554_v35  ;;  %v856_v59 = vld [vmem:[%s1513_s8 + $0x10] sm:$0x7]  ;;  %v1434_v6 = vld [vmem:[%s1649_s1 + $0x78] sm:$0xff]  }
  0x17   : > { %v286_v27 = vrot.slane %v284_v19, 1  ;;  %1351 = vmatprep.subr.bf16.mxu1 %v1420_v13  ;;  %v436_v33 = vsel %vm433_vm2, %v434_v24, %v435_v21  ;;  %v603_v39 = vshrl.u32 %v1218_v26, 16  ;;  %v606_v41 = vshll.u32 %v1218_v26, 16  ;;  %v1044_v9 = vld [vmem:[%s1651_s3 + $0x8] sm:$0xff]  ;;  %v1045_v12 = vld [vmem:[%s1651_s3 + $0x10] sm:$0xff] }
  0x18   : > { %v282_v30 = vor.u32 %v281_v23, %v277_v15  ;;  %v522_v40 = vsel %vm519_vm3, %v520_v31, %v521_v34  ;;  %v611_v45 = vshrl.u32 %v1228_v38, 16  ;;  %v614_v46 = vshll.u32 %v1228_v38, 16  ;;  %v952_v18 = vld [vmem:[%s1513_s8 + $0x4] sm:$0x8]  ;;  %1053 = vperm.xlu0 %1408, %v1044_v9   ;;  %1058 = vperm.xlu1 %1409, %v1045_v12   ;;  %v1439_v26 = vld [vmem:[%s1649_s1 + $0x88] sm:$0xff]  }
  0x19   : > { %v290_v32 = vor.u32 %v288_v20, %v286_v27  ;;  %1353 = vmatprep.mubr.msk.bf16.mxu1 %vm303_vm0, %v522_v40  ;;  %v605_v44 = vrot.slane %v603_v39, 3  ;;  %v608_v48 = vrot.slane %v606_v41, 4  ;;  %v1247_v58 = vcombine.low %v764_v53, %v765_v54  ;;  %v1433_v20 = vld [vmem:[%s1649_s1 + $0x68] sm:$0xff]   ;;  %v1438_v23 = vld [vmem:[%s1649_s1 + $0x80] sm:$0xff]  }
  0x1a   : > { %v287_v36 = vsel %vm275_vm1, %v282_v30, %v286_v27  ;;  %1352 = vmatpush3.bf16.msra.mxu1 %v1420_v13  ;;  %v613_v49 = vrot.slane %v611_v45, 3  ;;  %v616_v50 = vrot.slane %v614_v46, 4  ;;  %v1238_v60 = vcombine.low %v1554_v35, %v1554_v35  ;;  %v1429_v13 = vld [vmem:[%s1649_s1 + $0x60] sm:$0xff]  }
  0x1b   : > { %1329 = vmatprep.mubr.msk.bf16.mxu0 %vm303_vm0, %v287_v36  ;;  %1365 = vmatprep.subr.bf16.mxu1 %v1425_v29  ;;  %v609_v52 = vor.u32 %v608_v48, %v605_v44  ;;  %v1588_v61 = vcombine.low %v766_v55, %v856_v59  ;;  %v1248_v0 = vcombine.low %v766_v55, %v767_v57  ;;  %v867_v1 = vshrl.u32 %v1247_v58, 16 }
  0x1c   : > { %1330 = vmatmul.mubr.msk.bf16.vlgmr.msra.gmra.mrb[0].mxu0 %vm303_vm0, %v290_v32  ;;  %v617_v56 = vor.u32 %v616_v50, %v613_v49  ;;  %v870_v2 = vshll.u32 %v1247_v58, 16  ;;  %v784_v14 = vrot.slane %v1247_v58, 2  ;;  %v1266_v22 = vcombine.low %v952_v18, %v765_v54 }
  0x1d   : > { %1342 = vmatpush3.bf16.msra.mxu0 %v1508_v4  ;;  %1345 = vmatprep.mubr.msk.bf16.mxu0 %vm303_vm0, %v436_v33  ;;  %v875_v4 = vshrl.u32 %v1588_v61, 16  ;;  %v878_v5 = vshll.u32 %v1588_v61, 16  ;;  %v869_v7 = vrot.slane %v867_v1, 2  ;;  %v785_v15 = vrot.slane %v1248_v0, 2 }
  0x1e   : > { %1343 = vmatprep.subr.bf16.mxu0 %v1419_v37  ;;  %1354 = vmatmul.mubr.msk.bf16.vlgmr.msra.gmra.mrb[4].mxu1 %vm303_vm0, %v521_v34  ;;  %v618_v63 = vsel %vm601_vm4, %v609_v52, %v617_v56  ;;  %v872_v8 = vrot.slane %v870_v2, 3  ;;  %v961_v24 = vrot.slane %v1266_v22, 3  ;;  %v962_v25 = vrot.slane %v1588_v61, 3 }
  0x1f   : > { %1366 = vmatpush3.bf16.msra.mxu1 %v1425_v29  ;;  %1369 = vmatprep.mubr.msk.bf16.mxu1 %vm303_vm0, %v1237_v42  ;;  %v877_v10 = vrot.slane %v875_v4, 2  ;;  %v880_v11 = vrot.slane %v878_v5, 3 }
  0x20   : > { %1367 = vmatprep.subr.bf16.mxu1 %v1427_v43  ;;  %v873_v16 = vor.u32 %v872_v8, %v869_v7  ;;  %v963_v27 = vsel %vm519_vm3, %v961_v24, %v962_v25 }
  0x21   : > { %1344 = vmatpush3.bf16.msra.mxu0 %v1419_v37  ;;  %v881_v17 = vor.u32 %v880_v11, %v877_v10 }
  0x22   : > { %1357 = vmatprep.subr.bf16.mxu0 %v1422_v47 }
  0x23   : > { %1368 = vmatpush3.bf16.msra.mxu1 %v1427_v43  ;;  %v882_v19 = vsel %vm865_vm5, %v873_v16, %v881_v17 }
  0x24   : > { %1346 = vmatmul.mubr.msk.bf16.vlgmr.msra.gmra.mrb[4].mxu0 %vm303_vm0, %v435_v21  ;;  %1381 = vmatprep.subr.bf16.mxu1 %v1432_v51  ;;  %v786_v21 = vsel %vm783_vm6, %v784_v14, %v785_v15 }
  0x25   : > { %1358 = vmatpush3.bf16.msra.mxu0 %v1422_v47  ;;  %1361 = vmatprep.mubr.msk.bf16.mxu0 %vm303_vm0, %v618_v63 }
  0x26   : > { %1359 = vmatprep.subr.bf16.mxu0 %v1426_v62  ;;  %1370 = vmatmul.mubr.msk.bf16.vlgmr.msra.gmra.mrb[8].mxu1 %vm303_vm0, %v1238_v60 }
  0x27   : > { %1382 = vmatpush3.bf16.msra.mxu1 %v1432_v51  ;;  %1385 = vmatprep.mubr.msk.bf16.mxu1 %vm303_vm0, %v882_v19 }
  0x28   : > { %1383 = vmatprep.subr.bf16.mxu1 %v1434_v6 }
  0x29   : > { %1360 = vmatpush3.bf16.msra.mxu0 %v1426_v62 }
  0x2a   : > { %1373 = vmatprep.subr.bf16.mxu0 %v1429_v13 }
  0x2b   : > { %1384 = vmatpush3.bf16.msra.mxu1 %v1434_v6 }
  0x2c   : > { %1362 = vmatmul.mubr.msk.bf16.vlgmr.msra.gmra.mrb[8].mxu0 %vm303_vm0, %v617_v56 }
  0x2d   : > { %1374 = vmatpush3.bf16.msra.mxu0 %v1429_v13  ;;  %1377 = vmatprep.mubr.msk.bf16.mxu0 %vm303_vm0, %v786_v21  ;;  %v1271_v21 = vld [vmem:[%s1650_s2] ss:$0 sm:$0xff] }
  0x2e   : > { %1375 = vmatprep.subr.bf16.mxu0 %v1433_v20  ;;  %1386 = vmatmul.mubr.msk.bf16.vlgmr.msra.gmra.mrb[12].mxu1 %vm303_vm0, %v881_v17 }
  0x31   : > { %1376 = vmatpush3.bf16.msra.mxu0 %v1433_v20 }
  0x32   : > { %1389 = vmatprep.subr.bf16.mxu0 %v1438_v23 }
  0x34   : > { %1378 = vmatmul.mubr.msk.bf16.vlgmr.msra.gmra.mrb[12].mxu0 %vm303_vm0, %v785_v15 }
  0x35   : > { %1390 = vmatpush3.bf16.msra.mxu0 %v1438_v23  ;;  %1393 = vmatprep.mubr.msk.bf16.mxu0 %vm303_vm0, %v963_v27 }
  0x36   : > { %1391 = vmatprep.subr.bf16.mxu0 %v1439_v26 }
  0x39   : > { %1392 = vmatpush3.bf16.msra.mxu0 %v1439_v26 }
  0x3c   : > { %1394 = vmatmul.mubr.msk.bf16.vlgmr.msra.gmra.mrb[16].mxu0 %vm303_vm0, %v962_v25 }
  0x8c   : > { %v1049_v18 = vpop.permute.xlu0 %1048 }
  0xe8   : > { %v1339_v28 = vpop.f32.mrb[0].mxu1 }
  0xe9   : > { %v410_v29 = vpop.f32.mrb[1].mxu1 }
  0xea   : > { %v1340_v30 = vpop.f32.mrb[2].mxu1 }
  0xeb   : > { %v413_v31 = vpop.f32.mrb[3].mxu1  ;;  %v1059_v30 = vpop.permute.xlu1 %1058 }
  0xef   : > { %v1331_v32 = vpop.f32.mrb[0].mxu0 }
  0xf0   : > { %v419_v33 = vadd.f32 %v1339_v28, %v1331_v32  ;;  %v344_v34 = vpop.f32.mrb[1].mxu0 }
  0xf1   : > { %v411_v35 = vadd.f32 %v410_v29, %v344_v34  ;;  %v1332_v36 = vpop.f32.mrb[2].mxu0  ;;  %v1355_v37 = vpop.f32.mrb[4].mxu1 }
  0xf2   : > { %v347_v38 = vpop.f32.mrb[3].mxu0  ;;  %v575_v39 = vpop.f32.mrb[5].mxu1 }
  0xf3   : > { %v414_v40 = vadd.f32 %v413_v31, %v347_v38  ;;  %v1356_v41 = vpop.f32.mrb[6].mxu1  ;;  %v1054_v29 = vpop.permute.xlu0 %1053 }
  0xf4   : > { %v578_v42 = vpop.f32.mrb[7].mxu1 }
  0xf7   : > { %v1347_v43 = vpop.f32.mrb[4].mxu0 }
  0xf8   : > { %v505_v44 = vadd.f32 %v1347_v43, %v419_v33  ;;  %v489_v45 = vpop.f32.mrb[5].mxu0 }
  0xf9   : > { %v503_v46 = vadd.f32 %v489_v45, %v411_v35  ;;  %v1348_v47 = vpop.f32.mrb[6].mxu0  ;;  %v1371_v48 = vpop.f32.mrb[8].mxu1 }
  0xfa   : > { %v591_v49 = vadd.f32 %v1355_v37, %v505_v44  ;;  %v492_v50 = vpop.f32.mrb[7].mxu0  ;;  %v747_v51 = vpop.f32.mrb[9].mxu1 }
  0xfb   : > { %v504_v52 = vadd.f32 %v492_v50, %v414_v40  ;;  %v589_v53 = vadd.f32 %v575_v39, %v503_v46  ;;  %v1372_v54 = vpop.f32.mrb[10].mxu1 }
  0xfc   : > { %v750_v55 = vpop.f32.mrb[11].mxu1 }
  0xfd   : > { %v590_v56 = vadd.f32 %v578_v42, %v504_v52 }
  0xff   : > { %v1363_v57 = vpop.f32.mrb[8].mxu0 }
 0x100   : > { %v687_v58 = vadd.f32 %v1363_v57, %v591_v49  ;;  %v671_v59 = vpop.f32.mrb[9].mxu0 }
 0x101   : > { %v685_v60 = vadd.f32 %v671_v59, %v589_v53  ;;  %v1364_v61 = vpop.f32.mrb[10].mxu0  ;;  %v1387_v62 = vpop.f32.mrb[12].mxu1 }
 0x102   : > { %v763_v63 = vadd.f32 %v1371_v48, %v687_v58  ;;  %v674_v0 = vpop.f32.mrb[11].mxu0  ;;  %v935_v1 = vpop.f32.mrb[13].mxu1 }
 0x103   : > { %v686_v2 = vadd.f32 %v674_v0, %v590_v56  ;;  %v761_v3 = vadd.f32 %v747_v51, %v685_v60  ;;  %v1388_v4 = vpop.f32.mrb[14].mxu1 }
 0x104   : > { %v938_v5 = vpop.f32.mrb[15].mxu1 }
 0x105   : > { %v762_v6 = vadd.f32 %v750_v55, %v686_v2 }
 0x107   : > { %v1379_v7 = vpop.f32.mrb[12].mxu0 }
 0x108   : > { %v855_v8 = vadd.f32 %v1379_v7, %v763_v63  ;;  %v839_v9 = vpop.f32.mrb[13].mxu0  ;;  %v248_v63 = vld [vmem:[%s239_s25 + $0x8] sm:$0xf] }
 0x109   : > { %v853_v10 = vadd.f32 %v839_v9, %v761_v3  ;;  %v1380_v11 = vpop.f32.mrb[14].mxu0  ;;  %v251_v2 = vunpack.c.l.bf16 %v248_v63 }
 0x10a   : > { %v951_v12 = vadd.f32 %v1387_v62, %v855_v8  ;;  %v842_v13 = vpop.f32.mrb[15].mxu0  ;;  %v1281_v62 = vld [vmem:[%s239_s25] sm:$0xff]  }
 0x10b   : > { %v854_v14 = vadd.f32 %v842_v13, %v762_v6  ;;  %v949_v15 = vadd.f32 %v935_v1, %v853_v10  ;;  %v1282_v0 = vunpack.c.l.bf16 %v1281_v62  ;;  %v1283_v1 = vunpack.c.h.bf16 %v1281_v62 }
 0x10d   : > { %v950_v16 = vadd.f32 %v938_v5, %v854_v14 }
 0x10f   : > { %v1395_v17 = vpop.f32.mrb[16].mxu0 }
 0x110   : > { %v1032_v19 = vadd.f32 %v1395_v17, %v951_v12  ;;  %v1016_v20 = vpop.f32.mrb[17].mxu0 }
 0x111   : > { %v1030_v22 = vadd.f32 %v1016_v20, %v949_v15  ;;  %v1396_v23 = vpop.f32.mrb[18].mxu0 }
 0x112   : > { %v1019_v24 = vpop.f32.mrb[19].mxu0  ;;  %v1042_v28 = vadd.f32 %v1271_v21, %v1032_v19 }
 0x113   : > { %v1040_v25 = vadd.f32 %v1271_v21, %v1030_v22  ;;  %v1031_v26 = vadd.f32 %v1019_v24, %v950_v16 }
 0x114   : > { %v1063_v33 = vmul.f32 %v1059_v30, %v1042_v28 }
 0x115   : > { %v1041_v27 = vadd.f32 %v1271_v21, %v1031_v26  ;;  %v1061_v31 = vmul.f32 %v1049_v18, %v1040_v25 }
 0x117   : > { %v1062_v32 = vmul.f32 %v1054_v29, %v1041_v27 }
 0x119   : > { %v1064_v34 = vadd.f32 %v1062_v32, %v1061_v31 }
 0x11b   : > { %v1065_v35 = vadd.f32 %v1064_v34, %v1063_v33 }
 0x11d   : > { %v1066_v36 = vrot.slane %v1065_v35, 4 }
 0x11f   : > { %v1067_v37 = vadd.f32 %v1066_v36, %v1065_v35 }
 0x121   : > { %v1068_v38 = vrot.slane %v1067_v37, 2 }
 0x123   : > { %v1069_v39 = vadd.f32 %v1068_v38, %v1067_v37 }
 0x125   : > { %v1070_v40 = vrot.slane %v1069_v39, 1 }
 0x127   : > { %v1071_v41 = vadd.f32 %v1070_v40, %v1069_v39 }
 0x129   : > { %v1072_v42 = vmul.f32 0.0625, %v1071_v41 }
 0x12b   : > { %v1073_v43 = vsub.f32 %v1040_v25, %v1072_v42  ;;  %v1074_v44 = vsub.f32 %v1041_v27, %v1072_v42  ;;  %v1075_v45 = vsub.f32 %v1042_v28, %v1072_v42 }
 0x12d   : > { %v1076_v46 = vmul.f32 %v1073_v43, %v1073_v43  ;;  %v1077_v47 = vmul.f32 %v1074_v44, %v1074_v44  ;;  %v1078_v48 = vmul.f32 %v1075_v45, %v1075_v45 }
 0x12f   : > { %v1079_v49 = vmul.f32 %v1076_v46, %v1049_v18  ;;  %v1080_v50 = vmul.f32 %v1077_v47, %v1054_v29  ;;  %v1081_v51 = vmul.f32 %v1078_v48, %v1059_v30 }
 0x131   : > { %v1082_v52 = vadd.f32 %v1080_v50, %v1079_v49 }
 0x133   : > { %v1083_v53 = vadd.f32 %v1082_v52, %v1081_v51 }
 0x135   : > { %v1084_v54 = vrot.slane %v1083_v53, 4 }
 0x137   : > { %v1085_v55 = vadd.f32 %v1084_v54, %v1083_v53 }
 0x139   : > { %v1086_v56 = vrot.slane %v1085_v55, 2 }
 0x13b   : > { %v1087_v57 = vadd.f32 %v1086_v56, %v1085_v55 }
 0x13d   : > { %v1088_v58 = vrot.slane %v1087_v57, 1 }
 0x13f   : > { %v1089_v59 = vadd.f32 %v1088_v58, %v1087_v57 }
 0x141   : > { %v1090_v60 = vmul.f32 0.0625, %v1089_v59 }
 0x143   : > { %v1091_v61 = vadd.f32 1e-05, %v1090_v60 }
 0x145   : > { %1441 = vrsqrt.f32 %v1091_v61 }
 0x14f   : > { %v1442_v3 = vpop.eup %1441 }
 0x150   : > { %v1093_v4 = vmul.f32 %v1442_v3, %v1073_v43  ;;  %v1094_v5 = vmul.f32 %v1442_v3, %v1074_v44  ;;  %v1095_v6 = vmul.f32 %v1442_v3, %v1075_v45 }
 0x152   : > { %v1096_v7 = vadd.f32 %v1282_v0, %v1093_v4  ;;  %v1097_v8 = vadd.f32 %v1283_v1, %v1094_v5  ;;  %v1098_v9 = vadd.f32 %v1095_v6, %v251_v2 }
 0x154   : > { %v1279_v10 = vpack.c.bf16 %v1098_v9, %v1098_v9  ;;  %v1287_v11 = vpack.c.bf16 %v1097_v8, %v1096_v7 }
 0x156   : > { %1288 = vst [vmem:[%s244_s19] sm:$0xff] %v1287_v11   ;;  %1114 = vst [vmem:[%s244_s19 + $0x8] sm:$0xf] %v1279_v10 }
 0x157 PF: > { %s15_s18 = sadd.s32 1, %s1449_s18  }
 0x158   : > { %p12_p4 = scmp.ge.s32.totalorder %s15_s18, 4  }
 0x15a   :  { %14 = sbr.rel (!%p12_p4) target bundleno = 1 (0x1), region = 81 }

// kernel: tile.13
= control target key start
LH: loop header
LB: loop body
LE: loop exit
PB: predicated region body
PF: predicated region fallthrough
CT: control target
= control target key end

     0   :  { %s22_s0 = inlined_call_operand.vmem [shape: f32[128], index: 0, kind: input, shape index: {}]   ;;  %s23_s1 = inlined_call_operand.vmem [shape: f32[4,128], index: 1, kind: output, shape index: {}]  }
   0x1   :  { %v4_v0 = vld [vmem:[%s22_s0] ss:$0 sm:$0xff] }
   0x2   :  { %5 = vst [vmem:[%s23_s1] sm:$0xf] %v4_v0 }

// kernel: global_generator_forward.17
= control target key start
LH: loop header
LB: loop body
LE: loop exit
PB: predicated region body
PF: predicated region fallthrough
CT: control target
= control target key end

     0   :  { %s1464_s15 = smov 0   ;;  %s1775_s0 = inlined_call_operand.vmem [shape: bf16[2,32,32], index: 0, kind: input, shape index: {}]   ;;  %s1776_s1 = inlined_call_operand.vmem [shape: bf16[4,32,512], index: 1, kind: input, shape index: {}]   ;;  %s1777_s2 = inlined_call_operand.vmem [shape: f32[1,512], index: 2, kind: input, shape index: {}]   ;;  %s1778_s3 = inlined_call_operand.vmem [shape: f32[20,1], index: 3, kind: input, shape index: {}]   ;;  %s1779_s4 = inlined_call_operand.vmem [shape: bf16[2,20,512], index: 4, kind: output, shape index: {}]  }
   0x1 LB: > { %s1237_s16 = sadd.s32 4294967295, %s1436_s15   ;;  %p1241_p0 = scmp.ge.s32.totalorder %s1436_s15, 1  ;;  %s1436_s15 = sphi %s1464_s15, %s14_s15  }
   0x2   : > { %p162_p1 = scmp.lt.s32.totalorder %s1436_s15, 3 }
   0x4   : > { %p163_p2 = pnand %p1241_p0, %p162_p1 }
   0x5   : > { %v1374_v0 = vld [vmem:[%s1776_s1 + $0x44] ss:$16 sps:$4 sm:$0xff] (!%p163_p2)   ;;  %p188_p3 = scmp.lt.s32.totalorder (!%p163_p2), %s1237_s16, 1  ;;  %v1376_v1 = vld [vmem:[%s1776_s1 + $0x40] ss:$16 sps:$4 sm:$0xff] (!%p163_p2)   ;;  %v1438_v2 = vmov (!%p163_p2), 0  }
   0x6   : > { %166 = sbr.rel (%p163_p2) target bundleno = 383 (0x17f), region = 36  ;;  %323 = vmatprep.mubr.bf16.mxu0 (!%p163_p2), %v1438_v2  ;;  %374 = vmatprep.mubr.bf16.mxu1 (!%p163_p2), %v1438_v2  ;;  %v1377_v3 = vld [vmem:[%s1776_s1 + $0x4c] ss:$16 sps:$4 sm:$0xff] (!%p163_p2)   ;;  %v1379_v4 = vld [vmem:[%s1776_s1 + $0x48] ss:$16 sps:$4 sm:$0xff] (!%p163_p2)   ;;  %vm284_vm1 = vcmask (!%p163_p2), 261120  }
   0x7   : > { %291 = vmatprep.subr.bf16.mxu0 (!%p163_p2), %v1374_v0  ;;  %1372 = vset.pattern.permute.xlu0 (!%p163_p2), %v1438_v2  ;;  %v1380_v5 = vld [vmem:[%s1776_s1 + $0x64] ss:$16 sps:$4 sm:$0xff] (!%p163_p2)   ;;  %v1382_v6 = vld [vmem:[%s1776_s1 + $0x60] ss:$16 sps:$4 sm:$0xff] (!%p163_p2)   ;;  %v1383_v7 = vld [vmem:[%s1776_s1 + $0x6c] ss:$16 sps:$4 sm:$0xff] (!%p163_p2)  }
   0x8   : > { %292 = vmatpush1.bf16.msra.mxu0 (!%p163_p2), %v1376_v1  ;;  %1373 = vset.pattern.permute.xlu1 (!%p163_p2), %v1438_v2  ;;  %v1385_v8 = vld [vmem:[%s1776_s1 + $0x68] ss:$16 sps:$4 sm:$0xff] (!%p163_p2)   ;;  %v1388_v9 = vld [vmem:[%s1776_s1 + $0x4] ss:$16 sps:$4 sm:$0xff] (!%p163_p2)   ;;  %v1393_v14 = vld [vmem:[%s1776_s1 + $0xc] ss:$16 sps:$4 sm:$0xff] (!%p163_p2)  }
   0x9   : > { %342 = vmatprep.subr.bf16.mxu1 (!%p163_p2), %v1377_v3  ;;  %293 = vmatprep.subr.bf16.mxu0 (!%p163_p2), %v1380_v5  ;;  %vm228_vm0 = vsmask.f32 (!%p163_p2), 7424  ;;  %v1386_v18 = vld [vmem:[%s1776_s1] ss:$16 sps:$4 sm:$0xff] (!%p163_p2)   ;;  %v1391_v20 = vld [vmem:[%s1776_s1 + $0x8] ss:$16 sps:$4 sm:$0xff] (!%p163_p2)  }
   0xa   : > { %343 = vmatpush1.bf16.msra.mxu1 (!%p163_p2), %v1379_v4  ;;  %v1396_v21 = vld [vmem:[%s1776_s1 + $0x24] ss:$16 sps:$4 sm:$0xff] (!%p163_p2)   ;;  %v1399_v23 = vld [vmem:[%s1776_s1 + $0x2c] ss:$16 sps:$4 sm:$0xff] (!%p163_p2)   ;;  %v1394_v24 = vld [vmem:[%s1776_s1 + $0x20] ss:$16 sps:$4 sm:$0xff] (!%p163_p2)  }
   0xb   : > { %344 = vmatprep.subr.bf16.mxu1 (!%p163_p2), %v1383_v7  ;;  %v1397_v26 = vld [vmem:[%s1776_s1 + $0x28] ss:$16 sps:$4 sm:$0xff] (!%p163_p2)   ;;  %v1402_v27 = vld [vmem:[%s1776_s1 + $0x84] ss:$16 sps:$4 sm:$0xff] (!%p163_p2)   ;;  %v1405_v28 = vld [vmem:[%s1776_s1 + $0x8c] ss:$16 sps:$4 sm:$0xff] (!%p163_p2)  }
   0xc   : > { %294 = vmatpush1.bf16.msra.mxu0 (!%p163_p2), %v1382_v6  ;;  %v955_v30 = vld [vmem:[%s1778_s3] sm:$0xff] (!%p163_p2)  ;;  %v956_v33 = vld [vmem:[%s1778_s3 + $0x8] sm:$0xff] (!%p163_p2)  ;;  %v957_v34 = vld [vmem:[%s1778_s3 + $0x10] sm:$0xf] (!%p163_p2)  ;;  %vm566_vm2 = vsmask.f32 (!%p163_p2), 5376 }
   0xd   : > { %s1781_s16 = smov (!%p188_p3, %s1237_s16), 1  ;;  %441 = vmatprep.subr.bf16.mxu0 %v1388_v9  ;;  %960 = vperm.xlu0 %1372, %v955_v30   ;;  %v1400_v35 = vld [vmem:[%s1776_s1 + $0x80] ss:$16 sps:$4 sm:$0xff]   ;;  %v1403_v36 = vld [vmem:[%s1776_s1 + $0x88] ss:$16 sps:$4 sm:$0xff]   ;;  %vm757_vm3 = vcmask 1044480  }
   0xe   : > { %s1331_s5 = sshll.u32 %s1781_s16, 4  ;;  %345 = vmatpush1.bf16.msra.mxu1 %v1385_v8  ;;  %970 = vperm.xlu1 %1373, %v957_v34   ;;  %v1408_v39 = vld [vmem:[%s1776_s1 + $0xa4] ss:$16 sps:$4 sm:$0xff]   ;;  %v1412_v40 = vld [vmem:[%s1776_s1 + $0xac] ss:$16 sps:$4 sm:$0xff]   ;;  %vm986_vm4 = vcmask 1043456  }
   0xf   : > { %s1506_s10 = scalar_lea.vmem %s1775_s0, %s1331_s5  ;;  %492 = vmatprep.subr.bf16.mxu1 %v1393_v14  ;;  %v1406_v41 = vld [vmem:[%s1776_s1 + $0xa0] ss:$16 sps:$4 sm:$0xff]   ;;  %v1410_v42 = vld [vmem:[%s1776_s1 + $0xa8] ss:$16 sps:$4 sm:$0xff]   ;;  %v1415_v47 = vld [vmem:[%s1776_s1 + $0xc4] ss:$16 sps:$4 sm:$0xff]  }
  0x10   : > { %v1389_v10 = vld [vmem:[%s1506_s10] sm:$0xff]   ;;  %v1390_v11 = vld [vmem:[%s1506_s10 + $0x8] ss:$0 sps:$4 sm:$0x77]   ;;  %v1420_v48 = vld [vmem:[%s1776_s1 + $0xcc] ss:$16 sps:$4 sm:$0xff]  }
  0x11   : > { %v230_v12 = vshrl.u32 %v1389_v10, 16  ;;  %v232_v13 = vshll.u32 %v1389_v10, 16  ;;  %v237_v15 = vshll.u32 %v1390_v11, 16  ;;  %v241_v25 = vshrl.u32 %v1390_v11, 16  ;;  %v543_v31 = vld [vmem:[%s1506_s10] sm:$0xc]  ;;  %965 = vperm.xlu0 %1372, %v956_v33  }
  0x12   : > { %v1553_v32 = vld [vmem:[%s1506_s10 + $0x4] sm:$0xf]  ;;  %v1417_v38 = vld [vmem:[%s1506_s10 + $0x8] sm:$0x1f]   ;;  %v1413_v56 = vld [vmem:[%s1776_s1 + $0xc0] ss:$16 sps:$4 sm:$0xff]  }
  0x13   : > { %v234_v16 = vrot.slane %v232_v13, 1  ;;  %v239_v17 = vrot.slane %v237_v15, 1  ;;  %v1288_v37 = vcombine.low %v543_v31, %v1553_v32  ;;  %v576_v45 = vshrl.u32 %v1417_v38, 16  ;;  %v1409_v49 = vld [vmem:[%s1506_s10 + $0x8] ss:$0 sps:$4 sm:$0x33]  }
  0x14   : > { %v579_v46 = vshll.u32 %v1417_v38, 16  ;;  %v1418_v58 = vld [vmem:[%s1776_s1 + $0xc8] ss:$16 sps:$4 sm:$0xff]   ;;  %v1423_v59 = vld [vmem:[%s1776_s1 + $0xe4] ss:$16 sps:$4 sm:$0xff]   ;;  %v759_v3 = vrot.slane %v1417_v38, 3 }
  0x15   : > { %v235_v19 = vor.u32 %v234_v16, %v230_v12  ;;  %v243_v29 = vor.u32 %v241_v25, %v239_v17  ;;  %v568_v43 = vshrl.u32 %v1288_v37, 16  ;;  %v571_v44 = vshll.u32 %v1288_v37, 16  ;;  %v1426_v60 = vld [vmem:[%s1776_s1 + $0xec] ss:$16 sps:$4 sm:$0xff]   ;;  %v1421_v61 = vld [vmem:[%s1776_s1 + $0xe0] ss:$16 sps:$4 sm:$0xff]  }
  0x16   : > { %v578_v52 = vrot.slane %v576_v45, 2  ;;  %v581_v53 = vrot.slane %v579_v46, 3  ;;  %v1424_v62 = vld [vmem:[%s1776_s1 + $0xe8] ss:$16 sps:$4 sm:$0xff]   ;;  %v744_v63 = vld [vmem:[%s1506_s10] sm:$0x8] }
  0x17   : > { %v240_v22 = vsel %vm228_vm0, %v235_v19, %v239_v17  ;;  %v570_v50 = vrot.slane %v568_v43, 2  ;;  %v573_v51 = vrot.slane %v571_v44, 3  ;;  %v1310_v0 = vcombine.low %v744_v63, %v1553_v32  ;;  %s1362_s22 = smul.u32 48, %s1781_s16 }
  0x18   : > { %1263 = vmatmul.mubr.msk.bf16.vlgmr.msra.gmra.mrb[0].mxu0 %vm284_vm1, %v240_v22  ;;  %1265 = vmatmul.mubr.msk.bf16.vlgmr.msra.gmra.mrb[0].mxu1 %vm284_vm1, %v240_v22  ;;  %v582_v55 = vor.u32 %v581_v53, %v578_v52 }
  0x19   : > { %442 = vmatpush1.bf16.msra.mxu0 %v1386_v18  ;;  %493 = vmatpush1.bf16.msra.mxu1 %v1391_v20  ;;  %v574_v54 = vor.u32 %v573_v51, %v570_v50  ;;  %v758_v1 = vrot.slane %v1310_v0, 3  ;;  %s197_s24 = scalar_lea.vmem %s1779_s4, %s1362_s22 }
  0x1a   : > { %333 = vmatprep.mubr.bf16.mxu0 %v1438_v2  ;;  %384 = vmatprep.mubr.bf16.mxu1 %v1438_v2 }
  0x1b   : > { %443 = vmatprep.subr.bf16.mxu0 %v1396_v21  ;;  %494 = vmatprep.subr.bf16.mxu1 %v1399_v23  ;;  %v583_v57 = vsel %vm566_vm2, %v574_v54, %v582_v55  ;;  %v760_v4 = vsel %vm757_vm3, %v758_v1, %v759_v3 }
  0x1d   : > { %444 = vmatpush1.bf16.msra.mxu0 %v1394_v24  ;;  %495 = vmatpush1.bf16.msra.mxu1 %v1397_v26  ;;  %v923_v24 = vlaneseq }
  0x1e   : > { %630 = vmatprep.subr.bf16.mxu0 %v1402_v27  ;;  %681 = vmatprep.subr.bf16.mxu1 %v1405_v28 }
  0x1f   : > { %v924_v25 = vshrl.u32 %v923_v24, 7 }
  0x20   : > { %1264 = vmatmul.mubr.msk.bf16.gmra.mrb[4].mxu0 %vm284_vm1, %v243_v29  ;;  %1266 = vmatmul.mubr.msk.bf16.gmra.mrb[4].mxu1 %vm284_vm1, %v243_v29 }
  0x21   : > { %473 = vmatprep.mubr.bf16.mxu0 %v1438_v2  ;;  %524 = vmatprep.mubr.bf16.mxu1 %v1438_v2  ;;  %v1632_v33 = vsub.s32 0, %v924_v25  ;;  %v933_v34 = vsub.s32 2, %v924_v25 }
  0x28   : > { %1276 = vmatmul.mubr.msk.bf16.vlgmr.msra.gmra.mrb[0].mxu0 %vm284_vm1, %v1389_v10  ;;  %1278 = vmatmul.mubr.msk.bf16.vlgmr.msra.gmra.mrb[0].mxu1 %vm284_vm1, %v1389_v10 }
  0x29   : > { %631 = vmatpush1.bf16.msra.mxu0 %v1400_v35  ;;  %682 = vmatpush1.bf16.msra.mxu1 %v1403_v36 }
  0x2a   : > { %483 = vmatprep.mubr.bf16.mxu0 %v1438_v2  ;;  %534 = vmatprep.mubr.bf16.mxu1 %v1438_v2 }
  0x2b   : > { %632 = vmatprep.subr.bf16.mxu0 %v1408_v39  ;;  %683 = vmatprep.subr.bf16.mxu1 %v1412_v40  ;;  %v921_v39 = vld [vmem:[%s1777_s2] sm:$0xf]  ;;  %v929_v40 = vsub.s32 1, %v924_v25 }
  0x2c   : > { %v926_v44 = vrot.slane %v921_v39, %v1632_v33  ;;  %v934_v45 = vrot.slane %v921_v39, %v933_v34 }
  0x2d   : > { %633 = vmatpush1.bf16.msra.mxu0 %v1406_v41  ;;  %684 = vmatpush1.bf16.msra.mxu1 %v1410_v42  ;;  %v937_v41 = vsub.s32 3, %v924_v25  ;;  %v930_v46 = vrot.slane %v921_v39, %v929_v40 }
  0x2e   : > { %807 = vmatprep.subr.bf16.mxu0 %v1415_v47  ;;  %858 = vmatprep.subr.bf16.mxu1 %v1420_v48 }
  0x2f   : > { %v938_v47 = vrot.slane %v921_v39, %v937_v41 }
  0x30   : > { %1277 = vmatmul.mubr.msk.bf16.gmra.mrb[8].mxu0 %vm284_vm1, %v1409_v49  ;;  %1279 = vmatmul.mubr.msk.bf16.gmra.mrb[8].mxu1 %vm284_vm1, %v1409_v49 }
  0x31   : > { %662 = vmatprep.mubr.bf16.mxu0 %v1438_v2  ;;  %713 = vmatprep.mubr.bf16.mxu1 %v1438_v2 }
  0x38   : > { %1298 = vmatmul.mubr.msk.bf16.vlgmr.msra.gmra.mrb[0].mxu0 %vm284_vm1, %v583_v57  ;;  %1300 = vmatmul.mubr.msk.bf16.vlgmr.msra.gmra.mrb[0].mxu1 %vm284_vm1, %v583_v57 }
  0x39   : > { %808 = vmatpush1.bf16.msra.mxu0 %v1413_v56  ;;  %859 = vmatpush1.bf16.msra.mxu1 %v1418_v58 }
  0x3a   : > { %672 = vmatprep.mubr.bf16.mxu0 %v1438_v2  ;;  %723 = vmatprep.mubr.bf16.mxu1 %v1438_v2 }
  0x3b   : > { %809 = vmatprep.subr.bf16.mxu0 %v1423_v59  ;;  %860 = vmatprep.subr.bf16.mxu1 %v1426_v60 }
  0x3d   : > { %810 = vmatpush1.bf16.msra.mxu0 %v1421_v61  ;;  %861 = vmatpush1.bf16.msra.mxu1 %v1424_v62 }
  0x40   : > { %1299 = vmatmul.mubr.msk.bf16.gmra.mrb[12].mxu0 %vm284_vm1, %v582_v55  ;;  %1301 = vmatmul.mubr.msk.bf16.gmra.mrb[12].mxu1 %vm284_vm1, %v582_v55 }
  0x41   : > { %839 = vmatprep.mubr.bf16.mxu0 %v1438_v2  ;;  %890 = vmatprep.mubr.bf16.mxu1 %v1438_v2 }
  0x48   : > { %1319 = vmatmul.mubr.msk.bf16.vlgmr.msra.gmra.mrb[0].mxu0 %vm284_vm1, %v760_v4  ;;  %1321 = vmatmul.mubr.msk.bf16.vlgmr.msra.gmra.mrb[0].mxu1 %vm284_vm1, %v760_v4 }
  0x49   : > { %849 = vmatprep.mubr.bf16.mxu0 %v1438_v2  ;;  %900 = vmatprep.mubr.bf16.mxu1 %v1438_v2 }
  0x50   : > { %1320 = vmatmul.mubr.msk.bf16.gmra.mrb[16].mxu0 %vm284_vm1, %v759_v3  ;;  %1322 = vmatmul.mubr.msk.bf16.gmra.mrb[16].mxu1 %vm284_vm1, %v759_v3 }
  0x8c   : > { %v1630_v26 = vpop.permute.xlu0 %960 }
  0x90   : > { %v1638_v48 = vpop.permute.xlu0 %965 }
  0xf3   : > { %v335_v5 = vpop.f32.mrb[4].mxu0  ;;  %v386_v6 = vpop.f32.mrb[4].mxu1 }
  0xf4   : > { %v337_v7 = vpop.f32.mrb[5].mxu0  ;;  %v388_v8 = vpop.f32.mrb[5].mxu1 }
  0xf5   : > { %v339_v9 = vpop.f32.mrb[6].mxu0  ;;  %v390_v10 = vpop.f32.mrb[6].mxu1 }
  0xf6   : > { %v340_v11 = vpop.f32.mrb[7].mxu0  ;;  %v391_v12 = vpop.f32.mrb[7].mxu1 }
  0xf7   : > { %v1672_v12 = vpop.permute.xlu1 %970 }
 0x103   : > { %v485_v13 = vpop.f32.mrb[8].mxu0  ;;  %v536_v14 = vpop.f32.mrb[8].mxu1 }
 0x104   : > { %v486_v15 = vadd.f32 %v485_v13, %v335_v5  ;;  %v537_v16 = vadd.f32 %v536_v14, %v386_v6  ;;  %v487_v17 = vpop.f32.mrb[9].mxu0  ;;  %v538_v18 = vpop.f32.mrb[9].mxu1 }
 0x105   : > { %v488_v19 = vadd.f32 %v487_v17, %v337_v7  ;;  %v539_v2 = vadd.f32 %v538_v18, %v388_v8  ;;  %v489_v20 = vpop.f32.mrb[10].mxu0  ;;  %v540_v21 = vpop.f32.mrb[10].mxu1 }
 0x106   : > { %v490_v22 = vpop.f32.mrb[11].mxu0  ;;  %v541_v23 = vpop.f32.mrb[11].mxu1 }
 0x113   : > { %v674_v27 = vpop.f32.mrb[12].mxu0  ;;  %v725_v28 = vpop.f32.mrb[12].mxu1 }
 0x114   : > { %v740_v29 = vadd.f32 %v674_v27, %v486_v15  ;;  %v742_v30 = vadd.f32 %v725_v28, %v537_v16  ;;  %v676_v31 = vpop.f32.mrb[13].mxu0  ;;  %v727_v32 = vpop.f32.mrb[13].mxu1 }
 0x115   : > { %v741_v35 = vadd.f32 %v676_v31, %v488_v19  ;;  %v743_v36 = vadd.f32 %v727_v32, %v539_v2  ;;  %v678_v37 = vpop.f32.mrb[14].mxu0  ;;  %v729_v38 = vpop.f32.mrb[14].mxu1 }
 0x116   : > { %v679_v42 = vpop.f32.mrb[15].mxu0  ;;  %v730_v43 = vpop.f32.mrb[15].mxu1 }
 0x11b   : > { %v841_v49 = vpop.f32.mrb[0].mxu0  ;;  %v892_v50 = vpop.f32.mrb[0].mxu1 }
 0x11c   : > { %v1640_v51 = vadd.f32 %v926_v44, %v841_v49  ;;  %v1642_v52 = vadd.f32 %v934_v45, %v892_v50  ;;  %v843_v53 = vpop.f32.mrb[1].mxu0  ;;  %v894_v54 = vpop.f32.mrb[1].mxu1 }
 0x11d   : > { %v1644_v55 = vadd.f32 %v930_v46, %v843_v53  ;;  %v1646_v56 = vadd.f32 %v938_v47, %v894_v54  ;;  %v845_v57 = vpop.f32.mrb[2].mxu0  ;;  %v896_v58 = vpop.f32.mrb[2].mxu1 }
 0x11e   : > { %v1648_v59 = vadd.f32 %v926_v44, %v845_v57  ;;  %v1650_v60 = vadd.f32 %v934_v45, %v896_v58  ;;  %v847_v61 = vpop.f32.mrb[3].mxu0  ;;  %v898_v62 = vpop.f32.mrb[3].mxu1  ;;  %v973_v1 = vmul.f32 %v1630_v26, %v1640_v51  ;;  %v975_v3 = vmul.f32 %v1630_v26, %v1642_v52 }
 0x11f   : > { %v1652_v63 = vadd.f32 %v930_v46, %v847_v61  ;;  %v1654_v0 = vadd.f32 %v938_v47, %v898_v62  ;;  %v974_v6 = vmul.f32 %v1630_v26, %v1644_v55  ;;  %v976_v7 = vmul.f32 %v1630_v26, %v1646_v56 }
 0x120   : > { %v977_v4 = vmul.f32 %v1638_v48, %v1648_v59  ;;  %v979_v5 = vmul.f32 %v1638_v48, %v1650_v60 }
 0x121   : > { %v978_v8 = vmul.f32 %v1638_v48, %v1652_v63  ;;  %v980_v9 = vmul.f32 %v1638_v48, %v1654_v0 }
 0x122   : > { %v985_v10 = vadd.f32 %v977_v4, %v973_v1  ;;  %v1004_v11 = vadd.f32 %v979_v5, %v975_v3 }
 0x123   : > { %v995_v13 = vadd.f32 %v978_v8, %v974_v6  ;;  %v1013_v14 = vadd.f32 %v980_v9, %v976_v7  ;;  %v851_v15 = vpop.f32.mrb[16].mxu0  ;;  %v902_v16 = vpop.f32.mrb[16].mxu1 }
 0x124   : > { %v917_v17 = vadd.f32 %v851_v15, %v740_v29  ;;  %v919_v18 = vadd.f32 %v902_v16, %v742_v30  ;;  %v853_v19 = vpop.f32.mrb[17].mxu0  ;;  %v904_v2 = vpop.f32.mrb[17].mxu1 }
 0x125   : > { %v918_v20 = vadd.f32 %v853_v19, %v741_v35  ;;  %v920_v21 = vadd.f32 %v904_v2, %v743_v36  ;;  %v855_v22 = vpop.f32.mrb[18].mxu0  ;;  %v906_v23 = vpop.f32.mrb[18].mxu1 }
 0x126   : > { %v951_v24 = vadd.f32 %v926_v44, %v917_v17  ;;  %v953_v25 = vadd.f32 %v934_v45, %v919_v18  ;;  %v856_v27 = vpop.f32.mrb[19].mxu0  ;;  %v907_v28 = vpop.f32.mrb[19].mxu1 }
 0x127   : > { %v952_v31 = vadd.f32 %v930_v46, %v918_v20  ;;  %v954_v32 = vadd.f32 %v938_v47, %v920_v21 }
 0x128   : > { %v981_v34 = vmul.f32 %v1672_v12, %v951_v24  ;;  %v983_v37 = vmul.f32 %v1672_v12, %v953_v25 }
 0x129   : > { %v982_v29 = vmul.f32 %v1672_v12, %v952_v31  ;;  %v984_v30 = vmul.f32 %v1672_v12, %v954_v32 }
 0x12a   : > { %v987_v35 = vsel %vm986_vm4, %v981_v34, 0.0  ;;  %v1005_v36 = vsel %vm986_vm4, %v983_v37, 0.0 }
 0x12b   : > { %v988_v38 = vadd.f32 %v987_v35, %v985_v10  ;;  %v996_v39 = vsel %vm986_vm4, %v982_v29, 0.0  ;;  %v1006_v40 = vadd.f32 %v1005_v36, %v1004_v11  ;;  %v1014_v41 = vsel %vm986_vm4, %v984_v30, 0.0 }
 0x12c   : > { %v997_v42 = vadd.f32 %v996_v39, %v995_v13  ;;  %v1015_v43 = vadd.f32 %v1014_v41, %v1013_v14 }
 0x12d   : > { %v989_v44 = vrot.slane %v988_v38, 4  ;;  %v1007_v45 = vrot.slane %v1006_v40, 4 }
 0x12e   : > { %v998_v46 = vrot.slane %v997_v42, 4  ;;  %v1016_v47 = vrot.slane %v1015_v43, 4 }
 0x12f   : > { %v990_v49 = vadd.f32 %v989_v44, %v988_v38  ;;  %v1008_v50 = vadd.f32 %v1007_v45, %v1006_v40 }
 0x130   : > { %v999_v53 = vadd.f32 %v998_v46, %v997_v42  ;;  %v1017_v54 = vadd.f32 %v1016_v47, %v1015_v43 }
 0x131   : > { %v991_v57 = vrot.slane %v990_v49, 2  ;;  %v1009_v58 = vrot.slane %v1008_v50, 2 }
 0x132   : > { %v1000_v61 = vrot.slane %v999_v53, 2  ;;  %v1018_v62 = vrot.slane %v1017_v54, 2 }
 0x133   : > { %v992_v1 = vadd.f32 %v991_v57, %v990_v49  ;;  %v1010_v3 = vadd.f32 %v1009_v58, %v1008_v50 }
 0x134   : > { %v1001_v4 = vadd.f32 %v1000_v61, %v999_v53  ;;  %v1019_v5 = vadd.f32 %v1018_v62, %v1017_v54 }
 0x135   : > { %v993_v6 = vrot.slane %v992_v1, 1  ;;  %v1011_v8 = vrot.slane %v1010_v3, 1 }
 0x136   : > { %v1002_v7 = vrot.slane %v1001_v4, 1  ;;  %v1020_v11 = vrot.slane %v1019_v5, 1 }
 0x137   : > { %v994_v9 = vadd.f32 %v993_v6, %v992_v1  ;;  %v1012_v13 = vadd.f32 %v1011_v8, %v1010_v3 }
 0x138   : > { %v1003_v10 = vadd.f32 %v1002_v7, %v1001_v4  ;;  %v1021_v15 = vadd.f32 %v1020_v11, %v1019_v5 }
 0x13a   : > { %v1022_v14 = vadd.f32 %v1003_v10, %v994_v9 }
 0x13c   : > { %v1023_v16 = vadd.f32 %v1022_v14, %v1012_v13 }
 0x13e   : > { %v1024_v17 = vadd.f32 %v1023_v16, %v1021_v15 }
 0x140   : > { %v1025_v18 = vmul.f32 0.015625, %v1024_v17 }
 0x142   : > { %v1029_v19 = vrot.slane %v1025_v18, %v1632_v33 }
 0x144   : > { %v1684_v2 = vsub.f32 %v1640_v51, %v1029_v19  ;;  %v1687_v20 = vsub.f32 %v1644_v55, %v1029_v19  ;;  %v1690_v21 = vsub.f32 %v1642_v52, %v1029_v19  ;;  %v1693_v22 = vsub.f32 %v1646_v56, %v1029_v19 }
 0x145   : > { %v1696_v23 = vsub.f32 %v1648_v59, %v1029_v19  ;;  %v1699_v27 = vsub.f32 %v1652_v63, %v1029_v19  ;;  %v1702_v28 = vsub.f32 %v1650_v60, %v1029_v19  ;;  %v1705_v51 = vsub.f32 %v1654_v0, %v1029_v19 }
 0x146   : > { %v1707_v55 = vsub.f32 %v951_v24, %v1029_v19  ;;  %v1709_v34 = vsub.f32 %v952_v31, %v1029_v19  ;;  %v1711_v52 = vsub.f32 %v953_v25, %v1029_v19  ;;  %v1713_v56 = vsub.f32 %v954_v32, %v1029_v19 }
 0x147   : > { %v1042_v59 = vmul.f32 %v1684_v2, %v1684_v2  ;;  %v1043_v63 = vmul.f32 %v1687_v20, %v1687_v20  ;;  %v1044_v60 = vmul.f32 %v1690_v21, %v1690_v21  ;;  %v1045_v0 = vmul.f32 %v1693_v22, %v1693_v22 }
 0x148   : > { %v1046_v24 = vmul.f32 %v1696_v23, %v1696_v23  ;;  %v1047_v25 = vmul.f32 %v1699_v27, %v1699_v27  ;;  %v1048_v31 = vmul.f32 %v1702_v28, %v1702_v28  ;;  %v1049_v32 = vmul.f32 %v1705_v51, %v1705_v51 }
 0x149   : > { %v1050_v37 = vmul.f32 %v1707_v55, %v1707_v55  ;;  %v1051_v29 = vmul.f32 %v1709_v34, %v1709_v34  ;;  %v1052_v30 = vmul.f32 %v1711_v52, %v1711_v52  ;;  %v1053_v35 = vmul.f32 %v1713_v56, %v1713_v56 }
 0x14a   : > { %v1054_v36 = vmul.f32 %v1042_v59, %v1630_v26  ;;  %v1055_v38 = vmul.f32 %v1043_v63, %v1630_v26  ;;  %v1056_v39 = vmul.f32 %v1044_v60, %v1630_v26  ;;  %v1057_v40 = vmul.f32 %v1045_v0, %v1630_v26 }
 0x14b   : > { %v1058_v41 = vmul.f32 %v1046_v24, %v1638_v48  ;;  %v1059_v42 = vmul.f32 %v1047_v25, %v1638_v48  ;;  %v1060_v43 = vmul.f32 %v1048_v31, %v1638_v48  ;;  %v1061_v44 = vmul.f32 %v1049_v32, %v1638_v48 }
 0x14c   : > { %v1062_v45 = vmul.f32 %v1050_v37, %v1672_v12  ;;  %v1063_v46 = vmul.f32 %v1051_v29, %v1672_v12  ;;  %v1064_v47 = vmul.f32 %v1052_v30, %v1672_v12  ;;  %v1065_v49 = vmul.f32 %v1053_v35, %v1672_v12 }
 0x14d   : > { %v1066_v50 = vadd.f32 %v1058_v41, %v1054_v36  ;;  %v1075_v53 = vadd.f32 %v1059_v42, %v1055_v38  ;;  %v1084_v54 = vadd.f32 %v1060_v43, %v1056_v39  ;;  %v1093_v26 = vadd.f32 %v1061_v44, %v1057_v40 }
 0x14e   : > { %v1067_v57 = vsel %vm986_vm4, %v1062_v45, 0.0  ;;  %v1076_v58 = vsel %vm986_vm4, %v1063_v46, 0.0  ;;  %v1085_v61 = vsel %vm986_vm4, %v1064_v47, 0.0  ;;  %v1094_v48 = vsel %vm986_vm4, %v1065_v49, 0.0 }
 0x14f   : > { %v1068_v62 = vadd.f32 %v1067_v57, %v1066_v50  ;;  %v1077_v1 = vadd.f32 %v1076_v58, %v1075_v53  ;;  %v1086_v3 = vadd.f32 %v1085_v61, %v1084_v54  ;;  %v1095_v4 = vadd.f32 %v1094_v48, %v1093_v26 }
 0x151   : > { %v1069_v5 = vrot.slane %v1068_v62, 4  ;;  %v1078_v6 = vrot.slane %v1077_v1, 4  ;;  %v1087_v7 = vrot.slane %v1086_v3, 4  ;;  %v1096_v12 = vrot.slane %v1095_v4, 4 }
 0x153   : > { %v1070_v8 = vadd.f32 %v1069_v5, %v1068_v62  ;;  %v1079_v9 = vadd.f32 %v1078_v6, %v1077_v1  ;;  %v1088_v10 = vadd.f32 %v1087_v7, %v1086_v3  ;;  %v1097_v11 = vadd.f32 %v1096_v12, %v1095_v4 }
 0x155   : > { %v1071_v13 = vrot.slane %v1070_v8, 2  ;;  %v1080_v14 = vrot.slane %v1079_v9, 2  ;;  %v1089_v15 = vrot.slane %v1088_v10, 2  ;;  %v1098_v16 = vrot.slane %v1097_v11, 2 }
 0x157   : > { %v1072_v17 = vadd.f32 %v1071_v13, %v1070_v8  ;;  %v1081_v18 = vadd.f32 %v1080_v14, %v1079_v9  ;;  %v1090_v19 = vadd.f32 %v1089_v15, %v1088_v10  ;;  %v1099_v59 = vadd.f32 %v1098_v16, %v1097_v11 }
 0x159   : > { %v1073_v63 = vrot.slane %v1072_v17, 1  ;;  %v1082_v60 = vrot.slane %v1081_v18, 1  ;;  %v1091_v0 = vrot.slane %v1090_v19, 1  ;;  %v1100_v31 = vrot.slane %v1099_v59, 1 }
 0x15b   : > { %v1074_v24 = vadd.f32 %v1073_v63, %v1072_v17  ;;  %v1083_v25 = vadd.f32 %v1082_v60, %v1081_v18  ;;  %v1092_v32 = vadd.f32 %v1091_v0, %v1090_v19  ;;  %v1101_v29 = vadd.f32 %v1100_v31, %v1099_v59 }
 0x15d   : > { %v1102_v37 = vadd.f32 %v1083_v25, %v1074_v24 }
 0x15f   : > { %v1103_v30 = vadd.f32 %v1102_v37, %v1092_v32 }
 0x161   : > { %v1104_v35 = vadd.f32 %v1103_v30, %v1101_v29 }
 0x163   : > { %v1105_v36 = vmul.f32 0.015625, %v1104_v35 }
 0x165   : > { %v1106_v38 = vadd.f32 1e-05, %v1105_v36 }
 0x167   : > { %1428 = vrsqrt.f32 %v1106_v38 }
 0x171   : > { %v1429_v39 = vpop.eup %1428 }
 0x172   : > { %v1111_v40 = vrot.slane %v1429_v39, %v1632_v33 }
 0x174   : > { %v1112_v41 = vmul.f32 %v1111_v40, %v1684_v2  ;;  %v1113_v42 = vmul.f32 %v1111_v40, %v1687_v20  ;;  %v1114_v43 = vmul.f32 %v1111_v40, %v1690_v21  ;;  %v1115_v44 = vmul.f32 %v1111_v40, %v1693_v22 }
 0x175   : > { %v1116_v45 = vmul.f32 %v1111_v40, %v1696_v23  ;;  %v1117_v46 = vmul.f32 %v1111_v40, %v1699_v27  ;;  %v1118_v47 = vmul.f32 %v1111_v40, %v1702_v28  ;;  %v1119_v49 = vmul.f32 %v1111_v40, %v1705_v51 }
 0x176   : > { %v1120_v50 = vmul.f32 %v1111_v40, %v1707_v55  ;;  %v1121_v33 = vmul.f32 %v1111_v40, %v1709_v34  ;;  %v1122_v2 = vmul.f32 %v1111_v40, %v1711_v52  ;;  %v1123_v20 = vmul.f32 %v1111_v40, %v1713_v56 }
 0x177   : > { %v1124_v21 = vmax.f32 %v1112_v41, 0.0  ;;  %v1125_v53 = vmax.f32 %v1113_v42, 0.0  ;;  %v1126_v22 = vmax.f32 %v1114_v43, 0.0  ;;  %v1127_v54 = vmax.f32 %v1115_v44, 0.0 }
 0x178   : > { %v1128_v26 = vmax.f32 %v1116_v45, 0.0  ;;  %v1129_v23 = vmax.f32 %v1117_v46, 0.0  ;;  %v1130_v57 = vmax.f32 %v1118_v47, 0.0  ;;  %v1131_v27 = vmax.f32 %v1119_v49, 0.0 }
 0x179   : > { %v1132_v28 = vmax.f32 %v1120_v50, 0.0  ;;  %v1133_v51 = vmax.f32 %v1121_v33, 0.0  ;;  %v1134_v55 = vmax.f32 %v1122_v2, 0.0  ;;  %v1135_v34 = vmax.f32 %v1123_v20, 0.0 }
 0x17a   : > { %v1332_v58 = vpack.c.bf16 %v1125_v53, %v1124_v21  ;;  %v1333_v52 = vpack.c.bf16 %v1127_v54, %v1126_v22  ;;  %v1334_v61 = vpack.c.bf16 %v1129_v23, %v1128_v26  ;;  %v1335_v56 = vpack.c.bf16 %v1131_v27, %v1130_v57 }
 0x17b   : > { %v1336_v48 = vpack.c.bf16 %v1133_v51, %v1132_v28  ;;  %v1337_v62 = vpack.c.bf16 %v1135_v34, %v1134_v55 }
 0x17c   : > { %1176 = vst [vmem:[%s197_s24] sm:$0xff] %v1332_v58  ;;  %1177 = vst [vmem:[%s197_s24 + $0x8] sm:$0xff] %v1333_v52 }
 0x17d   : > { %1178 = vst [vmem:[%s197_s24 + $0x10] sm:$0xff] %v1334_v61  ;;  %1179 = vst [vmem:[%s197_s24 + $0x18] sm:$0xff] %v1335_v56 }
 0x17e   : > { %1180 = vst [vmem:[%s197_s24 + $0x20] sm:$0x33] %v1336_v48  ;;  %1181 = vst [vmem:[%s197_s24 + $0x28] sm:$0x33] %v1337_v62 }
 0x17f PF: > { %s14_s15 = sadd.s32 1, %s1436_s15  }
 0x180   : > { %p11_p4 = scmp.ge.s32.totalorder %s14_s15, 4  }
 0x182   :  { %13 = sbr.rel (!%p11_p4) target bundleno = 1 (0x1), region = 69 }

// kernel: global_generator_forward.18
= control target key start
LH: loop header
LB: loop body
LE: loop exit
PB: predicated region body
PF: predicated region fallthrough
CT: control target
= control target key end

     0   :  { %s2188_s15 = smov 0   ;;  %s3072_s0 = inlined_call_operand.vmem [shape: bf16[2,88,16], index: 0, kind: input, shape index: {}]   ;;  %s3073_s1 = inlined_call_operand.vmem [shape: bf16[4,16,512], index: 1, kind: input, shape index: {}]   ;;  %s3074_s2 = inlined_call_operand.vmem [shape: f32[1,512], index: 2, kind: input, shape index: {}]   ;;  %s3075_s3 = inlined_call_operand.vmem [shape: f32[72,1], index: 3, kind: input, shape index: {}]   ;;  %s3076_s4 = inlined_call_operand.vmem [shape: bf16[2,72,512], index: 4, kind: output, shape index: {}]  }
   0x1 LB: > { %s1882_s16 = sadd.s32 4294967295, %s2160_s15   ;;  %p1886_p0 = scmp.ge.s32.totalorder %s2160_s15, 1  ;;  %s2160_s15 = sphi %s2188_s15, %s14_s15  }
   0x2   : > { %p162_p1 = scmp.lt.s32.totalorder %s2160_s15, 3 }
   0x4   : > { %p163_p2 = pnand %p1886_p0, %p162_p1 }
   0x6   : > { %166 = sbr.rel (%p163_p2) target bundleno = 527 (0x20f), region = 36 }
   0xd   : > { %v2116_v0 = vld [vmem:[%s3073_s1 + $0x24] ss:$16 sps:$4 sm:$0xff]   ;;  %p188_p3 = scmp.lt.s32.totalorder %s1882_s16, 1  ;;  %v2118_v1 = vld [vmem:[%s3073_s1 + $0x20] ss:$16 sps:$4 sm:$0xff]   ;;  %v2162_v2 = vmov 0  }
   0xe   : > { %351 = vmatprep.mubr.bf16.mxu0 %v2162_v2  ;;  %432 = vmatprep.mubr.bf16.mxu1 %v2162_v2  ;;  %v2119_v3 = vld [vmem:[%s3073_s1 + $0x2c] ss:$16 sps:$4 sm:$0xff]   ;;  %v2121_v4 = vld [vmem:[%s3073_s1 + $0x28] ss:$16 sps:$4 sm:$0xff]   ;;  %v2124_v5 = vld [vmem:[%s3073_s1 + $0x4] ss:$16 sps:$4 sm:$0xff]  }
   0xf   : > { %319 = vmatprep.subr.bf16.mxu0 %v2116_v0  ;;  %s3195_s16 = smov (!%p188_p3, %s1882_s16), 1  ;;  %2114 = vset.pattern.permute.xlu0 %v2162_v2  ;;  %v2129_v6 = vld [vmem:[%s3073_s1 + $0xc] ss:$16 sps:$4 sm:$0xff]   ;;  %v2122_v15 = vld [vmem:[%s3073_s1] ss:$16 sps:$4 sm:$0xff]   ;;  %vm303_vm1 = vcmask 130048  }
  0x10   : > { %320 = vmatpush1.bf16.msra.mxu0 %v2118_v1  ;;  %2115 = vset.pattern.permute.xlu1 %v2162_v2  ;;  %s2103_s27 = smul.u32 44, %s3195_s16  ;;  %vm243_vm0 = vsmask.f32 7424  ;;  %v2127_v17 = vld [vmem:[%s3073_s1 + $0x8] ss:$16 sps:$4 sm:$0xff]   ;;  %vm996_vm2 = vcmask 1046528  }
  0x11   : > { %400 = vmatprep.subr.bf16.mxu1 %v2119_v3  ;;  %513 = vmatprep.subr.bf16.mxu0 %v2124_v5  ;;  %v2135_v21 = vld [vmem:[%s3073_s1 + $0x44] ss:$16 sps:$4 sm:$0xff]   ;;  %v2138_v22 = vld [vmem:[%s3073_s1 + $0x4c] ss:$16 sps:$4 sm:$0xff]   ;;  %s2104_s25 = smul.u32 144, %s3195_s16 }
  0x12   : > { %401 = vmatpush1.bf16.msra.mxu1 %v2121_v4  ;;  %s2224_s6 = scalar_lea.vmem %s3072_s0, %s2103_s27 }
  0x13   : > { %594 = vmatprep.subr.bf16.mxu1 %v2129_v6  ;;  %v2227_v7 = vld [vmem:[%s2224_s6] sm:$0xff]   ;;  %v2230_v8 = vld [vmem:[%s2224_s6 + $0x8] sm:$0xff]   ;;  %v2236_v12 = vld [vmem:[%s2224_s6 + $0x10] sm:$0xff]   ;;  %s3045_s27 = scalar_lea.vmem %s3076_s4, %s2104_s25 }
  0x14   : > { %v245_v9 = vshrl.u32 %v2227_v7, 16  ;;  %v247_v10 = vshll.u32 %v2227_v7, 16  ;;  %v252_v11 = vshll.u32 %v2230_v8, 16  ;;  %v256_v18 = vshrl.u32 %v2230_v8, 16  ;;  %v2247_v20 = vld [vmem:[%s2224_s6 + $0x18] sm:$0xff]   ;;  %v2256_v23 = vld [vmem:[%s2224_s6 + $0xc] sm:$0xff]  }
  0x15   : > { %v260_v19 = vshll.u32 %v2236_v12, 16  ;;  %v675_v25 = vld [vmem:[%s2224_s6 + $0x4] sm:$0xf]  ;;  %v2261_v26 = vld [vmem:[%s2224_s6 + $0x8] sm:$0xf]  ;;  %v264_v27 = vshrl.u32 %v2236_v12, 16 }
  0x16   : > { %v249_v13 = vrot.slane %v247_v10, 1  ;;  %v254_v14 = vrot.slane %v252_v11, 1  ;;  %v1931_v28 = vcombine.low %v675_v25, %v2261_v26  ;;  %v268_v31 = vshll.u32 %v2247_v20, 16  ;;  %v2270_v33 = vld [vmem:[%s2224_s6 + $0x14] sm:$0xff]   ;;  %v2275_v36 = vld [vmem:[%s2224_s6 + $0x20] sm:$0xf] }
  0x17   : > { %v262_v30 = vrot.slane %v260_v19, 1  ;;  %v723_v32 = vshll.u32 %v2256_v23, 16  ;;  %v212_v37 = vld [vmem:[%s2224_s6 + $0x24] sm:$0x1]  ;;  %v727_v39 = vshrl.u32 %v2256_v23, 16  ;;  %v731_v40 = vshll.u32 %v2270_v33, 16 }
  0x18   : > { %v250_v16 = vor.u32 %v249_v13, %v245_v9  ;;  %v258_v29 = vor.u32 %v256_v18, %v254_v14  ;;  %v716_v34 = vshrl.u32 %v1931_v28, 16  ;;  %v718_v35 = vshll.u32 %v1931_v28, 16  ;;  %v2281_v41 = vld [vmem:[%s2224_s6 + $0x1c] sm:$0xff]   ;;  %v2287_v48 = vld [vmem:[%s2224_s6 + $0x24] sm:$0x1f]   ;;  %v1299_v10 = vld [vmem:[%s3075_s3 + $0x10] sm:$0xff] }
  0x19   : > { %v725_v38 = vrot.slane %v723_v32, 1  ;;  %v735_v43 = vshrl.u32 %v2270_v33, 16  ;;  %v733_v46 = vrot.slane %v731_v40, 1  ;;  %v739_v47 = vshll.u32 %v2281_v41, 16  ;;  %v1297_v9 = vld [vmem:[%s3075_s3] sm:$0xff]  ;;  %1318 = vperm.xlu1 %2115, %v1299_v10   ;;  %v1298_v11 = vld [vmem:[%s3075_s3 + $0x8] sm:$0xff] }
  0x1a   : > { %v255_v24 = vsel %vm243_vm0, %v250_v16, %v254_v14  ;;  %v720_v42 = vrot.slane %v718_v35, 1  ;;  %v263_v44 = vsel %vm243_vm0, %v258_v29, %v262_v30  ;;  %v743_v50 = vshrl.u32 %v2281_v41, 16  ;;  %1308 = vperm.xlu0 %2114, %v1297_v9   ;;  %v1300_v13 = vld [vmem:[%s3075_s3 + $0x18] sm:$0xff]  ;;  %v1302_v16 = vld [vmem:[%s3075_s3 + $0x28] sm:$0xff]  ;;  %v2133_v19 = vld [vmem:[%s3073_s1 + $0x40] ss:$16 sps:$4 sm:$0xff]  }
  0x1b   : > { %1902 = vmatmul.mubr.msk.bf16.vlgmr.msra.gmra.mrb[0].mxu0 %vm303_vm1, %v255_v24  ;;  %1907 = vmatmul.mubr.msk.bf16.vlgmr.msra.gmra.mrb[0].mxu1 %vm303_vm1, %v255_v24  ;;  %v729_v45 = vor.u32 %v727_v39, %v725_v38  ;;  %v737_v52 = vor.u32 %v735_v43, %v733_v46  ;;  %v741_v53 = vrot.slane %v739_v47, 1  ;;  %v747_v54 = vshll.u32 %v2287_v48, 16  ;;  %v1304_v18 = vld [vmem:[%s3075_s3 + $0x38] sm:$0xff]  ;;  %v1305_v25 = vld [vmem:[%s3075_s3 + $0x40] sm:$0xff] }
  0x1c   : > { %514 = vmatpush1.bf16.msra.mxu0 %v2122_v15  ;;  %595 = vmatpush1.bf16.msra.mxu1 %v2127_v17  ;;  %v721_v49 = vor.u32 %v720_v42, %v716_v34  ;;  %v266_v55 = vor.u32 %v264_v27, %v262_v30  ;;  %v1897_v56 = vcombine.low %v2275_v36, %v212_v37  ;;  %v270_v58 = vrot.slane %v268_v31, 1  ;;  %v1301_v15 = vld [vmem:[%s3075_s3 + $0x20] sm:$0xff]  ;;  %v1303_v17 = vld [vmem:[%s3075_s3 + $0x30] sm:$0xff]  ;;  %v2147_v24 = vld [vmem:[%s3073_s1 + $0x6c] ss:$16 sps:$4 sm:$0xff]  }
  0x1d   : > { %361 = vmatprep.mubr.bf16.mxu0 %v2162_v2  ;;  %442 = vmatprep.mubr.bf16.mxu1 %v2162_v2  ;;  %v2291_v51 = vsel %vm243_vm0, %v729_v45, %v733_v46  ;;  %v2303_v59 = vsel %vm243_vm0, %v737_v52, %v741_v53  ;;  %v745_v60 = vor.u32 %v743_v50, %v741_v53  ;;  %v2305_v61 = vrot.slane %v747_v54, 1  ;;  %v987_v27 = vld [vmem:[%s2224_s6 + $0x4] sm:$0xe]  ;;  %v1239_v10 = vld [vmem:[%s3074_s2] sm:$0xf] }
  0x1e   : > { %789 = vmatprep.subr.bf16.mxu0 %v2135_v21  ;;  %870 = vmatprep.subr.bf16.mxu1 %v2138_v22  ;;  %v2298_v57 = vsel %vm243_vm0, %v721_v49, %v725_v38  ;;  %v271_v63 = vsel %vm243_vm0, %v266_v55, %v270_v58  ;;  %v272_v0 = vshrl.u32 %v2247_v20, 16  ;;  %v276_v1 = vshll.u32 %v1897_v56, 16  ;;  %v2136_v21 = vld [vmem:[%s3073_s1 + $0x48] ss:$16 sps:$4 sm:$0xff]   ;;  %v2142_v22 = vld [vmem:[%s3073_s1 + $0x64] ss:$16 sps:$4 sm:$0xff]  }
  0x1f   : > { %v2309_v62 = vsel %vm243_vm0, %v745_v60, %v2305_v61  ;;  %v280_v6 = vshrl.u32 %v1897_v56, 16  ;;  %1313 = vperm.xlu0 %2114, %v1298_v11   ;;  %1323 = vperm.xlu1 %2115, %v1300_v13   ;;  %v1954_v29 = vcombine.low %v987_v27, %v2261_v26  ;;  %v998_v31 = vrot.slane %v2256_v23, 1 }
  0x20   : > { %v274_v3 = vor.u32 %v272_v0, %v270_v58  ;;  %v278_v4 = vrot.slane %v276_v1, 1  ;;  %v1000_v26 = vrot.slane %v2270_v33, 1  ;;  %v1002_v23 = vrot.slane %v2281_v41, 1 }
  0x21   : > { %v997_v30 = vrot.slane %v1954_v29, 1  ;;  %v1004_v33 = vrot.slane %v2287_v48, 1  ;;  %v1241_v56 = vlaneseq }
  0x22   : > { %v279_v5 = vsel %vm243_vm0, %v274_v3, %v278_v4  ;;  %v282_v14 = vor.u32 %v280_v6, %v278_v4  ;;  %v1001_v34 = vsel %vm996_vm2, %v998_v31, %v1000_v26  ;;  %v1003_v35 = vsel %vm996_vm2, %v1000_v26, %v1002_v23 }
  0x23   : > { %1903 = vmatmul.mubr.msk.bf16.gmra.mrb[4].mxu0 %vm303_vm1, %v263_v44  ;;  %1908 = vmatmul.mubr.msk.bf16.gmra.mrb[4].mxu1 %vm303_vm1, %v263_v44  ;;  %v999_v32 = vsel %vm996_vm2, %v997_v30, %v998_v31 }
  0x24   : > { %371 = vmatprep.mubr.bf16.mxu0 %v2162_v2  ;;  %452 = vmatprep.mubr.bf16.mxu1 %v2162_v2 }
  0x25   : > { %1328 = vperm.xlu0 %2114, %v1301_v15   ;;  %1333 = vperm.xlu1 %2115, %v1302_v16  }
  0x29   : > { %1338 = vperm.xlu0 %2114, %v1303_v17   ;;  %1343 = vperm.xlu1 %2115, %v1304_v18  }
  0x2b   : > { %1904 = vmatmul.mubr.msk.bf16.gmra.mrb[8].mxu0 %vm303_vm1, %v271_v63  ;;  %1909 = vmatmul.mubr.msk.bf16.gmra.mrb[8].mxu1 %vm303_vm1, %v271_v63 }
  0x2c   : > { %381 = vmatprep.mubr.bf16.mxu0 %v2162_v2  ;;  %462 = vmatprep.mubr.bf16.mxu1 %v2162_v2 }
  0x2d   : > { %1348 = vperm.xlu0 %2114, %v1305_v25  }
  0x33   : > { %1905 = vmatmul.mubr.msk.bf16.gmra.mrb[12].mxu0 %vm303_vm1, %v279_v5  ;;  %1910 = vmatmul.mubr.msk.bf16.gmra.mrb[12].mxu1 %vm303_vm1, %v279_v5 }
  0x34   : > { %391 = vmatprep.mubr.bf16.mxu0 %v2162_v2  ;;  %472 = vmatprep.mubr.bf16.mxu1 %v2162_v2 }
  0x3b   : > { %1906 = vmatmul.mubr.msk.bf16.gmra.mrb[16].mxu0 %vm303_vm1, %v282_v14  ;;  %1911 = vmatmul.mubr.msk.bf16.gmra.mrb[16].mxu1 %vm303_vm1, %v282_v14 }
  0x3c   : > { %545 = vmatprep.mubr.bf16.mxu0 %v2162_v2  ;;  %626 = vmatprep.mubr.bf16.mxu1 %v2162_v2 }
  0x43   : > { %1917 = vmatmul.mubr.msk.bf16.vlgmr.msra.gmra.mrb[0].mxu0 %vm303_vm1, %v2227_v7  ;;  %1922 = vmatmul.mubr.msk.bf16.vlgmr.msra.gmra.mrb[0].mxu1 %vm303_vm1, %v2227_v7  ;;  %v1912_v7 = vcombine.low %v2275_v36, %v2275_v36  ;;  %v1005_v36 = vsel %vm996_vm2, %v1002_v23, %v1004_v33 }
  0x44   : > { %790 = vmatpush1.bf16.msra.mxu0 %v2133_v19  ;;  %871 = vmatpush1.bf16.msra.mxu1 %v2136_v21 }
  0x45   : > { %555 = vmatprep.mubr.bf16.mxu0 %v2162_v2  ;;  %636 = vmatprep.mubr.bf16.mxu1 %v2162_v2 }
  0x46   : > { %1041 = vmatprep.subr.bf16.mxu0 %v2142_v22  ;;  %1122 = vmatprep.subr.bf16.mxu1 %v2147_v24 }
  0x4b   : > { %1918 = vmatmul.mubr.msk.bf16.gmra.mrb[4].mxu0 %vm303_vm1, %v2230_v8  ;;  %1923 = vmatmul.mubr.msk.bf16.gmra.mrb[4].mxu1 %vm303_vm1, %v2230_v8  ;;  %v2140_v8 = vld [vmem:[%s3073_s1 + $0x60] ss:$16 sps:$4 sm:$0xff]  }
  0x4c   : > { %565 = vmatprep.mubr.bf16.mxu0 %v2162_v2  ;;  %646 = vmatprep.mubr.bf16.mxu1 %v2162_v2 }
  0x53   : > { %1919 = vmatmul.mubr.msk.bf16.gmra.mrb[8].mxu0 %vm303_vm1, %v2236_v12  ;;  %1924 = vmatmul.mubr.msk.bf16.gmra.mrb[8].mxu1 %vm303_vm1, %v2236_v12  ;;  %v2145_v12 = vld [vmem:[%s3073_s1 + $0x68] ss:$16 sps:$4 sm:$0xff]  }
  0x54   : > { %575 = vmatprep.mubr.bf16.mxu0 %v2162_v2  ;;  %656 = vmatprep.mubr.bf16.mxu1 %v2162_v2 }
  0x5b   : > { %1920 = vmatmul.mubr.msk.bf16.gmra.mrb[12].mxu0 %vm303_vm1, %v2247_v20  ;;  %1925 = vmatmul.mubr.msk.bf16.gmra.mrb[12].mxu1 %vm303_vm1, %v2247_v20  ;;  %v751_v20 = vshrl.u32 %v2287_v48, 16 }
  0x5c   : > { %585 = vmatprep.mubr.bf16.mxu0 %v2162_v2  ;;  %666 = vmatprep.mubr.bf16.mxu1 %v2162_v2 }
  0x5d   : > { %v753_v28 = vor.u32 %v751_v20, %v2305_v61 }
  0x63   : > { %1921 = vmatmul.mubr.msk.bf16.gmra.mrb[20].mxu0 %vm303_vm1, %v1912_v7  ;;  %1926 = vmatmul.mubr.msk.bf16.gmra.mrb[20].mxu1 %vm303_vm1, %v1912_v7 }
  0x64   : > { %821 = vmatprep.mubr.bf16.mxu0 %v2162_v2  ;;  %902 = vmatprep.mubr.bf16.mxu1 %v2162_v2 }
  0x6b   : > { %1940 = vmatmul.mubr.msk.bf16.vlgmr.msra.gmra.mrb[0].mxu0 %vm303_vm1, %v2298_v57  ;;  %1945 = vmatmul.mubr.msk.bf16.vlgmr.msra.gmra.mrb[0].mxu1 %vm303_vm1, %v2298_v57  ;;  %v1242_v57 = vshrl.u32 %v1241_v56, 7 }
  0x6c   : > { %1042 = vmatpush1.bf16.msra.mxu0 %v2140_v8  ;;  %1123 = vmatpush1.bf16.msra.mxu1 %v2145_v12 }
  0x6d   : > { %831 = vmatprep.mubr.bf16.mxu0 %v2162_v2  ;;  %912 = vmatprep.mubr.bf16.mxu1 %v2162_v2  ;;  %v2465_v1 = vsub.s32 0, %v1242_v57  ;;  %v1251_v3 = vsub.s32 2, %v1242_v57  ;;  %v1247_v11 = vsub.s32 1, %v1242_v57  ;;  %v1255_v13 = vsub.s32 3, %v1242_v57 }
  0x6f   : > { %v2475_v16 = vrot.slane %v1239_v10, %v2465_v1  ;;  %v2477_v17 = vrot.slane %v1239_v10, %v1251_v3  ;;  %v2479_v18 = vrot.slane %v1239_v10, %v1247_v11  ;;  %v2481_v19 = vrot.slane %v1239_v10, %v1255_v13 }
  0x73   : > { %1941 = vmatmul.mubr.msk.bf16.gmra.mrb[4].mxu0 %vm303_vm1, %v2291_v51  ;;  %1946 = vmatmul.mubr.msk.bf16.gmra.mrb[4].mxu1 %vm303_vm1, %v2291_v51 }
  0x74   : > { %841 = vmatprep.mubr.bf16.mxu0 %v2162_v2  ;;  %922 = vmatprep.mubr.bf16.mxu1 %v2162_v2 }
  0x7b   : > { %1942 = vmatmul.mubr.msk.bf16.gmra.mrb[8].mxu0 %vm303_vm1, %v2303_v59  ;;  %1947 = vmatmul.mubr.msk.bf16.gmra.mrb[8].mxu1 %vm303_vm1, %v2303_v59 }
  0x7c   : > { %851 = vmatprep.mubr.bf16.mxu0 %v2162_v2  ;;  %932 = vmatprep.mubr.bf16.mxu1 %v2162_v2 }
  0x83   : > { %1943 = vmatmul.mubr.msk.bf16.gmra.mrb[12].mxu0 %vm303_vm1, %v2309_v62  ;;  %1948 = vmatmul.mubr.msk.bf16.gmra.mrb[12].mxu1 %vm303_vm1, %v2309_v62 }
  0x84   : > { %861 = vmatprep.mubr.bf16.mxu0 %v2162_v2  ;;  %942 = vmatprep.mubr.bf16.mxu1 %v2162_v2 }
  0x8b   : > { %1944 = vmatmul.mubr.msk.bf16.gmra.mrb[24].mxu0 %vm303_vm1, %v753_v28  ;;  %1949 = vmatmul.mubr.msk.bf16.gmra.mrb[24].mxu1 %vm303_vm1, %v753_v28 }
  0x8c   : > { %1073 = vmatprep.mubr.bf16.mxu0 %v2162_v2  ;;  %1154 = vmatprep.mubr.bf16.mxu1 %v2162_v2 }
  0x93   : > { %1959 = vmatmul.mubr.msk.bf16.vlgmr.msra.gmra.mrb[0].mxu0 %vm303_vm1, %v999_v32  ;;  %1964 = vmatmul.mubr.msk.bf16.vlgmr.msra.gmra.mrb[0].mxu1 %vm303_vm1, %v999_v32 }
  0x94   : > { %1083 = vmatprep.mubr.bf16.mxu0 %v2162_v2  ;;  %1164 = vmatprep.mubr.bf16.mxu1 %v2162_v2 }
  0x98   : > { %v2485_v22 = vpop.permute.xlu1 %1318 }
  0x99   : > { %v2459_v58 = vpop.permute.xlu0 %1308  ;;  %3124 = vst [vmem:[#allocation4_spill] sm:$0xff] %v2485_v22 }
  0x9a   : > { %3122 = vst [vmem:[#allocation2_spill] sm:$0xff] %v2459_v58 }
  0x9b   : > { %1960 = vmatmul.mubr.msk.bf16.gmra.mrb[4].mxu0 %vm303_vm1, %v1001_v34  ;;  %1965 = vmatmul.mubr.msk.bf16.gmra.mrb[4].mxu1 %vm303_vm1, %v1001_v34 }
  0x9c   : > { %1093 = vmatprep.mubr.bf16.mxu0 %v2162_v2  ;;  %1174 = vmatprep.mubr.bf16.mxu1 %v2162_v2 }
  0x9e   : > { %v2483_v21 = vpop.permute.xlu0 %1313 }
  0x9f   : > { %3123 = vst [vmem:[#allocation3_spill] sm:$0xff] %v2483_v21 }
  0xa3   : > { %1961 = vmatmul.mubr.msk.bf16.gmra.mrb[8].mxu0 %vm303_vm1, %v1003_v35  ;;  %1966 = vmatmul.mubr.msk.bf16.gmra.mrb[8].mxu1 %vm303_vm1, %v1003_v35 }
  0xa4   : > { %1103 = vmatprep.mubr.bf16.mxu0 %v2162_v2  ;;  %1184 = vmatprep.mubr.bf16.mxu1 %v2162_v2 }
  0xab   : > { %1962 = vmatmul.mubr.msk.bf16.gmra.mrb[12].mxu0 %vm303_vm1, %v1005_v36  ;;  %1967 = vmatmul.mubr.msk.bf16.gmra.mrb[12].mxu1 %vm303_vm1, %v1005_v36 }
  0xac   : > { %1113 = vmatprep.mubr.bf16.mxu0 %v2162_v2  ;;  %1194 = vmatprep.mubr.bf16.mxu1 %v2162_v2 }
  0xb3   : > { %1963 = vmatmul.mubr.msk.bf16.gmra.mrb[28].mxu0 %vm303_vm1, %v1004_v33  ;;  %1968 = vmatmul.mubr.msk.bf16.gmra.mrb[28].mxu1 %vm303_vm1, %v1004_v33 }
 0x10e   : > { %v393_v37 = vpop.f32.mrb[16].mxu0  ;;  %v474_v38 = vpop.f32.mrb[16].mxu1 }
 0x10f   : > { %v395_v39 = vpop.f32.mrb[17].mxu0  ;;  %v476_v40 = vpop.f32.mrb[17].mxu1 }
 0x110   : > { %v397_v41 = vpop.f32.mrb[18].mxu0  ;;  %v478_v42 = vpop.f32.mrb[18].mxu1 }
 0x111   : > { %v398_v43 = vpop.f32.mrb[19].mxu0  ;;  %v479_v44 = vpop.f32.mrb[19].mxu1 }
 0x136   : > { %v587_v45 = vpop.f32.mrb[20].mxu0  ;;  %v668_v46 = vpop.f32.mrb[20].mxu1 }
 0x137   : > { %v588_v47 = vadd.f32 %v587_v45, %v393_v37  ;;  %v669_v48 = vadd.f32 %v668_v46, %v474_v38  ;;  %v589_v49 = vpop.f32.mrb[21].mxu0  ;;  %v670_v50 = vpop.f32.mrb[21].mxu1 }
 0x138   : > { %v590_v51 = vadd.f32 %v589_v49, %v395_v39  ;;  %v671_v2 = vadd.f32 %v670_v50, %v476_v40  ;;  %v591_v52 = vpop.f32.mrb[22].mxu0  ;;  %v672_v53 = vpop.f32.mrb[22].mxu1 }
 0x139   : > { %v592_v54 = vpop.f32.mrb[23].mxu0  ;;  %v673_v55 = vpop.f32.mrb[23].mxu1 }
 0x13a   : > { %v2527_v45 = vpop.permute.xlu1 %1323 }
 0x13b   : > { %3125 = vst [vmem:[#allocation5_spill] sm:$0xff] %v2527_v45 }
 0x15e   : > { %v863_v59 = vpop.f32.mrb[24].mxu0  ;;  %v944_v60 = vpop.f32.mrb[24].mxu1 }
 0x15f   : > { %v2461_v61 = vadd.f32 %v863_v59, %v588_v47  ;;  %v2463_v62 = vadd.f32 %v944_v60, %v669_v48  ;;  %v865_v63 = vpop.f32.mrb[25].mxu0  ;;  %v946_v0 = vpop.f32.mrb[25].mxu1 }
 0x160   : > { %v2467_v4 = vadd.f32 %v865_v63, %v590_v51  ;;  %v2469_v5 = vadd.f32 %v946_v0, %v671_v2  ;;  %v867_v6 = vpop.f32.mrb[26].mxu0  ;;  %v948_v9 = vpop.f32.mrb[26].mxu1 }
 0x161   : > { %v868_v14 = vpop.f32.mrb[27].mxu0  ;;  %v949_v15 = vpop.f32.mrb[27].mxu1 }
 0x166   : > { %v1075_v24 = vpop.f32.mrb[0].mxu0  ;;  %v1156_v25 = vpop.f32.mrb[0].mxu1 }
 0x167   : > { %v2488_v7 = vadd.f32 %v2475_v16, %v1075_v24  ;;  %v2491_v8 = vadd.f32 %v2477_v17, %v1156_v25  ;;  %v1077_v12 = vpop.f32.mrb[1].mxu0  ;;  %v1158_v20 = vpop.f32.mrb[1].mxu1 }
 0x168   : > { %v2494_v27 = vadd.f32 %v2479_v18, %v1077_v12  ;;  %v2497_v28 = vadd.f32 %v2481_v19, %v1158_v20  ;;  %v1079_v29 = vpop.f32.mrb[2].mxu0  ;;  %v1160_v30 = vpop.f32.mrb[2].mxu1 }
 0x169   : > { %v2500_v31 = vadd.f32 %v2475_v16, %v1079_v29  ;;  %v2503_v32 = vadd.f32 %v2477_v17, %v1160_v30  ;;  %v1081_v26 = vpop.f32.mrb[3].mxu0  ;;  %v1162_v34 = vpop.f32.mrb[3].mxu1  ;;  %v1351_v33 = vmul.f32 %v2459_v58, %v2488_v7  ;;  %v1353_v36 = vmul.f32 %v2459_v58, %v2491_v8 }
 0x16a   : > { %v2506_v23 = vadd.f32 %v2479_v18, %v1081_v26  ;;  %v2509_v35 = vadd.f32 %v2481_v19, %v1162_v34  ;;  %v1352_v39 = vmul.f32 %v2459_v58, %v2494_v27  ;;  %v1354_v40 = vmul.f32 %v2459_v58, %v2497_v28  ;;  %v2569_v30 = vpop.permute.xlu0 %1328 }
 0x16b   : > { %v1355_v37 = vmul.f32 %v2483_v21, %v2500_v31  ;;  %v1357_v38 = vmul.f32 %v2483_v21, %v2503_v32  ;;  %3126 = vst [vmem:[#allocation6_spill] sm:$0xff] %v2569_v30 }
 0x16c   : > { %v1356_v41 = vmul.f32 %v2483_v21, %v2506_v23  ;;  %v1358_v42 = vmul.f32 %v2483_v21, %v2509_v35 }
 0x16d   : > { %v1387_v43 = vadd.f32 %v1355_v37, %v1351_v33  ;;  %v1415_v44 = vadd.f32 %v1357_v38, %v1353_v36  ;;  %v2571_v33 = vpop.permute.xlu1 %1333 }
 0x16e   : > { %v1085_v46 = vpop.f32.mrb[4].mxu0  ;;  %v1166_v47 = vpop.f32.mrb[4].mxu1  ;;  %v1401_v48 = vadd.f32 %v1356_v41, %v1352_v39  ;;  %v1429_v49 = vadd.f32 %v1358_v42, %v1354_v40  ;;  %3127 = vst [vmem:[#allocation7_spill] sm:$0xff] %v2571_v33 }
 0x16f   : > { %v2530_v50 = vadd.f32 %v2475_v16, %v1085_v46  ;;  %v2533_v51 = vadd.f32 %v2477_v17, %v1166_v47  ;;  %v1087_v2 = vpop.f32.mrb[5].mxu0  ;;  %v1168_v52 = vpop.f32.mrb[5].mxu1 }
 0x170   : > { %v2536_v53 = vadd.f32 %v2479_v18, %v1087_v2  ;;  %v2539_v54 = vadd.f32 %v2481_v19, %v1168_v52  ;;  %v1089_v55 = vpop.f32.mrb[6].mxu0  ;;  %v1170_v56 = vpop.f32.mrb[6].mxu1 }
 0x171   : > { %v1359_v57 = vmul.f32 %v2485_v22, %v2530_v50  ;;  %v1361_v59 = vmul.f32 %v2485_v22, %v2533_v51  ;;  %v2546_v60 = vadd.f32 %v2475_v16, %v1089_v55  ;;  %v2549_v63 = vadd.f32 %v2477_v17, %v1170_v56  ;;  %v1091_v0 = vpop.f32.mrb[7].mxu0  ;;  %v1172_v3 = vpop.f32.mrb[7].mxu1 }
 0x172   : > { %v1360_v6 = vmul.f32 %v2485_v22, %v2536_v53  ;;  %v1362_v9 = vmul.f32 %v2485_v22, %v2539_v54  ;;  %v2556_v10 = vadd.f32 %v2479_v18, %v1091_v0  ;;  %v2559_v11 = vadd.f32 %v2481_v19, %v1172_v3 }
 0x173   : > { %v1388_v13 = vadd.f32 %v1387_v43, %v1359_v57  ;;  %v1416_v14 = vadd.f32 %v1415_v44, %v1361_v59  ;;  %v1363_v15 = vmul.f32 %v2527_v45, %v2546_v60  ;;  %v1365_v24 = vmul.f32 %v2527_v45, %v2549_v63 }
 0x174   : > { %v1402_v25 = vadd.f32 %v1401_v48, %v1360_v6  ;;  %v1430_v12 = vadd.f32 %v1429_v49, %v1362_v9  ;;  %v1364_v20 = vmul.f32 %v2527_v45, %v2556_v10  ;;  %v1366_v29 = vmul.f32 %v2527_v45, %v2559_v11 }
 0x175   : > { %v1389_v26 = vadd.f32 %v1388_v13, %v1363_v15  ;;  %v1417_v34 = vadd.f32 %v1416_v14, %v1365_v24 }
 0x176   : > { %v1095_v36 = vpop.f32.mrb[8].mxu0  ;;  %v1176_v37 = vpop.f32.mrb[8].mxu1  ;;  %v1403_v38 = vadd.f32 %v1402_v25, %v1364_v20  ;;  %v1431_v39 = vadd.f32 %v1430_v12, %v1366_v29 }
 0x177   : > { %v2574_v40 = vadd.f32 %v2475_v16, %v1095_v36  ;;  %v2577_v41 = vadd.f32 %v2477_v17, %v1176_v37  ;;  %v1097_v42 = vpop.f32.mrb[9].mxu0  ;;  %v1178_v43 = vpop.f32.mrb[9].mxu1 }
 0x178   : > { %v2580_v44 = vadd.f32 %v2479_v18, %v1097_v42  ;;  %v2583_v46 = vadd.f32 %v2481_v19, %v1178_v43  ;;  %v1099_v47 = vpop.f32.mrb[10].mxu0  ;;  %v1180_v48 = vpop.f32.mrb[10].mxu1 }
 0x179   : > { %v1367_v49 = vmul.f32 %v2569_v30, %v2574_v40  ;;  %v1369_v2 = vmul.f32 %v2569_v30, %v2577_v41  ;;  %v2590_v52 = vadd.f32 %v2475_v16, %v1099_v47  ;;  %v2593_v55 = vadd.f32 %v2477_v17, %v1180_v48  ;;  %v1101_v56 = vpop.f32.mrb[11].mxu0  ;;  %v1182_v57 = vpop.f32.mrb[11].mxu1 }
 0x17a   : > { %v1368_v59 = vmul.f32 %v2569_v30, %v2580_v44  ;;  %v1370_v0 = vmul.f32 %v2569_v30, %v2583_v46  ;;  %v2600_v3 = vadd.f32 %v2479_v18, %v1101_v56  ;;  %v2603_v6 = vadd.f32 %v2481_v19, %v1182_v57  ;;  %v2613_v29 = vpop.permute.xlu0 %1338 }
 0x17b   : > { %v1390_v9 = vadd.f32 %v1389_v26, %v1367_v49  ;;  %v1418_v13 = vadd.f32 %v1417_v34, %v1369_v2  ;;  %v1371_v14 = vmul.f32 %v2571_v33, %v2590_v52  ;;  %v1373_v15 = vmul.f32 %v2571_v33, %v2593_v55  ;;  %3128 = vst [vmem:[#allocation8_spill] sm:$0xff] %v2613_v29 }
 0x17c   : > { %v1404_v24 = vadd.f32 %v1403_v38, %v1368_v59  ;;  %v1432_v25 = vadd.f32 %v1431_v39, %v1370_v0  ;;  %v1372_v12 = vmul.f32 %v2571_v33, %v2600_v3  ;;  %v1374_v20 = vmul.f32 %v2571_v33, %v2603_v6 }
 0x17d   : > { %v1391_v36 = vadd.f32 %v1390_v9, %v1371_v14  ;;  %v1419_v37 = vadd.f32 %v1418_v13, %v1373_v15 }
 0x17e   : > { %v1405_v26 = vadd.f32 %v1404_v24, %v1372_v12  ;;  %v1433_v34 = vadd.f32 %v1432_v25, %v1374_v20  ;;  %v1105_v42 = vpop.f32.mrb[12].mxu0  ;;  %v1186_v43 = vpop.f32.mrb[12].mxu1 }
 0x17f   : > { %v2616_v47 = vadd.f32 %v2475_v16, %v1105_v42  ;;  %v2619_v38 = vadd.f32 %v2477_v17, %v1186_v43  ;;  %v1107_v39 = vpop.f32.mrb[13].mxu0  ;;  %v1188_v48 = vpop.f32.mrb[13].mxu1 }
 0x180   : > { %v2622_v49 = vadd.f32 %v2479_v18, %v1107_v39  ;;  %v2625_v2 = vadd.f32 %v2481_v19, %v1188_v48  ;;  %v1109_v56 = vpop.f32.mrb[14].mxu0  ;;  %v1190_v57 = vpop.f32.mrb[14].mxu1 }
 0x181   : > { %v1375_v59 = vmul.f32 %v2613_v29, %v2616_v47  ;;  %v1377_v0 = vmul.f32 %v2613_v29, %v2619_v38  ;;  %v2632_v9 = vadd.f32 %v2475_v16, %v1109_v56  ;;  %v2635_v13 = vadd.f32 %v2477_v17, %v1190_v57  ;;  %v1111_v14 = vpop.f32.mrb[15].mxu0  ;;  %v1192_v15 = vpop.f32.mrb[15].mxu1 }
 0x182   : > { %v2637_v24 = vpop.permute.xlu1 %1343  ;;  %v1376_v25 = vmul.f32 %v2613_v29, %v2622_v49  ;;  %v1378_v12 = vmul.f32 %v2613_v29, %v2625_v2  ;;  %v2644_v20 = vadd.f32 %v2479_v18, %v1111_v14  ;;  %v2647_v42 = vadd.f32 %v2481_v19, %v1192_v15 }
 0x183   : > { %3129 = vst [vmem:[#allocation9_spill] sm:$0xff] %v2637_v24  ;;  %v1392_v43 = vadd.f32 %v1391_v36, %v1375_v59  ;;  %v1420_v39 = vadd.f32 %v1419_v37, %v1377_v0  ;;  %v1379_v48 = vmul.f32 %v2637_v24, %v2632_v9  ;;  %v1381_v56 = vmul.f32 %v2637_v24, %v2635_v13 }
 0x184   : > { %v1406_v57 = vadd.f32 %v1405_v26, %v1376_v25  ;;  %v1434_v33 = vadd.f32 %v1433_v34, %v1378_v12  ;;  %v1380_v30 = vmul.f32 %v2637_v24, %v2644_v20  ;;  %v1382_v14 = vmul.f32 %v2637_v24, %v2647_v42 }
 0x185   : > { %v1393_v29 = vadd.f32 %v1392_v43, %v1379_v48  ;;  %v1421_v45 = vadd.f32 %v1420_v39, %v1381_v56  ;;  %v2667_v39 = vpop.permute.xlu0 %1348 }
 0x186   : > { %v1407_v15 = vadd.f32 %v1406_v57, %v1380_v30  ;;  %v1435_v22 = vadd.f32 %v1434_v33, %v1382_v14  ;;  %v1115_v36 = vpop.f32.mrb[28].mxu0  ;;  %v1196_v37 = vpop.f32.mrb[28].mxu1  ;;  %3131 = vst [vmem:[#allocation11_spill] sm:$0xff] %v2667_v39 }
 0x187   : > { %v1235_v59 = vadd.f32 %v1115_v36, %v2461_v61  ;;  %v1237_v0 = vadd.f32 %v1196_v37, %v2463_v62  ;;  %v1117_v21 = vpop.f32.mrb[29].mxu0  ;;  %v1198_v58 = vpop.f32.mrb[29].mxu1 }
 0x188   : > { %v1236_v26 = vadd.f32 %v1117_v21, %v2467_v4  ;;  %v1238_v34 = vadd.f32 %v1198_v58, %v2469_v5  ;;  %v1119_v25 = vpop.f32.mrb[30].mxu0  ;;  %v1200_v12 = vpop.f32.mrb[30].mxu1 }
 0x189   : > { %v2662_v24 = vadd.f32 %v2475_v16, %v1235_v59  ;;  %v2665_v30 = vadd.f32 %v2477_v17, %v1237_v0  ;;  %v1120_v33 = vpop.f32.mrb[31].mxu0  ;;  %v1201_v43 = vpop.f32.mrb[31].mxu1 }
 0x18a   : > { %v2670_v61 = vadd.f32 %v2479_v18, %v1236_v26  ;;  %v2673_v62 = vadd.f32 %v2481_v19, %v1238_v34 }
 0x18b   : > { %3130 = vst [vmem:[#allocation10_spill] sm:$0xff] %v2665_v30  ;;  %v1383_v58 = vmul.f32 %v2667_v39, %v2662_v24  ;;  %v1385_v4 = vmul.f32 %v2667_v39, %v2665_v30 }
 0x18c   : > { %v1384_v5 = vmul.f32 %v2667_v39, %v2670_v61  ;;  %v1386_v16 = vmul.f32 %v2667_v39, %v2673_v62 }
 0x18d   : > { %v1394_v17 = vadd.f32 %v1393_v29, %v1383_v58  ;;  %v1422_v21 = vadd.f32 %v1421_v45, %v1385_v4 }
 0x18e   : > { %v1408_v48 = vadd.f32 %v1407_v15, %v1384_v5  ;;  %v1436_v18 = vadd.f32 %v1435_v22, %v1386_v16 }
 0x18f   : > { %v1395_v56 = vrot.slane %v1394_v17, 4  ;;  %v1423_v57 = vrot.slane %v1422_v21, 4 }
 0x190   : > { %v1409_v19 = vrot.slane %v1408_v48, 4  ;;  %v1437_v14 = vrot.slane %v1436_v18, 4 }
 0x191   : > { %v1396_v36 = vadd.f32 %v1395_v56, %v1394_v17  ;;  %v1424_v37 = vadd.f32 %v1423_v57, %v1422_v21 }
 0x192   : > { %v1410_v59 = vadd.f32 %v1409_v19, %v1408_v48  ;;  %v1438_v0 = vadd.f32 %v1437_v14, %v1436_v18 }
 0x193   : > { %v1397_v26 = vrot.slane %v1396_v36, 2  ;;  %v1425_v34 = vrot.slane %v1424_v37, 2 }
 0x194   : > { %v1411_v25 = vrot.slane %v1410_v59, 2  ;;  %v1439_v12 = vrot.slane %v1438_v0, 2 }
 0x195   : > { %v1398_v33 = vadd.f32 %v1397_v26, %v1396_v36  ;;  %v1426_v43 = vadd.f32 %v1425_v34, %v1424_v37 }
 0x196   : > { %v1412_v30 = vadd.f32 %v1411_v25, %v1410_v59  ;;  %v1440_v39 = vadd.f32 %v1439_v12, %v1438_v0 }
 0x197   : > { %v1399_v29 = vrot.slane %v1398_v33, 1  ;;  %v1427_v45 = vrot.slane %v1426_v43, 1 }
 0x198   : > { %v1413_v15 = vrot.slane %v1412_v30, 1  ;;  %v1441_v4 = vrot.slane %v1440_v39, 1 }
 0x199   : > { %v1400_v22 = vadd.f32 %v1399_v29, %v1398_v33  ;;  %v1428_v5 = vadd.f32 %v1427_v45, %v1426_v43 }
 0x19a   : > { %v1414_v58 = vadd.f32 %v1413_v15, %v1412_v30  ;;  %v1442_v17 = vadd.f32 %v1441_v4, %v1440_v39 }
 0x19c   : > { %v1443_v16 = vadd.f32 %v1414_v58, %v1400_v22 }
 0x19e   : > { %v1444_v21 = vadd.f32 %v1443_v16, %v1428_v5 }
 0x1a0   : > { %v1445_v48 = vadd.f32 %v1444_v21, %v1442_v17 }
 0x1a2   : > { %v1446_v18 = vmul.f32 0.00390625, %v1445_v48 }
 0x1a4   : > { %v1450_v56 = vrot.slane %v1446_v18, %v2465_v1 }
 0x1a6   : > { %v2685_v57 = vsub.f32 %v2488_v7, %v1450_v56  ;;  %v2688_v19 = vsub.f32 %v2494_v27, %v1450_v56  ;;  %v2691_v14 = vsub.f32 %v2491_v8, %v1450_v56  ;;  %v2694_v30 = vsub.f32 %v2497_v28, %v1450_v56 }
 0x1a7   : > { %v2697_v36 = vsub.f32 %v2500_v31, %v1450_v56  ;;  %v2700_v39 = vsub.f32 %v2506_v23, %v1450_v56  ;;  %v2703_v37 = vsub.f32 %v2503_v32, %v1450_v56  ;;  %v2706_v7 = vsub.f32 %v2509_v35, %v1450_v56 }
 0x1a8   : > { %v2709_v27 = vsub.f32 %v2530_v50, %v1450_v56  ;;  %v2712_v8 = vsub.f32 %v2536_v53, %v1450_v56  ;;  %v2715_v28 = vsub.f32 %v2533_v51, %v1450_v56  ;;  %v2718_v31 = vsub.f32 %v2539_v54, %v1450_v56 }
 0x1a9   : > { %v2721_v23 = vsub.f32 %v2546_v60, %v1450_v56  ;;  %v2724_v32 = vsub.f32 %v2556_v10, %v1450_v56  ;;  %v2727_v35 = vsub.f32 %v2549_v63, %v1450_v56  ;;  %v2730_v50 = vsub.f32 %v2559_v11, %v1450_v56 }
 0x1aa   : > { %3132 = vst [vmem:[#allocation12_spill] sm:$0xff] %v2715_v28  ;;  %3133 = vst [vmem:[#allocation13_spill] sm:$0xff] %v2718_v31  ;;  %v2733_v53 = vsub.f32 %v2574_v40, %v1450_v56  ;;  %v2736_v51 = vsub.f32 %v2580_v44, %v1450_v56  ;;  %v2739_v54 = vsub.f32 %v2577_v41, %v1450_v56 }
 0x1ab   : > { %3134 = vst [vmem:[#allocation14_spill] sm:$0xff] %v2721_v23  ;;  %3135 = vst [vmem:[#allocation15_spill] sm:$0xff] %v2724_v32  ;;  %v2742_v60 = vsub.f32 %v2583_v46, %v1450_v56  ;;  %v2745_v10 = vsub.f32 %v2590_v52, %v1450_v56  ;;  %v2748_v63 = vsub.f32 %v2600_v3, %v1450_v56 }
 0x1ac   : > { %3136 = vst [vmem:[#allocation16_spill] sm:$0xff] %v2727_v35  ;;  %3137 = vst [vmem:[#allocation17_spill] sm:$0xff] %v2730_v50  ;;  %v2751_v11 = vsub.f32 %v2593_v55, %v1450_v56  ;;  %v2754_v40 = vsub.f32 %v2603_v6, %v1450_v56  ;;  %v2757_v44 = vsub.f32 %v2616_v47, %v1450_v56 }
 0x1ad   : > { %3138 = vst [vmem:[#allocation18_spill] sm:$0xff] %v2733_v53  ;;  %3139 = vst [vmem:[#allocation19_spill] sm:$0xff] %v2736_v51  ;;  %v2760_v41 = vsub.f32 %v2622_v49, %v1450_v56  ;;  %v2763_v46 = vsub.f32 %v2619_v38, %v1450_v56  ;;  %v2766_v52 = vsub.f32 %v2625_v2, %v1450_v56  ;;  %v3156_v2 = vld [vmem:[#allocation10_spill] sm:$0xff] }
 0x1ae   : > { %3140 = vst [vmem:[#allocation20_spill] sm:$0xff] %v2739_v54  ;;  %3141 = vst [vmem:[#allocation21_spill] sm:$0xff] %v2742_v60  ;;  %v2769_v3 = vsub.f32 %v2632_v9, %v1450_v56  ;;  %v2772_v55 = vsub.f32 %v2644_v20, %v1450_v56  ;;  %v2775_v6 = vsub.f32 %v2635_v13, %v1450_v56 }
 0x1af   : > { %3142 = vst [vmem:[#allocation22_spill] sm:$0xff] %v2745_v10  ;;  %3143 = vst [vmem:[#allocation23_spill] sm:$0xff] %v2748_v63  ;;  %v2778_v47 = vsub.f32 %v2647_v42, %v1450_v56  ;;  %v2781_v49 = vsub.f32 %v2662_v24, %v1450_v56  ;;  %v2784_v38 = vsub.f32 %v2670_v61, %v1450_v56 }
 0x1b0   : > { %3144 = vst [vmem:[#allocation24_spill] sm:$0xff] %v2751_v11  ;;  %3145 = vst [vmem:[#allocation25_spill] sm:$0xff] %v2754_v40  ;;  %v2787_v59 = vsub.f32 %v3156_v2, %v1450_v56  ;;  %v2790_v9 = vsub.f32 %v2673_v62, %v1450_v56  ;;  %v1487_v20 = vmul.f32 %v2685_v57, %v2685_v57 }
 0x1b1   : > { %3146 = vst [vmem:[#allocation26_spill] sm:$0xff] %v2757_v44  ;;  %3147 = vst [vmem:[#allocation27_spill] sm:$0xff] %v2760_v41  ;;  %v1488_v13 = vmul.f32 %v2688_v19, %v2688_v19  ;;  %v1489_v42 = vmul.f32 %v2691_v14, %v2691_v14  ;;  %v1490_v24 = vmul.f32 %v2694_v30, %v2694_v30 }
 0x1b2   : > { %3148 = vst [vmem:[#allocation28_spill] sm:$0xff] %v2763_v46  ;;  %3149 = vst [vmem:[#allocation29_spill] sm:$0xff] %v2766_v52  ;;  %v1491_v61 = vmul.f32 %v2697_v36, %v2697_v36  ;;  %v1492_v0 = vmul.f32 %v2700_v39, %v2700_v39  ;;  %v1493_v62 = vmul.f32 %v2703_v37, %v2703_v37 }
 0x1b3   : > { %3150 = vst [vmem:[#allocation30_spill] sm:$0xff] %v2769_v3  ;;  %3151 = vst [vmem:[#allocation31_spill] sm:$0xff] %v2772_v55  ;;  %v1494_v26 = vmul.f32 %v2706_v7, %v2706_v7  ;;  %v1495_v34 = vmul.f32 %v2709_v27, %v2709_v27  ;;  %v1496_v25 = vmul.f32 %v2712_v8, %v2712_v8 }
 0x1b4   : > { %3152 = vst [vmem:[#allocation32_spill] sm:$0xff] %v2775_v6  ;;  %3153 = vst [vmem:[#allocation33_spill] sm:$0xff] %v2778_v47  ;;  %v1497_v12 = vmul.f32 %v2715_v28, %v2715_v28  ;;  %v1498_v33 = vmul.f32 %v2718_v31, %v2718_v31  ;;  %v1499_v43 = vmul.f32 %v2721_v23, %v2721_v23  ;;  %v3163_v28 = vld [vmem:[#allocation6_spill] sm:$0xff] }
 0x1b5   : > { %3154 = vst [vmem:[#allocation34_spill] sm:$0xff] %v2781_v49  ;;  %3155 = vst [vmem:[#allocation35_spill] sm:$0xff] %v2784_v38  ;;  %v1500_v29 = vmul.f32 %v2724_v32, %v2724_v32  ;;  %v1501_v45 = vmul.f32 %v2727_v35, %v2727_v35  ;;  %v1502_v15 = vmul.f32 %v2730_v50, %v2730_v50  ;;  %v3162_v35 = vld [vmem:[#allocation5_spill] sm:$0xff] }
 0x1b6   : > { %3157 = vst [vmem:[#allocation10_spill] sm:$0xff] %v2787_v59  ;;  %3158 = vst [vmem:[#allocation36_spill] sm:$0xff] %v2790_v9  ;;  %v1503_v22 = vmul.f32 %v2733_v53, %v2733_v53  ;;  %v1504_v58 = vmul.f32 %v2736_v51, %v2736_v51  ;;  %v1505_v4 = vmul.f32 %v2739_v54, %v2739_v54  ;;  %v3160_v51 = vld [vmem:[#allocation3_spill] sm:$0xff] }
 0x1b7   : > { %v1506_v5 = vmul.f32 %v2742_v60, %v2742_v60  ;;  %v1507_v16 = vmul.f32 %v2745_v10, %v2745_v10  ;;  %v1508_v17 = vmul.f32 %v2748_v63, %v2748_v63  ;;  %v1509_v21 = vmul.f32 %v2751_v11, %v2751_v11  ;;  %v3159_v60 = vld [vmem:[#allocation2_spill] sm:$0xff] }
 0x1b8   : > { %v1510_v48 = vmul.f32 %v2754_v40, %v2754_v40  ;;  %v1511_v18 = vmul.f32 %v2757_v44, %v2757_v44  ;;  %v1512_v56 = vmul.f32 %v2760_v41, %v2760_v41  ;;  %v1513_v2 = vmul.f32 %v2763_v46, %v2763_v46 }
 0x1b9   : > { %v1514_v10 = vmul.f32 %v2766_v52, %v2766_v52  ;;  %v1523_v63 = vmul.f32 %v1487_v20, %v3159_v60  ;;  %v1524_v54 = vmul.f32 %v1488_v13, %v3159_v60  ;;  %v1525_v11 = vmul.f32 %v1489_v42, %v3159_v60 }
 0x1ba   : > { %v1526_v40 = vmul.f32 %v1490_v24, %v3159_v60  ;;  %v1527_v53 = vmul.f32 %v1491_v61, %v3160_v51  ;;  %v1528_v44 = vmul.f32 %v1492_v0, %v3160_v51  ;;  %v1529_v41 = vmul.f32 %v1493_v62, %v3160_v51  ;;  %v3161_v0 = vld [vmem:[#allocation4_spill] sm:$0xff] }
 0x1bb   : > { %v1530_v50 = vmul.f32 %v1494_v26, %v3160_v51  ;;  %v1515_v46 = vmul.f32 %v2769_v3, %v2769_v3  ;;  %v1516_v20 = vmul.f32 %v2772_v55, %v2772_v55  ;;  %v1517_v13 = vmul.f32 %v2775_v6, %v2775_v6 }
 0x1bc   : > { %v1518_v60 = vmul.f32 %v2778_v47, %v2778_v47  ;;  %v1519_v42 = vmul.f32 %v2781_v49, %v2781_v49  ;;  %v1520_v24 = vmul.f32 %v2784_v38, %v2784_v38  ;;  %v1521_v51 = vmul.f32 %v2787_v59, %v2787_v59 }
 0x1bd   : > { %v1522_v61 = vmul.f32 %v2790_v9, %v2790_v9  ;;  %v1531_v62 = vmul.f32 %v1495_v34, %v3161_v0  ;;  %v1532_v26 = vmul.f32 %v1496_v25, %v3161_v0  ;;  %v1533_v6 = vmul.f32 %v1497_v12, %v3161_v0 }
 0x1be   : > { %v1534_v47 = vmul.f32 %v1498_v33, %v3161_v0  ;;  %v1559_v55 = vadd.f32 %v1527_v53, %v1523_v63  ;;  %v1573_v3 = vadd.f32 %v1528_v44, %v1524_v54  ;;  %v1587_v49 = vadd.f32 %v1529_v41, %v1525_v11  ;;  %v3164_v44 = vld [vmem:[#allocation7_spill] sm:$0xff] }
 0x1bf   : > { %v1601_v52 = vadd.f32 %v1530_v50, %v1526_v40  ;;  %v1535_v38 = vmul.f32 %v1499_v43, %v3162_v35  ;;  %v1536_v32 = vmul.f32 %v1500_v29, %v3162_v35  ;;  %v1537_v59 = vmul.f32 %v1501_v45, %v3162_v35  ;;  %v3165_v43 = vld [vmem:[#allocation8_spill] sm:$0xff]  ;;  %v3166_v45 = vld [vmem:[#allocation9_spill] sm:$0xff] }
 0x1c0   : > { %v1538_v9 = vmul.f32 %v1502_v15, %v3162_v35  ;;  %v1560_v23 = vadd.f32 %v1559_v55, %v1531_v62  ;;  %v1574_v34 = vadd.f32 %v1573_v3, %v1532_v26  ;;  %v1588_v31 = vadd.f32 %v1587_v49, %v1533_v6 }
 0x1c1   : > { %v1602_v25 = vadd.f32 %v1601_v52, %v1534_v47  ;;  %v1539_v12 = vmul.f32 %v1503_v22, %v3163_v28  ;;  %v1540_v33 = vmul.f32 %v1504_v58, %v3163_v28  ;;  %v1541_v53 = vmul.f32 %v1505_v4, %v3163_v28 }
 0x1c2   : > { %v1542_v50 = vmul.f32 %v1506_v5, %v3163_v28  ;;  %v1561_v54 = vadd.f32 %v1560_v23, %v1535_v38  ;;  %v1575_v63 = vadd.f32 %v1574_v34, %v1536_v32  ;;  %v1589_v11 = vadd.f32 %v1588_v31, %v1537_v59 }
 0x1c3   : > { %v1603_v40 = vadd.f32 %v1602_v25, %v1538_v9  ;;  %v1543_v41 = vmul.f32 %v1507_v16, %v3164_v44  ;;  %v1544_v35 = vmul.f32 %v1508_v17, %v3164_v44  ;;  %v1545_v3 = vmul.f32 %v1509_v21, %v3164_v44 }
 0x1c4   : > { %v1546_v52 = vmul.f32 %v1510_v48, %v3164_v44  ;;  %v1562_v55 = vadd.f32 %v1561_v54, %v1539_v12  ;;  %v1576_v6 = vadd.f32 %v1575_v63, %v1540_v33  ;;  %v1590_v47 = vadd.f32 %v1589_v11, %v1541_v53  ;;  %v3167_v48 = vld [vmem:[#allocation11_spill] sm:$0xff] }
 0x1c5   : > { %v1604_v49 = vadd.f32 %v1603_v40, %v1542_v50  ;;  %v1547_v29 = vmul.f32 %v1511_v18, %v3165_v43  ;;  %v1548_v28 = vmul.f32 %v1512_v56, %v3165_v43  ;;  %v1549_v23 = vmul.f32 %v1513_v2, %v3165_v43 }
 0x1c6   : > { %v1550_v31 = vmul.f32 %v1514_v10, %v3165_v43  ;;  %v1563_v32 = vadd.f32 %v1562_v55, %v1543_v41  ;;  %v1577_v38 = vadd.f32 %v1576_v6, %v1544_v35  ;;  %v1591_v59 = vadd.f32 %v1590_v47, %v1545_v3 }
 0x1c7   : > { %v1605_v9 = vadd.f32 %v1604_v49, %v1546_v52  ;;  %v1551_v15 = vmul.f32 %v1515_v46, %v3166_v45  ;;  %v1552_v22 = vmul.f32 %v1516_v20, %v3166_v45  ;;  %v1553_v58 = vmul.f32 %v1517_v13, %v3166_v45 }
 0x1c8   : > { %v1554_v4 = vmul.f32 %v1518_v60, %v3166_v45  ;;  %v1564_v5 = vadd.f32 %v1563_v32, %v1547_v29  ;;  %v1578_v16 = vadd.f32 %v1577_v38, %v1548_v28  ;;  %v1592_v17 = vadd.f32 %v1591_v59, %v1549_v23 }
 0x1c9   : > { %v1606_v21 = vadd.f32 %v1605_v9, %v1550_v31  ;;  %v1555_v18 = vmul.f32 %v1519_v42, %v3167_v48  ;;  %v1556_v10 = vmul.f32 %v1520_v24, %v3167_v48  ;;  %v1557_v56 = vmul.f32 %v1521_v51, %v3167_v48 }
 0x1ca   : > { %v1558_v2 = vmul.f32 %v1522_v61, %v3167_v48  ;;  %v1565_v0 = vadd.f32 %v1564_v5, %v1551_v15  ;;  %v1579_v46 = vadd.f32 %v1578_v16, %v1552_v22  ;;  %v1593_v62 = vadd.f32 %v1592_v17, %v1553_v58 }
 0x1cb   : > { %v1607_v20 = vadd.f32 %v1606_v21, %v1554_v4 }
 0x1cc   : > { %v1566_v26 = vadd.f32 %v1565_v0, %v1555_v18  ;;  %v1580_v13 = vadd.f32 %v1579_v46, %v1556_v10  ;;  %v1594_v34 = vadd.f32 %v1593_v62, %v1557_v56  ;;  %v3176_v46 = vld [vmem:[#allocation20_spill] sm:$0xff] }
 0x1cd   : > { %v1608_v60 = vadd.f32 %v1607_v20, %v1558_v2  ;;  %v3175_v2 = vld [vmem:[#allocation19_spill] sm:$0xff]  ;;  %v3177_v20 = vld [vmem:[#allocation21_spill] sm:$0xff] }
 0x1ce   : > { %v1567_v25 = vrot.slane %v1566_v26, 4  ;;  %v1581_v12 = vrot.slane %v1580_v13, 4  ;;  %v1595_v33 = vrot.slane %v1594_v34, 4 }
 0x1cf   : > { %v1609_v53 = vrot.slane %v1608_v60, 4 }
 0x1d0   : > { %v1568_v50 = vadd.f32 %v1567_v25, %v1566_v26  ;;  %v1582_v42 = vadd.f32 %v1581_v12, %v1580_v13  ;;  %v1596_v54 = vadd.f32 %v1595_v33, %v1594_v34  ;;  %v3178_v13 = vld [vmem:[#allocation22_spill] sm:$0xff]  ;;  %v3180_v12 = vld [vmem:[#allocation24_spill] sm:$0xff] }
 0x1d1   : > { %v1610_v24 = vadd.f32 %v1609_v53, %v1608_v60  ;;  %v3179_v60 = vld [vmem:[#allocation23_spill] sm:$0xff]  ;;  %v3181_v53 = vld [vmem:[#allocation25_spill] sm:$0xff] }
 0x1d2   : > { %v1569_v63 = vrot.slane %v1568_v50, 2  ;;  %v1583_v51 = vrot.slane %v1582_v42, 2  ;;  %v1597_v11 = vrot.slane %v1596_v54, 2 }
 0x1d3   : > { %v1611_v61 = vrot.slane %v1610_v24, 2 }
 0x1d4   : > { %v1570_v40 = vadd.f32 %v1569_v63, %v1568_v50  ;;  %v1584_v44 = vadd.f32 %v1583_v51, %v1582_v42  ;;  %v1598_v41 = vadd.f32 %v1597_v11, %v1596_v54  ;;  %v3182_v42 = vld [vmem:[#allocation26_spill] sm:$0xff]  ;;  %v3184_v51 = vld [vmem:[#allocation28_spill] sm:$0xff] }
 0x1d5   : > { %v1612_v35 = vadd.f32 %v1611_v61, %v1610_v24  ;;  %v3183_v24 = vld [vmem:[#allocation27_spill] sm:$0xff]  ;;  %v3185_v61 = vld [vmem:[#allocation29_spill] sm:$0xff] }
 0x1d6   : > { %v1571_v3 = vrot.slane %v1570_v40, 1  ;;  %v1585_v52 = vrot.slane %v1584_v44, 1  ;;  %v1599_v55 = vrot.slane %v1598_v41, 1 }
 0x1d7   : > { %v1613_v49 = vrot.slane %v1612_v35, 1 }
 0x1d8   : > { %v1572_v6 = vadd.f32 %v1571_v3, %v1570_v40  ;;  %v1586_v47 = vadd.f32 %v1585_v52, %v1584_v44  ;;  %v1600_v43 = vadd.f32 %v1599_v55, %v1598_v41  ;;  %v3186_v44 = vld [vmem:[#allocation30_spill] sm:$0xff]  ;;  %v3188_v52 = vld [vmem:[#allocation32_spill] sm:$0xff] }
 0x1d9   : > { %v1614_v28 = vadd.f32 %v1613_v49, %v1612_v35  ;;  %v3187_v35 = vld [vmem:[#allocation31_spill] sm:$0xff]  ;;  %v3190_v49 = vld [vmem:[#allocation34_spill] sm:$0xff] }
 0x1da   : > { %v1615_v29 = vadd.f32 %v1586_v47, %v1572_v6  ;;  %v3189_v6 = vld [vmem:[#allocation33_spill] sm:$0xff] }
 0x1dc   : > { %v1616_v23 = vadd.f32 %v1615_v29, %v1600_v43  ;;  %v3191_v29 = vld [vmem:[#allocation35_spill] sm:$0xff] }
 0x1de   : > { %v1617_v31 = vadd.f32 %v1616_v23, %v1614_v28  ;;  %v3192_v23 = vld [vmem:[#allocation10_spill] sm:$0xff] }
 0x1e0   : > { %v1618_v32 = vmul.f32 0.00390625, %v1617_v31 }
 0x1e2   : > { %v1619_v38 = vadd.f32 1e-05, %v1618_v32  ;;  %v3193_v32 = vld [vmem:[#allocation36_spill] sm:$0xff] }
 0x1e4   : > { %2152 = vrsqrt.f32 %v1619_v38 }
 0x1ee   : > { %v2153_v59 = vpop.eup %2152 }
 0x1ef   : > { %v1624_v9 = vrot.slane %v2153_v59, %v2465_v1 }
 0x1f1   : > { %v2902_v45 = vmul.f32 %v1624_v9, %v2685_v57  ;;  %v2905_v15 = vmul.f32 %v1624_v9, %v2688_v19  ;;  %v2908_v22 = vmul.f32 %v1624_v9, %v2691_v14  ;;  %v2911_v58 = vmul.f32 %v1624_v9, %v2694_v30  ;;  %v3168_v30 = vld [vmem:[#allocation12_spill] sm:$0xff] }
 0x1f2   : > { %v2914_v4 = vmul.f32 %v1624_v9, %v2697_v36  ;;  %v2917_v5 = vmul.f32 %v1624_v9, %v2700_v39  ;;  %v2920_v1 = vmul.f32 %v1624_v9, %v2703_v37  ;;  %v2923_v57 = vmul.f32 %v1624_v9, %v2706_v7  ;;  %v3169_v36 = vld [vmem:[#allocation13_spill] sm:$0xff]  ;;  %v3170_v39 = vld [vmem:[#allocation14_spill] sm:$0xff]  ;;  %v3171_v37 = vld [vmem:[#allocation15_spill] sm:$0xff] }
 0x1f3   : > { %v2926_v19 = vmul.f32 %v1624_v9, %v2709_v27  ;;  %v2929_v14 = vmul.f32 %v1624_v9, %v2712_v8  ;;  %v2932_v16 = vmul.f32 %v1624_v9, %v3168_v30  ;;  %v2935_v17 = vmul.f32 %v1624_v9, %v3169_v36  ;;  %v3172_v7 = vld [vmem:[#allocation16_spill] sm:$0xff]  ;;  %v3173_v27 = vld [vmem:[#allocation17_spill] sm:$0xff]  ;;  %v3174_v8 = vld [vmem:[#allocation18_spill] sm:$0xff] }
 0x1f4   : > { %v2938_v21 = vmul.f32 %v1624_v9, %v3170_v39  ;;  %v2941_v48 = vmul.f32 %v1624_v9, %v3171_v37  ;;  %v2944_v18 = vmul.f32 %v1624_v9, %v3172_v7  ;;  %v2947_v10 = vmul.f32 %v1624_v9, %v3173_v27 }
 0x1f5   : > { %v2950_v56 = vmul.f32 %v1624_v9, %v3174_v8  ;;  %v2953_v0 = vmul.f32 %v1624_v9, %v3175_v2  ;;  %v2956_v62 = vmul.f32 %v1624_v9, %v3176_v46  ;;  %v2959_v26 = vmul.f32 %v1624_v9, %v3177_v20 }
 0x1f6   : > { %v2962_v34 = vmul.f32 %v1624_v9, %v3178_v13  ;;  %v2965_v25 = vmul.f32 %v1624_v9, %v3179_v60  ;;  %v2968_v33 = vmul.f32 %v1624_v9, %v3180_v12  ;;  %v2971_v50 = vmul.f32 %v1624_v9, %v3181_v53 }
 0x1f7   : > { %v2974_v54 = vmul.f32 %v1624_v9, %v3182_v42  ;;  %v2977_v63 = vmul.f32 %v1624_v9, %v3183_v24  ;;  %v2980_v11 = vmul.f32 %v1624_v9, %v3184_v51  ;;  %v2983_v40 = vmul.f32 %v1624_v9, %v3185_v61 }
 0x1f8   : > { %v2986_v41 = vmul.f32 %v1624_v9, %v3186_v44  ;;  %v2989_v3 = vmul.f32 %v1624_v9, %v3187_v35  ;;  %v2992_v55 = vmul.f32 %v1624_v9, %v3188_v52  ;;  %v2995_v47 = vmul.f32 %v1624_v9, %v3189_v6 }
 0x1f9   : > { %v2998_v43 = vmul.f32 %v1624_v9, %v3190_v49  ;;  %v3001_v28 = vmul.f32 %v1624_v9, %v3191_v29  ;;  %v3004_v31 = vmul.f32 %v1624_v9, %v3192_v23  ;;  %v3007_v38 = vmul.f32 %v1624_v9, %v3193_v32 }
 0x1fa   : > { %v1661_v59 = vmax.f32 %v2902_v45, 0.0  ;;  %v1662_v30 = vmax.f32 %v2905_v15, 0.0  ;;  %v1663_v36 = vmax.f32 %v2908_v22, 0.0  ;;  %v1664_v39 = vmax.f32 %v2911_v58, 0.0 }
 0x1fb   : > { %v1665_v37 = vmax.f32 %v2914_v4, 0.0  ;;  %v1666_v7 = vmax.f32 %v2917_v5, 0.0  ;;  %v1667_v27 = vmax.f32 %v2920_v1, 0.0  ;;  %v1668_v8 = vmax.f32 %v2923_v57, 0.0 }
 0x1fc   : > { %v1669_v9 = vmax.f32 %v2926_v19, 0.0  ;;  %v1670_v2 = vmax.f32 %v2929_v14, 0.0  ;;  %v1671_v45 = vmax.f32 %v2932_v16, 0.0  ;;  %v1672_v15 = vmax.f32 %v2935_v17, 0.0 }
 0x1fd   : > { %v1673_v22 = vmax.f32 %v2938_v21, 0.0  ;;  %v1674_v58 = vmax.f32 %v2941_v48, 0.0  ;;  %v1675_v4 = vmax.f32 %v2944_v18, 0.0  ;;  %v1676_v5 = vmax.f32 %v2947_v10, 0.0 }
 0x1fe   : > { %v1677_v1 = vmax.f32 %v2950_v56, 0.0  ;;  %v1678_v57 = vmax.f32 %v2953_v0, 0.0  ;;  %v1679_v19 = vmax.f32 %v2956_v62, 0.0  ;;  %v1680_v14 = vmax.f32 %v2959_v26, 0.0 }
 0x1ff   : > { %v1681_v16 = vmax.f32 %v2962_v34, 0.0  ;;  %v1682_v17 = vmax.f32 %v2965_v25, 0.0  ;;  %v1683_v21 = vmax.f32 %v2968_v33, 0.0  ;;  %v1684_v48 = vmax.f32 %v2971_v50, 0.0 }
 0x200   : > { %v1685_v18 = vmax.f32 %v2974_v54, 0.0  ;;  %v1686_v10 = vmax.f32 %v2977_v63, 0.0  ;;  %v1687_v56 = vmax.f32 %v2980_v11, 0.0  ;;  %v1688_v0 = vmax.f32 %v2983_v40, 0.0 }
 0x201   : > { %v1689_v46 = vmax.f32 %v2986_v41, 0.0  ;;  %v1690_v62 = vmax.f32 %v2989_v3, 0.0  ;;  %v1691_v20 = vmax.f32 %v2992_v55, 0.0  ;;  %v1692_v26 = vmax.f32 %v2995_v47, 0.0 }
 0x202   : > { %v1693_v13 = vmax.f32 %v2998_v43, 0.0  ;;  %v1694_v34 = vmax.f32 %v3001_v28, 0.0  ;;  %v1695_v60 = vmax.f32 %v3004_v31, 0.0  ;;  %v1696_v25 = vmax.f32 %v3007_v38, 0.0 }
 0x203   : > { %v1989_v12 = vpack.c.bf16 %v1662_v30, %v1661_v59  ;;  %v1990_v33 = vpack.c.bf16 %v1664_v39, %v1663_v36  ;;  %v1991_v53 = vpack.c.bf16 %v1666_v7, %v1665_v37  ;;  %v1992_v50 = vpack.c.bf16 %v1668_v8, %v1667_v27 }
 0x204   : > { %v1993_v42 = vpack.c.bf16 %v1670_v2, %v1669_v9  ;;  %v1994_v54 = vpack.c.bf16 %v1672_v15, %v1671_v45  ;;  %v1995_v24 = vpack.c.bf16 %v1674_v58, %v1673_v22  ;;  %v1996_v63 = vpack.c.bf16 %v1676_v5, %v1675_v4 }
 0x205   : > { %v1997_v51 = vpack.c.bf16 %v1678_v57, %v1677_v1  ;;  %v1998_v11 = vpack.c.bf16 %v1680_v14, %v1679_v19  ;;  %v1999_v61 = vpack.c.bf16 %v1682_v17, %v1681_v16  ;;  %v2000_v40 = vpack.c.bf16 %v1684_v48, %v1683_v21  ;;  %1809 = vst [vmem:[%s3045_s27] sm:$0xff] %v1989_v12 }
 0x206   : > { %1810 = vst [vmem:[%s3045_s27 + $0x8] sm:$0xff] %v1990_v33  ;;  %1811 = vst [vmem:[%s3045_s27 + $0x10] sm:$0xff] %v1991_v53  ;;  %v2001_v44 = vpack.c.bf16 %v1686_v10, %v1685_v18  ;;  %v2002_v41 = vpack.c.bf16 %v1688_v0, %v1687_v56  ;;  %v2003_v35 = vpack.c.bf16 %v1690_v62, %v1689_v46 }
 0x207   : > { %1812 = vst [vmem:[%s3045_s27 + $0x18] sm:$0xff] %v1992_v50  ;;  %v2004_v3 = vpack.c.bf16 %v1692_v26, %v1691_v20  ;;  %1813 = vst [vmem:[%s3045_s27 + $0x20] sm:$0xff] %v1993_v42  ;;  %v2005_v52 = vpack.c.bf16 %v1694_v34, %v1693_v13  ;;  %v2006_v55 = vpack.c.bf16 %v1696_v25, %v1695_v60 }
 0x208   : > { %1814 = vst [vmem:[%s3045_s27 + $0x28] sm:$0xff] %v1994_v54  ;;  %1815 = vst [vmem:[%s3045_s27 + $0x30] sm:$0xff] %v1995_v24 }
 0x209   : > { %1816 = vst [vmem:[%s3045_s27 + $0x38] sm:$0xff] %v1996_v63  ;;  %1817 = vst [vmem:[%s3045_s27 + $0x40] sm:$0xff] %v1997_v51 }
 0x20a   : > { %1818 = vst [vmem:[%s3045_s27 + $0x48] sm:$0xff] %v1998_v11  ;;  %1819 = vst [vmem:[%s3045_s27 + $0x50] sm:$0xff] %v1999_v61 }
 0x20b   : > { %1820 = vst [vmem:[%s3045_s27 + $0x58] sm:$0xff] %v2000_v40  ;;  %1821 = vst [vmem:[%s3045_s27 + $0x60] sm:$0xff] %v2001_v44 }
 0x20c   : > { %1822 = vst [vmem:[%s3045_s27 + $0x68] sm:$0xff] %v2002_v41  ;;  %1823 = vst [vmem:[%s3045_s27 + $0x70] sm:$0xff] %v2003_v35 }
 0x20d   : > { %1824 = vst [vmem:[%s3045_s27 + $0x78] sm:$0xff] %v2004_v3  ;;  %1825 = vst [vmem:[%s3045_s27 + $0x80] sm:$0xff] %v2005_v52 }
 0x20e   : > { %1826 = vst [vmem:[%s3045_s27 + $0x88] sm:$0xff] %v2006_v55 }
 0x20f PF: > { %s14_s15 = sadd.s32 1, %s2160_s15  }
 0x210   : > { %p11_p4 = scmp.ge.s32.totalorder %s14_s15, 4  }
 0x212   :  { %13 = sbr.rel (!%p11_p4) target bundleno = 1 (0x1), region = 69 }

// kernel: global_generator_forward.19
= control target key start
LH: loop header
LB: loop body
LE: loop exit
PB: predicated region body
PF: predicated region fallthrough
CT: control target
= control target key end

     0   :  { %s1725_s12 = smov 0   ;;  %s1727_s13 = smov 0   ;;  %s1971_s0 = inlined_call_operand.vmem [shape: bf16[2,256,512], index: 0, kind: input, shape index: {}]   ;;  %s1972_s1 = inlined_call_operand.vmem [shape: bf16[512,128], index: 1, kind: input, shape index: {}]   ;;  %s1973_s2 = inlined_call_operand.vmem [shape: f32[1,128], index: 2, kind: input, shape index: {}]   ;;  %s1974_s3 = inlined_call_operand.vmem [shape: bf16[2,256,128], index: 3, kind: output, shape index: {}]  }
   0x1   :  { %s1729_s14 = smov 0   ;;  %s1731_s15 = smov 0  }
   0x2   :  { %s1733_s16 = smov 0   ;;  %s1735_s17 = smov 0  }
   0x3   :  { %s1737_s18 = smov 0  }
   0x4 LB: > { %s22_s19 = sadd.s32 1, %s1694_s16  ;;  %s25_s20 = sadd.s32 1, %s1698_s17  ;;  %s1702_s18 = sphi %s1737_s18, %s13_s18   ;;  %s1698_s17 = sphi %s1735_s17, %s1980_s17   ;;  %s1694_s16 = sphi %s1733_s16, %s1979_s16   ;;  %s1690_s15 = sphi %s1731_s15, %s1978_s15   ;;  %s1686_s14 = sphi %s1729_s14, %s1977_s14   ;;  %s1682_s13 = sphi %s1727_s13, %s1976_s13   ;;  %s1678_s12 = sphi %s1725_s12, %s1975_s12  }
   0x5   : > { %p23_p0 = scmp.ge.s32.totalorder %s22_s19, 4  ;;  %p41_p1 = scmp.ne.s32.totalorder %s1682_s13, %s1678_s12 }
   0x6   : > { %p42_p2 = scmp.eq.s32.totalorder %s1702_s18, 0  ;;  %s34_s24 = sadd.s32 1, %s1682_s13 }
   0x7   : > { %s1982_s19 = smov (%p23_p0, %s22_s19), 0  ;;  %s1984_s20 = smov (!%p23_p0, %s25_s20), %s1698_s17 }
   0x8   : > { %p43_p3 = por %p42_p2, %p41_p1  ;;  %p27_p4 = scmp.ge.s32.totalorder %s1984_s20, 2 }
   0x9   : > { %s30_s21 = ssub.s32 %s1694_s16, %s1982_s19  ;;  %p1216_p6 = scmp.ge.s32.totalorder %s1702_s18, 8 }
   0xa   : > { %s1986_s20 = smov (%p27_p4, %s1984_s20), 0 }
   0xb   : > { %s29_s22 = ssub.s32 %s1698_s17, %s1986_s20  ;;  %143 = sbr.rel (%p1216_p6) target bundleno = 45 (0x2d), region = 20 }
   0xc   : > { %s31_s23 = sor.u32 %s30_s21, %s29_s22 }
   0xd   : > { %p32_p5 = scmp.eq.s32.totalorder %s31_s23, 0 }
   0xf   : > { %s1776_s25 = scalar_select %p32_p5, %s1682_s13, %s34_s24  }
  0x12   : > { %146 = sbr.rel (!%p43_p3) target bundleno = 45 (0x2d), region = 24  ;;  %s148_s26 = sand.u32 (%p43_p3), 1, %s1682_s13  }
  0x13   : > { %s1218_s27 = sshll.u32 (%p43_p3), %s1698_s17, 7  ;;  %s1217_s28 = sshll.u32 (%p43_p3), %s148_s26, 7 }
  0x14   : > { %s152_s29 = sadd.s32 (%p43_p3), %s1694_s16, %s1218_s27  ;;  %s1790_s7 = scalar_lea.vmem (%p43_p3), [#allocation3], %s1217_s28 }
  0x15   : > { %s1219_s30 = sshll.u32 (%p43_p3), %s152_s29, 2 }
  0x16   : > { %s1785_s6 = scalar_lea.vmem (%p43_p3), %s1971_s0, %s1219_s30 }
  0x17   : > { %v170_v0 = vld [vmem:[%s1785_s6] sm:$0xf] (%p43_p3)  ;;  %v172_v1 = vld [vmem:[%s1785_s6 + $0x10] sm:$0xf] (%p43_p3) }
  0x18   : > { %v174_v2 = vld [vmem:[%s1785_s6 + $0x20] sm:$0xf] (%p43_p3)  ;;  %171 = vst [vmem:[%s1790_s7] sm:$0xf] (%p43_p3), %v170_v0  ;;  %173 = vst [vmem:[%s1790_s7 + $0x4] sm:$0xf] (%p43_p3), %v172_v1 }
  0x19   : > { %175 = vst [vmem:[%s1790_s7 + $0x8] sm:$0xf] %v174_v2  ;;  %v176_v3 = vld [vmem:[%s1785_s6 + $0x30] sm:$0xf]  ;;  %v178_v4 = vld [vmem:[%s1785_s6 + $0x40] sm:$0xf] }
  0x1a   : > { %v180_v5 = vld [vmem:[%s1785_s6 + $0x50] sm:$0xf]  ;;  %177 = vst [vmem:[%s1790_s7 + $0xc] sm:$0xf] %v176_v3  ;;  %179 = vst [vmem:[%s1790_s7 + $0x10] sm:$0xf] %v178_v4 }
  0x1b   : > { %181 = vst [vmem:[%s1790_s7 + $0x14] sm:$0xf] %v180_v5  ;;  %v182_v6 = vld [vmem:[%s1785_s6 + $0x60] sm:$0xf]  ;;  %v184_v7 = vld [vmem:[%s1785_s6 + $0x70] sm:$0xf] }
  0x1c   : > { %v186_v8 = vld [vmem:[%s1785_s6 + $0x80] sm:$0xf]  ;;  %183 = vst [vmem:[%s1790_s7 + $0x18] sm:$0xf] %v182_v6  ;;  %185 = vst [vmem:[%s1790_s7 + $0x1c] sm:$0xf] %v184_v7 }
  0x1d   : > { %187 = vst [vmem:[%s1790_s7 + $0x20] sm:$0xf] %v186_v8  ;;  %v188_v9 = vld [vmem:[%s1785_s6 + $0x90] sm:$0xf]  ;;  %v190_v10 = vld [vmem:[%s1785_s6 + $0xa0] sm:$0xf] }
  0x1e   : > { %v192_v11 = vld [vmem:[%s1785_s6 + $0xb0] sm:$0xf]  ;;  %189 = vst [vmem:[%s1790_s7 + $0x24] sm:$0xf] %v188_v9  ;;  %191 = vst [vmem:[%s1790_s7 + $0x28] sm:$0xf] %v190_v10 }
  0x1f   : > { %193 = vst [vmem:[%s1790_s7 + $0x2c] sm:$0xf] %v192_v11  ;;  %v194_v12 = vld [vmem:[%s1785_s6 + $0xc0] sm:$0xf]  ;;  %v196_v13 = vld [vmem:[%s1785_s6 + $0xd0] sm:$0xf] }
  0x20   : > { %v198_v14 = vld [vmem:[%s1785_s6 + $0xe0] sm:$0xf]  ;;  %195 = vst [vmem:[%s1790_s7 + $0x30] sm:$0xf] %v194_v12  ;;  %197 = vst [vmem:[%s1790_s7 + $0x34] sm:$0xf] %v196_v13 }
  0x21   : > { %199 = vst [vmem:[%s1790_s7 + $0x38] sm:$0xf] %v198_v14  ;;  %v200_v15 = vld [vmem:[%s1785_s6 + $0xf0] sm:$0xf]  ;;  %v202_v16 = vld [vmem:[%s1785_s6 + $0x100] sm:$0xf] }
  0x22   : > { %v204_v17 = vld [vmem:[%s1785_s6 + $0x110] sm:$0xf]  ;;  %201 = vst [vmem:[%s1790_s7 + $0x3c] sm:$0xf] %v200_v15  ;;  %203 = vst [vmem:[%s1790_s7 + $0x40] sm:$0xf] %v202_v16 }
  0x23   : > { %205 = vst [vmem:[%s1790_s7 + $0x44] sm:$0xf] %v204_v17  ;;  %v206_v18 = vld [vmem:[%s1785_s6 + $0x120] sm:$0xf]  ;;  %v208_v19 = vld [vmem:[%s1785_s6 + $0x130] sm:$0xf] }
  0x24   : > { %v210_v20 = vld [vmem:[%s1785_s6 + $0x140] sm:$0xf]  ;;  %207 = vst [vmem:[%s1790_s7 + $0x48] sm:$0xf] %v206_v18  ;;  %209 = vst [vmem:[%s1790_s7 + $0x4c] sm:$0xf] %v208_v19 }
  0x25   : > { %211 = vst [vmem:[%s1790_s7 + $0x50] sm:$0xf] %v210_v20  ;;  %v212_v21 = vld [vmem:[%s1785_s6 + $0x150] sm:$0xf]  ;;  %v214_v22 = vld [vmem:[%s1785_s6 + $0x160] sm:$0xf] }
  0x26   : > { %v216_v23 = vld [vmem:[%s1785_s6 + $0x170] sm:$0xf]  ;;  %213 = vst [vmem:[%s1790_s7 + $0x54] sm:$0xf] %v212_v21  ;;  %215 = vst [vmem:[%s1790_s7 + $0x58] sm:$0xf] %v214_v22 }
  0x27   : > { %217 = vst [vmem:[%s1790_s7 + $0x5c] sm:$0xf] %v216_v23  ;;  %v218_v24 = vld [vmem:[%s1785_s6 + $0x180] sm:$0xf]  ;;  %v220_v25 = vld [vmem:[%s1785_s6 + $0x190] sm:$0xf] }
  0x28   : > { %v222_v26 = vld [vmem:[%s1785_s6 + $0x1a0] sm:$0xf]  ;;  %219 = vst [vmem:[%s1790_s7 + $0x60] sm:$0xf] %v218_v24  ;;  %221 = vst [vmem:[%s1790_s7 + $0x64] sm:$0xf] %v220_v25 }
  0x29   : > { %223 = vst [vmem:[%s1790_s7 + $0x68] sm:$0xf] %v222_v26  ;;  %v224_v27 = vld [vmem:[%s1785_s6 + $0x1b0] sm:$0xf]  ;;  %v226_v28 = vld [vmem:[%s1785_s6 + $0x1c0] sm:$0xf] }
  0x2a   : > { %v228_v29 = vld [vmem:[%s1785_s6 + $0x1d0] sm:$0xf]  ;;  %225 = vst [vmem:[%s1790_s7 + $0x6c] sm:$0xf] %v224_v27  ;;  %227 = vst [vmem:[%s1790_s7 + $0x70] sm:$0xf] %v226_v28 }
  0x2b   : > { %229 = vst [vmem:[%s1790_s7 + $0x74] sm:$0xf] %v228_v29  ;;  %v230_v30 = vld [vmem:[%s1785_s6 + $0x1e0] sm:$0xf]  ;;  %v232_v31 = vld [vmem:[%s1785_s6 + $0x1f0] sm:$0xf] }
  0x2c   : > { %231 = vst [vmem:[%s1790_s7 + $0x78] sm:$0xf] %v230_v30  ;;  %233 = vst [vmem:[%s1790_s7 + $0x7c] sm:$0xf] %v232_v31 }
  0x2d PF: > { %p1220_p7 = scmp.ge.s32.totalorder %s1702_s18, 1  ;;  %p328_p8 = scmp.lt.s32.totalorder %s1702_s18, 9 }
  0x2f   : > { %p329_p9 = pnand %p1220_p7, %p328_p8 }
  0x30   : > { %s335_s8 = sand.u32 (!%p329_p9), 1, %s1678_s12   ;;  %s1222_s9 = sshll.u32 (!%p329_p9), %s1686_s14, 4 }
  0x31   : > { %332 = sbr.rel (%p329_p9) target bundleno = 390 (0x186), region = 69  ;;  %s1221_s10 = sshll.u32 (!%p329_p9), %s335_s8, 7 }
  0x32   : > { %p364_p10 = scmp.lt.s32.totalorder (!%p329_p9), %s1222_s9, 63  ;;  %p369_p11 = scmp.lt.s32.totalorder (!%p329_p9), %s1690_s15, 1 }
  0x33   : > { %s1869_s29 = scalar_lea.vmem (!%p329_p9), [#allocation3], %s1221_s10  ;;  %p1226_p12 = scmp.ne.s32.totalorder (!%p329_p9), %s1686_s14, 0 }
  0x38   : > { %s1988_s9 = smov (!%p364_p10, %s1222_s9), 63  ;;  %s1990_s15 = smov (!%p369_p11, %s1690_s15), 1 }
  0x39   : > { %s1223_s11 = sshll.u32 %s1988_s9, 2  ;;  %s1287_s24 = sshll.u32 %s1990_s15, 7  ;;  %v1704_v32 = vmov (!%p1226_p12), 0.0  }
  0x3a   : > { %s1862_s23 = scalar_lea.vmem %s1972_s1, %s1223_s11  ;;  %s1867_s28 = scalar_lea.vmem %s1974_s3, %s1287_s24  ;;  %379 = vst [vmem:[#allocation2] sm:$0xff] (!%p1226_p12), %v1704_v32  ;;  %380 = vst [vmem:[#allocation2 + $0x8] sm:$0xff] (!%p1226_p12), %v1704_v32 }
  0x3b   : > { %378 = sbr.rel (%p1226_p12) target bundleno = 74 (0x4a), region = 77  ;;  %381 = vst [vmem:[#allocation2 + $0x10] sm:$0xff] (!%p1226_p12), %v1704_v32  ;;  %382 = vst [vmem:[#allocation2 + $0x18] sm:$0xff] (!%p1226_p12), %v1704_v32 }
  0x3c   : > { %383 = vst [vmem:[#allocation2 + $0x20] sm:$0xff] (!%p1226_p12), %v1704_v32  ;;  %384 = vst [vmem:[#allocation2 + $0x28] sm:$0xff] (!%p1226_p12), %v1704_v32 }
  0x3d   : > { %385 = vst [vmem:[#allocation2 + $0x30] sm:$0xff] (!%p1226_p12), %v1704_v32  ;;  %386 = vst [vmem:[#allocation2 + $0x38] sm:$0xff] (!%p1226_p12), %v1704_v32 }
  0x3e   : > { %387 = vst [vmem:[#allocation2 + $0x40] sm:$0xff] (!%p1226_p12), %v1704_v32  ;;  %388 = vst [vmem:[#allocation2 + $0x48] sm:$0xff] (!%p1226_p12), %v1704_v32 }
  0x3f   : > { %389 = vst [vmem:[#allocation2 + $0x50] sm:$0xff] (!%p1226_p12), %v1704_v32  ;;  %390 = vst [vmem:[#allocation2 + $0x58] sm:$0xff] (!%p1226_p12), %v1704_v32 }
  0x40   : > { %391 = vst [vmem:[#allocation2 + $0x60] sm:$0xff] (!%p1226_p12), %v1704_v32  ;;  %392 = vst [vmem:[#allocation2 + $0x68] sm:$0xff] (!%p1226_p12), %v1704_v32 }
  0x41   : > { %393 = vst [vmem:[#allocation2 + $0x70] sm:$0xff] (!%p1226_p12), %v1704_v32  ;;  %394 = vst [vmem:[#allocation2 + $0x78] sm:$0xff] (!%p1226_p12), %v1704_v32 }
  0x42   : > { %395 = vst [vmem:[#allocation2 + $0x80] sm:$0xff] %v1704_v32  ;;  %396 = vst [vmem:[#allocation2 + $0x88] sm:$0xff] %v1704_v32 }
  0x43   : > { %397 = vst [vmem:[#allocation2 + $0x90] sm:$0xff] %v1704_v32  ;;  %398 = vst [vmem:[#allocation2 + $0x98] sm:$0xff] %v1704_v32 }
  0x44   : > { %399 = vst [vmem:[#allocation2 + $0xa0] sm:$0xff] %v1704_v32  ;;  %400 = vst [vmem:[#allocation2 + $0xa8] sm:$0xff] %v1704_v32 }
  0x45   : > { %401 = vst [vmem:[#allocation2 + $0xb0] sm:$0xff] %v1704_v32  ;;  %402 = vst [vmem:[#allocation2 + $0xb8] sm:$0xff] %v1704_v32 }
  0x46   : > { %403 = vst [vmem:[#allocation2 + $0xc0] sm:$0xff] %v1704_v32  ;;  %404 = vst [vmem:[#allocation2 + $0xc8] sm:$0xff] %v1704_v32 }
  0x47   : > { %405 = vst [vmem:[#allocation2 + $0xd0] sm:$0xff] %v1704_v32  ;;  %406 = vst [vmem:[#allocation2 + $0xd8] sm:$0xff] %v1704_v32 }
  0x48   : > { %407 = vst [vmem:[#allocation2 + $0xe0] sm:$0xff] %v1704_v32  ;;  %408 = vst [vmem:[#allocation2 + $0xe8] sm:$0xff] %v1704_v32 }
  0x49   : > { %409 = vst [vmem:[#allocation2 + $0xf0] sm:$0xff] %v1704_v32  ;;  %410 = vst [vmem:[#allocation2 + $0xf8] sm:$0xff] %v1704_v32 }
  0x4a PF: > { %v1560_v33 = vld [vmem:[%s1862_s23] sm:$0xff]   ;;  %v1561_v34 = vld [vmem:[%s1862_s23 + $0x8] sm:$0xff]   ;;  %v1562_v35 = vld [vmem:[%s1862_s23 + $0x10] sm:$0xff]   ;;  %p1251_p13 = scmp.ne.s32.totalorder %s1686_s14, 3 }
  0x4b   : > { %1439 = vmatprep.subr.bf16.mxu0 %v1560_v33  ;;  %1487 = vmatprep.subr.bf16.mxu1 %v1560_v33  ;;  %v1563_v36 = vld [vmem:[%s1862_s23 + $0x18] sm:$0xff]   ;;  %v1568_v37 = vld [vmem:[%s1869_s29] sm:$0xff]   ;;  %v1565_v40 = vld [vmem:[%s1862_s23 + $0x28] sm:$0xff]  }
  0x4c   : > { %1440 = vmatpush3.bf16.msra.mxu0 %v1560_v33  ;;  %1495 = vmatpush3.bf16.msra.mxu1 %v1560_v33  ;;  %v1569_v38 = vld [vmem:[%s1869_s29 + $0x40] sm:$0xff]   ;;  %v1566_v41 = vld [vmem:[%s1862_s23 + $0x30] sm:$0xff]   ;;  %v1567_v42 = vld [vmem:[%s1862_s23 + $0x38] sm:$0xff]  }
  0x4d   : > { %1441 = vmatprep.subr.bf16.mxu0 %v1561_v34  ;;  %1488 = vmatprep.subr.bf16.mxu1 %v1561_v34  ;;  %v1564_v39 = vld [vmem:[%s1862_s23 + $0x20] sm:$0xff]   ;;  %v1570_v43 = vld [vmem:[%s1869_s29 + $0x8] sm:$0xff]   ;;  %v1572_v45 = vld [vmem:[%s1869_s29 + $0x10] sm:$0xff]  }
  0x4e   : > { %1455 = vmatprep.mubr.bf16.mxu0 %v1568_v37  ;;  %1471 = vmatprep.mubr.bf16.mxu1 %v1569_v38  ;;  %v1571_v44 = vld [vmem:[%s1869_s29 + $0x48] sm:$0xff]   ;;  %v1573_v46 = vld [vmem:[%s1869_s29 + $0x50] sm:$0xff]   ;;  %v1574_v47 = vld [vmem:[%s1869_s29 + $0x18] sm:$0xff]  }
  0x4f   : > { %v1575_v48 = vld [vmem:[%s1869_s29 + $0x58] sm:$0xff]   ;;  %v1576_v49 = vld [vmem:[%s1869_s29 + $0x20] sm:$0xff]   ;;  %v1578_v51 = vld [vmem:[%s1869_s29 + $0x28] sm:$0xff]  }
  0x50   : > { %1442 = vmatpush3.bf16.msra.mxu0 %v1561_v34  ;;  %1496 = vmatpush3.bf16.msra.mxu1 %v1561_v34  ;;  %v1577_v50 = vld [vmem:[%s1869_s29 + $0x60] sm:$0xff]   ;;  %v1579_v52 = vld [vmem:[%s1869_s29 + $0x68] sm:$0xff]   ;;  %v1580_v53 = vld [vmem:[%s1869_s29 + $0x30] sm:$0xff]  }
  0x51   : > { %1443 = vmatprep.subr.bf16.mxu0 %v1562_v35  ;;  %1489 = vmatprep.subr.bf16.mxu1 %v1562_v35  ;;  %v1581_v54 = vld [vmem:[%s1869_s29 + $0x70] sm:$0xff]   ;;  %v1582_v55 = vld [vmem:[%s1869_s29 + $0x38] sm:$0xff]   ;;  %v411_v59 = vld [vmem:[#allocation2] sm:$0xff] }
  0x52   : > { %v1583_v56 = vld [vmem:[%s1869_s29 + $0x78] sm:$0xff]   ;;  %v413_v57 = vld [vmem:[#allocation2 + $0x10] sm:$0xff]  ;;  %v427_v60 = vld [vmem:[#allocation2 + $0x80] sm:$0xff] }
  0x53   : > { %v429_v58 = vld [vmem:[#allocation2 + $0x90] sm:$0xff]  ;;  %v414_v63 = vld [vmem:[#allocation2 + $0x18] sm:$0xff]  ;;  %v412_v5 = vld [vmem:[#allocation2 + $0x8] sm:$0xff] }
  0x54   : > { %1444 = vmatpush3.bf16.msra.mxu0 %v1562_v35  ;;  %1497 = vmatpush3.bf16.msra.mxu1 %v1562_v35  ;;  %v430_v0 = vld [vmem:[#allocation2 + $0x98] sm:$0xff]  ;;  %v428_v6 = vld [vmem:[#allocation2 + $0x88] sm:$0xff]  ;;  %v417_v17 = vld [vmem:[#allocation2 + $0x30] sm:$0xff] }
  0x55   : > { %1445 = vmatprep.subr.bf16.mxu0 %v1563_v36  ;;  %1490 = vmatprep.subr.bf16.mxu1 %v1563_v36  ;;  %v433_v18 = vld [vmem:[#allocation2 + $0xb0] sm:$0xff]  ;;  %v415_v19 = vld [vmem:[#allocation2 + $0x20] sm:$0xff]  ;;  %v418_v23 = vld [vmem:[#allocation2 + $0x38] sm:$0xff] }
  0x56   : > { %v431_v20 = vld [vmem:[#allocation2 + $0xa0] sm:$0xff]  ;;  %v434_v24 = vld [vmem:[#allocation2 + $0xb8] sm:$0xff]  ;;  %v416_v29 = vld [vmem:[#allocation2 + $0x28] sm:$0xff] }
  0x57   : > { %v432_v30 = vld [vmem:[#allocation2 + $0xa8] sm:$0xff] }
  0x58   : > { %1446 = vmatpush3.bf16.msra.mxu0 %v1563_v36  ;;  %1498 = vmatpush3.bf16.msra.mxu1 %v1563_v36 }
  0x59   : > { %1447 = vmatprep.subr.bf16.mxu0 %v1564_v39  ;;  %1491 = vmatprep.subr.bf16.mxu1 %v1564_v39 }
  0x5c   : > { %1448 = vmatpush3.bf16.msra.mxu0 %v1564_v39  ;;  %1499 = vmatpush3.bf16.msra.mxu1 %v1564_v39 }
  0x5d   : > { %1449 = vmatprep.subr.bf16.mxu0 %v1565_v40  ;;  %1492 = vmatprep.subr.bf16.mxu1 %v1565_v40 }
  0x60   : > { %1450 = vmatpush3.bf16.msra.mxu0 %v1565_v40  ;;  %1500 = vmatpush3.bf16.msra.mxu1 %v1565_v40 }
  0x61   : > { %1451 = vmatprep.subr.bf16.mxu0 %v1566_v41  ;;  %1493 = vmatprep.subr.bf16.mxu1 %v1566_v41 }
  0x64   : > { %1452 = vmatpush3.bf16.msra.mxu0 %v1566_v41  ;;  %1501 = vmatpush3.bf16.msra.mxu1 %v1566_v41  ;;  %v421_v41 = vld [vmem:[#allocation2 + $0x50] sm:$0xff] }
  0x65   : > { %1453 = vmatprep.subr.bf16.mxu0 %v1567_v42  ;;  %1494 = vmatprep.subr.bf16.mxu1 %v1567_v42 }
  0x68   : > { %1454 = vmatpush3.bf16.msra.mxu0 %v1567_v42  ;;  %1502 = vmatpush3.bf16.msra.mxu1 %v1567_v42  ;;  %v437_v42 = vld [vmem:[#allocation2 + $0xd0] sm:$0xff] }
  0x6b   : > { %1456 = vmatmul.mubr.bf16.vlgmr.msra.gmra.mrb[0].mxu0 %v1570_v43  ;;  %1472 = vmatmul.mubr.bf16.vlgmr.msra.gmra.mrb[0].mxu1 %v1571_v44  ;;  %v419_v43 = vld [vmem:[#allocation2 + $0x40] sm:$0xff] }
  0x6c   : > { %1459 = vmatprep.mubr.bf16.mxu0 %v1572_v45  ;;  %1475 = vmatprep.mubr.bf16.mxu1 %v1573_v46  ;;  %v435_v44 = vld [vmem:[#allocation2 + $0xc0] sm:$0xff] }
  0x73   : > { %1460 = vmatmul.mubr.bf16.gmra.mrb[4].mxu0 %v1574_v47  ;;  %1476 = vmatmul.mubr.bf16.gmra.mrb[4].mxu1 %v1575_v48  ;;  %v422_v47 = vld [vmem:[#allocation2 + $0x58] sm:$0xff] }
  0x74   : > { %1463 = vmatprep.mubr.bf16.mxu0 %v1576_v49  ;;  %1479 = vmatprep.mubr.bf16.mxu1 %v1577_v50  ;;  %v438_v48 = vld [vmem:[#allocation2 + $0xd8] sm:$0xff] }
  0x7b   : > { %1464 = vmatmul.mubr.bf16.gmra.mrb[8].mxu0 %v1578_v51  ;;  %1480 = vmatmul.mubr.bf16.gmra.mrb[8].mxu1 %v1579_v52 }
  0x7c   : > { %1467 = vmatprep.mubr.bf16.mxu0 %v1580_v53  ;;  %1483 = vmatprep.mubr.bf16.mxu1 %v1581_v54  ;;  %v420_v53 = vld [vmem:[#allocation2 + $0x48] sm:$0xff] }
  0x7d   : > { %v436_v54 = vld [vmem:[#allocation2 + $0xc8] sm:$0xff] }
  0x83   : > { %1468 = vmatmul.mubr.bf16.gmra.mrb[12].mxu0 %v1582_v55  ;;  %1484 = vmatmul.mubr.bf16.gmra.mrb[12].mxu1 %v1583_v56 }
 0x13e   : > { %v1457_v61 = vpop.f32.mrb[0].mxu0  ;;  %v1473_v62 = vpop.f32.mrb[0].mxu1 }
 0x13f   : > { %v798_v1 = vadd.f32 %v1457_v61, %v413_v57  ;;  %v814_v2 = vadd.f32 %v1473_v62, %v429_v58  ;;  %v669_v3 = vpop.f32.mrb[1].mxu0  ;;  %v733_v4 = vpop.f32.mrb[1].mxu1 }
 0x140   : > { %v796_v7 = vadd.f32 %v669_v3, %v411_v59  ;;  %v812_v8 = vadd.f32 %v733_v4, %v427_v60  ;;  %v1458_v9 = vpop.f32.mrb[2].mxu0  ;;  %v1474_v10 = vpop.f32.mrb[2].mxu1  ;;  %v423_v3 = vld [vmem:[#allocation2 + $0x60] sm:$0xff] }
 0x141   : > { %830 = vst [vmem:[#allocation2 + $0x10] sm:$0xff] %v798_v1  ;;  %846 = vst [vmem:[#allocation2 + $0x90] sm:$0xff] %v814_v2  ;;  %v799_v11 = vadd.f32 %v1458_v9, %v414_v63  ;;  %v815_v12 = vadd.f32 %v1474_v10, %v430_v0  ;;  %v672_v13 = vpop.f32.mrb[3].mxu0  ;;  %v736_v14 = vpop.f32.mrb[3].mxu1  ;;  %v425_v1 = vld [vmem:[#allocation2 + $0x70] sm:$0xff]  ;;  %v439_v4 = vld [vmem:[#allocation2 + $0xe0] sm:$0xff] }
 0x142   : > { %828 = vst [vmem:[#allocation2] sm:$0xff] %v796_v7  ;;  %844 = vst [vmem:[#allocation2 + $0x80] sm:$0xff] %v812_v8  ;;  %v797_v15 = vadd.f32 %v672_v13, %v412_v5  ;;  %v813_v16 = vadd.f32 %v736_v14, %v428_v6  ;;  %v441_v2 = vld [vmem:[#allocation2 + $0xf0] sm:$0xff]  ;;  %v426_v7 = vld [vmem:[#allocation2 + $0x78] sm:$0xff] }
 0x143   : > { %831 = vst [vmem:[#allocation2 + $0x18] sm:$0xff] %v799_v11  ;;  %847 = vst [vmem:[#allocation2 + $0x98] sm:$0xff] %v815_v12  ;;  %v442_v8 = vld [vmem:[#allocation2 + $0xf8] sm:$0xff]  ;;  %v424_v13 = vld [vmem:[#allocation2 + $0x68] sm:$0xff] }
 0x144   : > { %829 = vst [vmem:[#allocation2 + $0x8] sm:$0xff] %v797_v15  ;;  %845 = vst [vmem:[#allocation2 + $0x88] sm:$0xff] %v813_v16  ;;  %v440_v14 = vld [vmem:[#allocation2 + $0xe8] sm:$0xff] }
 0x146   : > { %v1461_v21 = vpop.f32.mrb[4].mxu0  ;;  %v1477_v22 = vpop.f32.mrb[4].mxu1 }
 0x147   : > { %v802_v25 = vadd.f32 %v1461_v21, %v417_v17  ;;  %v818_v26 = vadd.f32 %v1477_v22, %v433_v18  ;;  %v685_v27 = vpop.f32.mrb[5].mxu0  ;;  %v749_v28 = vpop.f32.mrb[5].mxu1 }
 0x148   : > { %v800_v31 = vadd.f32 %v685_v27, %v415_v19  ;;  %v816_v32 = vadd.f32 %v749_v28, %v431_v20  ;;  %v1462_v33 = vpop.f32.mrb[6].mxu0  ;;  %v1478_v34 = vpop.f32.mrb[6].mxu1  ;;  %v1900_v27 = vld [vmem:[%s1973_s2] ss:$0 sm:$0xff] (!%p1251_p13) }
 0x149   : > { %834 = vst [vmem:[#allocation2 + $0x30] sm:$0xff] %v802_v25  ;;  %850 = vst [vmem:[#allocation2 + $0xb0] sm:$0xff] %v818_v26  ;;  %v803_v35 = vadd.f32 %v1462_v33, %v418_v23  ;;  %v819_v36 = vadd.f32 %v1478_v34, %v434_v24  ;;  %v688_v37 = vpop.f32.mrb[7].mxu0  ;;  %v752_v38 = vpop.f32.mrb[7].mxu1  ;;  %v864_v25 = vld [vmem:[#allocation2] sm:$0xff] (!%p1251_p13) }
 0x14a   : > { %832 = vst [vmem:[#allocation2 + $0x20] sm:$0xff] %v800_v31  ;;  %848 = vst [vmem:[#allocation2 + $0xa0] sm:$0xff] %v816_v32  ;;  %v801_v39 = vadd.f32 %v688_v37, %v416_v29  ;;  %v817_v40 = vadd.f32 %v752_v38, %v432_v30  ;;  %v903_v28 = vadd.f32 (!%p1251_p13), %v1900_v27, %v864_v25  ;;  %v866_v30 = vld [vmem:[#allocation2 + $0x10] sm:$0xff] (!%p1251_p13)  ;;  %v867_v31 = vld [vmem:[#allocation2 + $0x18] sm:$0xff] (!%p1251_p13) }
 0x14b   : > { %835 = vst [vmem:[#allocation2 + $0x38] sm:$0xff] %v803_v35  ;;  %851 = vst [vmem:[#allocation2 + $0xb8] sm:$0xff] %v819_v36  ;;  %v865_v26 = vld [vmem:[#allocation2 + $0x8] sm:$0xff] (!%p1251_p13)  ;;  %v905_v33 = vadd.f32 (!%p1251_p13), %v1900_v27, %v866_v30  ;;  %v906_v34 = vadd.f32 (!%p1251_p13), %v1900_v27, %v867_v31 }
 0x14c   : > { %833 = vst [vmem:[#allocation2 + $0x28] sm:$0xff] %v801_v39  ;;  %849 = vst [vmem:[#allocation2 + $0xa8] sm:$0xff] %v817_v40  ;;  %v904_v29 = vadd.f32 (!%p1251_p13), %v1900_v27, %v865_v26  ;;  %1584 = vtanh.f32 (!%p1251_p13), %v903_v28 }
 0x14e   : > { %v1465_v45 = vpop.f32.mrb[8].mxu0  ;;  %v1481_v46 = vpop.f32.mrb[8].mxu1  ;;  %1586 = vtanh.f32 (!%p1251_p13), %v904_v29 }
 0x14f   : > { %v806_v49 = vadd.f32 %v1465_v45, %v421_v41  ;;  %v822_v50 = vadd.f32 %v1481_v46, %v437_v42  ;;  %v701_v51 = vpop.f32.mrb[9].mxu0  ;;  %v765_v52 = vpop.f32.mrb[9].mxu1  ;;  %1588 = vtanh.f32 (!%p1251_p13), %v905_v33 }
 0x150   : > { %v804_v55 = vadd.f32 %v701_v51, %v419_v43  ;;  %v820_v56 = vadd.f32 %v765_v52, %v435_v44  ;;  %v1466_v57 = vpop.f32.mrb[10].mxu0  ;;  %v1482_v58 = vpop.f32.mrb[10].mxu1  ;;  %v870_v36 = vld [vmem:[#allocation2 + $0x30] sm:$0xff] (!%p1251_p13)  ;;  %1590 = vtanh.f32 (!%p1251_p13), %v906_v34 }
 0x151   : > { %838 = vst [vmem:[#allocation2 + $0x50] sm:$0xff] %v806_v49  ;;  %854 = vst [vmem:[#allocation2 + $0xd0] sm:$0xff] %v822_v50  ;;  %v807_v59 = vadd.f32 %v1466_v57, %v422_v47  ;;  %v823_v60 = vadd.f32 %v1482_v58, %v438_v48  ;;  %v704_v61 = vpop.f32.mrb[11].mxu0  ;;  %v768_v62 = vpop.f32.mrb[11].mxu1  ;;  %v868_v32 = vld [vmem:[#allocation2 + $0x20] sm:$0xff] (!%p1251_p13)  ;;  %v909_v41 = vadd.f32 (!%p1251_p13), %v1900_v27, %v870_v36 }
 0x152   : > { %836 = vst [vmem:[#allocation2 + $0x40] sm:$0xff] %v804_v55  ;;  %852 = vst [vmem:[#allocation2 + $0xc0] sm:$0xff] %v820_v56  ;;  %v805_v63 = vadd.f32 %v704_v61, %v420_v53  ;;  %v821_v0 = vadd.f32 %v768_v62, %v436_v54  ;;  %v907_v37 = vadd.f32 (!%p1251_p13), %v1900_v27, %v868_v32  ;;  %v871_v38 = vld [vmem:[#allocation2 + $0x38] sm:$0xff] (!%p1251_p13)  ;;  %v880_v56 = vld [vmem:[#allocation2 + $0x80] sm:$0xff] (!%p1251_p13) }
 0x153   : > { %839 = vst [vmem:[#allocation2 + $0x58] sm:$0xff] %v807_v59  ;;  %855 = vst [vmem:[#allocation2 + $0xd8] sm:$0xff] %v823_v60  ;;  %v869_v35 = vld [vmem:[#allocation2 + $0x28] sm:$0xff] (!%p1251_p13)  ;;  %v910_v43 = vadd.f32 (!%p1251_p13), %v1900_v27, %v871_v38  ;;  %v882_v62 = vld [vmem:[#allocation2 + $0x90] sm:$0xff] (!%p1251_p13) }
 0x154   : > { %837 = vst [vmem:[#allocation2 + $0x48] sm:$0xff] %v805_v63  ;;  %853 = vst [vmem:[#allocation2 + $0xc8] sm:$0xff] %v821_v0  ;;  %v908_v39 = vadd.f32 (!%p1251_p13), %v1900_v27, %v869_v35  ;;  %1592 = vtanh.f32 (!%p1251_p13), %v907_v37  ;;  %v881_v59 = vld [vmem:[#allocation2 + $0x88] sm:$0xff] (!%p1251_p13) }
 0x156   : > { %v1469_v5 = vpop.f32.mrb[12].mxu0  ;;  %v1485_v6 = vpop.f32.mrb[12].mxu1  ;;  %863 = sbr.rel (%p1251_p13) target bundleno = 390 (0x186), region = 81  ;;  %1594 = vtanh.f32 (!%p1251_p13), %v908_v39 }
 0x157   : > { %v810_v9 = vadd.f32 %v1469_v5, %v425_v1  ;;  %v826_v10 = vadd.f32 %v1485_v6, %v441_v2  ;;  %v717_v11 = vpop.f32.mrb[13].mxu0  ;;  %v781_v12 = vpop.f32.mrb[13].mxu1  ;;  %1596 = vtanh.f32 (!%p1251_p13), %v909_v41  ;;  %v919_v1 = vadd.f32 (!%p1251_p13), %v1900_v27, %v880_v56  ;;  %v883_v2 = vld [vmem:[#allocation2 + $0x98] sm:$0xff] (!%p1251_p13)  ;;  %v884_v5 = vld [vmem:[#allocation2 + $0xa0] sm:$0xff] (!%p1251_p13) }
 0x158   : > { %v808_v15 = vadd.f32 %v717_v11, %v423_v3  ;;  %v824_v16 = vadd.f32 %v781_v12, %v439_v4  ;;  %v1470_v17 = vpop.f32.mrb[14].mxu0  ;;  %v1486_v18 = vpop.f32.mrb[14].mxu1  ;;  %v874_v44 = vld [vmem:[#allocation2 + $0x50] sm:$0xff] (!%p1251_p13)  ;;  %1598 = vtanh.f32 (!%p1251_p13), %v910_v43  ;;  %v920_v4 = vadd.f32 (!%p1251_p13), %v1900_v27, %v881_v59 }
 0x159   : > { %842 = vst [vmem:[#allocation2 + $0x70] sm:$0xff] %v810_v9  ;;  %858 = vst [vmem:[#allocation2 + $0xf0] sm:$0xff] %v826_v10  ;;  %v811_v19 = vadd.f32 %v1470_v17, %v426_v7  ;;  %v827_v20 = vadd.f32 %v1486_v18, %v442_v8  ;;  %v720_v21 = vpop.f32.mrb[15].mxu0  ;;  %v784_v22 = vpop.f32.mrb[15].mxu1  ;;  %v872_v40 = vld [vmem:[#allocation2 + $0x40] sm:$0xff] (!%p1251_p13)  ;;  %v913_v49 = vadd.f32 (!%p1251_p13), %v1900_v27, %v874_v44  ;;  %v885_v9 = vld [vmem:[#allocation2 + $0xa8] sm:$0xff] (!%p1251_p13) }
 0x15a   : > { %840 = vst [vmem:[#allocation2 + $0x60] sm:$0xff] %v808_v15  ;;  %856 = vst [vmem:[#allocation2 + $0xe0] sm:$0xff] %v824_v16  ;;  %v809_v23 = vadd.f32 %v720_v21, %v424_v13  ;;  %v825_v24 = vadd.f32 %v784_v22, %v440_v14  ;;  %v911_v45 = vadd.f32 (!%p1251_p13), %v1900_v27, %v872_v40  ;;  %v875_v46 = vld [vmem:[#allocation2 + $0x58] sm:$0xff] (!%p1251_p13)  ;;  %v1585_v57 = vpop.eup (!%p1251_p13), %1584  ;;  %v886_v12 = vld [vmem:[#allocation2 + $0xb0] sm:$0xff] (!%p1251_p13) }
 0x15b   : > { %843 = vst [vmem:[#allocation2 + $0x78] sm:$0xff] %v811_v19  ;;  %859 = vst [vmem:[#allocation2 + $0xf8] sm:$0xff] %v827_v20  ;;  %v873_v42 = vld [vmem:[#allocation2 + $0x48] sm:$0xff] (!%p1251_p13)  ;;  %v914_v51 = vadd.f32 (!%p1251_p13), %v1900_v27, %v875_v46  ;;  %v1587_v60 = vpop.eup (!%p1251_p13), %1586  ;;  %v921_v8 = vadd.f32 (!%p1251_p13), %v1900_v27, %v882_v62  ;;  %v922_v11 = vadd.f32 (!%p1251_p13), %v1900_v27, %v883_v2  ;;  %v887_v16 = vld [vmem:[#allocation2 + $0xb8] sm:$0xff] (!%p1251_p13) }
 0x15c   : > { %841 = vst [vmem:[#allocation2 + $0x68] sm:$0xff] %v809_v23  ;;  %857 = vst [vmem:[#allocation2 + $0xe8] sm:$0xff] %v825_v24  ;;  %v912_v47 = vadd.f32 (!%p1251_p13), %v1900_v27, %v873_v42  ;;  %1600 = vtanh.f32 (!%p1251_p13), %v911_v45  ;;  %v1589_v63 = vpop.eup (!%p1251_p13), %1588  ;;  %v1323_v0 = vpack.c.bf16 (!%p1251_p13), %v1587_v60, %v1585_v57  ;;  %v923_v15 = vadd.f32 (!%p1251_p13), %v1900_v27, %v884_v5  ;;  %v888_v19 = vld [vmem:[#allocation2 + $0xc0] sm:$0xff] (!%p1251_p13)  ;;  %v889_v23 = vld [vmem:[#allocation2 + $0xc8] sm:$0xff] (!%p1251_p13) }
 0x15d   : > { %v1591_v3 = vpop.eup %1590  ;;  %v924_v18 = vadd.f32 %v1900_v27, %v885_v9  ;;  %v925_v22 = vadd.f32 %v1900_v27, %v886_v12  ;;  %v926_v25 = vadd.f32 %v1900_v27, %v887_v16  ;;  %v890_v26 = vld [vmem:[#allocation2 + $0xd0] sm:$0xff]  ;;  %v927_v30 = vadd.f32 %v1900_v27, %v888_v19  ;;  %v891_v31 = vld [vmem:[#allocation2 + $0xd8] sm:$0xff] }
 0x15e   : > { %1602 = vtanh.f32 %v912_v47  ;;  %v1593_v6 = vpop.eup %1592  ;;  %1324 = vst [vmem:[%s1867_s28] sm:$0xff] %v1323_v0   ;;  %v1328_v7 = vpack.c.bf16 %v1591_v3, %v1589_v63  ;;  %v928_v33 = vadd.f32 %v1900_v27, %v889_v23  ;;  %v929_v37 = vadd.f32 %v1900_v27, %v890_v26 }
 0x15f   : > { %1604 = vtanh.f32 %v913_v49  ;;  %v930_v40 = vadd.f32 %v1900_v27, %v891_v31 }
 0x160   : > { %v878_v52 = vld [vmem:[#allocation2 + $0x70] sm:$0xff]  ;;  %1606 = vtanh.f32 %v914_v51  ;;  %v1595_v10 = vpop.eup %1594  ;;  %1400 = vst [vmem:[%s1867_s28 + $0x8] sm:$0xff] %v1328_v7  }
 0x161   : > { %v876_v48 = vld [vmem:[#allocation2 + $0x60] sm:$0xff]  ;;  %v917_v58 = vadd.f32 %v1900_v27, %v878_v52  ;;  %v1597_v13 = vpop.eup %1596  ;;  %v1333_v14 = vpack.c.bf16 %v1595_v10, %v1593_v6  ;;  %v894_v41 = vld [vmem:[#allocation2 + $0xf0] sm:$0xff] }
 0x162   : > { %v915_v53 = vadd.f32 %v1900_v27, %v876_v48  ;;  %v879_v54 = vld [vmem:[#allocation2 + $0x78] sm:$0xff]  ;;  %v1599_v17 = vpop.eup %1598  ;;  %v892_v34 = vld [vmem:[#allocation2 + $0xe0] sm:$0xff] }
 0x163   : > { %v877_v50 = vld [vmem:[#allocation2 + $0x68] sm:$0xff]  ;;  %v918_v61 = vadd.f32 %v1900_v27, %v879_v54  ;;  %1401 = vst [vmem:[%s1867_s28 + $0x10] sm:$0xff] %v1333_v14   ;;  %v1338_v21 = vpack.c.bf16 %v1599_v17, %v1597_v13  ;;  %v931_v44 = vadd.f32 %v1900_v27, %v892_v34  ;;  %v895_v45 = vld [vmem:[#allocation2 + $0xf8] sm:$0xff] }
 0x164   : > { %v916_v55 = vadd.f32 %v1900_v27, %v877_v50  ;;  %1608 = vtanh.f32 %v915_v53  ;;  %v893_v38 = vld [vmem:[#allocation2 + $0xe8] sm:$0xff]  ;;  %v933_v50 = vadd.f32 %v1900_v27, %v894_v41  ;;  %v934_v52 = vadd.f32 %v1900_v27, %v895_v45 }
 0x165   : > { %1402 = vst [vmem:[%s1867_s28 + $0x18] sm:$0xff] %v1338_v21   ;;  %v932_v47 = vadd.f32 %v1900_v27, %v893_v38 }
 0x166   : > { %1610 = vtanh.f32 %v916_v55  ;;  %v1601_v20 = vpop.eup %1600 }
 0x167   : > { %1612 = vtanh.f32 %v917_v58 }
 0x168   : > { %1614 = vtanh.f32 %v918_v61  ;;  %v1603_v24 = vpop.eup %1602 }
 0x169   : > { %1616 = vtanh.f32 %v919_v1  ;;  %v1605_v28 = vpop.eup %1604  ;;  %v1343_v29 = vpack.c.bf16 %v1603_v24, %v1601_v20 }
 0x16a   : > { %1618 = vtanh.f32 %v920_v4  ;;  %v1607_v32 = vpop.eup %1606 }
 0x16b   : > { %1620 = vtanh.f32 %v921_v8  ;;  %1403 = vst [vmem:[%s1867_s28 + $0x20] sm:$0xff] %v1343_v29   ;;  %v1348_v36 = vpack.c.bf16 %v1607_v32, %v1605_v28 }
 0x16c   : > { %1622 = vtanh.f32 %v922_v11 }
 0x16d   : > { %1624 = vtanh.f32 %v923_v15  ;;  %1404 = vst [vmem:[%s1867_s28 + $0x28] sm:$0xff] %v1348_v36  }
 0x16e   : > { %1626 = vtanh.f32 %v924_v18  ;;  %v1609_v35 = vpop.eup %1608 }
 0x16f   : > { %1628 = vtanh.f32 %v925_v22 }
 0x170   : > { %v1611_v39 = vpop.eup %1610  ;;  %1630 = vtanh.f32 %v926_v25 }
 0x171   : > { %v1613_v42 = vpop.eup %1612  ;;  %v1353_v43 = vpack.c.bf16 %v1611_v39, %v1609_v35  ;;  %1632 = vtanh.f32 %v927_v30 }
 0x172   : > { %v1615_v46 = vpop.eup %1614  ;;  %1634 = vtanh.f32 %v928_v33 }
 0x173   : > { %v1617_v48 = vpop.eup %1616  ;;  %1405 = vst [vmem:[%s1867_s28 + $0x30] sm:$0xff] %v1353_v43   ;;  %v1358_v49 = vpack.c.bf16 %v1615_v46, %v1613_v42  ;;  %1636 = vtanh.f32 %v929_v37 }
 0x174   : > { %v1619_v51 = vpop.eup %1618  ;;  %1638 = vtanh.f32 %v930_v40 }
 0x175   : > { %v1621_v53 = vpop.eup %1620  ;;  %1406 = vst [vmem:[%s1867_s28 + $0x38] sm:$0xff] %v1358_v49   ;;  %v1363_v54 = vpack.c.bf16 %v1619_v51, %v1617_v48  ;;  %1640 = vtanh.f32 %v931_v44 }
 0x176   : > { %v1623_v55 = vpop.eup %1622  ;;  %1642 = vtanh.f32 %v932_v47 }
 0x177   : > { %v1625_v56 = vpop.eup %1624  ;;  %1407 = vst [vmem:[%s1867_s28 + $0x40] sm:$0xff] %v1363_v54   ;;  %v1368_v57 = vpack.c.bf16 %v1623_v55, %v1621_v53  ;;  %1644 = vtanh.f32 %v933_v50 }
 0x178   : > { %v1627_v58 = vpop.eup %1626  ;;  %1646 = vtanh.f32 %v934_v52 }
 0x179   : > { %v1629_v59 = vpop.eup %1628  ;;  %1408 = vst [vmem:[%s1867_s28 + $0x48] sm:$0xff] %v1368_v57   ;;  %v1373_v60 = vpack.c.bf16 %v1627_v58, %v1625_v56 }
 0x17a   : > { %v1631_v27 = vpop.eup %1630 }
 0x17b   : > { %v1633_v61 = vpop.eup %1632  ;;  %1409 = vst [vmem:[%s1867_s28 + $0x50] sm:$0xff] %v1373_v60   ;;  %v1378_v62 = vpack.c.bf16 %v1631_v27, %v1629_v59 }
 0x17c   : > { %v1635_v63 = vpop.eup %1634 }
 0x17d   : > { %v1637_v0 = vpop.eup %1636  ;;  %1410 = vst [vmem:[%s1867_s28 + $0x58] sm:$0xff] %v1378_v62   ;;  %v1383_v1 = vpack.c.bf16 %v1635_v63, %v1633_v61 }
 0x17e   : > { %v1639_v2 = vpop.eup %1638 }
 0x17f   : > { %v1641_v3 = vpop.eup %1640  ;;  %1411 = vst [vmem:[%s1867_s28 + $0x60] sm:$0xff] %v1383_v1   ;;  %v1388_v4 = vpack.c.bf16 %v1639_v2, %v1637_v0 }
 0x180   : > { %v1643_v5 = vpop.eup %1642 }
 0x181   : > { %v1645_v6 = vpop.eup %1644  ;;  %1412 = vst [vmem:[%s1867_s28 + $0x68] sm:$0xff] %v1388_v4   ;;  %v1393_v7 = vpack.c.bf16 %v1643_v5, %v1641_v3 }
 0x182   : > { %v1647_v8 = vpop.eup %1646 }
 0x183   : > { %1413 = vst [vmem:[%s1867_s28 + $0x70] sm:$0xff] %v1393_v7   ;;  %v1398_v9 = vpack.c.bf16 %v1647_v8, %v1645_v6 }
 0x185   : > { %1414 = vst [vmem:[%s1867_s28 + $0x78] sm:$0xff] %v1398_v9  }
 0x186 PF: > { %s13_s18 = sadd.s32 1, %s1702_s18   ;;  %s1975_s12 = smov %s1682_s13 }
 0x187   : > { %p10_p0 = scmp.ge.s32.totalorder %s13_s18, 10   ;;  %s1976_s13 = smov %s1776_s25 }
 0x188   : > { %s1977_s14 = smov %s1694_s16  ;;  %s1978_s15 = smov %s1698_s17 }
 0x189   : > { %s1979_s16 = smov %s1982_s19  ;;  %s1980_s17 = smov %s1986_s20 }
 0x18a   :  { %12 = sbr.rel (!%p10_p0) target bundleno = 4 (0x4), region = 119 }

</bundles_post_ra>
